<compile_context>
chip_gen: v5e
topology: v5e:2x2
jax: 0.10.0
libtpu: 0.0.40
codegen_flags: <defaults>
</compile_context>

<pallas_src>
import functools
import math

import jax
import jax.numpy as jnp
from jax.experimental import pallas as pl
from jax.experimental.pallas import tpu as pltpu


def _round_up(x, m):
    return (x + m - 1) // m * m


def _full_spec(shape):
    nd = len(shape)
    return pl.BlockSpec(shape, lambda i, nd=nd: (0,) * nd)


_SMEM_SPEC = pl.BlockSpec(memory_space=pltpu.MemorySpace.SMEM)
_CPARAMS = pltpu.CompilerParams(dimension_semantics=("arbitrary",))


# ----------------------------- Pallas kernels ---------------------------------
def _tap_conv_prelu_kernel(x_ref, w_ref, b_ref, a_ref, o_ref, *, shifts, l_acc):
    # x: (Cin, Lin) bf16 padded-flat, w: (T, Cout, Cin) bf16, b: (Cout, 1) f32,
    # a: (1, 1) f32 in SMEM (PReLU slope), o: (Cout, Lacc) bf16 (lane-dense).
    acc = jnp.zeros(o_ref.shape, jnp.float32)
    for t, s in enumerate(shifts):
        acc = acc + jnp.dot(w_ref[t], x_ref[:, s:s + l_acc],
                            preferred_element_type=jnp.float32)
    acc = acc + b_ref[...]
    alpha = a_ref[0, 0]
    o_ref[...] = jnp.where(acc >= 0.0, acc, alpha * acc).astype(o_ref.dtype)


def _tap_conv_linear_kernel(x_ref, w_ref, b_ref, o_ref, *, shifts, l_acc):
    # Same as above without activation (output_conv).
    acc = jnp.zeros(o_ref.shape, jnp.float32)
    for t, s in enumerate(shifts):
        acc = acc + jnp.dot(w_ref[t], x_ref[:, s:s + l_acc],
                            preferred_element_type=jnp.float32)
    o_ref[...] = (acc + b_ref[...]).astype(o_ref.dtype)


def _chunk_matmul_prelu_kernel(*refs, n_chunks, col_offsets):
    # 1x1 conv over a channel-concat that is never materialized:
    # refs = chunk_0..chunk_{n-1} (Ci, M) bf16, w (Cout, sumCi) bf16, b, a(SMEM), o.
    w_ref = refs[n_chunks]
    b_ref = refs[n_chunks + 1]
    a_ref = refs[n_chunks + 2]
    o_ref = refs[n_chunks + 3]
    acc = jnp.zeros(o_ref.shape, jnp.float32)
    for i in range(n_chunks):
        c0, c1 = col_offsets[i], col_offsets[i + 1]
        acc = acc + jnp.dot(w_ref[:, c0:c1], refs[i][...],
                            preferred_element_type=jnp.float32)
    acc = acc + b_ref[...]
    alpha = a_ref[0, 0]
    o_ref[...] = jnp.where(acc >= 0.0, acc, alpha * acc).astype(o_ref.dtype)


# -------------------------- layer wrappers (XLA glue) --------------------------
def _tap_conv(x4d, layer, *, prelu=True):
    """Stride-1 k x k conv via in-kernel tap accumulation.

    x4d: (Cin, N, H, W) bf16 -> (Cout, N, Ho, Wo) bf16, Ho = H + 2p - k + 1.
    """
    k, pad = layer["k"], layer["pad"]
    cin, n, h, w = x4d.shape
    hp, wp = h + 2 * pad, w + 2 * pad
    ho, wo = hp - k + 1, wp - k + 1
    cout = layer["wt"].shape[1]

    l_valid = n * hp * wp
    l_acc = _round_up(l_valid, 128)
    max_shift = (k - 1) * wp + (k - 1)
    l_in = _round_up(l_acc + max_shift, 128)

    xp = jnp.pad(x4d, ((0, 0), (0, 0), (pad, pad), (pad, pad))).reshape(cin, l_valid)
    xp = jnp.pad(xp, ((0, 0), (0, l_in - l_valid)))        # tail guard for the shifts
    shifts = tuple(a * wp + b for a in range(k) for b in range(k))

    if prelu:
        kern = functools.partial(_tap_conv_prelu_kernel, shifts=shifts, l_acc=l_acc)
        inputs = (xp, layer["wt"], layer["b"], layer["alpha"])
        specs = [_full_spec(xp.shape), _full_spec(layer["wt"].shape),
                 _full_spec(layer["b"].shape), _SMEM_SPEC]
    else:
        kern = functools.partial(_tap_conv_linear_kernel, shifts=shifts, l_acc=l_acc)
        inputs = (xp, layer["wt"], layer["b"])
        specs = [_full_spec(xp.shape), _full_spec(layer["wt"].shape),
                 _full_spec(layer["b"].shape)]

    out = pl.pallas_call(
        kern,
        out_shape=jax.ShapeDtypeStruct((cout, l_acc), jnp.bfloat16),
        grid=(1,),
        in_specs=specs,
        out_specs=pl.BlockSpec((cout, l_acc), lambda i: (0, 0)),
        compiler_params=_CPARAMS,
    )(*inputs)
    # Strip the garbage columns (pad ring / tail), keep the valid (n, y, x) window.
    out = out[:, :l_valid].reshape(cout, n, hp, wp)[:, :, :ho, :wo]
    return out


def _conv1x1(chunks, layer):
    """1x1 conv + PReLU over an (implicit) channel concat of `chunks` ((Ci, M) bf16)."""
    m = chunks[0].shape[1]
    cout = layer["w"].shape[0]
    offs = [0]
    for c in chunks:
        offs.append(offs[-1] + c.shape[0])
    kern = functools.partial(_chunk_matmul_prelu_kernel,
                             n_chunks=len(chunks), col_offsets=tuple(offs))
    specs = [_full_spec(c.shape) for c in chunks]
    specs += [_full_spec(layer["w"].shape), _full_spec(layer["b"].shape), _SMEM_SPEC]
    return pl.pallas_call(
        kern,
        out_shape=jax.ShapeDtypeStruct((cout, m), jnp.bfloat16),
        grid=(1,),
        in_specs=specs,
        out_specs=pl.BlockSpec((cout, m), lambda i: (0, 0)),
        compiler_params=_CPARAMS,
    )(*chunks, layer["w"], layer["b"], layer["alpha"])


def _deconv_up(x_lr, layer, n, h, w):
    """Phase-decomposed 6x6/s2/p2 ConvTranspose: LR canonical (C, n*h*w) ->
    HR canonical phase-major (Cout, 4*n*h*w)."""
    cin = x_lr.shape[0]
    cout = layer["wt"].shape[1] // 4
    y = _tap_conv(x_lr.reshape(cin, n, h, w), layer, prelu=True)   # (4*Cout, n, h, w)
    y = y.reshape(4, cout, n, h, w)
    return jnp.transpose(y, (1, 0, 2, 3, 4)).reshape(cout, 4 * n * h * w)


def _conv_down(x_hr, layer, n, h, w):
    """Phase-decomposed 6x6/s2/p2 conv: HR canonical (C, 4*n*h*w) -> LR (Cout, n*h*w)."""
    cin = x_hr.shape[0]
    y = _tap_conv(x_hr.reshape(cin * 4, n, h, w), layer, prelu=True)
    return y.reshape(y.shape[0], n * h * w)


def _hr_to_std4d(x_hr, n, h, w):
    """HR canonical phase-major (C, 4*n*h*w) -> standard (C, n, 2h, 2w)."""
    c = x_hr.shape[0]
    t = x_hr.reshape(c, 2, 2, n, h, w)             # (c, ry, rx, n, y, x)
    t = jnp.transpose(t, (0, 3, 4, 1, 5, 2))       # (c, n, y, ry, x, rx)
    return t.reshape(c, n, 2 * h, 2 * w)


def _res(a, b, sign):
    # DBPN residual chain: add/sub in f32, store bf16 (activations are bf16-rounded).
    return (a.astype(jnp.float32) + sign * b.astype(jnp.float32)).astype(jnp.bfloat16)


# ------------------------------- DBPN blocks -----------------------------------
def _up_block(x_lr, p, n, h, w):
    h0 = _deconv_up(x_lr, p["up1"], n, h, w)
    l0 = _conv_down(h0, p["up2"], n, h, w)
    h1 = _deconv_up(_res(l0, x_lr, -1.0), p["up3"], n, h, w)
    return _res(h1, h0, +1.0)


def _down_block(x_hr, p, n, h, w):
    l0 = _conv_down(x_hr, p["down1"], n, h, w)
    h0 = _deconv_up(l0, p["down2"], n, h, w)
    l1 = _conv_down(_res(h0, x_hr, -1.0), p["down3"], n, h, w)
    return _res(l1, l0, +1.0)


def _d_up_block(chunks_lr, p, n, h, w):
    return _up_block(_conv1x1(chunks_lr, p["conv"]), p, n, h, w)


def _d_down_block(chunks_hr, p, n, h, w):
    return _down_block(_conv1x1(chunks_hr, p["conv"]), p, n, h, w)


# ----------------------------- parameter packing -------------------------------
def _pack_conv_s1(w_oihw, bias, alpha, pad):
    cout, cin, k, _ = w_oihw.shape
    wt = jnp.transpose(w_oihw, (2, 3, 0, 1)).reshape(k * k, cout, cin)
    return {"wt": wt.astype(jnp.bfloat16),
            "b": bias.reshape(cout, 1).astype(jnp.float32),
            "alpha": jnp.asarray(alpha, jnp.float32).reshape(1, 1),
            "k": k, "pad": pad}


def _pack_deconv_phase(w_iohw, bias, alpha):
    # ConvTranspose2d(k=6, s=2, p=2) -> 4 output phases, each a 3x3/pad1 conv on LR.
    # out[2m+ry, 2q+rx] = sum_{a,b in 0..2} x[m+a-1, q+b-1] * w[ci, co, 4-2a+ry, 4-2b+rx]
    cin, cout, k, _ = w_iohw.shape
    w6 = w_iohw.reshape(cin, cout, 3, 2, 3, 2)      # [ci, co, A, ry, B, rx], ky = 2A+ry
    w6 = w6[:, :, ::-1, :, ::-1, :]                 # A -> tap index a (A = 2 - a)
    we = jnp.transpose(w6, (3, 5, 2, 4, 1, 0))      # (ry, rx, a, b, co, ci)
    we = we.reshape(4, 9, cout, cin)
    we = jnp.transpose(we, (1, 0, 2, 3)).reshape(9, 4 * cout, cin)   # rows r*cout+co
    b = jnp.tile(bias.reshape(cout, 1), (4, 1))
    return {"wt": we.astype(jnp.bfloat16), "b": b.astype(jnp.float32),
            "alpha": jnp.asarray(alpha, jnp.float32).reshape(1, 1),
            "k": 3, "pad": 1}


def _pack_conv_s2_phase(w_oihw, bias, alpha):
    # Conv2d(k=6, s=2, p=2) over HR == 3x3/pad1 conv over the 4 HR phases at LR:
    # out[oy, ox] = sum_{a,b,r} Xphase[ci, r][oy+a-1, ox+b-1] * w[co, ci, 2a+ry, 2b+rx]
    cout, cin, k, _ = w_oihw.shape
    w6 = w_oihw.reshape(cout, cin, 3, 2, 3, 2)      # [co, ci, a, ry, b, rx]
    we = jnp.transpose(w6, (2, 4, 0, 1, 3, 5))      # (a, b, co, ci, ry, rx)
    we = we.reshape(9, cout, cin * 4)               # cols: ci*4 + (ry*2+rx)
    return {"wt": we.astype(jnp.bfloat16),
            "b": bias.reshape(cout, 1).astype(jnp.float32),
            "alpha": jnp.asarray(alpha, jnp.float32).reshape(1, 1),
            "k": 3, "pad": 1}


def _pack_conv1x1(w_oihw, bias, alpha):
    cout, cin = w_oihw.shape[:2]
    return {"w": w_oihw.reshape(cout, cin).astype(jnp.bfloat16),
            "b": bias.reshape(cout, 1).astype(jnp.float32),
            "alpha": jnp.asarray(alpha, jnp.float32).reshape(1, 1)}


def init_net6_params(key, scale_factor=2, num_channels=3, base_filter=16, feat=32):
    assert scale_factor == 2, "phase decomposition implemented for scale_factor=2"
    kernel = 6
    bf = base_filter
    keys = iter(jax.random.split(key, 80))
    A = 0.25  # nn.PReLU() default init

    def conv_w(cout, cin, k):                      # kaiming_normal_, fan_in
        std = math.sqrt(2.0 / (cin * k * k))
        return std * jax.random.normal(next(keys), (cout, cin, k, k), jnp.float32)

    def deconv_w(cin, cout, k):                    # ConvTranspose2d fan_in = cout*k*k
        std = math.sqrt(2.0 / (cout * k * k))
        return std * jax.random.normal(next(keys), (cin, cout, k, k), jnp.float32)

    z = lambda c: jnp.zeros((c,), jnp.float32)     # biases are zero-initialized

    def up_params():
        return {"up1": _pack_deconv_phase(deconv_w(bf, bf, kernel), z(bf), A),
                "up2": _pack_conv_s2_phase(conv_w(bf, bf, kernel), z(bf), A),
                "up3": _pack_deconv_phase(deconv_w(bf, bf, kernel), z(bf), A)}

    def down_params():
        return {"down1": _pack_conv_s2_phase(conv_w(bf, bf, kernel), z(bf), A),
                "down2": _pack_deconv_phase(deconv_w(bf, bf, kernel), z(bf), A),
                "down3": _pack_conv_s2_phase(conv_w(bf, bf, kernel), z(bf), A)}

    P = {}
    P["feat0"] = _pack_conv_s1(conv_w(feat, num_channels, 3), z(feat), A, pad=1)
    P["feat1"] = _pack_conv1x1(conv_w(bf, feat, 1), z(bf), A)
    P["up1"] = up_params()
    P["down1"] = down_params()
    P["up2"] = up_params()
    P["down2"] = {"conv": _pack_conv1x1(conv_w(bf, 2 * bf, 1), z(bf), A), **down_params()}
    P["up3"] = {"conv": _pack_conv1x1(conv_w(bf, 2 * bf, 1), z(bf), A), **up_params()}
    P["down3"] = {"conv": _pack_conv1x1(conv_w(bf, 3 * bf, 1), z(bf), A), **down_params()}
    P["up4"] = {"conv": _pack_conv1x1(conv_w(bf, 3 * bf, 1), z(bf), A), **up_params()}
    P["down4"] = {"conv": _pack_conv1x1(conv_w(bf, 4 * bf, 1), z(bf), A), **down_params()}
    P["up5"] = {"conv": _pack_conv1x1(conv_w(bf, 4 * bf, 1), z(bf), A), **up_params()}
    P["down5"] = {"conv": _pack_conv1x1(conv_w(bf, 5 * bf, 1), z(bf), A), **down_params()}
    P["up6"] = {"conv": _pack_conv1x1(conv_w(bf, 5 * bf, 1), z(bf), A), **up_params()}
    # output_conv: 3x3 s1 p1, activation=None; pad Cout 3 -> 8 (sublane-friendly stores)
    w_out = jnp.pad(conv_w(num_channels, 6 * bf, 3),
                    ((0, 8 - num_channels), (0, 0), (0, 0), (0, 0)))
    out_layer = _pack_conv_s1(w_out, jnp.zeros((8,), jnp.float32), 1.0, pad=1)
    out_layer["cout_true"] = num_channels
    P["output_conv"] = out_layer
    return P


# ------------------------------- Net_6 forward ---------------------------------
def net6_forward(params, x_nchw):
    n, _, h, w = x_nchw.shape                      # LR input geometry
    x = jnp.transpose(x_nchw, (1, 0, 2, 3)).astype(jnp.bfloat16)    # (C, N, H, W)

    x = _tap_conv(x, params["feat0"], prelu=True)                   # (feat, N, H, W)
    x = x.reshape(x.shape[0], n * h * w)
    x = _conv1x1([x], params["feat1"])                              # (bf, M_LR)

    h1 = _up_block(x, params["up1"], n, h, w)
    l1 = _down_block(h1, params["down1"], n, h, w)
    h2 = _up_block(l1, params["up2"], n, h, w)

    h_chunks = [h2, h1]                             # concat_h, kept as a chunk list
    l = _d_down_block(h_chunks, params["down2"], n, h, w)
    l_chunks = [l, l1]                              # concat_l
    hh = _d_up_block(l_chunks, params["up3"], n, h, w)
    h_chunks = [hh] + h_chunks
    l = _d_down_block(h_chunks, params["down3"], n, h, w)
    l_chunks = [l] + l_chunks
    hh = _d_up_block(l_chunks, params["up4"], n, h, w)
    h_chunks = [hh] + h_chunks
    l = _d_down_block(h_chunks, params["down4"], n, h, w)
    l_chunks = [l] + l_chunks
    hh = _d_up_block(l_chunks, params["up5"], n, h, w)
    h_chunks = [hh] + h_chunks
    l = _d_down_block(h_chunks, params["down5"], n, h, w)
    l_chunks = [l] + l_chunks
    hh = _d_up_block(l_chunks, params["up6"], n, h, w)
    h_chunks = [hh] + h_chunks

    # output_conv over the 6*bf-channel HR concat (single materialization + un-shuffle)
    cat = jnp.concatenate(h_chunks, axis=0)                         # (6*bf, 4*N*h*w)
    cat_std = _hr_to_std4d(cat, n, h, w)                            # (6*bf, N, 2h, 2w)
    out = _tap_conv(cat_std, params["output_conv"], prelu=False)    # (8, N, 2h, 2w)
    out = out[:params["output_conv"]["cout_true"]]
    # (the reference's final torch.cat((concat_l, _input), 1) is dead code)
    return jnp.transpose(out, (1, 0, 2, 3)).astype(jnp.float32)     # NCHW f32


if __name__ == "__main__":
    key = jax.random.PRNGKey(0)
    pkey, xkey = jax.random.split(key)
    # Small config: scale_factor=2 (kernel=6, stride=2, pad=2), 3 channels,
    # base_filter=16, feat=32, input 2x3x8x8 -> output 2x3x16x16.
    params = init_net6_params(pkey, scale_factor=2, num_channels=3,
                              base_filter=16, feat=32)
    x = jax.random.normal(xkey, (2, 3, 8, 8), dtype=jnp.float32)    # NCHW

    fwd = jax.jit(functools.partial(net6_forward, params))
    y = fwd(x)
    jax.block_until_ready(y)
    assert y.shape == (2, 3, 16, 16), y.shape
    assert bool(jnp.all(jnp.isfinite(y)))
    print("KERNEL_OK")
</pallas_src>

<mosaic_0001>
module attributes {stable_mosaic.version = 11 : i64} {
  func.func @_tap_conv_prelu_kernel(%arg0: i32, %arg1: memref<3x384xbf16, #tpu.memory_space<vmem>>, %arg2: memref<9x32x3xbf16, #tpu.memory_space<vmem>>, %arg3: memref<32x1xf32, #tpu.memory_space<vmem>>, %arg4: memref<1x1xf32, #tpu.memory_space<smem>>, %arg5: memref<32x256xbf16, #tpu.memory_space<vmem>>) attributes {dimension_semantics = [#tpu.dimension_semantics<arbitrary>], iteration_bounds = array<i64: 1>, scalar_prefetch = 0 : i64, scratch_operands = 0 : i64, tpu.core_type = #tpu.core_type<tc>, window_params = [{pipeline_mode = #tpu.pipeline_mode<synchronous>, transform_indices = @transform_0, window_bounds = array<i64: 3, 384>}, {pipeline_mode = #tpu.pipeline_mode<synchronous>, transform_indices = @transform_1, window_bounds = array<i64: 9, 32, 3>}, {pipeline_mode = #tpu.pipeline_mode<synchronous>, transform_indices = @transform_2, window_bounds = array<i64: 32, 1>}, {transform_indices = @transform_3, window_bounds = array<i64: 1, 1>}, {pipeline_mode = #tpu.pipeline_mode<synchronous>, transform_indices = @transform_4, window_bounds = array<i64: 32, 256>}]} {
    %cst = arith.constant 0.000000e+00 : f32
    %0 = vector.broadcast %cst : f32 to vector<32x256xf32>
    %c0 = arith.constant 0 : index
    %c0_0 = arith.constant 0 : index
    %c0_1 = arith.constant 0 : index
    %1 = vector.load %arg2[%c0, %c0_0, %c0_1] : memref<9x32x3xbf16, #tpu.memory_space<vmem>>, vector<1x32x3xbf16>
    %2 = vector.shape_cast %1 : vector<1x32x3xbf16> to vector<32x3xbf16>
    %c0_2 = arith.constant 0 : index
    %c0_3 = arith.constant 0 : index
    %3 = vector.load %arg1[%c0_2, %c0_3] : memref<3x384xbf16, #tpu.memory_space<vmem>>, vector<3x256xbf16>
    %cst_4 = arith.constant dense<0.000000e+00> : vector<32x256xf32>
    %4 = tpu.matmul %2, %3, %cst_4 {dimension_numbers = #tpu.dot_dimension_numbers<[1], [0], [0], [1], [0, 0, 1, 1], [], []>} : vector<32x3xbf16>, vector<3x256xbf16>, vector<32x256xf32> -> vector<32x256xf32>
    %5 = arith.addf %0, %4 : vector<32x256xf32>
    %c1 = arith.constant 1 : index
    %c0_5 = arith.constant 0 : index
    %c0_6 = arith.constant 0 : index
    %6 = vector.load %arg2[%c1, %c0_5, %c0_6] : memref<9x32x3xbf16, #tpu.memory_space<vmem>>, vector<1x32x3xbf16>
    %7 = vector.shape_cast %6 : vector<1x32x3xbf16> to vector<32x3xbf16>
    %c0_7 = arith.constant 0 : index
    %c1_8 = arith.constant 1 : index
    %8 = vector.load %arg1[%c0_7, %c1_8] : memref<3x384xbf16, #tpu.memory_space<vmem>>, vector<3x256xbf16>
    %cst_9 = arith.constant dense<0.000000e+00> : vector<32x256xf32>
    %9 = tpu.matmul %7, %8, %cst_9 {dimension_numbers = #tpu.dot_dimension_numbers<[1], [0], [0], [1], [0, 0, 1, 1], [], []>} : vector<32x3xbf16>, vector<3x256xbf16>, vector<32x256xf32> -> vector<32x256xf32>
    %10 = arith.addf %5, %9 : vector<32x256xf32>
    %c2 = arith.constant 2 : index
    %c0_10 = arith.constant 0 : index
    %c0_11 = arith.constant 0 : index
    %11 = vector.load %arg2[%c2, %c0_10, %c0_11] : memref<9x32x3xbf16, #tpu.memory_space<vmem>>, vector<1x32x3xbf16>
    %12 = vector.shape_cast %11 : vector<1x32x3xbf16> to vector<32x3xbf16>
    %c0_12 = arith.constant 0 : index
    %c2_13 = arith.constant 2 : index
    %13 = vector.load %arg1[%c0_12, %c2_13] : memref<3x384xbf16, #tpu.memory_space<vmem>>, vector<3x256xbf16>
    %cst_14 = arith.constant dense<0.000000e+00> : vector<32x256xf32>
    %14 = tpu.matmul %12, %13, %cst_14 {dimension_numbers = #tpu.dot_dimension_numbers<[1], [0], [0], [1], [0, 0, 1, 1], [], []>} : vector<32x3xbf16>, vector<3x256xbf16>, vector<32x256xf32> -> vector<32x256xf32>
    %15 = arith.addf %10, %14 : vector<32x256xf32>
    %c3 = arith.constant 3 : index
    %c0_15 = arith.constant 0 : index
    %c0_16 = arith.constant 0 : index
    %16 = vector.load %arg2[%c3, %c0_15, %c0_16] : memref<9x32x3xbf16, #tpu.memory_space<vmem>>, vector<1x32x3xbf16>
    %17 = vector.shape_cast %16 : vector<1x32x3xbf16> to vector<32x3xbf16>
    %c0_17 = arith.constant 0 : index
    %c10 = arith.constant 10 : index
    %18 = vector.load %arg1[%c0_17, %c10] : memref<3x384xbf16, #tpu.memory_space<vmem>>, vector<3x256xbf16>
    %cst_18 = arith.constant dense<0.000000e+00> : vector<32x256xf32>
    %19 = tpu.matmul %17, %18, %cst_18 {dimension_numbers = #tpu.dot_dimension_numbers<[1], [0], [0], [1], [0, 0, 1, 1], [], []>} : vector<32x3xbf16>, vector<3x256xbf16>, vector<32x256xf32> -> vector<32x256xf32>
    %20 = arith.addf %15, %19 : vector<32x256xf32>
    %c4 = arith.constant 4 : index
    %c0_19 = arith.constant 0 : index
    %c0_20 = arith.constant 0 : index
    %21 = vector.load %arg2[%c4, %c0_19, %c0_20] : memref<9x32x3xbf16, #tpu.memory_space<vmem>>, vector<1x32x3xbf16>
    %22 = vector.shape_cast %21 : vector<1x32x3xbf16> to vector<32x3xbf16>
    %c0_21 = arith.constant 0 : index
    %c11 = arith.constant 11 : index
    %23 = vector.load %arg1[%c0_21, %c11] : memref<3x384xbf16, #tpu.memory_space<vmem>>, vector<3x256xbf16>
    %cst_22 = arith.constant dense<0.000000e+00> : vector<32x256xf32>
    %24 = tpu.matmul %22, %23, %cst_22 {dimension_numbers = #tpu.dot_dimension_numbers<[1], [0], [0], [1], [0, 0, 1, 1], [], []>} : vector<32x3xbf16>, vector<3x256xbf16>, vector<32x256xf32> -> vector<32x256xf32>
    %25 = arith.addf %20, %24 : vector<32x256xf32>
    %c5 = arith.constant 5 : index
    %c0_23 = arith.constant 0 : index
    %c0_24 = arith.constant 0 : index
    %26 = vector.load %arg2[%c5, %c0_23, %c0_24] : memref<9x32x3xbf16, #tpu.memory_space<vmem>>, vector<1x32x3xbf16>
    %27 = vector.shape_cast %26 : vector<1x32x3xbf16> to vector<32x3xbf16>
    %c0_25 = arith.constant 0 : index
    %c12 = arith.constant 12 : index
    %28 = vector.load %arg1[%c0_25, %c12] : memref<3x384xbf16, #tpu.memory_space<vmem>>, vector<3x256xbf16>
    %cst_26 = arith.constant dense<0.000000e+00> : vector<32x256xf32>
    %29 = tpu.matmul %27, %28, %cst_26 {dimension_numbers = #tpu.dot_dimension_numbers<[1], [0], [0], [1], [0, 0, 1, 1], [], []>} : vector<32x3xbf16>, vector<3x256xbf16>, vector<32x256xf32> -> vector<32x256xf32>
    %30 = arith.addf %25, %29 : vector<32x256xf32>
    %c6 = arith.constant 6 : index
    %c0_27 = arith.constant 0 : index
    %c0_28 = arith.constant 0 : index
    %31 = vector.load %arg2[%c6, %c0_27, %c0_28] : memref<9x32x3xbf16, #tpu.memory_space<vmem>>, vector<1x32x3xbf16>
    %32 = vector.shape_cast %31 : vector<1x32x3xbf16> to vector<32x3xbf16>
    %c0_29 = arith.constant 0 : index
    %c20 = arith.constant 20 : index
    %33 = vector.load %arg1[%c0_29, %c20] : memref<3x384xbf16, #tpu.memory_space<vmem>>, vector<3x256xbf16>
    %cst_30 = arith.constant dense<0.000000e+00> : vector<32x256xf32>
    %34 = tpu.matmul %32, %33, %cst_30 {dimension_numbers = #tpu.dot_dimension_numbers<[1], [0], [0], [1], [0, 0, 1, 1], [], []>} : vector<32x3xbf16>, vector<3x256xbf16>, vector<32x256xf32> -> vector<32x256xf32>
    %35 = arith.addf %30, %34 : vector<32x256xf32>
    %c7 = arith.constant 7 : index
    %c0_31 = arith.constant 0 : index
    %c0_32 = arith.constant 0 : index
    %36 = vector.load %arg2[%c7, %c0_31, %c0_32] : memref<9x32x3xbf16, #tpu.memory_space<vmem>>, vector<1x32x3xbf16>
    %37 = vector.shape_cast %36 : vector<1x32x3xbf16> to vector<32x3xbf16>
    %c0_33 = arith.constant 0 : index
    %c21 = arith.constant 21 : index
    %38 = vector.load %arg1[%c0_33, %c21] : memref<3x384xbf16, #tpu.memory_space<vmem>>, vector<3x256xbf16>
    %cst_34 = arith.constant dense<0.000000e+00> : vector<32x256xf32>
    %39 = tpu.matmul %37, %38, %cst_34 {dimension_numbers = #tpu.dot_dimension_numbers<[1], [0], [0], [1], [0, 0, 1, 1], [], []>} : vector<32x3xbf16>, vector<3x256xbf16>, vector<32x256xf32> -> vector<32x256xf32>
    %40 = arith.addf %35, %39 : vector<32x256xf32>
    %c8 = arith.constant 8 : index
    %c0_35 = arith.constant 0 : index
    %c0_36 = arith.constant 0 : index
    %41 = vector.load %arg2[%c8, %c0_35, %c0_36] : memref<9x32x3xbf16, #tpu.memory_space<vmem>>, vector<1x32x3xbf16>
    %42 = vector.shape_cast %41 : vector<1x32x3xbf16> to vector<32x3xbf16>
    %c0_37 = arith.constant 0 : index
    %c22 = arith.constant 22 : index
    %43 = vector.load %arg1[%c0_37, %c22] : memref<3x384xbf16, #tpu.memory_space<vmem>>, vector<3x256xbf16>
    %cst_38 = arith.constant dense<0.000000e+00> : vector<32x256xf32>
    %44 = tpu.matmul %42, %43, %cst_38 {dimension_numbers = #tpu.dot_dimension_numbers<[1], [0], [0], [1], [0, 0, 1, 1], [], []>} : vector<32x3xbf16>, vector<3x256xbf16>, vector<32x256xf32> -> vector<32x256xf32>
    %45 = arith.addf %40, %44 : vector<32x256xf32>
    %c0_39 = arith.constant 0 : index
    %c0_40 = arith.constant 0 : index
    %46 = vector.load %arg3[%c0_39, %c0_40] : memref<32x1xf32, #tpu.memory_space<vmem>>, vector<32x1xf32>
    %47 = vector.broadcast %46 : vector<32x1xf32> to vector<32x256xf32>
    %48 = arith.addf %45, %47 : vector<32x256xf32>
    %c0_41 = arith.constant 0 : index
    %c0_42 = arith.constant 0 : index
    %49 = memref.load %arg4[%c0_41, %c0_42] : memref<1x1xf32, #tpu.memory_space<smem>>
    %cst_43 = arith.constant 0.000000e+00 : f32
    %50 = vector.broadcast %cst_43 : f32 to vector<32x256xf32>
    %51 = arith.cmpf oge, %48, %50 : vector<32x256xf32>
    %52 = vector.broadcast %49 : f32 to vector<32x256xf32>
    %53 = arith.mulf %52, %48 : vector<32x256xf32>
    %54 = arith.select %51, %48, %53 : vector<32x256xi1>, vector<32x256xf32>
    %55 = arith.truncf %54 : vector<32x256xf32> to vector<32x256xbf16>
    %c0_44 = arith.constant 0 : index
    %c0_45 = arith.constant 0 : index
    %56 = vector.load %arg5[%c0_44, %c0_45] : memref<32x256xbf16, #tpu.memory_space<vmem>>, vector<32x256xbf16>
    tpu.vector_store %arg5[%c0_44, %c0_45], %55 {strides = array<i32>} : memref<32x256xbf16, #tpu.memory_space<vmem>>, vector<32x256xbf16>,
    return
  }
  func.func @transform_0(%arg0: i32) -> (i32, i32) {
    %c0_i32 = arith.constant 0 : i32
    %c0_i32_0 = arith.constant 0 : i32
    %c0_i32_1 = arith.constant 0 : i32
    return %c0_i32, %c0_i32_0 : i32, i32
  }
  func.func @transform_1(%arg0: i32) -> (i32, i32, i32) {
    %c0_i32 = arith.constant 0 : i32
    %c0_i32_0 = arith.constant 0 : i32
    %c0_i32_1 = arith.constant 0 : i32
    %c0_i32_2 = arith.constant 0 : i32
    return %c0_i32, %c0_i32_0, %c0_i32_1 : i32, i32, i32
  }
  func.func @transform_2(%arg0: i32) -> (i32, i32) {
    %c0_i32 = arith.constant 0 : i32
    %c0_i32_0 = arith.constant 0 : i32
    %c0_i32_1 = arith.constant 0 : i32
    return %c0_i32, %c0_i32_0 : i32, i32
  }
  func.func @transform_3(%arg0: i32) -> (i32, i32) {
    %c0_i32 = arith.constant 0 : i32
    %c0_i32_0 = arith.constant 0 : i32
    %c0_i32_1 = arith.constant 0 : i32
    return %c0_i32, %c0_i32_0 : i32, i32
  }
  func.func @transform_4(%arg0: i32) -> (i32, i32) {
    %c0_i32 = arith.constant 0 : i32
    %c0_i32_0 = arith.constant 0 : i32
    %c0_i32_1 = arith.constant 0 : i32
    return %c0_i32, %c0_i32_0 : i32, i32
  }
}

module attributes {stable_mosaic.version = 11 : i64} {
  func.func @_chunk_matmul_prelu_kernel(%arg0: i32, %arg1: memref<32x128xbf16, #tpu.memory_space<vmem>>, %arg2: memref<16x32xbf16, #tpu.memory_space<vmem>>, %arg3: memref<16x1xf32, #tpu.memory_space<vmem>>, %arg4: memref<1x1xf32, #tpu.memory_space<smem>>, %arg5: memref<16x128xbf16, #tpu.memory_space<vmem>>) attributes {dimension_semantics = [#tpu.dimension_semantics<arbitrary>], iteration_bounds = array<i64: 1>, scalar_prefetch = 0 : i64, scratch_operands = 0 : i64, tpu.core_type = #tpu.core_type<tc>, window_params = [{pipeline_mode = #tpu.pipeline_mode<synchronous>, transform_indices = @transform_0, window_bounds = array<i64: 32, 128>}, {pipeline_mode = #tpu.pipeline_mode<synchronous>, transform_indices = @transform_1, window_bounds = array<i64: 16, 32>}, {pipeline_mode = #tpu.pipeline_mode<synchronous>, transform_indices = @transform_2, window_bounds = array<i64: 16, 1>}, {transform_indices = @transform_3, window_bounds = array<i64: 1, 1>}, {pipeline_mode = #tpu.pipeline_mode<synchronous>, transform_indices = @transform_4, window_bounds = array<i64: 16, 128>}]} {
    %cst = arith.constant 0.000000e+00 : f32
    %0 = vector.broadcast %cst : f32 to vector<16x128xf32>
    %c0 = arith.constant 0 : index
    %c0_0 = arith.constant 0 : index
    %1 = vector.load %arg2[%c0, %c0_0] : memref<16x32xbf16, #tpu.memory_space<vmem>>, vector<16x32xbf16>
    %c0_1 = arith.constant 0 : index
    %c0_2 = arith.constant 0 : index
    %2 = vector.load %arg1[%c0_1, %c0_2] : memref<32x128xbf16, #tpu.memory_space<vmem>>, vector<32x128xbf16>
    %cst_3 = arith.constant dense<0.000000e+00> : vector<16x128xf32>
    %3 = tpu.matmul %1, %2, %cst_3 {dimension_numbers = #tpu.dot_dimension_numbers<[1], [0], [0], [1], [0, 0, 1, 1], [], []>} : vector<16x32xbf16>, vector<32x128xbf16>, vector<16x128xf32> -> vector<16x128xf32>
    %4 = arith.addf %0, %3 : vector<16x128xf32>
    %c0_4 = arith.constant 0 : index
    %c0_5 = arith.constant 0 : index
    %5 = vector.load %arg3[%c0_4, %c0_5] : memref<16x1xf32, #tpu.memory_space<vmem>>, vector<16x1xf32>
    %6 = vector.broadcast %5 : vector<16x1xf32> to vector<16x128xf32>
    %7 = arith.addf %4, %6 : vector<16x128xf32>
    %c0_6 = arith.constant 0 : index
    %c0_7 = arith.constant 0 : index
    %8 = memref.load %arg4[%c0_6, %c0_7] : memref<1x1xf32, #tpu.memory_space<smem>>
    %cst_8 = arith.constant 0.000000e+00 : f32
    %9 = vector.broadcast %cst_8 : f32 to vector<16x128xf32>
    %10 = arith.cmpf oge, %7, %9 : vector<16x128xf32>
    %11 = vector.broadcast %8 : f32 to vector<16x128xf32>
    %12 = arith.mulf %11, %7 : vector<16x128xf32>
    %13 = arith.select %10, %7, %12 : vector<16x128xi1>, vector<16x128xf32>
    %14 = arith.truncf %13 : vector<16x128xf32> to vector<16x128xbf16>
    %c0_9 = arith.constant 0 : index
    %c0_10 = arith.constant 0 : index
    %15 = vector.load %arg5[%c0_9, %c0_10] : memref<16x128xbf16, #tpu.memory_space<vmem>>, vector<16x128xbf16>
    tpu.vector_store %arg5[%c0_9, %c0_10], %14 {strides = array<i32>} : memref<16x128xbf16, #tpu.memory_space<vmem>>, vector<16x128xbf16>,
    return
  }
  func.func @transform_0(%arg0: i32) -> (i32, i32) {
    %c0_i32 = arith.constant 0 : i32
    %c0_i32_0 = arith.constant 0 : i32
    %c0_i32_1 = arith.constant 0 : i32
    return %c0_i32, %c0_i32_0 : i32, i32
  }
  func.func @transform_1(%arg0: i32) -> (i32, i32) {
    %c0_i32 = arith.constant 0 : i32
    %c0_i32_0 = arith.constant 0 : i32
    %c0_i32_1 = arith.constant 0 : i32
    return %c0_i32, %c0_i32_0 : i32, i32
  }
  func.func @transform_2(%arg0: i32) -> (i32, i32) {
    %c0_i32 = arith.constant 0 : i32
    %c0_i32_0 = arith.constant 0 : i32
    %c0_i32_1 = arith.constant 0 : i32
    return %c0_i32, %c0_i32_0 : i32, i32
  }
  func.func @transform_3(%arg0: i32) -> (i32, i32) {
    %c0_i32 = arith.constant 0 : i32
    %c0_i32_0 = arith.constant 0 : i32
    %c0_i32_1 = arith.constant 0 : i32
    return %c0_i32, %c0_i32_0 : i32, i32
  }
  func.func @transform_4(%arg0: i32) -> (i32, i32) {
    %c0_i32 = arith.constant 0 : i32
    %c0_i32_0 = arith.constant 0 : i32
    %c0_i32_1 = arith.constant 0 : i32
    return %c0_i32, %c0_i32_0 : i32, i32
  }
}

module attributes {stable_mosaic.version = 11 : i64} {
  func.func @_tap_conv_prelu_kernel(%arg0: i32, %arg1: memref<16x384xbf16, #tpu.memory_space<vmem>>, %arg2: memref<9x64x16xbf16, #tpu.memory_space<vmem>>, %arg3: memref<64x1xf32, #tpu.memory_space<vmem>>, %arg4: memref<1x1xf32, #tpu.memory_space<smem>>, %arg5: memref<64x256xbf16, #tpu.memory_space<vmem>>) attributes {dimension_semantics = [#tpu.dimension_semantics<arbitrary>], iteration_bounds = array<i64: 1>, scalar_prefetch = 0 : i64, scratch_operands = 0 : i64, tpu.core_type = #tpu.core_type<tc>, window_params = [{pipeline_mode = #tpu.pipeline_mode<synchronous>, transform_indices = @transform_0, window_bounds = array<i64: 16, 384>}, {pipeline_mode = #tpu.pipeline_mode<synchronous>, transform_indices = @transform_1, window_bounds = array<i64: 9, 64, 16>}, {pipeline_mode = #tpu.pipeline_mode<synchronous>, transform_indices = @transform_2, window_bounds = array<i64: 64, 1>}, {transform_indices = @transform_3, window_bounds = array<i64: 1, 1>}, {pipeline_mode = #tpu.pipeline_mode<synchronous>, transform_indices = @transform_4, window_bounds = array<i64: 64, 256>}]} {
    %cst = arith.constant 0.000000e+00 : f32
    %0 = vector.broadcast %cst : f32 to vector<64x256xf32>
    %c0 = arith.constant 0 : index
    %c0_0 = arith.constant 0 : index
    %c0_1 = arith.constant 0 : index
    %1 = vector.load %arg2[%c0, %c0_0, %c0_1] : memref<9x64x16xbf16, #tpu.memory_space<vmem>>, vector<1x64x16xbf16>
    %2 = vector.shape_cast %1 : vector<1x64x16xbf16> to vector<64x16xbf16>
    %c0_2 = arith.constant 0 : index
    %c0_3 = arith.constant 0 : index
    %3 = vector.load %arg1[%c0_2, %c0_3] : memref<16x384xbf16, #tpu.memory_space<vmem>>, vector<16x256xbf16>
    %cst_4 = arith.constant dense<0.000000e+00> : vector<64x256xf32>
    %4 = tpu.matmul %2, %3, %cst_4 {dimension_numbers = #tpu.dot_dimension_numbers<[1], [0], [0], [1], [0, 0, 1, 1], [], []>} : vector<64x16xbf16>, vector<16x256xbf16>, vector<64x256xf32> -> vector<64x256xf32>
    %5 = arith.addf %0, %4 : vector<64x256xf32>
    %c1 = arith.constant 1 : index
    %c0_5 = arith.constant 0 : index
    %c0_6 = arith.constant 0 : index
    %6 = vector.load %arg2[%c1, %c0_5, %c0_6] : memref<9x64x16xbf16, #tpu.memory_space<vmem>>, vector<1x64x16xbf16>
    %7 = vector.shape_cast %6 : vector<1x64x16xbf16> to vector<64x16xbf16>
    %c0_7 = arith.constant 0 : index
    %c1_8 = arith.constant 1 : index
    %8 = vector.load %arg1[%c0_7, %c1_8] : memref<16x384xbf16, #tpu.memory_space<vmem>>, vector<16x256xbf16>
    %cst_9 = arith.constant dense<0.000000e+00> : vector<64x256xf32>
    %9 = tpu.matmul %7, %8, %cst_9 {dimension_numbers = #tpu.dot_dimension_numbers<[1], [0], [0], [1], [0, 0, 1, 1], [], []>} : vector<64x16xbf16>, vector<16x256xbf16>, vector<64x256xf32> -> vector<64x256xf32>
    %10 = arith.addf %5, %9 : vector<64x256xf32>
    %c2 = arith.constant 2 : index
    %c0_10 = arith.constant 0 : index
    %c0_11 = arith.constant 0 : index
    %11 = vector.load %arg2[%c2, %c0_10, %c0_11] : memref<9x64x16xbf16, #tpu.memory_space<vmem>>, vector<1x64x16xbf16>
    %12 = vector.shape_cast %11 : vector<1x64x16xbf16> to vector<64x16xbf16>
    %c0_12 = arith.constant 0 : index
    %c2_13 = arith.constant 2 : index
    %13 = vector.load %arg1[%c0_12, %c2_13] : memref<16x384xbf16, #tpu.memory_space<vmem>>, vector<16x256xbf16>
    %cst_14 = arith.constant dense<0.000000e+00> : vector<64x256xf32>
    %14 = tpu.matmul %12, %13, %cst_14 {dimension_numbers = #tpu.dot_dimension_numbers<[1], [0], [0], [1], [0, 0, 1, 1], [], []>} : vector<64x16xbf16>, vector<16x256xbf16>, vector<64x256xf32> -> vector<64x256xf32>
    %15 = arith.addf %10, %14 : vector<64x256xf32>
    %c3 = arith.constant 3 : index
    %c0_15 = arith.constant 0 : index
    %c0_16 = arith.constant 0 : index
    %16 = vector.load %arg2[%c3, %c0_15, %c0_16] : memref<9x64x16xbf16, #tpu.memory_space<vmem>>, vector<1x64x16xbf16>
    %17 = vector.shape_cast %16 : vector<1x64x16xbf16> to vector<64x16xbf16>
    %c0_17 = arith.constant 0 : index
    %c10 = arith.constant 10 : index
    %18 = vector.load %arg1[%c0_17, %c10] : memref<16x384xbf16, #tpu.memory_space<vmem>>, vector<16x256xbf16>
    %cst_18 = arith.constant dense<0.000000e+00> : vector<64x256xf32>
    %19 = tpu.matmul %17, %18, %cst_18 {dimension_numbers = #tpu.dot_dimension_numbers<[1], [0], [0], [1], [0, 0, 1, 1], [], []>} : vector<64x16xbf16>, vector<16x256xbf16>, vector<64x256xf32> -> vector<64x256xf32>
    %20 = arith.addf %15, %19 : vector<64x256xf32>
    %c4 = arith.constant 4 : index
    %c0_19 = arith.constant 0 : index
    %c0_20 = arith.constant 0 : index
    %21 = vector.load %arg2[%c4, %c0_19, %c0_20] : memref<9x64x16xbf16, #tpu.memory_space<vmem>>, vector<1x64x16xbf16>
    %22 = vector.shape_cast %21 : vector<1x64x16xbf16> to vector<64x16xbf16>
    %c0_21 = arith.constant 0 : index
    %c11 = arith.constant 11 : index
    %23 = vector.load %arg1[%c0_21, %c11] : memref<16x384xbf16, #tpu.memory_space<vmem>>, vector<16x256xbf16>
    %cst_22 = arith.constant dense<0.000000e+00> : vector<64x256xf32>
    %24 = tpu.matmul %22, %23, %cst_22 {dimension_numbers = #tpu.dot_dimension_numbers<[1], [0], [0], [1], [0, 0, 1, 1], [], []>} : vector<64x16xbf16>, vector<16x256xbf16>, vector<64x256xf32> -> vector<64x256xf32>
    %25 = arith.addf %20, %24 : vector<64x256xf32>
    %c5 = arith.constant 5 : index
    %c0_23 = arith.constant 0 : index
    %c0_24 = arith.constant 0 : index
    %26 = vector.load %arg2[%c5, %c0_23, %c0_24] : memref<9x64x16xbf16, #tpu.memory_space<vmem>>, vector<1x64x16xbf16>
    %27 = vector.shape_cast %26 : vector<1x64x16xbf16> to vector<64x16xbf16>
    %c0_25 = arith.constant 0 : index
    %c12 = arith.constant 12 : index
    %28 = vector.load %arg1[%c0_25, %c12] : memref<16x384xbf16, #tpu.memory_space<vmem>>, vector<16x256xbf16>
    %cst_26 = arith.constant dense<0.000000e+00> : vector<64x256xf32>
    %29 = tpu.matmul %27, %28, %cst_26 {dimension_numbers = #tpu.dot_dimension_numbers<[1], [0], [0], [1], [0, 0, 1, 1], [], []>} : vector<64x16xbf16>, vector<16x256xbf16>, vector<64x256xf32> -> vector<64x256xf32>
    %30 = arith.addf %25, %29 : vector<64x256xf32>
    %c6 = arith.constant 6 : index
    %c0_27 = arith.constant 0 : index
    %c0_28 = arith.constant 0 : index
    %31 = vector.load %arg2[%c6, %c0_27, %c0_28] : memref<9x64x16xbf16, #tpu.memory_space<vmem>>, vector<1x64x16xbf16>
    %32 = vector.shape_cast %31 : vector<1x64x16xbf16> to vector<64x16xbf16>
    %c0_29 = arith.constant 0 : index
    %c20 = arith.constant 20 : index
    %33 = vector.load %arg1[%c0_29, %c20] : memref<16x384xbf16, #tpu.memory_space<vmem>>, vector<16x256xbf16>
    %cst_30 = arith.constant dense<0.000000e+00> : vector<64x256xf32>
    %34 = tpu.matmul %32, %33, %cst_30 {dimension_numbers = #tpu.dot_dimension_numbers<[1], [0], [0], [1], [0, 0, 1, 1], [], []>} : vector<64x16xbf16>, vector<16x256xbf16>, vector<64x256xf32> -> vector<64x256xf32>
    %35 = arith.addf %30, %34 : vector<64x256xf32>
    %c7 = arith.constant 7 : index
    %c0_31 = arith.constant 0 : index
    %c0_32 = arith.constant 0 : index
    %36 = vector.load %arg2[%c7, %c0_31, %c0_32] : memref<9x64x16xbf16, #tpu.memory_space<vmem>>, vector<1x64x16xbf16>
    %37 = vector.shape_cast %36 : vector<1x64x16xbf16> to vector<64x16xbf16>
    %c0_33 = arith.constant 0 : index
    %c21 = arith.constant 21 : index
    %38 = vector.load %arg1[%c0_33, %c21] : memref<16x384xbf16, #tpu.memory_space<vmem>>, vector<16x256xbf16>
    %cst_34 = arith.constant dense<0.000000e+00> : vector<64x256xf32>
    %39 = tpu.matmul %37, %38, %cst_34 {dimension_numbers = #tpu.dot_dimension_numbers<[1], [0], [0], [1], [0, 0, 1, 1], [], []>} : vector<64x16xbf16>, vector<16x256xbf16>, vector<64x256xf32> -> vector<64x256xf32>
    %40 = arith.addf %35, %39 : vector<64x256xf32>
    %c8 = arith.constant 8 : index
    %c0_35 = arith.constant 0 : index
    %c0_36 = arith.constant 0 : index
    %41 = vector.load %arg2[%c8, %c0_35, %c0_36] : memref<9x64x16xbf16, #tpu.memory_space<vmem>>, vector<1x64x16xbf16>
    %42 = vector.shape_cast %41 : vector<1x64x16xbf16> to vector<64x16xbf16>
    %c0_37 = arith.constant 0 : index
    %c22 = arith.constant 22 : index
    %43 = vector.load %arg1[%c0_37, %c22] : memref<16x384xbf16, #tpu.memory_space<vmem>>, vector<16x256xbf16>
    %cst_38 = arith.constant dense<0.000000e+00> : vector<64x256xf32>
    %44 = tpu.matmul %42, %43, %cst_38 {dimension_numbers = #tpu.dot_dimension_numbers<[1], [0], [0], [1], [0, 0, 1, 1], [], []>} : vector<64x16xbf16>, vector<16x256xbf16>, vector<64x256xf32> -> vector<64x256xf32>
    %45 = arith.addf %40, %44 : vector<64x256xf32>
    %c0_39 = arith.constant 0 : index
    %c0_40 = arith.constant 0 : index
    %46 = vector.load %arg3[%c0_39, %c0_40] : memref<64x1xf32, #tpu.memory_space<vmem>>, vector<64x1xf32>
    %47 = vector.broadcast %46 : vector<64x1xf32> to vector<64x256xf32>
    %48 = arith.addf %45, %47 : vector<64x256xf32>
    %c0_41 = arith.constant 0 : index
    %c0_42 = arith.constant 0 : index
    %49 = memref.load %arg4[%c0_41, %c0_42] : memref<1x1xf32, #tpu.memory_space<smem>>
    %cst_43 = arith.constant 0.000000e+00 : f32
    %50 = vector.broadcast %cst_43 : f32 to vector<64x256xf32>
    %51 = arith.cmpf oge, %48, %50 : vector<64x256xf32>
    %52 = vector.broadcast %49 : f32 to vector<64x256xf32>
    %53 = arith.mulf %52, %48 : vector<64x256xf32>
    %54 = arith.select %51, %48, %53 : vector<64x256xi1>, vector<64x256xf32>
    %55 = arith.truncf %54 : vector<64x256xf32> to vector<64x256xbf16>
    %c0_44 = arith.constant 0 : index
    %c0_45 = arith.constant 0 : index
    %56 = vector.load %arg5[%c0_44, %c0_45] : memref<64x256xbf16, #tpu.memory_space<vmem>>, vector<64x256xbf16>
    tpu.vector_store %arg5[%c0_44, %c0_45], %55 {strides = array<i32>} : memref<64x256xbf16, #tpu.memory_space<vmem>>, vector<64x256xbf16>,
    return
  }
  func.func @transform_0(%arg0: i32) -> (i32, i32) {
    %c0_i32 = arith.constant 0 : i32
    %c0_i32_0 = arith.constant 0 : i32
    %c0_i32_1 = arith.constant 0 : i32
    return %c0_i32, %c0_i32_0 : i32, i32
  }
  func.func @transform_1(%arg0: i32) -> (i32, i32, i32) {
    %c0_i32 = arith.constant 0 : i32
    %c0_i32_0 = arith.constant 0 : i32
    %c0_i32_1 = arith.constant 0 : i32
    %c0_i32_2 = arith.constant 0 : i32
    return %c0_i32, %c0_i32_0, %c0_i32_1 : i32, i32, i32
  }
  func.func @transform_2(%arg0: i32) -> (i32, i32) {
    %c0_i32 = arith.constant 0 : i32
    %c0_i32_0 = arith.constant 0 : i32
    %c0_i32_1 = arith.constant 0 : i32
    return %c0_i32, %c0_i32_0 : i32, i32
  }
  func.func @transform_3(%arg0: i32) -> (i32, i32) {
    %c0_i32 = arith.constant 0 : i32
    %c0_i32_0 = arith.constant 0 : i32
    %c0_i32_1 = arith.constant 0 : i32
    return %c0_i32, %c0_i32_0 : i32, i32
  }
  func.func @transform_4(%arg0: i32) -> (i32, i32) {
    %c0_i32 = arith.constant 0 : i32
    %c0_i32_0 = arith.constant 0 : i32
    %c0_i32_1 = arith.constant 0 : i32
    return %c0_i32, %c0_i32_0 : i32, i32
  }
}

module attributes {stable_mosaic.version = 11 : i64} {
  func.func @_tap_conv_prelu_kernel(%arg0: i32, %arg1: memref<64x384xbf16, #tpu.memory_space<vmem>>, %arg2: memref<9x16x64xbf16, #tpu.memory_space<vmem>>, %arg3: memref<16x1xf32, #tpu.memory_space<vmem>>, %arg4: memref<1x1xf32, #tpu.memory_space<smem>>, %arg5: memref<16x256xbf16, #tpu.memory_space<vmem>>) attributes {dimension_semantics = [#tpu.dimension_semantics<arbitrary>], iteration_bounds = array<i64: 1>, scalar_prefetch = 0 : i64, scratch_operands = 0 : i64, tpu.core_type = #tpu.core_type<tc>, window_params = [{pipeline_mode = #tpu.pipeline_mode<synchronous>, transform_indices = @transform_0, window_bounds = array<i64: 64, 384>}, {pipeline_mode = #tpu.pipeline_mode<synchronous>, transform_indices = @transform_1, window_bounds = array<i64: 9, 16, 64>}, {pipeline_mode = #tpu.pipeline_mode<synchronous>, transform_indices = @transform_2, window_bounds = array<i64: 16, 1>}, {transform_indices = @transform_3, window_bounds = array<i64: 1, 1>}, {pipeline_mode = #tpu.pipeline_mode<synchronous>, transform_indices = @transform_4, window_bounds = array<i64: 16, 256>}]} {
    %cst = arith.constant 0.000000e+00 : f32
    %0 = vector.broadcast %cst : f32 to vector<16x256xf32>
    %c0 = arith.constant 0 : index
    %c0_0 = arith.constant 0 : index
    %c0_1 = arith.constant 0 : index
    %1 = vector.load %arg2[%c0, %c0_0, %c0_1] : memref<9x16x64xbf16, #tpu.memory_space<vmem>>, vector<1x16x64xbf16>
    %2 = vector.shape_cast %1 : vector<1x16x64xbf16> to vector<16x64xbf16>
    %c0_2 = arith.constant 0 : index
    %c0_3 = arith.constant 0 : index
    %3 = vector.load %arg1[%c0_2, %c0_3] : memref<64x384xbf16, #tpu.memory_space<vmem>>, vector<64x256xbf16>
    %cst_4 = arith.constant dense<0.000000e+00> : vector<16x256xf32>
    %4 = tpu.matmul %2, %3, %cst_4 {dimension_numbers = #tpu.dot_dimension_numbers<[1], [0], [0], [1], [0, 0, 1, 1], [], []>} : vector<16x64xbf16>, vector<64x256xbf16>, vector<16x256xf32> -> vector<16x256xf32>
    %5 = arith.addf %0, %4 : vector<16x256xf32>
    %c1 = arith.constant 1 : index
    %c0_5 = arith.constant 0 : index
    %c0_6 = arith.constant 0 : index
    %6 = vector.load %arg2[%c1, %c0_5, %c0_6] : memref<9x16x64xbf16, #tpu.memory_space<vmem>>, vector<1x16x64xbf16>
    %7 = vector.shape_cast %6 : vector<1x16x64xbf16> to vector<16x64xbf16>
    %c0_7 = arith.constant 0 : index
    %c1_8 = arith.constant 1 : index
    %8 = vector.load %arg1[%c0_7, %c1_8] : memref<64x384xbf16, #tpu.memory_space<vmem>>, vector<64x256xbf16>
    %cst_9 = arith.constant dense<0.000000e+00> : vector<16x256xf32>
    %9 = tpu.matmul %7, %8, %cst_9 {dimension_numbers = #tpu.dot_dimension_numbers<[1], [0], [0], [1], [0, 0, 1, 1], [], []>} : vector<16x64xbf16>, vector<64x256xbf16>, vector<16x256xf32> -> vector<16x256xf32>
    %10 = arith.addf %5, %9 : vector<16x256xf32>
    %c2 = arith.constant 2 : index
    %c0_10 = arith.constant 0 : index
    %c0_11 = arith.constant 0 : index
    %11 = vector.load %arg2[%c2, %c0_10, %c0_11] : memref<9x16x64xbf16, #tpu.memory_space<vmem>>, vector<1x16x64xbf16>
    %12 = vector.shape_cast %11 : vector<1x16x64xbf16> to vector<16x64xbf16>
    %c0_12 = arith.constant 0 : index
    %c2_13 = arith.constant 2 : index
    %13 = vector.load %arg1[%c0_12, %c2_13] : memref<64x384xbf16, #tpu.memory_space<vmem>>, vector<64x256xbf16>
    %cst_14 = arith.constant dense<0.000000e+00> : vector<16x256xf32>
    %14 = tpu.matmul %12, %13, %cst_14 {dimension_numbers = #tpu.dot_dimension_numbers<[1], [0], [0], [1], [0, 0, 1, 1], [], []>} : vector<16x64xbf16>, vector<64x256xbf16>, vector<16x256xf32> -> vector<16x256xf32>
    %15 = arith.addf %10, %14 : vector<16x256xf32>
    %c3 = arith.constant 3 : index
    %c0_15 = arith.constant 0 : index
    %c0_16 = arith.constant 0 : index
    %16 = vector.load %arg2[%c3, %c0_15, %c0_16] : memref<9x16x64xbf16, #tpu.memory_space<vmem>>, vector<1x16x64xbf16>
    %17 = vector.shape_cast %16 : vector<1x16x64xbf16> to vector<16x64xbf16>
    %c0_17 = arith.constant 0 : index
    %c10 = arith.constant 10 : index
    %18 = vector.load %arg1[%c0_17, %c10] : memref<64x384xbf16, #tpu.memory_space<vmem>>, vector<64x256xbf16>
    %cst_18 = arith.constant dense<0.000000e+00> : vector<16x256xf32>
    %19 = tpu.matmul %17, %18, %cst_18 {dimension_numbers = #tpu.dot_dimension_numbers<[1], [0], [0], [1], [0, 0, 1, 1], [], []>} : vector<16x64xbf16>, vector<64x256xbf16>, vector<16x256xf32> -> vector<16x256xf32>
    %20 = arith.addf %15, %19 : vector<16x256xf32>
    %c4 = arith.constant 4 : index
    %c0_19 = arith.constant 0 : index
    %c0_20 = arith.constant 0 : index
    %21 = vector.load %arg2[%c4, %c0_19, %c0_20] : memref<9x16x64xbf16, #tpu.memory_space<vmem>>, vector<1x16x64xbf16>
    %22 = vector.shape_cast %21 : vector<1x16x64xbf16> to vector<16x64xbf16>
    %c0_21 = arith.constant 0 : index
    %c11 = arith.constant 11 : index
    %23 = vector.load %arg1[%c0_21, %c11] : memref<64x384xbf16, #tpu.memory_space<vmem>>, vector<64x256xbf16>
    %cst_22 = arith.constant dense<0.000000e+00> : vector<16x256xf32>
    %24 = tpu.matmul %22, %23, %cst_22 {dimension_numbers = #tpu.dot_dimension_numbers<[1], [0], [0], [1], [0, 0, 1, 1], [], []>} : vector<16x64xbf16>, vector<64x256xbf16>, vector<16x256xf32> -> vector<16x256xf32>
    %25 = arith.addf %20, %24 : vector<16x256xf32>
    %c5 = arith.constant 5 : index
    %c0_23 = arith.constant 0 : index
    %c0_24 = arith.constant 0 : index
    %26 = vector.load %arg2[%c5, %c0_23, %c0_24] : memref<9x16x64xbf16, #tpu.memory_space<vmem>>, vector<1x16x64xbf16>
    %27 = vector.shape_cast %26 : vector<1x16x64xbf16> to vector<16x64xbf16>
    %c0_25 = arith.constant 0 : index
    %c12 = arith.constant 12 : index
    %28 = vector.load %arg1[%c0_25, %c12] : memref<64x384xbf16, #tpu.memory_space<vmem>>, vector<64x256xbf16>
    %cst_26 = arith.constant dense<0.000000e+00> : vector<16x256xf32>
    %29 = tpu.matmul %27, %28, %cst_26 {dimension_numbers = #tpu.dot_dimension_numbers<[1], [0], [0], [1], [0, 0, 1, 1], [], []>} : vector<16x64xbf16>, vector<64x256xbf16>, vector<16x256xf32> -> vector<16x256xf32>
    %30 = arith.addf %25, %29 : vector<16x256xf32>
    %c6 = arith.constant 6 : index
    %c0_27 = arith.constant 0 : index
    %c0_28 = arith.constant 0 : index
    %31 = vector.load %arg2[%c6, %c0_27, %c0_28] : memref<9x16x64xbf16, #tpu.memory_space<vmem>>, vector<1x16x64xbf16>
    %32 = vector.shape_cast %31 : vector<1x16x64xbf16> to vector<16x64xbf16>
    %c0_29 = arith.constant 0 : index
    %c20 = arith.constant 20 : index
    %33 = vector.load %arg1[%c0_29, %c20] : memref<64x384xbf16, #tpu.memory_space<vmem>>, vector<64x256xbf16>
    %cst_30 = arith.constant dense<0.000000e+00> : vector<16x256xf32>
    %34 = tpu.matmul %32, %33, %cst_30 {dimension_numbers = #tpu.dot_dimension_numbers<[1], [0], [0], [1], [0, 0, 1, 1], [], []>} : vector<16x64xbf16>, vector<64x256xbf16>, vector<16x256xf32> -> vector<16x256xf32>
    %35 = arith.addf %30, %34 : vector<16x256xf32>
    %c7 = arith.constant 7 : index
    %c0_31 = arith.constant 0 : index
    %c0_32 = arith.constant 0 : index
    %36 = vector.load %arg2[%c7, %c0_31, %c0_32] : memref<9x16x64xbf16, #tpu.memory_space<vmem>>, vector<1x16x64xbf16>
    %37 = vector.shape_cast %36 : vector<1x16x64xbf16> to vector<16x64xbf16>
    %c0_33 = arith.constant 0 : index
    %c21 = arith.constant 21 : index
    %38 = vector.load %arg1[%c0_33, %c21] : memref<64x384xbf16, #tpu.memory_space<vmem>>, vector<64x256xbf16>
    %cst_34 = arith.constant dense<0.000000e+00> : vector<16x256xf32>
    %39 = tpu.matmul %37, %38, %cst_34 {dimension_numbers = #tpu.dot_dimension_numbers<[1], [0], [0], [1], [0, 0, 1, 1], [], []>} : vector<16x64xbf16>, vector<64x256xbf16>, vector<16x256xf32> -> vector<16x256xf32>
    %40 = arith.addf %35, %39 : vector<16x256xf32>
    %c8 = arith.constant 8 : index
    %c0_35 = arith.constant 0 : index
    %c0_36 = arith.constant 0 : index
    %41 = vector.load %arg2[%c8, %c0_35, %c0_36] : memref<9x16x64xbf16, #tpu.memory_space<vmem>>, vector<1x16x64xbf16>
    %42 = vector.shape_cast %41 : vector<1x16x64xbf16> to vector<16x64xbf16>
    %c0_37 = arith.constant 0 : index
    %c22 = arith.constant 22 : index
    %43 = vector.load %arg1[%c0_37, %c22] : memref<64x384xbf16, #tpu.memory_space<vmem>>, vector<64x256xbf16>
    %cst_38 = arith.constant dense<0.000000e+00> : vector<16x256xf32>
    %44 = tpu.matmul %42, %43, %cst_38 {dimension_numbers = #tpu.dot_dimension_numbers<[1], [0], [0], [1], [0, 0, 1, 1], [], []>} : vector<16x64xbf16>, vector<64x256xbf16>, vector<16x256xf32> -> vector<16x256xf32>
    %45 = arith.addf %40, %44 : vector<16x256xf32>
    %c0_39 = arith.constant 0 : index
    %c0_40 = arith.constant 0 : index
    %46 = vector.load %arg3[%c0_39, %c0_40] : memref<16x1xf32, #tpu.memory_space<vmem>>, vector<16x1xf32>
    %47 = vector.broadcast %46 : vector<16x1xf32> to vector<16x256xf32>
    %48 = arith.addf %45, %47 : vector<16x256xf32>
    %c0_41 = arith.constant 0 : index
    %c0_42 = arith.constant 0 : index
    %49 = memref.load %arg4[%c0_41, %c0_42] : memref<1x1xf32, #tpu.memory_space<smem>>
    %cst_43 = arith.constant 0.000000e+00 : f32
    %50 = vector.broadcast %cst_43 : f32 to vector<16x256xf32>
    %51 = arith.cmpf oge, %48, %50 : vector<16x256xf32>
    %52 = vector.broadcast %49 : f32 to vector<16x256xf32>
    %53 = arith.mulf %52, %48 : vector<16x256xf32>
    %54 = arith.select %51, %48, %53 : vector<16x256xi1>, vector<16x256xf32>
    %55 = arith.truncf %54 : vector<16x256xf32> to vector<16x256xbf16>
    %c0_44 = arith.constant 0 : index
    %c0_45 = arith.constant 0 : index
    %56 = vector.load %arg5[%c0_44, %c0_45] : memref<16x256xbf16, #tpu.memory_space<vmem>>, vector<16x256xbf16>
    tpu.vector_store %arg5[%c0_44, %c0_45], %55 {strides = array<i32>} : memref<16x256xbf16, #tpu.memory_space<vmem>>, vector<16x256xbf16>,
    return
  }
  func.func @transform_0(%arg0: i32) -> (i32, i32) {
    %c0_i32 = arith.constant 0 : i32
    %c0_i32_0 = arith.constant 0 : i32
    %c0_i32_1 = arith.constant 0 : i32
    return %c0_i32, %c0_i32_0 : i32, i32
  }
  func.func @transform_1(%arg0: i32) -> (i32, i32, i32) {
    %c0_i32 = arith.constant 0 : i32
    %c0_i32_0 = arith.constant 0 : i32
    %c0_i32_1 = arith.constant 0 : i32
    %c0_i32_2 = arith.constant 0 : i32
    return %c0_i32, %c0_i32_0, %c0_i32_1 : i32, i32, i32
  }
  func.func @transform_2(%arg0: i32) -> (i32, i32) {
    %c0_i32 = arith.constant 0 : i32
    %c0_i32_0 = arith.constant 0 : i32
    %c0_i32_1 = arith.constant 0 : i32
    return %c0_i32, %c0_i32_0 : i32, i32
  }
  func.func @transform_3(%arg0: i32) -> (i32, i32) {
    %c0_i32 = arith.constant 0 : i32
    %c0_i32_0 = arith.constant 0 : i32
    %c0_i32_1 = arith.constant 0 : i32
    return %c0_i32, %c0_i32_0 : i32, i32
  }
  func.func @transform_4(%arg0: i32) -> (i32, i32) {
    %c0_i32 = arith.constant 0 : i32
    %c0_i32_0 = arith.constant 0 : i32
    %c0_i32_1 = arith.constant 0 : i32
    return %c0_i32, %c0_i32_0 : i32, i32
  }
}

module attributes {stable_mosaic.version = 11 : i64} {
  func.func @_chunk_matmul_prelu_kernel(%arg0: i32, %arg1: memref<16x512xbf16, #tpu.memory_space<vmem>>, %arg2: memref<16x512xbf16, #tpu.memory_space<vmem>>, %arg3: memref<16x32xbf16, #tpu.memory_space<vmem>>, %arg4: memref<16x1xf32, #tpu.memory_space<vmem>>, %arg5: memref<1x1xf32, #tpu.memory_space<smem>>, %arg6: memref<16x512xbf16, #tpu.memory_space<vmem>>) attributes {dimension_semantics = [#tpu.dimension_semantics<arbitrary>], iteration_bounds = array<i64: 1>, scalar_prefetch = 0 : i64, scratch_operands = 0 : i64, tpu.core_type = #tpu.core_type<tc>, window_params = [{pipeline_mode = #tpu.pipeline_mode<synchronous>, transform_indices = @transform_0, window_bounds = array<i64: 16, 512>}, {pipeline_mode = #tpu.pipeline_mode<synchronous>, transform_indices = @transform_1, window_bounds = array<i64: 16, 512>}, {pipeline_mode = #tpu.pipeline_mode<synchronous>, transform_indices = @transform_2, window_bounds = array<i64: 16, 32>}, {pipeline_mode = #tpu.pipeline_mode<synchronous>, transform_indices = @transform_3, window_bounds = array<i64: 16, 1>}, {transform_indices = @transform_4, window_bounds = array<i64: 1, 1>}, {pipeline_mode = #tpu.pipeline_mode<synchronous>, transform_indices = @transform_5, window_bounds = array<i64: 16, 512>}]} {
    %cst = arith.constant 0.000000e+00 : f32
    %0 = vector.broadcast %cst : f32 to vector<16x512xf32>
    %c0 = arith.constant 0 : index
    %c0_0 = arith.constant 0 : index
    %1 = vector.load %arg3[%c0, %c0_0] : memref<16x32xbf16, #tpu.memory_space<vmem>>, vector<16x16xbf16>
    %c0_1 = arith.constant 0 : index
    %c0_2 = arith.constant 0 : index
    %2 = vector.load %arg1[%c0_1, %c0_2] : memref<16x512xbf16, #tpu.memory_space<vmem>>, vector<16x512xbf16>
    %cst_3 = arith.constant dense<0.000000e+00> : vector<16x512xf32>
    %3 = tpu.matmul %1, %2, %cst_3 {dimension_numbers = #tpu.dot_dimension_numbers<[1], [0], [0], [1], [0, 0, 1, 1], [], []>} : vector<16x16xbf16>, vector<16x512xbf16>, vector<16x512xf32> -> vector<16x512xf32>
    %4 = arith.addf %0, %3 : vector<16x512xf32>
    %c0_4 = arith.constant 0 : index
    %c16 = arith.constant 16 : index
    %5 = vector.load %arg3[%c0_4, %c16] : memref<16x32xbf16, #tpu.memory_space<vmem>>, vector<16x16xbf16>
    %c0_5 = arith.constant 0 : index
    %c0_6 = arith.constant 0 : index
    %6 = vector.load %arg2[%c0_5, %c0_6] : memref<16x512xbf16, #tpu.memory_space<vmem>>, vector<16x512xbf16>
    %cst_7 = arith.constant dense<0.000000e+00> : vector<16x512xf32>
    %7 = tpu.matmul %5, %6, %cst_7 {dimension_numbers = #tpu.dot_dimension_numbers<[1], [0], [0], [1], [0, 0, 1, 1], [], []>} : vector<16x16xbf16>, vector<16x512xbf16>, vector<16x512xf32> -> vector<16x512xf32>
    %8 = arith.addf %4, %7 : vector<16x512xf32>
    %c0_8 = arith.constant 0 : index
    %c0_9 = arith.constant 0 : index
    %9 = vector.load %arg4[%c0_8, %c0_9] : memref<16x1xf32, #tpu.memory_space<vmem>>, vector<16x1xf32>
    %10 = vector.broadcast %9 : vector<16x1xf32> to vector<16x512xf32>
    %11 = arith.addf %8, %10 : vector<16x512xf32>
    %c0_10 = arith.constant 0 : index
    %c0_11 = arith.constant 0 : index
    %12 = memref.load %arg5[%c0_10, %c0_11] : memref<1x1xf32, #tpu.memory_space<smem>>
    %cst_12 = arith.constant 0.000000e+00 : f32
    %13 = vector.broadcast %cst_12 : f32 to vector<16x512xf32>
    %14 = arith.cmpf oge, %11, %13 : vector<16x512xf32>
    %15 = vector.broadcast %12 : f32 to vector<16x512xf32>
    %16 = arith.mulf %15, %11 : vector<16x512xf32>
    %17 = arith.select %14, %11, %16 : vector<16x512xi1>, vector<16x512xf32>
    %18 = arith.truncf %17 : vector<16x512xf32> to vector<16x512xbf16>
    %c0_13 = arith.constant 0 : index
    %c0_14 = arith.constant 0 : index
    %19 = vector.load %arg6[%c0_13, %c0_14] : memref<16x512xbf16, #tpu.memory_space<vmem>>, vector<16x512xbf16>
    tpu.vector_store %arg6[%c0_13, %c0_14], %18 {strides = array<i32>} : memref<16x512xbf16, #tpu.memory_space<vmem>>, vector<16x512xbf16>,
    return
  }
  func.func @transform_0(%arg0: i32) -> (i32, i32) {
    %c0_i32 = arith.constant 0 : i32
    %c0_i32_0 = arith.constant 0 : i32
    %c0_i32_1 = arith.constant 0 : i32
    return %c0_i32, %c0_i32_0 : i32, i32
  }
  func.func @transform_1(%arg0: i32) -> (i32, i32) {
    %c0_i32 = arith.constant 0 : i32
    %c0_i32_0 = arith.constant 0 : i32
    %c0_i32_1 = arith.constant 0 : i32
    return %c0_i32, %c0_i32_0 : i32, i32
  }
  func.func @transform_2(%arg0: i32) -> (i32, i32) {
    %c0_i32 = arith.constant 0 : i32
    %c0_i32_0 = arith.constant 0 : i32
    %c0_i32_1 = arith.constant 0 : i32
    return %c0_i32, %c0_i32_0 : i32, i32
  }
  func.func @transform_3(%arg0: i32) -> (i32, i32) {
    %c0_i32 = arith.constant 0 : i32
    %c0_i32_0 = arith.constant 0 : i32
    %c0_i32_1 = arith.constant 0 : i32
    return %c0_i32, %c0_i32_0 : i32, i32
  }
  func.func @transform_4(%arg0: i32) -> (i32, i32) {
    %c0_i32 = arith.constant 0 : i32
    %c0_i32_0 = arith.constant 0 : i32
    %c0_i32_1 = arith.constant 0 : i32
    return %c0_i32, %c0_i32_0 : i32, i32
  }
  func.func @transform_5(%arg0: i32) -> (i32, i32) {
    %c0_i32 = arith.constant 0 : i32
    %c0_i32_0 = arith.constant 0 : i32
    %c0_i32_1 = arith.constant 0 : i32
    return %c0_i32, %c0_i32_0 : i32, i32
  }
}

module attributes {stable_mosaic.version = 11 : i64} {
  func.func @_chunk_matmul_prelu_kernel(%arg0: i32, %arg1: memref<16x128xbf16, #tpu.memory_space<vmem>>, %arg2: memref<16x128xbf16, #tpu.memory_space<vmem>>, %arg3: memref<16x128xbf16, #tpu.memory_space<vmem>>, %arg4: memref<16x48xbf16, #tpu.memory_space<vmem>>, %arg5: memref<16x1xf32, #tpu.memory_space<vmem>>, %arg6: memref<1x1xf32, #tpu.memory_space<smem>>, %arg7: memref<16x128xbf16, #tpu.memory_space<vmem>>) attributes {dimension_semantics = [#tpu.dimension_semantics<arbitrary>], iteration_bounds = array<i64: 1>, scalar_prefetch = 0 : i64, scratch_operands = 0 : i64, tpu.core_type = #tpu.core_type<tc>, window_params = [{pipeline_mode = #tpu.pipeline_mode<synchronous>, transform_indices = @transform_0, window_bounds = array<i64: 16, 128>}, {pipeline_mode = #tpu.pipeline_mode<synchronous>, transform_indices = @transform_1, window_bounds = array<i64: 16, 128>}, {pipeline_mode = #tpu.pipeline_mode<synchronous>, transform_indices = @transform_2, window_bounds = array<i64: 16, 128>}, {pipeline_mode = #tpu.pipeline_mode<synchronous>, transform_indices = @transform_3, window_bounds = array<i64: 16, 48>}, {pipeline_mode = #tpu.pipeline_mode<synchronous>, transform_indices = @transform_4, window_bounds = array<i64: 16, 1>}, {transform_indices = @transform_5, window_bounds = array<i64: 1, 1>}, {pipeline_mode = #tpu.pipeline_mode<synchronous>, transform_indices = @transform_6, window_bounds = array<i64: 16, 128>}]} {
    %cst = arith.constant 0.000000e+00 : f32
    %0 = vector.broadcast %cst : f32 to vector<16x128xf32>
    %c0 = arith.constant 0 : index
    %c0_0 = arith.constant 0 : index
    %1 = vector.load %arg4[%c0, %c0_0] : memref<16x48xbf16, #tpu.memory_space<vmem>>, vector<16x16xbf16>
    %c0_1 = arith.constant 0 : index
    %c0_2 = arith.constant 0 : index
    %2 = vector.load %arg1[%c0_1, %c0_2] : memref<16x128xbf16, #tpu.memory_space<vmem>>, vector<16x128xbf16>
    %cst_3 = arith.constant dense<0.000000e+00> : vector<16x128xf32>
    %3 = tpu.matmul %1, %2, %cst_3 {dimension_numbers = #tpu.dot_dimension_numbers<[1], [0], [0], [1], [0, 0, 1, 1], [], []>} : vector<16x16xbf16>, vector<16x128xbf16>, vector<16x128xf32> -> vector<16x128xf32>
    %4 = arith.addf %0, %3 : vector<16x128xf32>
    %c0_4 = arith.constant 0 : index
    %c16 = arith.constant 16 : index
    %5 = vector.load %arg4[%c0_4, %c16] : memref<16x48xbf16, #tpu.memory_space<vmem>>, vector<16x16xbf16>
    %c0_5 = arith.constant 0 : index
    %c0_6 = arith.constant 0 : index
    %6 = vector.load %arg2[%c0_5, %c0_6] : memref<16x128xbf16, #tpu.memory_space<vmem>>, vector<16x128xbf16>
    %cst_7 = arith.constant dense<0.000000e+00> : vector<16x128xf32>
    %7 = tpu.matmul %5, %6, %cst_7 {dimension_numbers = #tpu.dot_dimension_numbers<[1], [0], [0], [1], [0, 0, 1, 1], [], []>} : vector<16x16xbf16>, vector<16x128xbf16>, vector<16x128xf32> -> vector<16x128xf32>
    %8 = arith.addf %4, %7 : vector<16x128xf32>
    %c0_8 = arith.constant 0 : index
    %c32 = arith.constant 32 : index
    %9 = vector.load %arg4[%c0_8, %c32] : memref<16x48xbf16, #tpu.memory_space<vmem>>, vector<16x16xbf16>
    %c0_9 = arith.constant 0 : index
    %c0_10 = arith.constant 0 : index
    %10 = vector.load %arg3[%c0_9, %c0_10] : memref<16x128xbf16, #tpu.memory_space<vmem>>, vector<16x128xbf16>
    %cst_11 = arith.constant dense<0.000000e+00> : vector<16x128xf32>
    %11 = tpu.matmul %9, %10, %cst_11 {dimension_numbers = #tpu.dot_dimension_numbers<[1], [0], [0], [1], [0, 0, 1, 1], [], []>} : vector<16x16xbf16>, vector<16x128xbf16>, vector<16x128xf32> -> vector<16x128xf32>
    %12 = arith.addf %8, %11 : vector<16x128xf32>
    %c0_12 = arith.constant 0 : index
    %c0_13 = arith.constant 0 : index
    %13 = vector.load %arg5[%c0_12, %c0_13] : memref<16x1xf32, #tpu.memory_space<vmem>>, vector<16x1xf32>
    %14 = vector.broadcast %13 : vector<16x1xf32> to vector<16x128xf32>
    %15 = arith.addf %12, %14 : vector<16x128xf32>
    %c0_14 = arith.constant 0 : index
    %c0_15 = arith.constant 0 : index
    %16 = memref.load %arg6[%c0_14, %c0_15] : memref<1x1xf32, #tpu.memory_space<smem>>
    %cst_16 = arith.constant 0.000000e+00 : f32
    %17 = vector.broadcast %cst_16 : f32 to vector<16x128xf32>
    %18 = arith.cmpf oge, %15, %17 : vector<16x128xf32>
    %19 = vector.broadcast %16 : f32 to vector<16x128xf32>
    %20 = arith.mulf %19, %15 : vector<16x128xf32>
    %21 = arith.select %18, %15, %20 : vector<16x128xi1>, vector<16x128xf32>
    %22 = arith.truncf %21 : vector<16x128xf32> to vector<16x128xbf16>
    %c0_17 = arith.constant 0 : index
    %c0_18 = arith.constant 0 : index
    %23 = vector.load %arg7[%c0_17, %c0_18] : memref<16x128xbf16, #tpu.memory_space<vmem>>, vector<16x128xbf16>
    tpu.vector_store %arg7[%c0_17, %c0_18], %22 {strides = array<i32>} : memref<16x128xbf16, #tpu.memory_space<vmem>>, vector<16x128xbf16>,
    return
  }
  func.func @transform_0(%arg0: i32) -> (i32, i32) {
    %c0_i32 = arith.constant 0 : i32
    %c0_i32_0 = arith.constant 0 : i32
    %c0_i32_1 = arith.constant 0 : i32
    return %c0_i32, %c0_i32_0 : i32, i32
  }
  func.func @transform_1(%arg0: i32) -> (i32, i32) {
    %c0_i32 = arith.constant 0 : i32
    %c0_i32_0 = arith.constant 0 : i32
    %c0_i32_1 = arith.constant 0 : i32
    return %c0_i32, %c0_i32_0 : i32, i32
  }
  func.func @transform_2(%arg0: i32) -> (i32, i32) {
    %c0_i32 = arith.constant 0 : i32
    %c0_i32_0 = arith.constant 0 : i32
    %c0_i32_1 = arith.constant 0 : i32
    return %c0_i32, %c0_i32_0 : i32, i32
  }
  func.func @transform_3(%arg0: i32) -> (i32, i32) {
    %c0_i32 = arith.constant 0 : i32
    %c0_i32_0 = arith.constant 0 : i32
    %c0_i32_1 = arith.constant 0 : i32
    return %c0_i32, %c0_i32_0 : i32, i32
  }
  func.func @transform_4(%arg0: i32) -> (i32, i32) {
    %c0_i32 = arith.constant 0 : i32
    %c0_i32_0 = arith.constant 0 : i32
    %c0_i32_1 = arith.constant 0 : i32
    return %c0_i32, %c0_i32_0 : i32, i32
  }
  func.func @transform_5(%arg0: i32) -> (i32, i32) {
    %c0_i32 = arith.constant 0 : i32
    %c0_i32_0 = arith.constant 0 : i32
    %c0_i32_1 = arith.constant 0 : i32
    return %c0_i32, %c0_i32_0 : i32, i32
  }
  func.func @transform_6(%arg0: i32) -> (i32, i32) {
    %c0_i32 = arith.constant 0 : i32
    %c0_i32_0 = arith.constant 0 : i32
    %c0_i32_1 = arith.constant 0 : i32
    return %c0_i32, %c0_i32_0 : i32, i32
  }
}

module attributes {stable_mosaic.version = 11 : i64} {
  func.func @_chunk_matmul_prelu_kernel(%arg0: i32, %arg1: memref<16x512xbf16, #tpu.memory_space<vmem>>, %arg2: memref<16x512xbf16, #tpu.memory_space<vmem>>, %arg3: memref<16x512xbf16, #tpu.memory_space<vmem>>, %arg4: memref<16x48xbf16, #tpu.memory_space<vmem>>, %arg5: memref<16x1xf32, #tpu.memory_space<vmem>>, %arg6: memref<1x1xf32, #tpu.memory_space<smem>>, %arg7: memref<16x512xbf16, #tpu.memory_space<vmem>>) attributes {dimension_semantics = [#tpu.dimension_semantics<arbitrary>], iteration_bounds = array<i64: 1>, scalar_prefetch = 0 : i64, scratch_operands = 0 : i64, tpu.core_type = #tpu.core_type<tc>, window_params = [{pipeline_mode = #tpu.pipeline_mode<synchronous>, transform_indices = @transform_0, window_bounds = array<i64: 16, 512>}, {pipeline_mode = #tpu.pipeline_mode<synchronous>, transform_indices = @transform_1, window_bounds = array<i64: 16, 512>}, {pipeline_mode = #tpu.pipeline_mode<synchronous>, transform_indices = @transform_2, window_bounds = array<i64: 16, 512>}, {pipeline_mode = #tpu.pipeline_mode<synchronous>, transform_indices = @transform_3, window_bounds = array<i64: 16, 48>}, {pipeline_mode = #tpu.pipeline_mode<synchronous>, transform_indices = @transform_4, window_bounds = array<i64: 16, 1>}, {transform_indices = @transform_5, window_bounds = array<i64: 1, 1>}, {pipeline_mode = #tpu.pipeline_mode<synchronous>, transform_indices = @transform_6, window_bounds = array<i64: 16, 512>}]} {
    %cst = arith.constant 0.000000e+00 : f32
    %0 = vector.broadcast %cst : f32 to vector<16x512xf32>
    %c0 = arith.constant 0 : index
    %c0_0 = arith.constant 0 : index
    %1 = vector.load %arg4[%c0, %c0_0] : memref<16x48xbf16, #tpu.memory_space<vmem>>, vector<16x16xbf16>
    %c0_1 = arith.constant 0 : index
    %c0_2 = arith.constant 0 : index
    %2 = vector.load %arg1[%c0_1, %c0_2] : memref<16x512xbf16, #tpu.memory_space<vmem>>, vector<16x512xbf16>
    %cst_3 = arith.constant dense<0.000000e+00> : vector<16x512xf32>
    %3 = tpu.matmul %1, %2, %cst_3 {dimension_numbers = #tpu.dot_dimension_numbers<[1], [0], [0], [1], [0, 0, 1, 1], [], []>} : vector<16x16xbf16>, vector<16x512xbf16>, vector<16x512xf32> -> vector<16x512xf32>
    %4 = arith.addf %0, %3 : vector<16x512xf32>
    %c0_4 = arith.constant 0 : index
    %c16 = arith.constant 16 : index
    %5 = vector.load %arg4[%c0_4, %c16] : memref<16x48xbf16, #tpu.memory_space<vmem>>, vector<16x16xbf16>
    %c0_5 = arith.constant 0 : index
    %c0_6 = arith.constant 0 : index
    %6 = vector.load %arg2[%c0_5, %c0_6] : memref<16x512xbf16, #tpu.memory_space<vmem>>, vector<16x512xbf16>
    %cst_7 = arith.constant dense<0.000000e+00> : vector<16x512xf32>
    %7 = tpu.matmul %5, %6, %cst_7 {dimension_numbers = #tpu.dot_dimension_numbers<[1], [0], [0], [1], [0, 0, 1, 1], [], []>} : vector<16x16xbf16>, vector<16x512xbf16>, vector<16x512xf32> -> vector<16x512xf32>
    %8 = arith.addf %4, %7 : vector<16x512xf32>
    %c0_8 = arith.constant 0 : index
    %c32 = arith.constant 32 : index
    %9 = vector.load %arg4[%c0_8, %c32] : memref<16x48xbf16, #tpu.memory_space<vmem>>, vector<16x16xbf16>
    %c0_9 = arith.constant 0 : index
    %c0_10 = arith.constant 0 : index
    %10 = vector.load %arg3[%c0_9, %c0_10] : memref<16x512xbf16, #tpu.memory_space<vmem>>, vector<16x512xbf16>
    %cst_11 = arith.constant dense<0.000000e+00> : vector<16x512xf32>
    %11 = tpu.matmul %9, %10, %cst_11 {dimension_numbers = #tpu.dot_dimension_numbers<[1], [0], [0], [1], [0, 0, 1, 1], [], []>} : vector<16x16xbf16>, vector<16x512xbf16>, vector<16x512xf32> -> vector<16x512xf32>
    %12 = arith.addf %8, %11 : vector<16x512xf32>
    %c0_12 = arith.constant 0 : index
    %c0_13 = arith.constant 0 : index
    %13 = vector.load %arg5[%c0_12, %c0_13] : memref<16x1xf32, #tpu.memory_space<vmem>>, vector<16x1xf32>
    %14 = vector.broadcast %13 : vector<16x1xf32> to vector<16x512xf32>
    %15 = arith.addf %12, %14 : vector<16x512xf32>
    %c0_14 = arith.constant 0 : index
    %c0_15 = arith.constant 0 : index
    %16 = memref.load %arg6[%c0_14, %c0_15] : memref<1x1xf32, #tpu.memory_space<smem>>
    %cst_16 = arith.constant 0.000000e+00 : f32
    %17 = vector.broadcast %cst_16 : f32 to vector<16x512xf32>
    %18 = arith.cmpf oge, %15, %17 : vector<16x512xf32>
    %19 = vector.broadcast %16 : f32 to vector<16x512xf32>
    %20 = arith.mulf %19, %15 : vector<16x512xf32>
    %21 = arith.select %18, %15, %20 : vector<16x512xi1>, vector<16x512xf32>
    %22 = arith.truncf %21 : vector<16x512xf32> to vector<16x512xbf16>
    %c0_17 = arith.constant 0 : index
    %c0_18 = arith.constant 0 : index
    %23 = vector.load %arg7[%c0_17, %c0_18] : memref<16x512xbf16, #tpu.memory_space<vmem>>, vector<16x512xbf16>
    tpu.vector_store %arg7[%c0_17, %c0_18], %22 {strides = array<i32>} : memref<16x512xbf16, #tpu.memory_space<vmem>>, vector<16x512xbf16>,
    return
  }
  func.func @transform_0(%arg0: i32) -> (i32, i32) {
    %c0_i32 = arith.constant 0 : i32
    %c0_i32_0 = arith.constant 0 : i32
    %c0_i32_1 = arith.constant 0 : i32
    return %c0_i32, %c0_i32_0 : i32, i32
  }
  func.func @transform_1(%arg0: i32) -> (i32, i32) {
    %c0_i32 = arith.constant 0 : i32
    %c0_i32_0 = arith.constant 0 : i32
    %c0_i32_1 = arith.constant 0 : i32
    return %c0_i32, %c0_i32_0 : i32, i32
  }
  func.func @transform_2(%arg0: i32) -> (i32, i32) {
    %c0_i32 = arith.constant 0 : i32
    %c0_i32_0 = arith.constant 0 : i32
    %c0_i32_1 = arith.constant 0 : i32
    return %c0_i32, %c0_i32_0 : i32, i32
  }
  func.func @transform_3(%arg0: i32) -> (i32, i32) {
    %c0_i32 = arith.constant 0 : i32
    %c0_i32_0 = arith.constant 0 : i32
    %c0_i32_1 = arith.constant 0 : i32
    return %c0_i32, %c0_i32_0 : i32, i32
  }
  func.func @transform_4(%arg0: i32) -> (i32, i32) {
    %c0_i32 = arith.constant 0 : i32
    %c0_i32_0 = arith.constant 0 : i32
    %c0_i32_1 = arith.constant 0 : i32
    return %c0_i32, %c0_i32_0 : i32, i32
  }
  func.func @transform_5(%arg0: i32) -> (i32, i32) {
    %c0_i32 = arith.constant 0 : i32
    %c0_i32_0 = arith.constant 0 : i32
    %c0_i32_1 = arith.constant 0 : i32
    return %c0_i32, %c0_i32_0 : i32, i32
  }
  func.func @transform_6(%arg0: i32) -> (i32, i32) {
    %c0_i32 = arith.constant 0 : i32
    %c0_i32_0 = arith.constant 0 : i32
    %c0_i32_1 = arith.constant 0 : i32
    return %c0_i32, %c0_i32_0 : i32, i32
  }
}

module attributes {stable_mosaic.version = 11 : i64} {
  func.func @_chunk_matmul_prelu_kernel(%arg0: i32, %arg1: memref<16x128xbf16, #tpu.memory_space<vmem>>, %arg2: memref<16x128xbf16, #tpu.memory_space<vmem>>, %arg3: memref<16x32xbf16, #tpu.memory_space<vmem>>, %arg4: memref<16x1xf32, #tpu.memory_space<vmem>>, %arg5: memref<1x1xf32, #tpu.memory_space<smem>>, %arg6: memref<16x128xbf16, #tpu.memory_space<vmem>>) attributes {dimension_semantics = [#tpu.dimension_semantics<arbitrary>], iteration_bounds = array<i64: 1>, scalar_prefetch = 0 : i64, scratch_operands = 0 : i64, tpu.core_type = #tpu.core_type<tc>, window_params = [{pipeline_mode = #tpu.pipeline_mode<synchronous>, transform_indices = @transform_0, window_bounds = array<i64: 16, 128>}, {pipeline_mode = #tpu.pipeline_mode<synchronous>, transform_indices = @transform_1, window_bounds = array<i64: 16, 128>}, {pipeline_mode = #tpu.pipeline_mode<synchronous>, transform_indices = @transform_2, window_bounds = array<i64: 16, 32>}, {pipeline_mode = #tpu.pipeline_mode<synchronous>, transform_indices = @transform_3, window_bounds = array<i64: 16, 1>}, {transform_indices = @transform_4, window_bounds = array<i64: 1, 1>}, {pipeline_mode = #tpu.pipeline_mode<synchronous>, transform_indices = @transform_5, window_bounds = array<i64: 16, 128>}]} {
    %cst = arith.constant 0.000000e+00 : f32
    %0 = vector.broadcast %cst : f32 to vector<16x128xf32>
    %c0 = arith.constant 0 : index
    %c0_0 = arith.constant 0 : index
    %1 = vector.load %arg3[%c0, %c0_0] : memref<16x32xbf16, #tpu.memory_space<vmem>>, vector<16x16xbf16>
    %c0_1 = arith.constant 0 : index
    %c0_2 = arith.constant 0 : index
    %2 = vector.load %arg1[%c0_1, %c0_2] : memref<16x128xbf16, #tpu.memory_space<vmem>>, vector<16x128xbf16>
    %cst_3 = arith.constant dense<0.000000e+00> : vector<16x128xf32>
    %3 = tpu.matmul %1, %2, %cst_3 {dimension_numbers = #tpu.dot_dimension_numbers<[1], [0], [0], [1], [0, 0, 1, 1], [], []>} : vector<16x16xbf16>, vector<16x128xbf16>, vector<16x128xf32> -> vector<16x128xf32>
    %4 = arith.addf %0, %3 : vector<16x128xf32>
    %c0_4 = arith.constant 0 : index
    %c16 = arith.constant 16 : index
    %5 = vector.load %arg3[%c0_4, %c16] : memref<16x32xbf16, #tpu.memory_space<vmem>>, vector<16x16xbf16>
    %c0_5 = arith.constant 0 : index
    %c0_6 = arith.constant 0 : index
    %6 = vector.load %arg2[%c0_5, %c0_6] : memref<16x128xbf16, #tpu.memory_space<vmem>>, vector<16x128xbf16>
    %cst_7 = arith.constant dense<0.000000e+00> : vector<16x128xf32>
    %7 = tpu.matmul %5, %6, %cst_7 {dimension_numbers = #tpu.dot_dimension_numbers<[1], [0], [0], [1], [0, 0, 1, 1], [], []>} : vector<16x16xbf16>, vector<16x128xbf16>, vector<16x128xf32> -> vector<16x128xf32>
    %8 = arith.addf %4, %7 : vector<16x128xf32>
    %c0_8 = arith.constant 0 : index
    %c0_9 = arith.constant 0 : index
    %9 = vector.load %arg4[%c0_8, %c0_9] : memref<16x1xf32, #tpu.memory_space<vmem>>, vector<16x1xf32>
    %10 = vector.broadcast %9 : vector<16x1xf32> to vector<16x128xf32>
    %11 = arith.addf %8, %10 : vector<16x128xf32>
    %c0_10 = arith.constant 0 : index
    %c0_11 = arith.constant 0 : index
    %12 = memref.load %arg5[%c0_10, %c0_11] : memref<1x1xf32, #tpu.memory_space<smem>>
    %cst_12 = arith.constant 0.000000e+00 : f32
    %13 = vector.broadcast %cst_12 : f32 to vector<16x128xf32>
    %14 = arith.cmpf oge, %11, %13 : vector<16x128xf32>
    %15 = vector.broadcast %12 : f32 to vector<16x128xf32>
    %16 = arith.mulf %15, %11 : vector<16x128xf32>
    %17 = arith.select %14, %11, %16 : vector<16x128xi1>, vector<16x128xf32>
    %18 = arith.truncf %17 : vector<16x128xf32> to vector<16x128xbf16>
    %c0_13 = arith.constant 0 : index
    %c0_14 = arith.constant 0 : index
    %19 = vector.load %arg6[%c0_13, %c0_14] : memref<16x128xbf16, #tpu.memory_space<vmem>>, vector<16x128xbf16>
    tpu.vector_store %arg6[%c0_13, %c0_14], %18 {strides = array<i32>} : memref<16x128xbf16, #tpu.memory_space<vmem>>, vector<16x128xbf16>,
    return
  }
  func.func @transform_0(%arg0: i32) -> (i32, i32) {
    %c0_i32 = arith.constant 0 : i32
    %c0_i32_0 = arith.constant 0 : i32
    %c0_i32_1 = arith.constant 0 : i32
    return %c0_i32, %c0_i32_0 : i32, i32
  }
  func.func @transform_1(%arg0: i32) -> (i32, i32) {
    %c0_i32 = arith.constant 0 : i32
    %c0_i32_0 = arith.constant 0 : i32
    %c0_i32_1 = arith.constant 0 : i32
    return %c0_i32, %c0_i32_0 : i32, i32
  }
  func.func @transform_2(%arg0: i32) -> (i32, i32) {
    %c0_i32 = arith.constant 0 : i32
    %c0_i32_0 = arith.constant 0 : i32
    %c0_i32_1 = arith.constant 0 : i32
    return %c0_i32, %c0_i32_0 : i32, i32
  }
  func.func @transform_3(%arg0: i32) -> (i32, i32) {
    %c0_i32 = arith.constant 0 : i32
    %c0_i32_0 = arith.constant 0 : i32
    %c0_i32_1 = arith.constant 0 : i32
    return %c0_i32, %c0_i32_0 : i32, i32
  }
  func.func @transform_4(%arg0: i32) -> (i32, i32) {
    %c0_i32 = arith.constant 0 : i32
    %c0_i32_0 = arith.constant 0 : i32
    %c0_i32_1 = arith.constant 0 : i32
    return %c0_i32, %c0_i32_0 : i32, i32
  }
  func.func @transform_5(%arg0: i32) -> (i32, i32) {
    %c0_i32 = arith.constant 0 : i32
    %c0_i32_0 = arith.constant 0 : i32
    %c0_i32_1 = arith.constant 0 : i32
    return %c0_i32, %c0_i32_0 : i32, i32
  }
}

module attributes {stable_mosaic.version = 11 : i64} {
  func.func @_chunk_matmul_prelu_kernel(%arg0: i32, %arg1: memref<16x512xbf16, #tpu.memory_space<vmem>>, %arg2: memref<16x512xbf16, #tpu.memory_space<vmem>>, %arg3: memref<16x512xbf16, #tpu.memory_space<vmem>>, %arg4: memref<16x512xbf16, #tpu.memory_space<vmem>>, %arg5: memref<16x64xbf16, #tpu.memory_space<vmem>>, %arg6: memref<16x1xf32, #tpu.memory_space<vmem>>, %arg7: memref<1x1xf32, #tpu.memory_space<smem>>, %arg8: memref<16x512xbf16, #tpu.memory_space<vmem>>) attributes {dimension_semantics = [#tpu.dimension_semantics<arbitrary>], iteration_bounds = array<i64: 1>, scalar_prefetch = 0 : i64, scratch_operands = 0 : i64, tpu.core_type = #tpu.core_type<tc>, window_params = [{pipeline_mode = #tpu.pipeline_mode<synchronous>, transform_indices = @transform_0, window_bounds = array<i64: 16, 512>}, {pipeline_mode = #tpu.pipeline_mode<synchronous>, transform_indices = @transform_1, window_bounds = array<i64: 16, 512>}, {pipeline_mode = #tpu.pipeline_mode<synchronous>, transform_indices = @transform_2, window_bounds = array<i64: 16, 512>}, {pipeline_mode = #tpu.pipeline_mode<synchronous>, transform_indices = @transform_3, window_bounds = array<i64: 16, 512>}, {pipeline_mode = #tpu.pipeline_mode<synchronous>, transform_indices = @transform_4, window_bounds = array<i64: 16, 64>}, {pipeline_mode = #tpu.pipeline_mode<synchronous>, transform_indices = @transform_5, window_bounds = array<i64: 16, 1>}, {transform_indices = @transform_6, window_bounds = array<i64: 1, 1>}, {pipeline_mode = #tpu.pipeline_mode<synchronous>, transform_indices = @transform_7, window_bounds = array<i64: 16, 512>}]} {
    %cst = arith.constant 0.000000e+00 : f32
    %0 = vector.broadcast %cst : f32 to vector<16x512xf32>
    %c0 = arith.constant 0 : index
    %c0_0 = arith.constant 0 : index
    %1 = vector.load %arg5[%c0, %c0_0] : memref<16x64xbf16, #tpu.memory_space<vmem>>, vector<16x16xbf16>
    %c0_1 = arith.constant 0 : index
    %c0_2 = arith.constant 0 : index
    %2 = vector.load %arg1[%c0_1, %c0_2] : memref<16x512xbf16, #tpu.memory_space<vmem>>, vector<16x512xbf16>
    %cst_3 = arith.constant dense<0.000000e+00> : vector<16x512xf32>
    %3 = tpu.matmul %1, %2, %cst_3 {dimension_numbers = #tpu.dot_dimension_numbers<[1], [0], [0], [1], [0, 0, 1, 1], [], []>} : vector<16x16xbf16>, vector<16x512xbf16>, vector<16x512xf32> -> vector<16x512xf32>
    %4 = arith.addf %0, %3 : vector<16x512xf32>
    %c0_4 = arith.constant 0 : index
    %c16 = arith.constant 16 : index
    %5 = vector.load %arg5[%c0_4, %c16] : memref<16x64xbf16, #tpu.memory_space<vmem>>, vector<16x16xbf16>
    %c0_5 = arith.constant 0 : index
    %c0_6 = arith.constant 0 : index
    %6 = vector.load %arg2[%c0_5, %c0_6] : memref<16x512xbf16, #tpu.memory_space<vmem>>, vector<16x512xbf16>
    %cst_7 = arith.constant dense<0.000000e+00> : vector<16x512xf32>
    %7 = tpu.matmul %5, %6, %cst_7 {dimension_numbers = #tpu.dot_dimension_numbers<[1], [0], [0], [1], [0, 0, 1, 1], [], []>} : vector<16x16xbf16>, vector<16x512xbf16>, vector<16x512xf32> -> vector<16x512xf32>
    %8 = arith.addf %4, %7 : vector<16x512xf32>
    %c0_8 = arith.constant 0 : index
    %c32 = arith.constant 32 : index
    %9 = vector.load %arg5[%c0_8, %c32] : memref<16x64xbf16, #tpu.memory_space<vmem>>, vector<16x16xbf16>
    %c0_9 = arith.constant 0 : index
    %c0_10 = arith.constant 0 : index
    %10 = vector.load %arg3[%c0_9, %c0_10] : memref<16x512xbf16, #tpu.memory_space<vmem>>, vector<16x512xbf16>
    %cst_11 = arith.constant dense<0.000000e+00> : vector<16x512xf32>
    %11 = tpu.matmul %9, %10, %cst_11 {dimension_numbers = #tpu.dot_dimension_numbers<[1], [0], [0], [1], [0, 0, 1, 1], [], []>} : vector<16x16xbf16>, vector<16x512xbf16>, vector<16x512xf32> -> vector<16x512xf32>
    %12 = arith.addf %8, %11 : vector<16x512xf32>
    %c0_12 = arith.constant 0 : index
    %c48 = arith.constant 48 : index
    %13 = vector.load %arg5[%c0_12, %c48] : memref<16x64xbf16, #tpu.memory_space<vmem>>, vector<16x16xbf16>
    %c0_13 = arith.constant 0 : index
    %c0_14 = arith.constant 0 : index
    %14 = vector.load %arg4[%c0_13, %c0_14] : memref<16x512xbf16, #tpu.memory_space<vmem>>, vector<16x512xbf16>
    %cst_15 = arith.constant dense<0.000000e+00> : vector<16x512xf32>
    %15 = tpu.matmul %13, %14, %cst_15 {dimension_numbers = #tpu.dot_dimension_numbers<[1], [0], [0], [1], [0, 0, 1, 1], [], []>} : vector<16x16xbf16>, vector<16x512xbf16>, vector<16x512xf32> -> vector<16x512xf32>
    %16 = arith.addf %12, %15 : vector<16x512xf32>
    %c0_16 = arith.constant 0 : index
    %c0_17 = arith.constant 0 : index
    %17 = vector.load %arg6[%c0_16, %c0_17] : memref<16x1xf32, #tpu.memory_space<vmem>>, vector<16x1xf32>
    %18 = vector.broadcast %17 : vector<16x1xf32> to vector<16x512xf32>
    %19 = arith.addf %16, %18 : vector<16x512xf32>
    %c0_18 = arith.constant 0 : index
    %c0_19 = arith.constant 0 : index
    %20 = memref.load %arg7[%c0_18, %c0_19] : memref<1x1xf32, #tpu.memory_space<smem>>
    %cst_20 = arith.constant 0.000000e+00 : f32
    %21 = vector.broadcast %cst_20 : f32 to vector<16x512xf32>
    %22 = arith.cmpf oge, %19, %21 : vector<16x512xf32>
    %23 = vector.broadcast %20 : f32 to vector<16x512xf32>
    %24 = arith.mulf %23, %19 : vector<16x512xf32>
    %25 = arith.select %22, %19, %24 : vector<16x512xi1>, vector<16x512xf32>
    %26 = arith.truncf %25 : vector<16x512xf32> to vector<16x512xbf16>
    %c0_21 = arith.constant 0 : index
    %c0_22 = arith.constant 0 : index
    %27 = vector.load %arg8[%c0_21, %c0_22] : memref<16x512xbf16, #tpu.memory_space<vmem>>, vector<16x512xbf16>
    tpu.vector_store %arg8[%c0_21, %c0_22], %26 {strides = array<i32>} : memref<16x512xbf16, #tpu.memory_space<vmem>>, vector<16x512xbf16>,
    return
  }
  func.func @transform_0(%arg0: i32) -> (i32, i32) {
    %c0_i32 = arith.constant 0 : i32
    %c0_i32_0 = arith.constant 0 : i32
    %c0_i32_1 = arith.constant 0 : i32
    return %c0_i32, %c0_i32_0 : i32, i32
  }
  func.func @transform_1(%arg0: i32) -> (i32, i32) {
    %c0_i32 = arith.constant 0 : i32
    %c0_i32_0 = arith.constant 0 : i32
    %c0_i32_1 = arith.constant 0 : i32
    return %c0_i32, %c0_i32_0 : i32, i32
  }
  func.func @transform_2(%arg0: i32) -> (i32, i32) {
    %c0_i32 = arith.constant 0 : i32
    %c0_i32_0 = arith.constant 0 : i32
    %c0_i32_1 = arith.constant 0 : i32
    return %c0_i32, %c0_i32_0 : i32, i32
  }
  func.func @transform_3(%arg0: i32) -> (i32, i32) {
    %c0_i32 = arith.constant 0 : i32
    %c0_i32_0 = arith.constant 0 : i32
    %c0_i32_1 = arith.constant 0 : i32
    return %c0_i32, %c0_i32_0 : i32, i32
  }
  func.func @transform_4(%arg0: i32) -> (i32, i32) {
    %c0_i32 = arith.constant 0 : i32
    %c0_i32_0 = arith.constant 0 : i32
    %c0_i32_1 = arith.constant 0 : i32
    return %c0_i32, %c0_i32_0 : i32, i32
  }
  func.func @transform_5(%arg0: i32) -> (i32, i32) {
    %c0_i32 = arith.constant 0 : i32
    %c0_i32_0 = arith.constant 0 : i32
    %c0_i32_1 = arith.constant 0 : i32
    return %c0_i32, %c0_i32_0 : i32, i32
  }
  func.func @transform_6(%arg0: i32) -> (i32, i32) {
    %c0_i32 = arith.constant 0 : i32
    %c0_i32_0 = arith.constant 0 : i32
    %c0_i32_1 = arith.constant 0 : i32
    return %c0_i32, %c0_i32_0 : i32, i32
  }
  func.func @transform_7(%arg0: i32) -> (i32, i32) {
    %c0_i32 = arith.constant 0 : i32
    %c0_i32_0 = arith.constant 0 : i32
    %c0_i32_1 = arith.constant 0 : i32
    return %c0_i32, %c0_i32_0 : i32, i32
  }
}

module attributes {stable_mosaic.version = 11 : i64} {
  func.func @_chunk_matmul_prelu_kernel(%arg0: i32, %arg1: memref<16x128xbf16, #tpu.memory_space<vmem>>, %arg2: memref<16x128xbf16, #tpu.memory_space<vmem>>, %arg3: memref<16x128xbf16, #tpu.memory_space<vmem>>, %arg4: memref<16x128xbf16, #tpu.memory_space<vmem>>, %arg5: memref<16x64xbf16, #tpu.memory_space<vmem>>, %arg6: memref<16x1xf32, #tpu.memory_space<vmem>>, %arg7: memref<1x1xf32, #tpu.memory_space<smem>>, %arg8: memref<16x128xbf16, #tpu.memory_space<vmem>>) attributes {dimension_semantics = [#tpu.dimension_semantics<arbitrary>], iteration_bounds = array<i64: 1>, scalar_prefetch = 0 : i64, scratch_operands = 0 : i64, tpu.core_type = #tpu.core_type<tc>, window_params = [{pipeline_mode = #tpu.pipeline_mode<synchronous>, transform_indices = @transform_0, window_bounds = array<i64: 16, 128>}, {pipeline_mode = #tpu.pipeline_mode<synchronous>, transform_indices = @transform_1, window_bounds = array<i64: 16, 128>}, {pipeline_mode = #tpu.pipeline_mode<synchronous>, transform_indices = @transform_2, window_bounds = array<i64: 16, 128>}, {pipeline_mode = #tpu.pipeline_mode<synchronous>, transform_indices = @transform_3, window_bounds = array<i64: 16, 128>}, {pipeline_mode = #tpu.pipeline_mode<synchronous>, transform_indices = @transform_4, window_bounds = array<i64: 16, 64>}, {pipeline_mode = #tpu.pipeline_mode<synchronous>, transform_indices = @transform_5, window_bounds = array<i64: 16, 1>}, {transform_indices = @transform_6, window_bounds = array<i64: 1, 1>}, {pipeline_mode = #tpu.pipeline_mode<synchronous>, transform_indices = @transform_7, window_bounds = array<i64: 16, 128>}]} {
    %cst = arith.constant 0.000000e+00 : f32
    %0 = vector.broadcast %cst : f32 to vector<16x128xf32>
    %c0 = arith.constant 0 : index
    %c0_0 = arith.constant 0 : index
    %1 = vector.load %arg5[%c0, %c0_0] : memref<16x64xbf16, #tpu.memory_space<vmem>>, vector<16x16xbf16>
    %c0_1 = arith.constant 0 : index
    %c0_2 = arith.constant 0 : index
    %2 = vector.load %arg1[%c0_1, %c0_2] : memref<16x128xbf16, #tpu.memory_space<vmem>>, vector<16x128xbf16>
    %cst_3 = arith.constant dense<0.000000e+00> : vector<16x128xf32>
    %3 = tpu.matmul %1, %2, %cst_3 {dimension_numbers = #tpu.dot_dimension_numbers<[1], [0], [0], [1], [0, 0, 1, 1], [], []>} : vector<16x16xbf16>, vector<16x128xbf16>, vector<16x128xf32> -> vector<16x128xf32>
    %4 = arith.addf %0, %3 : vector<16x128xf32>
    %c0_4 = arith.constant 0 : index
    %c16 = arith.constant 16 : index
    %5 = vector.load %arg5[%c0_4, %c16] : memref<16x64xbf16, #tpu.memory_space<vmem>>, vector<16x16xbf16>
    %c0_5 = arith.constant 0 : index
    %c0_6 = arith.constant 0 : index
    %6 = vector.load %arg2[%c0_5, %c0_6] : memref<16x128xbf16, #tpu.memory_space<vmem>>, vector<16x128xbf16>
    %cst_7 = arith.constant dense<0.000000e+00> : vector<16x128xf32>
    %7 = tpu.matmul %5, %6, %cst_7 {dimension_numbers = #tpu.dot_dimension_numbers<[1], [0], [0], [1], [0, 0, 1, 1], [], []>} : vector<16x16xbf16>, vector<16x128xbf16>, vector<16x128xf32> -> vector<16x128xf32>
    %8 = arith.addf %4, %7 : vector<16x128xf32>
    %c0_8 = arith.constant 0 : index
    %c32 = arith.constant 32 : index
    %9 = vector.load %arg5[%c0_8, %c32] : memref<16x64xbf16, #tpu.memory_space<vmem>>, vector<16x16xbf16>
    %c0_9 = arith.constant 0 : index
    %c0_10 = arith.constant 0 : index
    %10 = vector.load %arg3[%c0_9, %c0_10] : memref<16x128xbf16, #tpu.memory_space<vmem>>, vector<16x128xbf16>
    %cst_11 = arith.constant dense<0.000000e+00> : vector<16x128xf32>
    %11 = tpu.matmul %9, %10, %cst_11 {dimension_numbers = #tpu.dot_dimension_numbers<[1], [0], [0], [1], [0, 0, 1, 1], [], []>} : vector<16x16xbf16>, vector<16x128xbf16>, vector<16x128xf32> -> vector<16x128xf32>
    %12 = arith.addf %8, %11 : vector<16x128xf32>
    %c0_12 = arith.constant 0 : index
    %c48 = arith.constant 48 : index
    %13 = vector.load %arg5[%c0_12, %c48] : memref<16x64xbf16, #tpu.memory_space<vmem>>, vector<16x16xbf16>
    %c0_13 = arith.constant 0 : index
    %c0_14 = arith.constant 0 : index
    %14 = vector.load %arg4[%c0_13, %c0_14] : memref<16x128xbf16, #tpu.memory_space<vmem>>, vector<16x128xbf16>
    %cst_15 = arith.constant dense<0.000000e+00> : vector<16x128xf32>
    %15 = tpu.matmul %13, %14, %cst_15 {dimension_numbers = #tpu.dot_dimension_numbers<[1], [0], [0], [1], [0, 0, 1, 1], [], []>} : vector<16x16xbf16>, vector<16x128xbf16>, vector<16x128xf32> -> vector<16x128xf32>
    %16 = arith.addf %12, %15 : vector<16x128xf32>
    %c0_16 = arith.constant 0 : index
    %c0_17 = arith.constant 0 : index
    %17 = vector.load %arg6[%c0_16, %c0_17] : memref<16x1xf32, #tpu.memory_space<vmem>>, vector<16x1xf32>
    %18 = vector.broadcast %17 : vector<16x1xf32> to vector<16x128xf32>
    %19 = arith.addf %16, %18 : vector<16x128xf32>
    %c0_18 = arith.constant 0 : index
    %c0_19 = arith.constant 0 : index
    %20 = memref.load %arg7[%c0_18, %c0_19] : memref<1x1xf32, #tpu.memory_space<smem>>
    %cst_20 = arith.constant 0.000000e+00 : f32
    %21 = vector.broadcast %cst_20 : f32 to vector<16x128xf32>
    %22 = arith.cmpf oge, %19, %21 : vector<16x128xf32>
    %23 = vector.broadcast %20 : f32 to vector<16x128xf32>
    %24 = arith.mulf %23, %19 : vector<16x128xf32>
    %25 = arith.select %22, %19, %24 : vector<16x128xi1>, vector<16x128xf32>
    %26 = arith.truncf %25 : vector<16x128xf32> to vector<16x128xbf16>
    %c0_21 = arith.constant 0 : index
    %c0_22 = arith.constant 0 : index
    %27 = vector.load %arg8[%c0_21, %c0_22] : memref<16x128xbf16, #tpu.memory_space<vmem>>, vector<16x128xbf16>
    tpu.vector_store %arg8[%c0_21, %c0_22], %26 {strides = array<i32>} : memref<16x128xbf16, #tpu.memory_space<vmem>>, vector<16x128xbf16>,
    return
  }
  func.func @transform_0(%arg0: i32) -> (i32, i32) {
    %c0_i32 = arith.constant 0 : i32
    %c0_i32_0 = arith.constant 0 : i32
    %c0_i32_1 = arith.constant 0 : i32
    return %c0_i32, %c0_i32_0 : i32, i32
  }
  func.func @transform_1(%arg0: i32) -> (i32, i32) {
    %c0_i32 = arith.constant 0 : i32
    %c0_i32_0 = arith.constant 0 : i32
    %c0_i32_1 = arith.constant 0 : i32
    return %c0_i32, %c0_i32_0 : i32, i32
  }
  func.func @transform_2(%arg0: i32) -> (i32, i32) {
    %c0_i32 = arith.constant 0 : i32
    %c0_i32_0 = arith.constant 0 : i32
    %c0_i32_1 = arith.constant 0 : i32
    return %c0_i32, %c0_i32_0 : i32, i32
  }
  func.func @transform_3(%arg0: i32) -> (i32, i32) {
    %c0_i32 = arith.constant 0 : i32
    %c0_i32_0 = arith.constant 0 : i32
    %c0_i32_1 = arith.constant 0 : i32
    return %c0_i32, %c0_i32_0 : i32, i32
  }
  func.func @transform_4(%arg0: i32) -> (i32, i32) {
    %c0_i32 = arith.constant 0 : i32
    %c0_i32_0 = arith.constant 0 : i32
    %c0_i32_1 = arith.constant 0 : i32
    return %c0_i32, %c0_i32_0 : i32, i32
  }
  func.func @transform_5(%arg0: i32) -> (i32, i32) {
    %c0_i32 = arith.constant 0 : i32
    %c0_i32_0 = arith.constant 0 : i32
    %c0_i32_1 = arith.constant 0 : i32
    return %c0_i32, %c0_i32_0 : i32, i32
  }
  func.func @transform_6(%arg0: i32) -> (i32, i32) {
    %c0_i32 = arith.constant 0 : i32
    %c0_i32_0 = arith.constant 0 : i32
    %c0_i32_1 = arith.constant 0 : i32
    return %c0_i32, %c0_i32_0 : i32, i32
  }
  func.func @transform_7(%arg0: i32) -> (i32, i32) {
    %c0_i32 = arith.constant 0 : i32
    %c0_i32_0 = arith.constant 0 : i32
    %c0_i32_1 = arith.constant 0 : i32
    return %c0_i32, %c0_i32_0 : i32, i32
  }
}

module attributes {stable_mosaic.version = 11 : i64} {
  func.func @_chunk_matmul_prelu_kernel(%arg0: i32, %arg1: memref<16x512xbf16, #tpu.memory_space<vmem>>, %arg2: memref<16x512xbf16, #tpu.memory_space<vmem>>, %arg3: memref<16x512xbf16, #tpu.memory_space<vmem>>, %arg4: memref<16x512xbf16, #tpu.memory_space<vmem>>, %arg5: memref<16x512xbf16, #tpu.memory_space<vmem>>, %arg6: memref<16x80xbf16, #tpu.memory_space<vmem>>, %arg7: memref<16x1xf32, #tpu.memory_space<vmem>>, %arg8: memref<1x1xf32, #tpu.memory_space<smem>>, %arg9: memref<16x512xbf16, #tpu.memory_space<vmem>>) attributes {dimension_semantics = [#tpu.dimension_semantics<arbitrary>], iteration_bounds = array<i64: 1>, scalar_prefetch = 0 : i64, scratch_operands = 0 : i64, tpu.core_type = #tpu.core_type<tc>, window_params = [{pipeline_mode = #tpu.pipeline_mode<synchronous>, transform_indices = @transform_0, window_bounds = array<i64: 16, 512>}, {pipeline_mode = #tpu.pipeline_mode<synchronous>, transform_indices = @transform_1, window_bounds = array<i64: 16, 512>}, {pipeline_mode = #tpu.pipeline_mode<synchronous>, transform_indices = @transform_2, window_bounds = array<i64: 16, 512>}, {pipeline_mode = #tpu.pipeline_mode<synchronous>, transform_indices = @transform_3, window_bounds = array<i64: 16, 512>}, {pipeline_mode = #tpu.pipeline_mode<synchronous>, transform_indices = @transform_4, window_bounds = array<i64: 16, 512>}, {pipeline_mode = #tpu.pipeline_mode<synchronous>, transform_indices = @transform_5, window_bounds = array<i64: 16, 80>}, {pipeline_mode = #tpu.pipeline_mode<synchronous>, transform_indices = @transform_6, window_bounds = array<i64: 16, 1>}, {transform_indices = @transform_7, window_bounds = array<i64: 1, 1>}, {pipeline_mode = #tpu.pipeline_mode<synchronous>, transform_indices = @transform_8, window_bounds = array<i64: 16, 512>}]} {
    %cst = arith.constant 0.000000e+00 : f32
    %0 = vector.broadcast %cst : f32 to vector<16x512xf32>
    %c0 = arith.constant 0 : index
    %c0_0 = arith.constant 0 : index
    %1 = vector.load %arg6[%c0, %c0_0] : memref<16x80xbf16, #tpu.memory_space<vmem>>, vector<16x16xbf16>
    %c0_1 = arith.constant 0 : index
    %c0_2 = arith.constant 0 : index
    %2 = vector.load %arg1[%c0_1, %c0_2] : memref<16x512xbf16, #tpu.memory_space<vmem>>, vector<16x512xbf16>
    %cst_3 = arith.constant dense<0.000000e+00> : vector<16x512xf32>
    %3 = tpu.matmul %1, %2, %cst_3 {dimension_numbers = #tpu.dot_dimension_numbers<[1], [0], [0], [1], [0, 0, 1, 1], [], []>} : vector<16x16xbf16>, vector<16x512xbf16>, vector<16x512xf32> -> vector<16x512xf32>
    %4 = arith.addf %0, %3 : vector<16x512xf32>
    %c0_4 = arith.constant 0 : index
    %c16 = arith.constant 16 : index
    %5 = vector.load %arg6[%c0_4, %c16] : memref<16x80xbf16, #tpu.memory_space<vmem>>, vector<16x16xbf16>
    %c0_5 = arith.constant 0 : index
    %c0_6 = arith.constant 0 : index
    %6 = vector.load %arg2[%c0_5, %c0_6] : memref<16x512xbf16, #tpu.memory_space<vmem>>, vector<16x512xbf16>
    %cst_7 = arith.constant dense<0.000000e+00> : vector<16x512xf32>
    %7 = tpu.matmul %5, %6, %cst_7 {dimension_numbers = #tpu.dot_dimension_numbers<[1], [0], [0], [1], [0, 0, 1, 1], [], []>} : vector<16x16xbf16>, vector<16x512xbf16>, vector<16x512xf32> -> vector<16x512xf32>
    %8 = arith.addf %4, %7 : vector<16x512xf32>
    %c0_8 = arith.constant 0 : index
    %c32 = arith.constant 32 : index
    %9 = vector.load %arg6[%c0_8, %c32] : memref<16x80xbf16, #tpu.memory_space<vmem>>, vector<16x16xbf16>
    %c0_9 = arith.constant 0 : index
    %c0_10 = arith.constant 0 : index
    %10 = vector.load %arg3[%c0_9, %c0_10] : memref<16x512xbf16, #tpu.memory_space<vmem>>, vector<16x512xbf16>
    %cst_11 = arith.constant dense<0.000000e+00> : vector<16x512xf32>
    %11 = tpu.matmul %9, %10, %cst_11 {dimension_numbers = #tpu.dot_dimension_numbers<[1], [0], [0], [1], [0, 0, 1, 1], [], []>} : vector<16x16xbf16>, vector<16x512xbf16>, vector<16x512xf32> -> vector<16x512xf32>
    %12 = arith.addf %8, %11 : vector<16x512xf32>
    %c0_12 = arith.constant 0 : index
    %c48 = arith.constant 48 : index
    %13 = vector.load %arg6[%c0_12, %c48] : memref<16x80xbf16, #tpu.memory_space<vmem>>, vector<16x16xbf16>
    %c0_13 = arith.constant 0 : index
    %c0_14 = arith.constant 0 : index
    %14 = vector.load %arg4[%c0_13, %c0_14] : memref<16x512xbf16, #tpu.memory_space<vmem>>, vector<16x512xbf16>
    %cst_15 = arith.constant dense<0.000000e+00> : vector<16x512xf32>
    %15 = tpu.matmul %13, %14, %cst_15 {dimension_numbers = #tpu.dot_dimension_numbers<[1], [0], [0], [1], [0, 0, 1, 1], [], []>} : vector<16x16xbf16>, vector<16x512xbf16>, vector<16x512xf32> -> vector<16x512xf32>
    %16 = arith.addf %12, %15 : vector<16x512xf32>
    %c0_16 = arith.constant 0 : index
    %c64 = arith.constant 64 : index
    %17 = vector.load %arg6[%c0_16, %c64] : memref<16x80xbf16, #tpu.memory_space<vmem>>, vector<16x16xbf16>
    %c0_17 = arith.constant 0 : index
    %c0_18 = arith.constant 0 : index
    %18 = vector.load %arg5[%c0_17, %c0_18] : memref<16x512xbf16, #tpu.memory_space<vmem>>, vector<16x512xbf16>
    %cst_19 = arith.constant dense<0.000000e+00> : vector<16x512xf32>
    %19 = tpu.matmul %17, %18, %cst_19 {dimension_numbers = #tpu.dot_dimension_numbers<[1], [0], [0], [1], [0, 0, 1, 1], [], []>} : vector<16x16xbf16>, vector<16x512xbf16>, vector<16x512xf32> -> vector<16x512xf32>
    %20 = arith.addf %16, %19 : vector<16x512xf32>
    %c0_20 = arith.constant 0 : index
    %c0_21 = arith.constant 0 : index
    %21 = vector.load %arg7[%c0_20, %c0_21] : memref<16x1xf32, #tpu.memory_space<vmem>>, vector<16x1xf32>
    %22 = vector.broadcast %21 : vector<16x1xf32> to vector<16x512xf32>
    %23 = arith.addf %20, %22 : vector<16x512xf32>
    %c0_22 = arith.constant 0 : index
    %c0_23 = arith.constant 0 : index
    %24 = memref.load %arg8[%c0_22, %c0_23] : memref<1x1xf32, #tpu.memory_space<smem>>
    %cst_24 = arith.constant 0.000000e+00 : f32
    %25 = vector.broadcast %cst_24 : f32 to vector<16x512xf32>
    %26 = arith.cmpf oge, %23, %25 : vector<16x512xf32>
    %27 = vector.broadcast %24 : f32 to vector<16x512xf32>
    %28 = arith.mulf %27, %23 : vector<16x512xf32>
    %29 = arith.select %26, %23, %28 : vector<16x512xi1>, vector<16x512xf32>
    %30 = arith.truncf %29 : vector<16x512xf32> to vector<16x512xbf16>
    %c0_25 = arith.constant 0 : index
    %c0_26 = arith.constant 0 : index
    %31 = vector.load %arg9[%c0_25, %c0_26] : memref<16x512xbf16, #tpu.memory_space<vmem>>, vector<16x512xbf16>
    tpu.vector_store %arg9[%c0_25, %c0_26], %30 {strides = array<i32>} : memref<16x512xbf16, #tpu.memory_space<vmem>>, vector<16x512xbf16>,
    return
  }
  func.func @transform_0(%arg0: i32) -> (i32, i32) {
    %c0_i32 = arith.constant 0 : i32
    %c0_i32_0 = arith.constant 0 : i32
    %c0_i32_1 = arith.constant 0 : i32
    return %c0_i32, %c0_i32_0 : i32, i32
  }
  func.func @transform_1(%arg0: i32) -> (i32, i32) {
    %c0_i32 = arith.constant 0 : i32
    %c0_i32_0 = arith.constant 0 : i32
    %c0_i32_1 = arith.constant 0 : i32
    return %c0_i32, %c0_i32_0 : i32, i32
  }
  func.func @transform_2(%arg0: i32) -> (i32, i32) {
    %c0_i32 = arith.constant 0 : i32
    %c0_i32_0 = arith.constant 0 : i32
    %c0_i32_1 = arith.constant 0 : i32
    return %c0_i32, %c0_i32_0 : i32, i32
  }
  func.func @transform_3(%arg0: i32) -> (i32, i32) {
    %c0_i32 = arith.constant 0 : i32
    %c0_i32_0 = arith.constant 0 : i32
    %c0_i32_1 = arith.constant 0 : i32
    return %c0_i32, %c0_i32_0 : i32, i32
  }
  func.func @transform_4(%arg0: i32) -> (i32, i32) {
    %c0_i32 = arith.constant 0 : i32
    %c0_i32_0 = arith.constant 0 : i32
    %c0_i32_1 = arith.constant 0 : i32
    return %c0_i32, %c0_i32_0 : i32, i32
  }
  func.func @transform_5(%arg0: i32) -> (i32, i32) {
    %c0_i32 = arith.constant 0 : i32
    %c0_i32_0 = arith.constant 0 : i32
    %c0_i32_1 = arith.constant 0 : i32
    return %c0_i32, %c0_i32_0 : i32, i32
  }
  func.func @transform_6(%arg0: i32) -> (i32, i32) {
    %c0_i32 = arith.constant 0 : i32
    %c0_i32_0 = arith.constant 0 : i32
    %c0_i32_1 = arith.constant 0 : i32
    return %c0_i32, %c0_i32_0 : i32, i32
  }
  func.func @transform_7(%arg0: i32) -> (i32, i32) {
    %c0_i32 = arith.constant 0 : i32
    %c0_i32_0 = arith.constant 0 : i32
    %c0_i32_1 = arith.constant 0 : i32
    return %c0_i32, %c0_i32_0 : i32, i32
  }
  func.func @transform_8(%arg0: i32) -> (i32, i32) {
    %c0_i32 = arith.constant 0 : i32
    %c0_i32_0 = arith.constant 0 : i32
    %c0_i32_1 = arith.constant 0 : i32
    return %c0_i32, %c0_i32_0 : i32, i32
  }
}

module attributes {stable_mosaic.version = 11 : i64} {
  func.func @_chunk_matmul_prelu_kernel(%arg0: i32, %arg1: memref<16x128xbf16, #tpu.memory_space<vmem>>, %arg2: memref<16x128xbf16, #tpu.memory_space<vmem>>, %arg3: memref<16x128xbf16, #tpu.memory_space<vmem>>, %arg4: memref<16x128xbf16, #tpu.memory_space<vmem>>, %arg5: memref<16x128xbf16, #tpu.memory_space<vmem>>, %arg6: memref<16x80xbf16, #tpu.memory_space<vmem>>, %arg7: memref<16x1xf32, #tpu.memory_space<vmem>>, %arg8: memref<1x1xf32, #tpu.memory_space<smem>>, %arg9: memref<16x128xbf16, #tpu.memory_space<vmem>>) attributes {dimension_semantics = [#tpu.dimension_semantics<arbitrary>], iteration_bounds = array<i64: 1>, scalar_prefetch = 0 : i64, scratch_operands = 0 : i64, tpu.core_type = #tpu.core_type<tc>, window_params = [{pipeline_mode = #tpu.pipeline_mode<synchronous>, transform_indices = @transform_0, window_bounds = array<i64: 16, 128>}, {pipeline_mode = #tpu.pipeline_mode<synchronous>, transform_indices = @transform_1, window_bounds = array<i64: 16, 128>}, {pipeline_mode = #tpu.pipeline_mode<synchronous>, transform_indices = @transform_2, window_bounds = array<i64: 16, 128>}, {pipeline_mode = #tpu.pipeline_mode<synchronous>, transform_indices = @transform_3, window_bounds = array<i64: 16, 128>}, {pipeline_mode = #tpu.pipeline_mode<synchronous>, transform_indices = @transform_4, window_bounds = array<i64: 16, 128>}, {pipeline_mode = #tpu.pipeline_mode<synchronous>, transform_indices = @transform_5, window_bounds = array<i64: 16, 80>}, {pipeline_mode = #tpu.pipeline_mode<synchronous>, transform_indices = @transform_6, window_bounds = array<i64: 16, 1>}, {transform_indices = @transform_7, window_bounds = array<i64: 1, 1>}, {pipeline_mode = #tpu.pipeline_mode<synchronous>, transform_indices = @transform_8, window_bounds = array<i64: 16, 128>}]} {
    %cst = arith.constant 0.000000e+00 : f32
    %0 = vector.broadcast %cst : f32 to vector<16x128xf32>
    %c0 = arith.constant 0 : index
    %c0_0 = arith.constant 0 : index
    %1 = vector.load %arg6[%c0, %c0_0] : memref<16x80xbf16, #tpu.memory_space<vmem>>, vector<16x16xbf16>
    %c0_1 = arith.constant 0 : index
    %c0_2 = arith.constant 0 : index
    %2 = vector.load %arg1[%c0_1, %c0_2] : memref<16x128xbf16, #tpu.memory_space<vmem>>, vector<16x128xbf16>
    %cst_3 = arith.constant dense<0.000000e+00> : vector<16x128xf32>
    %3 = tpu.matmul %1, %2, %cst_3 {dimension_numbers = #tpu.dot_dimension_numbers<[1], [0], [0], [1], [0, 0, 1, 1], [], []>} : vector<16x16xbf16>, vector<16x128xbf16>, vector<16x128xf32> -> vector<16x128xf32>
    %4 = arith.addf %0, %3 : vector<16x128xf32>
    %c0_4 = arith.constant 0 : index
    %c16 = arith.constant 16 : index
    %5 = vector.load %arg6[%c0_4, %c16] : memref<16x80xbf16, #tpu.memory_space<vmem>>, vector<16x16xbf16>
    %c0_5 = arith.constant 0 : index
    %c0_6 = arith.constant 0 : index
    %6 = vector.load %arg2[%c0_5, %c0_6] : memref<16x128xbf16, #tpu.memory_space<vmem>>, vector<16x128xbf16>
    %cst_7 = arith.constant dense<0.000000e+00> : vector<16x128xf32>
    %7 = tpu.matmul %5, %6, %cst_7 {dimension_numbers = #tpu.dot_dimension_numbers<[1], [0], [0], [1], [0, 0, 1, 1], [], []>} : vector<16x16xbf16>, vector<16x128xbf16>, vector<16x128xf32> -> vector<16x128xf32>
    %8 = arith.addf %4, %7 : vector<16x128xf32>
    %c0_8 = arith.constant 0 : index
    %c32 = arith.constant 32 : index
    %9 = vector.load %arg6[%c0_8, %c32] : memref<16x80xbf16, #tpu.memory_space<vmem>>, vector<16x16xbf16>
    %c0_9 = arith.constant 0 : index
    %c0_10 = arith.constant 0 : index
    %10 = vector.load %arg3[%c0_9, %c0_10] : memref<16x128xbf16, #tpu.memory_space<vmem>>, vector<16x128xbf16>
    %cst_11 = arith.constant dense<0.000000e+00> : vector<16x128xf32>
    %11 = tpu.matmul %9, %10, %cst_11 {dimension_numbers = #tpu.dot_dimension_numbers<[1], [0], [0], [1], [0, 0, 1, 1], [], []>} : vector<16x16xbf16>, vector<16x128xbf16>, vector<16x128xf32> -> vector<16x128xf32>
    %12 = arith.addf %8, %11 : vector<16x128xf32>
    %c0_12 = arith.constant 0 : index
    %c48 = arith.constant 48 : index
    %13 = vector.load %arg6[%c0_12, %c48] : memref<16x80xbf16, #tpu.memory_space<vmem>>, vector<16x16xbf16>
    %c0_13 = arith.constant 0 : index
    %c0_14 = arith.constant 0 : index
    %14 = vector.load %arg4[%c0_13, %c0_14] : memref<16x128xbf16, #tpu.memory_space<vmem>>, vector<16x128xbf16>
    %cst_15 = arith.constant dense<0.000000e+00> : vector<16x128xf32>
    %15 = tpu.matmul %13, %14, %cst_15 {dimension_numbers = #tpu.dot_dimension_numbers<[1], [0], [0], [1], [0, 0, 1, 1], [], []>} : vector<16x16xbf16>, vector<16x128xbf16>, vector<16x128xf32> -> vector<16x128xf32>
    %16 = arith.addf %12, %15 : vector<16x128xf32>
    %c0_16 = arith.constant 0 : index
    %c64 = arith.constant 64 : index
    %17 = vector.load %arg6[%c0_16, %c64] : memref<16x80xbf16, #tpu.memory_space<vmem>>, vector<16x16xbf16>
    %c0_17 = arith.constant 0 : index
    %c0_18 = arith.constant 0 : index
    %18 = vector.load %arg5[%c0_17, %c0_18] : memref<16x128xbf16, #tpu.memory_space<vmem>>, vector<16x128xbf16>
    %cst_19 = arith.constant dense<0.000000e+00> : vector<16x128xf32>
    %19 = tpu.matmul %17, %18, %cst_19 {dimension_numbers = #tpu.dot_dimension_numbers<[1], [0], [0], [1], [0, 0, 1, 1], [], []>} : vector<16x16xbf16>, vector<16x128xbf16>, vector<16x128xf32> -> vector<16x128xf32>
    %20 = arith.addf %16, %19 : vector<16x128xf32>
    %c0_20 = arith.constant 0 : index
    %c0_21 = arith.constant 0 : index
    %21 = vector.load %arg7[%c0_20, %c0_21] : memref<16x1xf32, #tpu.memory_space<vmem>>, vector<16x1xf32>
    %22 = vector.broadcast %21 : vector<16x1xf32> to vector<16x128xf32>
    %23 = arith.addf %20, %22 : vector<16x128xf32>
    %c0_22 = arith.constant 0 : index
    %c0_23 = arith.constant 0 : index
    %24 = memref.load %arg8[%c0_22, %c0_23] : memref<1x1xf32, #tpu.memory_space<smem>>
    %cst_24 = arith.constant 0.000000e+00 : f32
    %25 = vector.broadcast %cst_24 : f32 to vector<16x128xf32>
    %26 = arith.cmpf oge, %23, %25 : vector<16x128xf32>
    %27 = vector.broadcast %24 : f32 to vector<16x128xf32>
    %28 = arith.mulf %27, %23 : vector<16x128xf32>
    %29 = arith.select %26, %23, %28 : vector<16x128xi1>, vector<16x128xf32>
    %30 = arith.truncf %29 : vector<16x128xf32> to vector<16x128xbf16>
    %c0_25 = arith.constant 0 : index
    %c0_26 = arith.constant 0 : index
    %31 = vector.load %arg9[%c0_25, %c0_26] : memref<16x128xbf16, #tpu.memory_space<vmem>>, vector<16x128xbf16>
    tpu.vector_store %arg9[%c0_25, %c0_26], %30 {strides = array<i32>} : memref<16x128xbf16, #tpu.memory_space<vmem>>, vector<16x128xbf16>,
    return
  }
  func.func @transform_0(%arg0: i32) -> (i32, i32) {
    %c0_i32 = arith.constant 0 : i32
    %c0_i32_0 = arith.constant 0 : i32
    %c0_i32_1 = arith.constant 0 : i32
    return %c0_i32, %c0_i32_0 : i32, i32
  }
  func.func @transform_1(%arg0: i32) -> (i32, i32) {
    %c0_i32 = arith.constant 0 : i32
    %c0_i32_0 = arith.constant 0 : i32
    %c0_i32_1 = arith.constant 0 : i32
    return %c0_i32, %c0_i32_0 : i32, i32
  }
  func.func @transform_2(%arg0: i32) -> (i32, i32) {
    %c0_i32 = arith.constant 0 : i32
    %c0_i32_0 = arith.constant 0 : i32
    %c0_i32_1 = arith.constant 0 : i32
    return %c0_i32, %c0_i32_0 : i32, i32
  }
  func.func @transform_3(%arg0: i32) -> (i32, i32) {
    %c0_i32 = arith.constant 0 : i32
    %c0_i32_0 = arith.constant 0 : i32
    %c0_i32_1 = arith.constant 0 : i32
    return %c0_i32, %c0_i32_0 : i32, i32
  }
  func.func @transform_4(%arg0: i32) -> (i32, i32) {
    %c0_i32 = arith.constant 0 : i32
    %c0_i32_0 = arith.constant 0 : i32
    %c0_i32_1 = arith.constant 0 : i32
    return %c0_i32, %c0_i32_0 : i32, i32
  }
  func.func @transform_5(%arg0: i32) -> (i32, i32) {
    %c0_i32 = arith.constant 0 : i32
    %c0_i32_0 = arith.constant 0 : i32
    %c0_i32_1 = arith.constant 0 : i32
    return %c0_i32, %c0_i32_0 : i32, i32
  }
  func.func @transform_6(%arg0: i32) -> (i32, i32) {
    %c0_i32 = arith.constant 0 : i32
    %c0_i32_0 = arith.constant 0 : i32
    %c0_i32_1 = arith.constant 0 : i32
    return %c0_i32, %c0_i32_0 : i32, i32
  }
  func.func @transform_7(%arg0: i32) -> (i32, i32) {
    %c0_i32 = arith.constant 0 : i32
    %c0_i32_0 = arith.constant 0 : i32
    %c0_i32_1 = arith.constant 0 : i32
    return %c0_i32, %c0_i32_0 : i32, i32
  }
  func.func @transform_8(%arg0: i32) -> (i32, i32) {
    %c0_i32 = arith.constant 0 : i32
    %c0_i32_0 = arith.constant 0 : i32
    %c0_i32_1 = arith.constant 0 : i32
    return %c0_i32, %c0_i32_0 : i32, i32
  }
}

module attributes {stable_mosaic.version = 11 : i64} {
  func.func @_tap_conv_linear_kernel(%arg0: i32, %arg1: memref<96x896xbf16, #tpu.memory_space<vmem>>, %arg2: memref<9x8x96xbf16, #tpu.memory_space<vmem>>, %arg3: memref<8x1xf32, #tpu.memory_space<vmem>>, %arg4: memref<8x768xbf16, #tpu.memory_space<vmem>>) attributes {dimension_semantics = [#tpu.dimension_semantics<arbitrary>], iteration_bounds = array<i64: 1>, scalar_prefetch = 0 : i64, scratch_operands = 0 : i64, tpu.core_type = #tpu.core_type<tc>, window_params = [{pipeline_mode = #tpu.pipeline_mode<synchronous>, transform_indices = @transform_0, window_bounds = array<i64: 96, 896>}, {pipeline_mode = #tpu.pipeline_mode<synchronous>, transform_indices = @transform_1, window_bounds = array<i64: 9, 8, 96>}, {pipeline_mode = #tpu.pipeline_mode<synchronous>, transform_indices = @transform_2, window_bounds = array<i64: 8, 1>}, {pipeline_mode = #tpu.pipeline_mode<synchronous>, transform_indices = @transform_3, window_bounds = array<i64: 8, 768>}]} {
    %cst = arith.constant 0.000000e+00 : f32
    %0 = vector.broadcast %cst : f32 to vector<8x768xf32>
    %c0 = arith.constant 0 : index
    %c0_0 = arith.constant 0 : index
    %c0_1 = arith.constant 0 : index
    %1 = vector.load %arg2[%c0, %c0_0, %c0_1] : memref<9x8x96xbf16, #tpu.memory_space<vmem>>, vector<1x8x96xbf16>
    %2 = vector.shape_cast %1 : vector<1x8x96xbf16> to vector<8x96xbf16>
    %c0_2 = arith.constant 0 : index
    %c0_3 = arith.constant 0 : index
    %3 = vector.load %arg1[%c0_2, %c0_3] : memref<96x896xbf16, #tpu.memory_space<vmem>>, vector<96x768xbf16>
    %cst_4 = arith.constant dense<0.000000e+00> : vector<8x768xf32>
    %4 = tpu.matmul %2, %3, %cst_4 {dimension_numbers = #tpu.dot_dimension_numbers<[1], [0], [0], [1], [0, 0, 1, 1], [], []>} : vector<8x96xbf16>, vector<96x768xbf16>, vector<8x768xf32> -> vector<8x768xf32>
    %5 = arith.addf %0, %4 : vector<8x768xf32>
    %c1 = arith.constant 1 : index
    %c0_5 = arith.constant 0 : index
    %c0_6 = arith.constant 0 : index
    %6 = vector.load %arg2[%c1, %c0_5, %c0_6] : memref<9x8x96xbf16, #tpu.memory_space<vmem>>, vector<1x8x96xbf16>
    %7 = vector.shape_cast %6 : vector<1x8x96xbf16> to vector<8x96xbf16>
    %c0_7 = arith.constant 0 : index
    %c1_8 = arith.constant 1 : index
    %8 = vector.load %arg1[%c0_7, %c1_8] : memref<96x896xbf16, #tpu.memory_space<vmem>>, vector<96x768xbf16>
    %cst_9 = arith.constant dense<0.000000e+00> : vector<8x768xf32>
    %9 = tpu.matmul %7, %8, %cst_9 {dimension_numbers = #tpu.dot_dimension_numbers<[1], [0], [0], [1], [0, 0, 1, 1], [], []>} : vector<8x96xbf16>, vector<96x768xbf16>, vector<8x768xf32> -> vector<8x768xf32>
    %10 = arith.addf %5, %9 : vector<8x768xf32>
    %c2 = arith.constant 2 : index
    %c0_10 = arith.constant 0 : index
    %c0_11 = arith.constant 0 : index
    %11 = vector.load %arg2[%c2, %c0_10, %c0_11] : memref<9x8x96xbf16, #tpu.memory_space<vmem>>, vector<1x8x96xbf16>
    %12 = vector.shape_cast %11 : vector<1x8x96xbf16> to vector<8x96xbf16>
    %c0_12 = arith.constant 0 : index
    %c2_13 = arith.constant 2 : index
    %13 = vector.load %arg1[%c0_12, %c2_13] : memref<96x896xbf16, #tpu.memory_space<vmem>>, vector<96x768xbf16>
    %cst_14 = arith.constant dense<0.000000e+00> : vector<8x768xf32>
    %14 = tpu.matmul %12, %13, %cst_14 {dimension_numbers = #tpu.dot_dimension_numbers<[1], [0], [0], [1], [0, 0, 1, 1], [], []>} : vector<8x96xbf16>, vector<96x768xbf16>, vector<8x768xf32> -> vector<8x768xf32>
    %15 = arith.addf %10, %14 : vector<8x768xf32>
    %c3 = arith.constant 3 : index
    %c0_15 = arith.constant 0 : index
    %c0_16 = arith.constant 0 : index
    %16 = vector.load %arg2[%c3, %c0_15, %c0_16] : memref<9x8x96xbf16, #tpu.memory_space<vmem>>, vector<1x8x96xbf16>
    %17 = vector.shape_cast %16 : vector<1x8x96xbf16> to vector<8x96xbf16>
    %c0_17 = arith.constant 0 : index
    %c18 = arith.constant 18 : index
    %18 = vector.load %arg1[%c0_17, %c18] : memref<96x896xbf16, #tpu.memory_space<vmem>>, vector<96x768xbf16>
    %cst_18 = arith.constant dense<0.000000e+00> : vector<8x768xf32>
    %19 = tpu.matmul %17, %18, %cst_18 {dimension_numbers = #tpu.dot_dimension_numbers<[1], [0], [0], [1], [0, 0, 1, 1], [], []>} : vector<8x96xbf16>, vector<96x768xbf16>, vector<8x768xf32> -> vector<8x768xf32>
    %20 = arith.addf %15, %19 : vector<8x768xf32>
    %c4 = arith.constant 4 : index
    %c0_19 = arith.constant 0 : index
    %c0_20 = arith.constant 0 : index
    %21 = vector.load %arg2[%c4, %c0_19, %c0_20] : memref<9x8x96xbf16, #tpu.memory_space<vmem>>, vector<1x8x96xbf16>
    %22 = vector.shape_cast %21 : vector<1x8x96xbf16> to vector<8x96xbf16>
    %c0_21 = arith.constant 0 : index
    %c19 = arith.constant 19 : index
    %23 = vector.load %arg1[%c0_21, %c19] : memref<96x896xbf16, #tpu.memory_space<vmem>>, vector<96x768xbf16>
    %cst_22 = arith.constant dense<0.000000e+00> : vector<8x768xf32>
    %24 = tpu.matmul %22, %23, %cst_22 {dimension_numbers = #tpu.dot_dimension_numbers<[1], [0], [0], [1], [0, 0, 1, 1], [], []>} : vector<8x96xbf16>, vector<96x768xbf16>, vector<8x768xf32> -> vector<8x768xf32>
    %25 = arith.addf %20, %24 : vector<8x768xf32>
    %c5 = arith.constant 5 : index
    %c0_23 = arith.constant 0 : index
    %c0_24 = arith.constant 0 : index
    %26 = vector.load %arg2[%c5, %c0_23, %c0_24] : memref<9x8x96xbf16, #tpu.memory_space<vmem>>, vector<1x8x96xbf16>
    %27 = vector.shape_cast %26 : vector<1x8x96xbf16> to vector<8x96xbf16>
    %c0_25 = arith.constant 0 : index
    %c20 = arith.constant 20 : index
    %28 = vector.load %arg1[%c0_25, %c20] : memref<96x896xbf16, #tpu.memory_space<vmem>>, vector<96x768xbf16>
    %cst_26 = arith.constant dense<0.000000e+00> : vector<8x768xf32>
    %29 = tpu.matmul %27, %28, %cst_26 {dimension_numbers = #tpu.dot_dimension_numbers<[1], [0], [0], [1], [0, 0, 1, 1], [], []>} : vector<8x96xbf16>, vector<96x768xbf16>, vector<8x768xf32> -> vector<8x768xf32>
    %30 = arith.addf %25, %29 : vector<8x768xf32>
    %c6 = arith.constant 6 : index
    %c0_27 = arith.constant 0 : index
    %c0_28 = arith.constant 0 : index
    %31 = vector.load %arg2[%c6, %c0_27, %c0_28] : memref<9x8x96xbf16, #tpu.memory_space<vmem>>, vector<1x8x96xbf16>
    %32 = vector.shape_cast %31 : vector<1x8x96xbf16> to vector<8x96xbf16>
    %c0_29 = arith.constant 0 : index
    %c36 = arith.constant 36 : index
    %33 = vector.load %arg1[%c0_29, %c36] : memref<96x896xbf16, #tpu.memory_space<vmem>>, vector<96x768xbf16>
    %cst_30 = arith.constant dense<0.000000e+00> : vector<8x768xf32>
    %34 = tpu.matmul %32, %33, %cst_30 {dimension_numbers = #tpu.dot_dimension_numbers<[1], [0], [0], [1], [0, 0, 1, 1], [], []>} : vector<8x96xbf16>, vector<96x768xbf16>, vector<8x768xf32> -> vector<8x768xf32>
    %35 = arith.addf %30, %34 : vector<8x768xf32>
    %c7 = arith.constant 7 : index
    %c0_31 = arith.constant 0 : index
    %c0_32 = arith.constant 0 : index
    %36 = vector.load %arg2[%c7, %c0_31, %c0_32] : memref<9x8x96xbf16, #tpu.memory_space<vmem>>, vector<1x8x96xbf16>
    %37 = vector.shape_cast %36 : vector<1x8x96xbf16> to vector<8x96xbf16>
    %c0_33 = arith.constant 0 : index
    %c37 = arith.constant 37 : index
    %38 = vector.load %arg1[%c0_33, %c37] : memref<96x896xbf16, #tpu.memory_space<vmem>>, vector<96x768xbf16>
    %cst_34 = arith.constant dense<0.000000e+00> : vector<8x768xf32>
    %39 = tpu.matmul %37, %38, %cst_34 {dimension_numbers = #tpu.dot_dimension_numbers<[1], [0], [0], [1], [0, 0, 1, 1], [], []>} : vector<8x96xbf16>, vector<96x768xbf16>, vector<8x768xf32> -> vector<8x768xf32>
    %40 = arith.addf %35, %39 : vector<8x768xf32>
    %c8 = arith.constant 8 : index
    %c0_35 = arith.constant 0 : index
    %c0_36 = arith.constant 0 : index
    %41 = vector.load %arg2[%c8, %c0_35, %c0_36] : memref<9x8x96xbf16, #tpu.memory_space<vmem>>, vector<1x8x96xbf16>
    %42 = vector.shape_cast %41 : vector<1x8x96xbf16> to vector<8x96xbf16>
    %c0_37 = arith.constant 0 : index
    %c38 = arith.constant 38 : index
    %43 = vector.load %arg1[%c0_37, %c38] : memref<96x896xbf16, #tpu.memory_space<vmem>>, vector<96x768xbf16>
    %cst_38 = arith.constant dense<0.000000e+00> : vector<8x768xf32>
    %44 = tpu.matmul %42, %43, %cst_38 {dimension_numbers = #tpu.dot_dimension_numbers<[1], [0], [0], [1], [0, 0, 1, 1], [], []>} : vector<8x96xbf16>, vector<96x768xbf16>, vector<8x768xf32> -> vector<8x768xf32>
    %45 = arith.addf %40, %44 : vector<8x768xf32>
    %c0_39 = arith.constant 0 : index
    %c0_40 = arith.constant 0 : index
    %46 = vector.load %arg3[%c0_39, %c0_40] : memref<8x1xf32, #tpu.memory_space<vmem>>, vector<8x1xf32>
    %47 = vector.broadcast %46 : vector<8x1xf32> to vector<8x768xf32>
    %48 = arith.addf %45, %47 : vector<8x768xf32>
    %49 = arith.truncf %48 : vector<8x768xf32> to vector<8x768xbf16>
    %c0_41 = arith.constant 0 : index
    %c0_42 = arith.constant 0 : index
    %50 = vector.load %arg4[%c0_41, %c0_42] : memref<8x768xbf16, #tpu.memory_space<vmem>>, vector<8x768xbf16>
    tpu.vector_store %arg4[%c0_41, %c0_42], %49 {strides = array<i32>} : memref<8x768xbf16, #tpu.memory_space<vmem>>, vector<8x768xbf16>,
    return
  }
  func.func @transform_0(%arg0: i32) -> (i32, i32) {
    %c0_i32 = arith.constant 0 : i32
    %c0_i32_0 = arith.constant 0 : i32
    %c0_i32_1 = arith.constant 0 : i32
    return %c0_i32, %c0_i32_0 : i32, i32
  }
  func.func @transform_1(%arg0: i32) -> (i32, i32, i32) {
    %c0_i32 = arith.constant 0 : i32
    %c0_i32_0 = arith.constant 0 : i32
    %c0_i32_1 = arith.constant 0 : i32
    %c0_i32_2 = arith.constant 0 : i32
    return %c0_i32, %c0_i32_0, %c0_i32_1 : i32, i32, i32
  }
  func.func @transform_2(%arg0: i32) -> (i32, i32) {
    %c0_i32 = arith.constant 0 : i32
    %c0_i32_0 = arith.constant 0 : i32
    %c0_i32_1 = arith.constant 0 : i32
    return %c0_i32, %c0_i32_0 : i32, i32
  }
  func.func @transform_3(%arg0: i32) -> (i32, i32) {
    %c0_i32 = arith.constant 0 : i32
    %c0_i32_0 = arith.constant 0 : i32
    %c0_i32_1 = arith.constant 0 : i32
    return %c0_i32, %c0_i32_0 : i32, i32
  }
}

</mosaic_0001>

<bundles_post_ra>
// kernel: net6_forward.45
= control target key start
LH: loop header
LB: loop body
LE: loop exit
PB: predicated region body
PF: predicated region fallthrough
CT: control target
= control target key end

     0   :  { %v111_v1 = vmov 0   ;;  %vm54_vm0 = vcmask 261120   ;;  %s158_s0 = inlined_call_operand.vmem [shape: bf16[32,128], index: 0, kind: input, shape index: {}]   ;;  %s159_s2 = inlined_call_operand.vmem [shape: f32[16,1], index: 2, kind: input, shape index: {}]   ;;  %s160_s1 = inlined_call_operand.vmem [shape: bf16[16,32], index: 1, kind: input, shape index: {}]   ;;  %s161_s3 = inlined_call_operand.<no memory space> [shape: f32[1,1], index: 3, kind: input, shape index: {}]   ;;  %s162_s4 = inlined_call_operand.vmem [shape: bf16[16,128], index: 4, kind: output, shape index: {}]  }
   0x1   :  { %v103_v0 = vld [vmem:[%s158_s0 + $0x8] sm:$0xff]  ;;  %110 = vset.pattern.permute.xlu0 %v111_v1  ;;  %v25_v2 = vld [vmem:[%s159_s2] sm:$0xff]  ;;  %v75_v9 = vstv %s161_s3 }
   0x2   :  { %64 = vmatpush.bf16.msra.mxu0 %v103_v0  ;;  %v102_v3 = vld [vmem:[%s158_s0] sm:$0xff]  ;;  %29 = vperm.xlu0 %110, %v25_v2   ;;  %v26_v5 = vld [vmem:[%s159_s2 + $0x8] sm:$0xff] }
   0x3   :  { %v101_v4 = vld [vmem:[%s160_s1] sm:$0xff] }
   0x6   :  { %65 = vmatpush.bf16.msra.mxu0 %v102_v3 }
   0x9   :  { %100 = vmatmul.msk.bf16.vlgmr.msra.gmra.mxu0 %vm54_vm0, %v101_v4 }
   0xa   :  { %34 = vperm.xlu0 %110, %v26_v5  }
  0x74   :  { %v30_v6 = vpop.permute.xlu0 %29 }
  0x7c   :  { %v35_v10 = vpop.permute.xlu0 %34 }
  0x86   :  { %v67_v7 = vpop.f32.mrf.mxu0 }
  0x87   :  { %v68_v8 = vadd.f32 %v67_v7, %v30_v6 }
  0x89   :  { %v76_v12 = vmul.f32 %v75_v9, %v68_v8  ;;  %vm73_vm1 = vcmp.ge.f32.partialorder %v68_v8, 0.0 }
  0x8b   :  { %v78_v15 = vsel %vm73_vm1, %v68_v8, %v76_v12 }
  0x8e   :  { %v69_v11 = vpop.f32.mrf.mxu0 }
  0x8f   :  { %v70_v13 = vadd.f32 %v69_v11, %v35_v10 }
  0x91   :  { %vm74_vm2 = vcmp.ge.f32.partialorder %v70_v13, 0.0  ;;  %v77_v14 = vmul.f32 %v75_v9, %v70_v13 }
  0x93   :  { %v79_v16 = vsel %vm74_vm2, %v70_v13, %v77_v14 }
  0x94   :  { %v107_v17 = vpack.c.bf16 %v79_v16, %v78_v15 }
  0x96   :  { %108 = vst [vmem:[%s162_s4] sm:$0xff] %v107_v17  }

// kernel: net6_forward.44
= control target key start
LH: loop header
LB: loop body
LE: loop exit
PB: predicated region body
PF: predicated region fallthrough
CT: control target
= control target key end

     0   :  { %s1054_s19 = smov 127   ;;  %s1055_s24 = smov 126   ;;  %vm64_vm0 = vcmask 1040384   ;;  %vm65_vm1 = vcmask 1041408   ;;  %v1062_v37 = vmov 65535   ;;  %vm54_vm2 = vcmask 1039360   ;;  %s1316_s0 = inlined_call_operand.vmem [shape: bf16[3,384], index: 0, kind: input, shape index: {}]   ;;  %s1317_s1 = inlined_call_operand.vmem [shape: bf16[9,32,3], index: 1, kind: input, shape index: {}]   ;;  %s1318_s2 = inlined_call_operand.vmem [shape: f32[32,1], index: 2, kind: input, shape index: {}]   ;;  %s1319_s3 = inlined_call_operand.<no memory space> [shape: f32[1,1], index: 3, kind: input, shape index: {}]   ;;  %s1320_s4 = inlined_call_operand.vmem [shape: bf16[32,256], index: 4, kind: output, shape index: {}]  }
   0x1   :  { %v29_v0 = vld [vmem:[%s1316_s0] sm:$0x3f]  ;;  %s1056_s27 = smov 118   ;;  %s1057_s30 = smov 117   ;;  %v66_v38 = vsel %vm64_vm0, 4294967295, %v1062_v37  ;;  %vm204_vm3 = vcmask 1031168  }
   0x2   :  { %41 = vst [vmem:[#allocation1] ss:$4 sm:$0xff] %v29_v0  ;;  %v23_v1 = vld [vmem:[%s1316_s0] sm:$0xf]  ;;  %s1058_s7 = smov 116   ;;  %s1059_s10 = smov 108  }
   0x3   :  { %v179_v5 = vld [vmem:[%s1316_s0] sm:$0x3f]  ;;  %s1060_s13 = smov 107   ;;  %s1061_s14 = smov 106   ;;  %v1120_v41 = vsel %vm65_vm1, %v66_v38, 0  ;;  %v1023_v50 = vld [vmem:[%s1317_s1 + $0x10] sm:$0xff] }
   0x4   :  { %v270_v8 = vld [vmem:[%s1316_s0] sm:$0x3f]  ;;  %v1024_v51 = vld [vmem:[%s1317_s1 + $0x18] sm:$0xff]  ;;  %vm57_vm4 = vcmask 23552   ;;  %vm295_vm5 = vcmask 965632   ;;  %vm386_vm6 = vcmask 957440  }
   0x5   :  { %v361_v12 = vld [vmem:[%s1316_s0] sm:$0x3f]  ;;  %vm477_vm7 = vcmask 949248   ;;  %vm568_vm8 = vcmask 883712   ;;  %vm659_vm9 = vcmask 875520   ;;  %vm750_vm10 = vcmask 867328  }
   0x6   :  { %v452_v16 = vld [vmem:[%s1316_s0] sm:$0x3f] }
   0x7   :  { %v543_v20 = vld [vmem:[%s1316_s0] sm:$0x3f] }
   0x8   :  { %v634_v24 = vld [vmem:[%s1316_s0] sm:$0x3f] }
   0x9   :  { %v42_v2 = vld.sshfl [vmem:[#allocation1] sm:$0xff pattern:$0x73625140]  ;;  %v46_v3 = vld.sshfl [vmem:[#allocation1 + $0x10] sm:$0xff pattern:$0x73625140] }
   0xa   :  { %48 = vrot.lane.b32.xlu0 %v42_v2, %s1054_s19  ;;  %52 = vrot.lane.b32.xlu1 %v46_v3, %s1054_s19  ;;  %v44_v4 = vld.sshfl [vmem:[#allocation1 + $0x8] sm:$0xff pattern:$0x73625140]  ;;  %v725_v28 = vld [vmem:[%s1316_s0] sm:$0x3f] }
   0xb   :  { %123 = vst [vmem:[#allocation1] ss:$4 sm:$0xff] %v23_v1  ;;  %v1021_v60 = vld [vmem:[%s1317_s1] sm:$0xff] }
   0xc   :  { %v1025_v61 = vld [vmem:[%s1317_s1 + $0x20] sm:$0xff] }
  0x12   :  { %50 = vrot.lane.b32.xlu0 %v44_v4, %s1054_s19  ;;  %v1098_v6 = vld.sshfl [vmem:[#allocation1] sm:$0xff pattern:$0x73625140]  ;;  %v1100_v7 = vld.sshfl [vmem:[#allocation1 + $0x8] sm:$0xff pattern:$0x73625140] }
  0x13   :  { %191 = vst [vmem:[#allocation1] ss:$4 sm:$0xff] %v179_v5  ;;  %v132_v45 = vand.u32 %v1098_v6, %v1120_v41  ;;  %v134_v49 = vand.u32 %v1100_v7, %v1120_v41 }
  0x1a   :  { %v192_v9 = vld.sshfl [vmem:[#allocation1] sm:$0xff pattern:$0x73625140]  ;;  %v194_v10 = vld.sshfl [vmem:[#allocation1 + $0x8] sm:$0xff pattern:$0x73625140] }
  0x1b   :  { %198 = vrot.lane.b32.xlu1 %v192_v9, %s1055_s24  ;;  %v196_v11 = vld.sshfl [vmem:[#allocation1 + $0x10] sm:$0xff pattern:$0x73625140]  ;;  %200 = vrot.lane.b32.xlu2 %v194_v10, %s1055_s24  ;;  %v1022_v9 = vld [vmem:[%s1317_s1 + $0x8] sm:$0xff] }
  0x1c   :  { %282 = vst [vmem:[#allocation1] ss:$4 sm:$0xff] %v270_v8  ;;  %v1026_v10 = vld [vmem:[%s1317_s1 + $0x28] sm:$0xff] }
  0x23   :  { %v287_v13 = vld.sshfl [vmem:[#allocation1 + $0x10] sm:$0xff pattern:$0x73625140]  ;;  %v285_v14 = vld.sshfl [vmem:[#allocation1 + $0x8] sm:$0xff pattern:$0x73625140]  ;;  %202 = vrot.lane.b32.xlu2 %v196_v11, %s1055_s24 }
  0x24   :  { %291 = vrot.lane.b32.xlu1 %v285_v14, %s1056_s27  ;;  %v283_v15 = vld.sshfl [vmem:[#allocation1] sm:$0xff pattern:$0x73625140] }
  0x25   :  { %289 = vrot.lane.b32.xlu0 %v283_v15, %s1056_s27  ;;  %373 = vst [vmem:[#allocation1] ss:$4 sm:$0xff] %v361_v12 }
  0x2b   :  { %293 = vrot.lane.b32.xlu2 %v287_v13, %s1056_s27 }
  0x2c   :  { %v376_v17 = vld.sshfl [vmem:[#allocation1 + $0x8] sm:$0xff pattern:$0x73625140]  ;;  %v374_v18 = vld.sshfl [vmem:[#allocation1] sm:$0xff pattern:$0x73625140] }
  0x2d   :  { %382 = vrot.lane.b32.xlu1 %v376_v17, %s1057_s30  ;;  %380 = vrot.lane.b32.xlu0 %v374_v18, %s1057_s30  ;;  %v378_v19 = vld.sshfl [vmem:[#allocation1 + $0x10] sm:$0xff pattern:$0x73625140] }
  0x2e   :  { %464 = vst [vmem:[#allocation1] ss:$4 sm:$0xff] %v452_v16 }
  0x33   :  { %384 = vrot.lane.b32.xlu2 %v378_v19, %s1057_s30 }
  0x35   :  { %v467_v21 = vld.sshfl [vmem:[#allocation1 + $0x8] sm:$0xff pattern:$0x73625140]  ;;  %v469_v22 = vld.sshfl [vmem:[#allocation1 + $0x10] sm:$0xff pattern:$0x73625140] }
  0x36   :  { %473 = vrot.lane.b32.xlu1 %v467_v21, %s1058_s7  ;;  %v465_v23 = vld.sshfl [vmem:[#allocation1] sm:$0xff pattern:$0x73625140] }
  0x37   :  { %471 = vrot.lane.b32.xlu0 %v465_v23, %s1058_s7  ;;  %555 = vst [vmem:[#allocation1] ss:$4 sm:$0xff] %v543_v20 }
  0x3b   :  { %475 = vrot.lane.b32.xlu2 %v469_v22, %s1058_s7 }
  0x3e   :  { %v558_v25 = vld.sshfl [vmem:[#allocation1 + $0x8] sm:$0xff pattern:$0x73625140]  ;;  %v556_v26 = vld.sshfl [vmem:[#allocation1] sm:$0xff pattern:$0x73625140] }
  0x3f   :  { %564 = vrot.lane.b32.xlu1 %v558_v25, %s1059_s10  ;;  %562 = vrot.lane.b32.xlu0 %v556_v26, %s1059_s10  ;;  %v560_v27 = vld.sshfl [vmem:[#allocation1 + $0x10] sm:$0xff pattern:$0x73625140]  ;;  %v1029_v25 = vld [vmem:[%s1317_s1 + $0x40] sm:$0xff] }
  0x40   :  { %646 = vst [vmem:[#allocation1] ss:$4 sm:$0xff] %v634_v24  ;;  %v1027_v24 = vld [vmem:[%s1317_s1 + $0x30] sm:$0xff] }
  0x43   :  { %566 = vrot.lane.b32.xlu2 %v560_v27, %s1059_s10 }
  0x47   :  { %v649_v29 = vld.sshfl [vmem:[#allocation1 + $0x8] sm:$0xff pattern:$0x73625140]  ;;  %v651_v30 = vld.sshfl [vmem:[#allocation1 + $0x10] sm:$0xff pattern:$0x73625140] }
  0x48   :  { %655 = vrot.lane.b32.xlu1 %v649_v29, %s1060_s13  ;;  %v647_v31 = vld.sshfl [vmem:[#allocation1] sm:$0xff pattern:$0x73625140] }
  0x49   :  { %653 = vrot.lane.b32.xlu0 %v647_v31, %s1060_s13  ;;  %737 = vst [vmem:[#allocation1] ss:$4 sm:$0xff] %v725_v28 }
  0x4b   :  { %657 = vrot.lane.b32.xlu2 %v651_v30, %s1060_s13 }
  0x50   :  { %v740_v32 = vld.sshfl [vmem:[#allocation1 + $0x8] sm:$0xff pattern:$0x73625140]  ;;  %v738_v33 = vld.sshfl [vmem:[#allocation1] sm:$0xff pattern:$0x73625140] }
  0x51   :  { %746 = vrot.lane.b32.xlu1 %v740_v32, %s1061_s14  ;;  %744 = vrot.lane.b32.xlu0 %v738_v33, %s1061_s14  ;;  %v742_v34 = vld.sshfl [vmem:[#allocation1 + $0x10] sm:$0xff pattern:$0x73625140] }
  0x53   :  { %748 = vrot.lane.b32.xlu2 %v742_v34, %s1061_s14 }
  0x75   :  { %v201_v35 = vpop.permute.xlu2 %200 }
  0x7c   :  { %v49_v36 = vpop.permute.xlu0 %48  ;;  %v53_v39 = vpop.permute.xlu1 %52 }
  0x7d   :  { %v203_v40 = vpop.permute.xlu2 %202 }
  0x7e   :  { %v206_v46 = vsel %vm204_vm3, %v201_v35, %v203_v40  ;;  %v1028_v40 = vld [vmem:[%s1317_s1 + $0x38] sm:$0xff] }
  0x7f   :  { %v217_v52 = vand.u32 %v206_v46, %v1120_v41  ;;  %v1063_v46 = vmov 0  }
  0x80   :  { %1051 = vset.pattern.permute.xlu0 %v1063_v46  ;;  %1052 = vset.pattern.permute.xlu1 %v1063_v46 }
  0x81   :  { %1053 = vset.pattern.permute.xlu2 %v1063_v46 }
  0x84   :  { %v51_v42 = vpop.permute.xlu0 %50 }
  0x85   :  { %v55_v43 = vsel %vm54_vm2, %v49_v36, %v51_v42  ;;  %v56_v44 = vsel %vm54_vm2, %v51_v42, %v53_v39  ;;  %v294_v56 = vpop.permute.xlu2 %293  ;;  %v1030_v42 = vld [vmem:[%s1317_s1 + $0x48] sm:$0xff] }
  0x86   :  { %v69_v47 = vand.u32 %v1120_v41, %v55_v43  ;;  %v72_v48 = vand.u32 %v1120_v41, %v56_v44  ;;  %v1033_v43 = vld [vmem:[%s1317_s1 + $0x60] sm:$0xff]  ;;  %v1032_v44 = vld [vmem:[%s1317_s1 + $0x58] sm:$0xff] }
  0x88   :  { %81 = vmatpush.bf16.msra.mxu0 %v69_v47  ;;  %1039 = vmatpush.bf16.msra.mxu2 %v69_v47  ;;  %v811_v47 = vld [vmem:[%s1318_s2] sm:$0xff] }
  0x89   :  { %100 = vmatpush.bf16.msra.mxu1 %v72_v48  ;;  %1040 = vmatpush.bf16.msra.mxu3 %v72_v48  ;;  %v1035_v48 = vld [vmem:[%s1317_s1 + $0x70] sm:$0xff] }
  0x8a   :  { %817 = vperm.xlu0 %1051, %v811_v47  }
  0x8b   :  { %893 = vmatmul.msk.bf16.vlgmr.msra.gmra.mxu0 %vm57_vm4, %v1023_v50  ;;  %894 = vmatmul.msk.bf16.vlgmr.msra.gmra.mxu2 %vm57_vm4, %v1024_v51 }
  0x8c   :  { %143 = vmatpush.bf16.msrb.mxu2 %v132_v45  ;;  %895 = vmatmul.msk.bf16.vlgmr.msra.gmra.mxu1 %vm57_vm4, %v1023_v50  ;;  %v1034_v45 = vld [vmem:[%s1317_s1 + $0x68] sm:$0xff] }
  0x8d   :  { %162 = vmatpush.bf16.msrb.mxu3 %v134_v49  ;;  %245 = vmatpush.bf16.msrb.mxu1 %v217_v52  ;;  %v199_v53 = vpop.permute.xlu1 %198  ;;  %v385_v1 = vpop.permute.xlu2 %384  ;;  %v1037_v49 = vld [vmem:[%s1317_s1 + $0x80] sm:$0xff]  ;;  %v812_v50 = vld [vmem:[%s1318_s2 + $0x8] sm:$0xff]  ;;  %v1036_v52 = vld [vmem:[%s1317_s1 + $0x78] sm:$0xff] }
  0x8e   :  { %896 = vmatmul.msk.bf16.vlgmr.msra.gmra.mxu3 %vm57_vm4, %v1024_v51  ;;  %v205_v54 = vsel %vm204_vm3, %v199_v53, %v201_v35  ;;  %822 = vperm.xlu1 %1052, %v812_v50   ;;  %v814_v51 = vld [vmem:[%s1318_s2 + $0x18] sm:$0xff]  ;;  %v1038_v53 = vld [vmem:[%s1317_s1 + $0x88] sm:$0xff] }
  0x8f   :  { %v214_v55 = vand.u32 %v205_v54, %v1120_v41 }
  0x91   :  { %226 = vmatpush.bf16.msrb.mxu0 %v214_v55 }
  0x95   :  { %v476_v8 = vpop.permute.xlu2 %475 }
  0x96   :  { %v292_v57 = vpop.permute.xlu1 %291  ;;  %832 = vperm.xlu1 %1052, %v814_v51  }
  0x97   :  { %v297_v58 = vsel %vm295_vm5, %v292_v57, %v294_v56  ;;  %v290_v59 = vpop.permute.xlu0 %289 }
  0x98   :  { %v308_v62 = vand.u32 %v297_v58, %v1120_v41  ;;  %v296_v63 = vsel %vm295_vm5, %v290_v59, %v292_v57 }
  0x99   :  { %v305_v0 = vand.u32 %v296_v63, %v1120_v41  ;;  %v813_v63 = vld [vmem:[%s1318_s2 + $0x10] sm:$0xff] }
  0x9a   :  { %336 = vmatpush.bf16.msra.mxu3 %v308_v62  ;;  %827 = vperm.xlu2 %1053, %v813_v63  }
  0x9b   :  { %905 = vmatmul.msk.bf16.vlgmr.msrb.gmra.mxu2 %vm57_vm4, %v1021_v60  ;;  %921 = vmatmul.msk.bf16.vlgmr.msrb.gmra.mxu0 %vm57_vm4, %v1025_v61 }
  0x9c   :  { %923 = vmatmul.msk.bf16.vlgmr.msrb.gmra.mxu1 %vm57_vm4, %v1025_v61  ;;  %317 = vmatpush.bf16.msra.mxu2 %v305_v0 }
  0x9d   :  { %v567_v17 = vpop.permute.xlu2 %566 }
  0x9e   :  { %907 = vmatmul.msk.bf16.vlgmr.msrb.gmra.mxu3 %vm57_vm4, %v1021_v60 }
  0x9f   :  { %v383_v2 = vpop.permute.xlu1 %382  ;;  %v381_v3 = vpop.permute.xlu0 %380 }
  0xa0   :  { %v388_v4 = vsel %vm386_vm6, %v383_v2, %v385_v1  ;;  %v387_v5 = vsel %vm386_vm6, %v381_v3, %v383_v2 }
  0xa1   :  { %v399_v6 = vand.u32 %v388_v4, %v1120_v41  ;;  %v396_v7 = vand.u32 %v387_v5, %v1120_v41 }
  0xa3   :  { %408 = vmatpush.bf16.msra.mxu0 %v396_v7  ;;  %427 = vmatpush.bf16.msra.mxu1 %v399_v6 }
  0xa5   :  { %v658_v26 = vpop.permute.xlu2 %657 }
  0xa8   :  { %v474_v11 = vpop.permute.xlu1 %473 }
  0xa9   :  { %v479_v12 = vsel %vm477_vm7, %v474_v11, %v476_v8  ;;  %v472_v13 = vpop.permute.xlu0 %471 }
  0xaa   :  { %v490_v14 = vand.u32 %v479_v12, %v1120_v41  ;;  %v478_v15 = vsel %vm477_vm7, %v472_v13, %v474_v11 }
  0xab   :  { %906 = vmatmul.msk.bf16.gmra.mxu2 %vm57_vm4, %v1022_v9  ;;  %922 = vmatmul.msk.bf16.gmra.mxu0 %vm57_vm4, %v1026_v10  ;;  %v487_v16 = vand.u32 %v478_v15, %v1120_v41 }
  0xac   :  { %924 = vmatmul.msk.bf16.gmra.mxu1 %vm57_vm4, %v1026_v10  ;;  %518 = vmatpush.bf16.msrb.mxu3 %v490_v14 }
  0xad   :  { %499 = vmatpush.bf16.msrb.mxu2 %v487_v16  ;;  %v749_v33 = vpop.permute.xlu2 %748 }
  0xae   :  { %908 = vmatmul.msk.bf16.gmra.mxu3 %vm57_vm4, %v1022_v9 }
  0xb1   :  { %v565_v18 = vpop.permute.xlu1 %564  ;;  %v563_v19 = vpop.permute.xlu0 %562 }
  0xb2   :  { %v570_v20 = vsel %vm568_vm8, %v565_v18, %v567_v17  ;;  %v569_v21 = vsel %vm568_vm8, %v563_v19, %v565_v18 }
  0xb3   :  { %v581_v22 = vand.u32 %v570_v20, %v1120_v41  ;;  %v578_v23 = vand.u32 %v569_v21, %v1120_v41 }
  0xb5   :  { %590 = vmatpush.bf16.msrb.mxu0 %v578_v23  ;;  %609 = vmatpush.bf16.msrb.mxu1 %v581_v22 }
  0xba   :  { %v656_v27 = vpop.permute.xlu1 %655 }
  0xbb   :  { %937 = vmatmul.msk.bf16.vlgmr.msra.gmra.mxu2 %vm57_vm4, %v1027_v24  ;;  %953 = vmatmul.msk.bf16.vlgmr.msra.gmra.mxu0 %vm57_vm4, %v1029_v25  ;;  %v661_v28 = vsel %vm659_vm9, %v656_v27, %v658_v26  ;;  %v654_v29 = vpop.permute.xlu0 %653 }
  0xbc   :  { %955 = vmatmul.msk.bf16.vlgmr.msra.gmra.mxu1 %vm57_vm4, %v1029_v25  ;;  %v672_v30 = vand.u32 %v661_v28, %v1120_v41  ;;  %v660_v31 = vsel %vm659_vm9, %v654_v29, %v656_v27 }
  0xbd   :  { %v669_v32 = vand.u32 %v660_v31, %v1120_v41 }
  0xbe   :  { %939 = vmatmul.msk.bf16.vlgmr.msra.gmra.mxu3 %vm57_vm4, %v1027_v24 }
  0xbf   :  { %700 = vmatpush.bf16.msra.mxu3 %v672_v30  ;;  %681 = vmatpush.bf16.msra.mxu2 %v669_v32 }
  0xc3   :  { %v747_v34 = vpop.permute.xlu1 %746  ;;  %v745_v35 = vpop.permute.xlu0 %744 }
  0xc4   :  { %v752_v36 = vsel %vm750_vm10, %v747_v34, %v749_v33  ;;  %v751_v37 = vsel %vm750_vm10, %v745_v35, %v747_v34 }
  0xc5   :  { %v763_v38 = vand.u32 %v752_v36, %v1120_v41  ;;  %v760_v39 = vand.u32 %v751_v37, %v1120_v41  ;;  %v1031_v41 = vld [vmem:[%s1317_s1 + $0x50] sm:$0xff] }
  0xc7   :  { %772 = vmatpush.bf16.msra.mxu0 %v760_v39  ;;  %791 = vmatpush.bf16.msra.mxu1 %v763_v38 }
  0xcb   :  { %938 = vmatmul.msk.bf16.gmra.mxu2 %vm57_vm4, %v1028_v40  ;;  %954 = vmatmul.msk.bf16.gmra.mxu0 %vm57_vm4, %v1030_v42 }
  0xcc   :  { %956 = vmatmul.msk.bf16.gmra.mxu1 %vm57_vm4, %v1030_v42 }
  0xce   :  { %940 = vmatmul.msk.bf16.gmra.mxu3 %vm57_vm4, %v1028_v40 }
  0xdb   :  { %969 = vmatmul.msk.bf16.vlgmr.msrb.gmra.mxu2 %vm57_vm4, %v1031_v41  ;;  %985 = vmatmul.msk.bf16.vlgmr.msrb.gmra.mxu0 %vm57_vm4, %v1033_v43 }
  0xdc   :  { %987 = vmatmul.msk.bf16.vlgmr.msrb.gmra.mxu1 %vm57_vm4, %v1033_v43 }
  0xde   :  { %971 = vmatmul.msk.bf16.vlgmr.msrb.gmra.mxu3 %vm57_vm4, %v1031_v41 }
  0xeb   :  { %970 = vmatmul.msk.bf16.gmra.mxu2 %vm57_vm4, %v1032_v44  ;;  %986 = vmatmul.msk.bf16.gmra.mxu0 %vm57_vm4, %v1034_v45 }
  0xec   :  { %988 = vmatmul.msk.bf16.gmra.mxu1 %vm57_vm4, %v1034_v45 }
  0xee   :  { %972 = vmatmul.msk.bf16.gmra.mxu3 %vm57_vm4, %v1032_v44 }
  0xfb   :  { %1001 = vmatmul.msk.bf16.vlgmr.msra.gmra.mxu2 %vm57_vm4, %v1035_v48  ;;  %1017 = vmatmul.msk.bf16.vlgmr.msra.gmra.mxu0 %vm57_vm4, %v1037_v49 }
  0xfc   :  { %1019 = vmatmul.msk.bf16.vlgmr.msra.gmra.mxu1 %vm57_vm4, %v1037_v49 }
  0xfe   :  { %1003 = vmatmul.msk.bf16.vlgmr.msra.gmra.mxu3 %vm57_vm4, %v1035_v48 }
 0x108   :  { %v83_v54 = vpop.f32.mrf.mxu0 }
 0x109   :  { %v102_v55 = vpop.f32.mrf.mxu1 }
 0x10b   :  { %1002 = vmatmul.msk.bf16.gmra.mxu2 %vm57_vm4, %v1036_v52  ;;  %1018 = vmatmul.msk.bf16.gmra.mxu0 %vm57_vm4, %v1038_v53 }
 0x10c   :  { %1020 = vmatmul.msk.bf16.gmra.mxu1 %vm57_vm4, %v1038_v53 }
 0x10e   :  { %1004 = vmatmul.msk.bf16.gmra.mxu3 %vm57_vm4, %v1036_v52  ;;  %v88_v56 = vpop.f32.mrf.mxu2 }
 0x110   :  { %v85_v58 = vpop.f32.mrf.mxu0 }
 0x111   :  { %v107_v57 = vpop.f32.mrf.mxu3  ;;  %v104_v59 = vpop.f32.mrf.mxu1 }
 0x116   :  { %v90_v60 = vpop.f32.mrf.mxu2 }
 0x118   :  { %v228_v62 = vpop.f32.mrf.mxu0 }
 0x119   :  { %v109_v61 = vpop.f32.mrf.mxu3  ;;  %v247_v0 = vpop.f32.mrf.mxu1 }
 0x11e   :  { %v145_v1 = vpop.f32.mrf.mxu2 }
 0x11f   :  { %v146_v2 = vadd.f32 %v145_v1, %v83_v54 }
 0x120   :  { %v230_v5 = vpop.f32.mrf.mxu0 }
 0x121   :  { %v164_v3 = vpop.f32.mrf.mxu3  ;;  %v249_v6 = vpop.f32.mrf.mxu1  ;;  %v257_v7 = vadd.f32 %v228_v62, %v146_v2 }
 0x122   :  { %v165_v4 = vadd.f32 %v164_v3, %v102_v55 }
 0x124   :  { %v258_v8 = vadd.f32 %v247_v0, %v165_v4 }
 0x126   :  { %v147_v9 = vpop.f32.mrf.mxu2 }
 0x127   :  { %v148_v10 = vadd.f32 %v147_v9, %v85_v58 }
 0x128   :  { %v233_v13 = vpop.f32.mrf.mxu0 }
 0x129   :  { %v166_v11 = vpop.f32.mrf.mxu3  ;;  %v252_v14 = vpop.f32.mrf.mxu1  ;;  %v259_v15 = vadd.f32 %v230_v5, %v148_v10 }
 0x12a   :  { %v167_v12 = vadd.f32 %v166_v11, %v104_v59 }
 0x12c   :  { %v260_v16 = vadd.f32 %v249_v6, %v167_v12 }
 0x12e   :  { %v150_v17 = vpop.f32.mrf.mxu2 }
 0x12f   :  { %v151_v18 = vadd.f32 %v150_v17, %v88_v56 }
 0x130   :  { %v235_v21 = vpop.f32.mrf.mxu0 }
 0x131   :  { %v169_v19 = vpop.f32.mrf.mxu3  ;;  %v254_v22 = vpop.f32.mrf.mxu1  ;;  %v1246_v23 = vadd.f32 %v233_v13, %v151_v18 }
 0x132   :  { %v170_v20 = vadd.f32 %v169_v19, %v107_v57  ;;  %v818_v19 = vpop.permute.xlu0 %817 }
 0x134   :  { %v1248_v24 = vadd.f32 %v252_v14, %v170_v20 }
 0x136   :  { %v152_v25 = vpop.f32.mrf.mxu2 }
 0x137   :  { %v153_v26 = vadd.f32 %v152_v25, %v90_v60 }
 0x138   :  { %v410_v29 = vpop.f32.mrf.mxu0 }
 0x139   :  { %v171_v27 = vpop.f32.mrf.mxu3  ;;  %v429_v30 = vpop.f32.mrf.mxu1  ;;  %v1250_v31 = vadd.f32 %v235_v21, %v153_v26  ;;  %v1279_v26 = vstv %s1319_s3 }
 0x13a   :  { %v172_v28 = vadd.f32 %v171_v27, %v109_v61 }
 0x13c   :  { %v1252_v32 = vadd.f32 %v254_v22, %v172_v28 }
 0x13e   :  { %v319_v33 = vpop.f32.mrf.mxu2 }
 0x13f   :  { %v348_v61 = vadd.f32 %v319_v33, %v257_v7 }
 0x140   :  { %v412_v35 = vpop.f32.mrf.mxu0 }
 0x141   :  { %v338_v34 = vpop.f32.mrf.mxu3  ;;  %v431_v36 = vpop.f32.mrf.mxu1  ;;  %v439_v0 = vadd.f32 %v410_v29, %v348_v61 }
 0x142   :  { %v349_v62 = vadd.f32 %v338_v34, %v258_v8 }
 0x144   :  { %v440_v2 = vadd.f32 %v429_v30, %v349_v62 }
 0x146   :  { %v321_v37 = vpop.f32.mrf.mxu2 }
 0x147   :  { %v350_v6 = vadd.f32 %v321_v37, %v259_v15 }
 0x148   :  { %v415_v39 = vpop.f32.mrf.mxu0 }
 0x149   :  { %v340_v38 = vpop.f32.mrf.mxu3  ;;  %v1254_v40 = vpop.f32.mrf.mxu1  ;;  %v441_v14 = vadd.f32 %v412_v35, %v350_v6 }
 0x14a   :  { %v351_v10 = vadd.f32 %v340_v38, %v260_v16 }
 0x14c   :  { %v442_v7 = vadd.f32 %v431_v36, %v351_v10 }
 0x14e   :  { %v324_v42 = vpop.f32.mrf.mxu2 }
 0x14f   :  { %v352_v15 = vadd.f32 %v324_v42, %v1246_v23 }
 0x150   :  { %v1256_v43 = vpop.f32.mrf.mxu0 }
 0x151   :  { %v343_v41 = vpop.f32.mrf.mxu3  ;;  %v1258_v44 = vpop.f32.mrf.mxu1  ;;  %v443_v38 = vadd.f32 %v415_v39, %v352_v15 }
 0x152   :  { %v353_v27 = vadd.f32 %v343_v41, %v1248_v24  ;;  %v823_v41 = vpop.permute.xlu1 %822 }
 0x154   :  { %v444_v23 = vadd.f32 %v1254_v40, %v353_v27 }
 0x156   :  { %v1260_v45 = vpop.f32.mrf.mxu2 }
 0x158   :  { %v592_v47 = vpop.f32.mrf.mxu0 }
 0x159   :  { %v1262_v46 = vpop.f32.mrf.mxu3  ;;  %v611_v48 = vpop.f32.mrf.mxu1 }
 0x15e   :  { %v501_v49 = vpop.f32.mrf.mxu2 }
 0x15f   :  { %v530_v3 = vadd.f32 %v501_v49, %v439_v0 }
 0x160   :  { %v594_v51 = vpop.f32.mrf.mxu0 }
 0x161   :  { %v520_v50 = vpop.f32.mrf.mxu3  ;;  %v613_v52 = vpop.f32.mrf.mxu1  ;;  %v621_v11 = vadd.f32 %v592_v47, %v530_v3 }
 0x162   :  { %v531_v4 = vadd.f32 %v520_v50, %v440_v2 }
 0x164   :  { %v622_v13 = vadd.f32 %v611_v48, %v531_v4 }
 0x166   :  { %v503_v53 = vpop.f32.mrf.mxu2 }
 0x167   :  { %v532_v20 = vadd.f32 %v503_v53, %v441_v14 }
 0x168   :  { %v1264_v55 = vpop.f32.mrf.mxu0 }
 0x169   :  { %v522_v54 = vpop.f32.mrf.mxu3  ;;  %v1266_v56 = vpop.f32.mrf.mxu1  ;;  %v623_v34 = vadd.f32 %v594_v51, %v532_v20  ;;  %v354_v51 = vadd.f32 %v1260_v45, %v1250_v31 }
 0x16a   :  { %v533_v22 = vadd.f32 %v522_v54, %v442_v7 }
 0x16b   :  { %v445_v45 = vadd.f32 %v1256_v43, %v354_v51 }
 0x16c   :  { %v624_v37 = vadd.f32 %v613_v52, %v533_v22  ;;  %v355_v52 = vadd.f32 %v1262_v46, %v1252_v32 }
 0x16e   :  { %v506_v57 = vpop.f32.mrf.mxu2  ;;  %v446_v32 = vadd.f32 %v1258_v44, %v355_v52 }
 0x16f   :  { %v534_v50 = vadd.f32 %v506_v57, %v443_v38 }
 0x170   :  { %v1268_v59 = vpop.f32.mrf.mxu0 }
 0x171   :  { %v525_v58 = vpop.f32.mrf.mxu3  ;;  %v1270_v60 = vpop.f32.mrf.mxu1  ;;  %v625_v57 = vadd.f32 %v1264_v55, %v534_v50 }
 0x172   :  { %v535_v61 = vadd.f32 %v525_v58, %v444_v23 }
 0x174   :  { %v626_v31 = vadd.f32 %v1266_v56, %v535_v61 }
 0x176   :  { %v1272_v63 = vpop.f32.mrf.mxu2 }
 0x177   :  { %v536_v55 = vadd.f32 %v1272_v63, %v445_v45 }
 0x178   :  { %v774_v5 = vpop.f32.mrf.mxu0 }
 0x179   :  { %v1274_v1 = vpop.f32.mrf.mxu3  ;;  %v793_v9 = vpop.f32.mrf.mxu1  ;;  %v627_v44 = vadd.f32 %v1268_v59, %v536_v55 }
 0x17a   :  { %v537_v14 = vadd.f32 %v1274_v1, %v446_v32 }
 0x17e   :  { %v683_v12 = vpop.f32.mrf.mxu2 }
 0x17f   :  { %v712_v17 = vadd.f32 %v683_v12, %v621_v11  ;;  %v828_v11 = vpop.permute.xlu2 %827 }
 0x180   :  { %v776_v28 = vpop.f32.mrf.mxu0 }
 0x181   :  { %v702_v18 = vpop.f32.mrf.mxu3  ;;  %v803_v21 = vadd.f32 %v774_v5, %v712_v17  ;;  %v795_v30 = vpop.f32.mrf.mxu1 }
 0x182   :  { %v713_v8 = vadd.f32 %v702_v18, %v622_v13 }
 0x183   :  { %v835_v16 = vadd.f32 %v818_v19, %v803_v21 }
 0x184   :  { %v804_v25 = vadd.f32 %v793_v9, %v713_v8  ;;  %v628_v8 = vadd.f32 %v1270_v60, %v537_v14 }
 0x185   :  { %vm844_vm11 = vcmp.ge.f32.partialorder %v835_v16, 0.0  ;;  %v853_v33 = vmul.f32 %v1279_v26, %v835_v16 }
 0x186   :  { %v836_v29 = vadd.f32 %v818_v19, %v804_v25  ;;  %v685_v36 = vpop.f32.mrf.mxu2 }
 0x187   :  { %v861_v47 = vsel %vm844_vm11, %v835_v16, %v853_v33  ;;  %v714_v48 = vadd.f32 %v685_v36, %v623_v34 }
 0x188   :  { %vm845_vm12 = vcmp.ge.f32.partialorder %v836_v29, 0.0  ;;  %v854_v35 = vmul.f32 %v1279_v26, %v836_v29  ;;  %v779_v2 = vpop.f32.mrf.mxu0 }
 0x189   :  { %v704_v49 = vpop.f32.mrf.mxu3  ;;  %v805_v54 = vadd.f32 %v776_v28, %v714_v48  ;;  %v798_v4 = vpop.f32.mrf.mxu1 }
 0x18a   :  { %v862_v42 = vsel %vm845_vm12, %v836_v29, %v854_v35  ;;  %v715_v24 = vadd.f32 %v704_v49, %v624_v37  ;;  %v833_v28 = vpop.permute.xlu1 %832 }
 0x18b   :  { %v869_v53 = vpack.c.bf16 %v862_v42, %v861_v47  ;;  %v837_v39 = vadd.f32 %v823_v41, %v805_v54 }
 0x18c   :  { %v806_v62 = vadd.f32 %v795_v30, %v715_v24 }
 0x18d   :  { %873 = vst [vmem:[%s1320_s4] sm:$0xff] %v869_v53  ;;  %vm846_vm13 = vcmp.ge.f32.partialorder %v837_v39, 0.0  ;;  %v855_v0 = vmul.f32 %v1279_v26, %v837_v39 }
 0x18e   :  { %v838_v40 = vadd.f32 %v823_v41, %v806_v62  ;;  %v688_v3 = vpop.f32.mrf.mxu2 }
 0x18f   :  { %v863_v5 = vsel %vm846_vm13, %v837_v39, %v855_v0  ;;  %v716_v6 = vadd.f32 %v688_v3, %v625_v57 }
 0x190   :  { %vm847_vm14 = vcmp.ge.f32.partialorder %v838_v40, 0.0  ;;  %v856_v58 = vmul.f32 %v1279_v26, %v838_v40  ;;  %v781_v21 = vpop.f32.mrf.mxu0 }
 0x191   :  { %v707_v9 = vpop.f32.mrf.mxu3  ;;  %v807_v13 = vadd.f32 %v779_v2, %v716_v6  ;;  %v800_v15 = vpop.f32.mrf.mxu1 }
 0x192   :  { %v864_v46 = vsel %vm847_vm14, %v838_v40, %v856_v58  ;;  %v717_v10 = vadd.f32 %v707_v9, %v626_v31 }
 0x193   :  { %v870_v12 = vpack.c.bf16 %v864_v46, %v863_v5  ;;  %v839_v43 = vadd.f32 %v828_v11, %v807_v13 }
 0x194   :  { %v808_v17 = vadd.f32 %v798_v4, %v717_v10 }
 0x195   :  { %874 = vst [vmem:[%s1320_s4 + $0x8] sm:$0xff] %v870_v12  ;;  %vm848_vm15 = vcmp.ge.f32.partialorder %v839_v43, 0.0  ;;  %v857_v18 = vmul.f32 %v1279_v26, %v839_v43 }
 0x196   :  { %v840_v56 = vadd.f32 %v828_v11, %v808_v17  ;;  %v690_v63 = vpop.f32.mrf.mxu2 }
 0x197   :  { %v865_v19 = vsel %vm848_vm15, %v839_v43, %v857_v18  ;;  %v718_v1 = vadd.f32 %v690_v63, %v627_v44 }
 0x198   :  { %vm849_vm0 = vcmp.ge.f32.partialorder %v840_v56, 0.0  ;;  %v858_v7 = vmul.f32 %v1279_v26, %v840_v56 }
 0x199   :  { %v709_v20 = vpop.f32.mrf.mxu3  ;;  %v809_v27 = vadd.f32 %v781_v21, %v718_v1 }
 0x19a   :  { %v866_v22 = vsel %vm849_vm0, %v840_v56, %v858_v7  ;;  %v719_v25 = vadd.f32 %v709_v20, %v628_v8 }
 0x19b   :  { %v871_v16 = vpack.c.bf16 %v866_v22, %v865_v19  ;;  %v841_v59 = vadd.f32 %v833_v28, %v809_v27 }
 0x19c   :  { %v810_v29 = vadd.f32 %v800_v15, %v719_v25 }
 0x19d   :  { %875 = vst [vmem:[%s1320_s4 + $0x10] sm:$0xff] %v871_v16  ;;  %vm850_vm1 = vcmp.ge.f32.partialorder %v841_v59, 0.0  ;;  %v859_v60 = vmul.f32 %v1279_v26, %v841_v59 }
 0x19e   :  { %v842_v30 = vadd.f32 %v833_v28, %v810_v29 }
 0x19f   :  { %v867_v34 = vsel %vm850_vm1, %v841_v59, %v859_v60 }
 0x1a0   :  { %vm851_vm2 = vcmp.ge.f32.partialorder %v842_v30, 0.0  ;;  %v860_v33 = vmul.f32 %v1279_v26, %v842_v30 }
 0x1a2   :  { %v868_v35 = vsel %vm851_vm2, %v842_v30, %v860_v33 }
 0x1a3   :  { %v872_v36 = vpack.c.bf16 %v868_v35, %v867_v34 }
 0x1a5   :  { %876 = vst [vmem:[%s1320_s4 + $0x18] sm:$0xff] %v872_v36 }

// kernel: net6_forward.46
= control target key start
LH: loop header
LB: loop body
LE: loop exit
PB: predicated region body
PF: predicated region fallthrough
CT: control target
= control target key end

     0   :  { %s1628_s27 = smov 127   ;;  %s1629_s28 = smov 126   ;;  %vm81_vm0 = vcmask 1039360   ;;  %vm292_vm1 = vcmask 1031168   ;;  %vm86_vm2 = vcmask 130048   ;;  %vm418_vm3 = vcmask 965632   ;;  %s2127_s0 = inlined_call_operand.vmem [shape: bf16[16,384], index: 0, kind: input, shape index: {}]   ;;  %s2128_s1 = inlined_call_operand.vmem [shape: bf16[9,64,16], index: 1, kind: input, shape index: {}]   ;;  %s2129_s2 = inlined_call_operand.vmem [shape: f32[64,1], index: 2, kind: input, shape index: {}]   ;;  %s2130_s3 = inlined_call_operand.<no memory space> [shape: f32[1,1], index: 3, kind: input, shape index: {}]   ;;  %s2131_s4 = inlined_call_operand.vmem [shape: bf16[64,256], index: 4, kind: output, shape index: {}]  }
   0x1   :  { %v1299_v0 = vld [vmem:[%s2127_s0] sm:$0xf]  ;;  %v1584_v1 = vld [vmem:[%s2127_s0 + $0x8] sm:$0xf0]  ;;  %v1307_v2 = vld [vmem:[%s2127_s0 + $0x8] sm:$0xf] }
   0x2   :  { %v1300_v3 = vor.u32 %v1584_v1, %v1299_v0  ;;  %v1585_v4 = vld [vmem:[%s2127_s0 + $0x10] sm:$0xf0]  ;;  %v1583_v5 = vld [vmem:[%s2127_s0 + $0x4] sm:$0xf]  ;;  %v1301_v6 = vld [vmem:[%s2127_s0 + $0xc] sm:$0xf0] }
   0x3   :  { %v1308_v7 = vor.u32 %v1585_v4, %v1307_v2  ;;  %v1304_v8 = vor.u32 %v1583_v5, %v1301_v6  ;;  %s1630_s29 = smov 118   ;;  %s1631_s30 = smov 117   ;;  %v1335_v12 = vld [vmem:[%s2127_s0] sm:$0xf]  ;;  %v1578_v14 = vld [vmem:[%s2127_s0 + $0x8] sm:$0xf0] }
   0x4   :  { %75 = vrot.lane.b32.xlu0 %v1300_v3, %s1628_s27  ;;  %s1632_s5 = smov 116   ;;  %s1633_s6 = smov 108   ;;  %v1577_v15 = vld [vmem:[%s2127_s0 + $0x4] sm:$0xf]  ;;  %v1337_v16 = vld [vmem:[%s2127_s0 + $0xc] sm:$0xf0]  ;;  %v1336_v18 = vor.u32 %v1578_v14, %v1335_v12 }
   0x5   :  { %79 = vrot.lane.b32.xlu1 %v1308_v7, %s1628_s27  ;;  %288 = vrot.lane.b32.xlu2 %v1304_v8, %s1629_s28  ;;  %s1634_s7 = smov 107   ;;  %s1635_s8 = smov 106   ;;  %v1340_v19 = vor.u32 %v1577_v15, %v1337_v16  ;;  %v1579_v23 = vld [vmem:[%s2128_s1 + $0x20] sm:$0xff]  ;;  %v1581_v24 = vld [vmem:[%s2128_s1 + $0x30] sm:$0xff]  ;;  %vm544_vm4 = vcmask 957440   ;;  %vm670_vm5 = vcmask 949248  }
   0x6   :  { %v1580_v34 = vld [vmem:[%s2128_s1 + $0x28] sm:$0xff]  ;;  %v1582_v35 = vld [vmem:[%s2128_s1 + $0x38] sm:$0xff]  ;;  %v1573_v39 = vld [vmem:[%s2128_s1] sm:$0xff]  ;;  %vm796_vm6 = vcmask 883712   ;;  %vm922_vm7 = vcmask 875520   ;;  %vm1048_vm8 = vcmask 867328  }
   0x7   :  { %v1586_v40 = vld [vmem:[%s2128_s1 + $0x40] sm:$0xff]  ;;  %v1574_v41 = vld [vmem:[%s2128_s1 + $0x8] sm:$0xff]  ;;  %v1575_v48 = vld [vmem:[%s2128_s1 + $0x10] sm:$0xff] }
   0x8   :  { %v1587_v42 = vld [vmem:[%s2128_s1 + $0x48] sm:$0xff]  ;;  %v1588_v49 = vld [vmem:[%s2128_s1 + $0x50] sm:$0xff]  ;;  %v1576_v55 = vld [vmem:[%s2128_s1 + $0x18] sm:$0xff] }
   0x9   :  { %v1589_v56 = vld [vmem:[%s2128_s1 + $0x58] sm:$0xff]  ;;  %v1590_v57 = vld [vmem:[%s2128_s1 + $0x60] sm:$0xff]  ;;  %v1591_v59 = vld [vmem:[%s2128_s1 + $0x68] sm:$0xff] }
   0xa   :  { %v1594_v58 = vld [vmem:[%s2128_s1 + $0x80] sm:$0xff]  ;;  %v1595_v60 = vld [vmem:[%s2128_s1 + $0x88] sm:$0xff]  ;;  %v1592_v61 = vld [vmem:[%s2128_s1 + $0x70] sm:$0xff] }
   0xb   :  { %v1596_v62 = vld [vmem:[%s2128_s1 + $0x90] sm:$0xff] }
   0xc   :  { %77 = vrot.lane.b32.xlu0 %v1304_v8, %s1628_s27 }
   0xd   :  { %286 = vrot.lane.b32.xlu1 %v1300_v3, %s1629_s28  ;;  %290 = vrot.lane.b32.xlu2 %v1308_v7, %s1629_s28 }
  0x14   :  { %412 = vrot.lane.b32.xlu0 %v1300_v3, %s1630_s29 }
  0x15   :  { %414 = vrot.lane.b32.xlu1 %v1304_v8, %s1630_s29  ;;  %416 = vrot.lane.b32.xlu2 %v1308_v7, %s1630_s29 }
  0x1c   :  { %538 = vrot.lane.b32.xlu0 %v1300_v3, %s1631_s30 }
  0x1d   :  { %540 = vrot.lane.b32.xlu1 %v1304_v8, %s1631_s30  ;;  %542 = vrot.lane.b32.xlu2 %v1308_v7, %s1631_s30 }
  0x24   :  { %664 = vrot.lane.b32.xlu0 %v1300_v3, %s1632_s5 }
  0x25   :  { %666 = vrot.lane.b32.xlu1 %v1304_v8, %s1632_s5  ;;  %668 = vrot.lane.b32.xlu2 %v1308_v7, %s1632_s5 }
  0x2c   :  { %790 = vrot.lane.b32.xlu0 %v1300_v3, %s1633_s6 }
  0x2d   :  { %792 = vrot.lane.b32.xlu1 %v1304_v8, %s1633_s6  ;;  %794 = vrot.lane.b32.xlu2 %v1308_v7, %s1633_s6 }
  0x34   :  { %916 = vrot.lane.b32.xlu0 %v1300_v3, %s1634_s7 }
  0x35   :  { %918 = vrot.lane.b32.xlu1 %v1304_v8, %s1634_s7  ;;  %920 = vrot.lane.b32.xlu2 %v1308_v7, %s1634_s7 }
  0x3c   :  { %1042 = vrot.lane.b32.xlu0 %v1300_v3, %s1635_s8 }
  0x3d   :  { %1044 = vrot.lane.b32.xlu1 %v1304_v8, %s1635_s8  ;;  %1046 = vrot.lane.b32.xlu2 %v1308_v7, %s1635_s8 }
  0x5f   :  { %v289_v9 = vpop.permute.xlu2 %288 }
  0x67   :  { %v291_v13 = vpop.permute.xlu2 %290 }
  0x68   :  { %v294_v26 = vsel %vm292_vm1, %v289_v9, %v291_v13 }
  0x6f   :  { %v417_v27 = vpop.permute.xlu2 %416 }
  0x76   :  { %v76_v10 = vpop.permute.xlu0 %75 }
  0x77   :  { %v80_v11 = vpop.permute.xlu1 %79  ;;  %v543_v32 = vpop.permute.xlu2 %542 }
  0x7e   :  { %v78_v17 = vpop.permute.xlu0 %77 }
  0x7f   :  { %v82_v20 = vsel %vm81_vm0, %v76_v10, %v78_v17  ;;  %v83_v21 = vsel %vm81_vm0, %v78_v17, %v80_v11  ;;  %v287_v22 = vpop.permute.xlu1 %286  ;;  %v669_v44 = vpop.permute.xlu2 %668  ;;  %v1593_v17 = vld [vmem:[%s2128_s1 + $0x78] sm:$0xff] }
  0x80   :  { %106 = vmatpush.bf16.msra.mxu0 %v82_v20  ;;  %1614 = vmatpush.bf16.msra.mxu2 %v82_v20  ;;  %v293_v25 = vsel %vm292_vm1, %v287_v22, %v289_v9 }
  0x81   :  { %135 = vmatpush.bf16.msra.mxu1 %v83_v21  ;;  %1615 = vmatpush.bf16.msra.mxu3 %v83_v21 }
  0x83   :  { %1309 = vmatmul.msk.bf16.vlgmr.msra.gmra.mxu0 %vm86_vm2, %v1579_v23  ;;  %1311 = vmatmul.msk.bf16.vlgmr.msra.gmra.mxu2 %vm86_vm2, %v1581_v24 }
  0x84   :  { %206 = vmatpush.bf16.msrb.mxu2 %v1336_v18  ;;  %1313 = vmatmul.msk.bf16.vlgmr.msra.gmra.mxu1 %vm86_vm2, %v1579_v23  ;;  %v1597_v18 = vld [vmem:[%s2128_s1 + $0x98] sm:$0xff] }
  0x85   :  { %235 = vmatpush.bf16.msrb.mxu3 %v1340_v19  ;;  %316 = vmatpush.bf16.msrb.mxu0 %v293_v25 }
  0x86   :  { %1315 = vmatmul.msk.bf16.vlgmr.msra.gmra.mxu3 %vm86_vm2, %v1581_v24  ;;  %345 = vmatpush.bf16.msrb.mxu1 %v294_v26  ;;  %v413_v28 = vpop.permute.xlu0 %412 }
  0x87   :  { %v415_v29 = vpop.permute.xlu1 %414  ;;  %v795_v51 = vpop.permute.xlu2 %794 }
  0x88   :  { %v420_v30 = vsel %vm418_vm3, %v415_v29, %v417_v27  ;;  %v419_v31 = vsel %vm418_vm3, %v413_v28, %v415_v29  ;;  %v1598_v27 = vld [vmem:[%s2128_s1 + $0xa0] sm:$0xff] }
  0x89   :  { %442 = vmatpush.bf16.msra.mxu2 %v419_v31  ;;  %471 = vmatpush.bf16.msra.mxu3 %v420_v30  ;;  %v1602_v28 = vld [vmem:[%s2128_s1 + $0xc0] sm:$0xff] }
  0x8e   :  { %v539_v33 = vpop.permute.xlu0 %538 }
  0x8f   :  { %v541_v36 = vpop.permute.xlu1 %540  ;;  %v921_v2 = vpop.permute.xlu2 %920 }
  0x90   :  { %v546_v37 = vsel %vm544_vm4, %v541_v36, %v543_v32  ;;  %v545_v38 = vsel %vm544_vm4, %v539_v33, %v541_v36 }
  0x91   :  { %568 = vmatpush.bf16.msra.mxu0 %v545_v38  ;;  %597 = vmatpush.bf16.msra.mxu1 %v546_v37 }
  0x93   :  { %1310 = vmatmul.msk.bf16.gmra.mxu0 %vm86_vm2, %v1580_v34  ;;  %1312 = vmatmul.msk.bf16.gmra.mxu2 %vm86_vm2, %v1582_v35 }
  0x94   :  { %1314 = vmatmul.msk.bf16.gmra.mxu1 %vm86_vm2, %v1580_v34 }
  0x96   :  { %1316 = vmatmul.msk.bf16.gmra.mxu3 %vm86_vm2, %v1582_v35  ;;  %v665_v46 = vpop.permute.xlu0 %664 }
  0x97   :  { %v667_v43 = vpop.permute.xlu1 %666  ;;  %v1047_v11 = vpop.permute.xlu2 %1046 }
  0x98   :  { %v672_v45 = vsel %vm670_vm5, %v667_v43, %v669_v44  ;;  %v671_v47 = vsel %vm670_vm5, %v665_v46, %v667_v43  ;;  %v1603_v43 = vld [vmem:[%s2128_s1 + $0xc8] sm:$0xff] }
  0x9e   :  { %v791_v53 = vpop.permute.xlu0 %790 }
  0x9f   :  { %v793_v50 = vpop.permute.xlu1 %792 }
  0xa0   :  { %v798_v52 = vsel %vm796_vm6, %v793_v50, %v795_v51  ;;  %v797_v54 = vsel %vm796_vm6, %v791_v53, %v793_v50 }
  0xa3   :  { %1341 = vmatmul.msk.bf16.vlgmr.msrb.gmra.mxu2 %vm86_vm2, %v1573_v39  ;;  %1373 = vmatmul.msk.bf16.vlgmr.msrb.gmra.mxu0 %vm86_vm2, %v1586_v40 }
  0xa4   :  { %1377 = vmatmul.msk.bf16.vlgmr.msrb.gmra.mxu1 %vm86_vm2, %v1586_v40  ;;  %694 = vmatpush.bf16.msrb.mxu2 %v671_v47 }
  0xa5   :  { %849 = vmatpush.bf16.msrb.mxu1 %v798_v52  ;;  %820 = vmatpush.bf16.msrb.mxu0 %v797_v54 }
  0xa6   :  { %1345 = vmatmul.msk.bf16.vlgmr.msrb.gmra.mxu3 %vm86_vm2, %v1573_v39  ;;  %v917_v3 = vpop.permute.xlu0 %916 }
  0xa7   :  { %723 = vmatpush.bf16.msrb.mxu3 %v672_v45  ;;  %v919_v1 = vpop.permute.xlu1 %918 }
  0xa8   :  { %v924_v4 = vsel %vm922_vm7, %v919_v1, %v921_v2  ;;  %v923_v5 = vsel %vm922_vm7, %v917_v3, %v919_v1 }
  0xae   :  { %v1043_v12 = vpop.permute.xlu0 %1042 }
  0xaf   :  { %v1045_v10 = vpop.permute.xlu1 %1044 }
  0xb0   :  { %v1050_v13 = vsel %vm1048_vm8, %v1045_v10, %v1047_v11  ;;  %v1049_v14 = vsel %vm1048_vm8, %v1043_v12, %v1045_v10 }
  0xb3   :  { %1342 = vmatmul.msk.bf16.gmra.mxu2 %vm86_vm2, %v1574_v41  ;;  %1374 = vmatmul.msk.bf16.gmra.mxu0 %vm86_vm2, %v1587_v42 }
  0xb4   :  { %1378 = vmatmul.msk.bf16.gmra.mxu1 %vm86_vm2, %v1587_v42  ;;  %v1599_v42 = vld [vmem:[%s2128_s1 + $0xa8] sm:$0xff] }
  0xb6   :  { %1346 = vmatmul.msk.bf16.gmra.mxu3 %vm86_vm2, %v1574_v41 }
  0xc3   :  { %1343 = vmatmul.msk.bf16.gmra.mxu2 %vm86_vm2, %v1575_v48  ;;  %1375 = vmatmul.msk.bf16.gmra.mxu0 %vm86_vm2, %v1588_v49 }
  0xc4   :  { %1379 = vmatmul.msk.bf16.gmra.mxu1 %vm86_vm2, %v1588_v49 }
  0xc6   :  { %1347 = vmatmul.msk.bf16.gmra.mxu3 %vm86_vm2, %v1575_v48 }
  0xd3   :  { %1344 = vmatmul.msk.bf16.gmra.mxu2 %vm86_vm2, %v1576_v55  ;;  %1376 = vmatmul.msk.bf16.gmra.mxu0 %vm86_vm2, %v1589_v56 }
  0xd4   :  { %1380 = vmatmul.msk.bf16.gmra.mxu1 %vm86_vm2, %v1589_v56 }
  0xd6   :  { %1348 = vmatmul.msk.bf16.gmra.mxu3 %vm86_vm2, %v1576_v55 }
  0xe3   :  { %1405 = vmatmul.msk.bf16.vlgmr.msra.gmra.mxu2 %vm86_vm2, %v1590_v57  ;;  %1437 = vmatmul.msk.bf16.vlgmr.msra.gmra.mxu0 %vm86_vm2, %v1594_v58 }
  0xe4   :  { %1441 = vmatmul.msk.bf16.vlgmr.msra.gmra.mxu1 %vm86_vm2, %v1594_v58  ;;  %946 = vmatpush.bf16.msra.mxu2 %v923_v5 }
  0xe5   :  { %1072 = vmatpush.bf16.msra.mxu0 %v1049_v14  ;;  %1101 = vmatpush.bf16.msra.mxu1 %v1050_v13 }
  0xe6   :  { %1409 = vmatmul.msk.bf16.vlgmr.msra.gmra.mxu3 %vm86_vm2, %v1590_v57 }
  0xe7   :  { %975 = vmatpush.bf16.msra.mxu3 %v924_v4 }
  0xf3   :  { %1406 = vmatmul.msk.bf16.gmra.mxu2 %vm86_vm2, %v1591_v59  ;;  %1438 = vmatmul.msk.bf16.gmra.mxu0 %vm86_vm2, %v1595_v60 }
  0xf4   :  { %1442 = vmatmul.msk.bf16.gmra.mxu1 %vm86_vm2, %v1595_v60  ;;  %v1600_v60 = vld [vmem:[%s2128_s1 + $0xb0] sm:$0xff] }
  0xf6   :  { %1410 = vmatmul.msk.bf16.gmra.mxu3 %vm86_vm2, %v1591_v59 }
 0x100   :  { %v108_v63 = vpop.f32.mrf.mxu0 }
 0x101   :  { %v137_v0 = vpop.f32.mrf.mxu1 }
 0x103   :  { %1407 = vmatmul.msk.bf16.gmra.mxu2 %vm86_vm2, %v1592_v61  ;;  %1439 = vmatmul.msk.bf16.gmra.mxu0 %vm86_vm2, %v1596_v62 }
 0x104   :  { %1443 = vmatmul.msk.bf16.gmra.mxu1 %vm86_vm2, %v1596_v62 }
 0x106   :  { %1411 = vmatmul.msk.bf16.gmra.mxu3 %vm86_vm2, %v1592_v61  ;;  %v1782_v6 = vpop.f32.mrf.mxu2  ;;  %v1604_v61 = vld [vmem:[%s2128_s1 + $0xd0] sm:$0xff] }
 0x108   :  { %v110_v8 = vpop.f32.mrf.mxu0 }
 0x109   :  { %v1784_v7 = vpop.f32.mrf.mxu3  ;;  %v139_v9 = vpop.f32.mrf.mxu1 }
 0x10e   :  { %v1786_v15 = vpop.f32.mrf.mxu2 }
 0x110   :  { %v113_v19 = vpop.f32.mrf.mxu0 }
 0x111   :  { %v1788_v16 = vpop.f32.mrf.mxu3  ;;  %v142_v20 = vpop.f32.mrf.mxu1 }
 0x113   :  { %1408 = vmatmul.msk.bf16.gmra.mxu2 %vm86_vm2, %v1593_v17  ;;  %1440 = vmatmul.msk.bf16.gmra.mxu0 %vm86_vm2, %v1597_v18 }
 0x114   :  { %1444 = vmatmul.msk.bf16.gmra.mxu1 %vm86_vm2, %v1597_v18  ;;  %v1601_v18 = vld [vmem:[%s2128_s1 + $0xb8] sm:$0xff] }
 0x116   :  { %1412 = vmatmul.msk.bf16.gmra.mxu3 %vm86_vm2, %v1593_v17  ;;  %v1800_v21 = vpop.f32.mrf.mxu2 }
 0x118   :  { %v115_v23 = vpop.f32.mrf.mxu0 }
 0x119   :  { %v1802_v22 = vpop.f32.mrf.mxu3  ;;  %v144_v24 = vpop.f32.mrf.mxu1 }
 0x11e   :  { %v1804_v25 = vpop.f32.mrf.mxu2 }
 0x120   :  { %v318_v29 = vpop.f32.mrf.mxu0 }
 0x121   :  { %v1806_v26 = vpop.f32.mrf.mxu3  ;;  %v347_v30 = vpop.f32.mrf.mxu1 }
 0x123   :  { %1469 = vmatmul.msk.bf16.vlgmr.msrb.gmra.mxu2 %vm86_vm2, %v1598_v27  ;;  %1501 = vmatmul.msk.bf16.vlgmr.msrb.gmra.mxu0 %vm86_vm2, %v1602_v28 }
 0x124   :  { %1505 = vmatmul.msk.bf16.vlgmr.msrb.gmra.mxu1 %vm86_vm2, %v1602_v28 }
 0x126   :  { %1473 = vmatmul.msk.bf16.vlgmr.msrb.gmra.mxu3 %vm86_vm2, %v1598_v27  ;;  %v208_v31 = vpop.f32.mrf.mxu2 }
 0x127   :  { %v209_v32 = vadd.f32 %v208_v31, %v108_v63  ;;  %v1139_v31 = vld [vmem:[%s2129_s2] sm:$0xff] }
 0x128   :  { %v320_v35 = vpop.f32.mrf.mxu0 }
 0x129   :  { %v237_v33 = vpop.f32.mrf.mxu3  ;;  %v349_v36 = vpop.f32.mrf.mxu1  ;;  %v1818_v37 = vadd.f32 %v318_v29, %v209_v32 }
 0x12a   :  { %v238_v34 = vadd.f32 %v237_v33, %v137_v0 }
 0x12c   :  { %v1820_v38 = vadd.f32 %v347_v30, %v238_v34  ;;  %v1636_v30 = vmov 0  }
 0x12d   :  { %1625 = vset.pattern.permute.xlu0 %v1636_v30  ;;  %1626 = vset.pattern.permute.xlu1 %v1636_v30 }
 0x12e   :  { %v210_v39 = vpop.f32.mrf.mxu2  ;;  %1149 = vperm.xlu0 %1625, %v1139_v31   ;;  %1627 = vset.pattern.permute.xlu2 %v1636_v30 }
 0x12f   :  { %v211_v40 = vadd.f32 %v210_v39, %v110_v8  ;;  %v1610_v39 = vld [vmem:[%s2128_s1 + $0x100] sm:$0xff] }
 0x130   :  { %v323_v45 = vpop.f32.mrf.mxu0 }
 0x131   :  { %v239_v41 = vpop.f32.mrf.mxu3  ;;  %v352_v46 = vpop.f32.mrf.mxu1  ;;  %v1828_v47 = vadd.f32 %v320_v35, %v211_v40 }
 0x132   :  { %v240_v44 = vadd.f32 %v239_v41, %v139_v9 }
 0x133   :  { %1470 = vmatmul.msk.bf16.gmra.mxu2 %vm86_vm2, %v1599_v42  ;;  %1502 = vmatmul.msk.bf16.gmra.mxu0 %vm86_vm2, %v1603_v43 }
 0x134   :  { %v1830_v48 = vadd.f32 %v349_v36, %v240_v44  ;;  %1506 = vmatmul.msk.bf16.gmra.mxu1 %vm86_vm2, %v1603_v43 }
 0x136   :  { %1474 = vmatmul.msk.bf16.gmra.mxu3 %vm86_vm2, %v1599_v42  ;;  %v213_v49 = vpop.f32.mrf.mxu2  ;;  %v1140_v42 = vld [vmem:[%s2129_s2 + $0x8] sm:$0xff] }
 0x137   :  { %v214_v50 = vadd.f32 %v213_v49, %v113_v19  ;;  %1154 = vperm.xlu1 %1626, %v1140_v42  }
 0x138   :  { %v325_v53 = vpop.f32.mrf.mxu0 }
 0x139   :  { %v242_v51 = vpop.f32.mrf.mxu3  ;;  %v354_v54 = vpop.f32.mrf.mxu1  ;;  %v1836_v55 = vadd.f32 %v323_v45, %v214_v50 }
 0x13a   :  { %v243_v52 = vadd.f32 %v242_v51, %v142_v20 }
 0x13c   :  { %v1838_v56 = vadd.f32 %v352_v46, %v243_v52 }
 0x13e   :  { %v215_v57 = vpop.f32.mrf.mxu2 }
 0x13f   :  { %v216_v58 = vadd.f32 %v215_v57, %v115_v23 }
 0x140   :  { %v328_v63 = vpop.f32.mrf.mxu0 }
 0x141   :  { %v244_v59 = vpop.f32.mrf.mxu3  ;;  %v357_v0 = vpop.f32.mrf.mxu1  ;;  %v1846_v1 = vadd.f32 %v325_v53, %v216_v58 }
 0x142   :  { %v245_v62 = vadd.f32 %v244_v59, %v144_v24  ;;  %v1607_v59 = vld [vmem:[%s2128_s1 + $0xe8] sm:$0xff] }
 0x143   :  { %1471 = vmatmul.msk.bf16.gmra.mxu2 %vm86_vm2, %v1600_v60  ;;  %1503 = vmatmul.msk.bf16.gmra.mxu0 %vm86_vm2, %v1604_v61 }
 0x144   :  { %v1848_v2 = vadd.f32 %v354_v54, %v245_v62  ;;  %1507 = vmatmul.msk.bf16.gmra.mxu1 %vm86_vm2, %v1604_v61  ;;  %v1142_v61 = vld [vmem:[%s2129_s2 + $0x18] sm:$0xff] }
 0x145   :  { %1164 = vperm.xlu1 %1626, %v1142_v61  }
 0x146   :  { %1475 = vmatmul.msk.bf16.gmra.mxu3 %vm86_vm2, %v1600_v60  ;;  %v218_v3 = vpop.f32.mrf.mxu2 }
 0x147   :  { %v219_v4 = vadd.f32 %v218_v3, %v1782_v6  ;;  %v1605_v6 = vld [vmem:[%s2128_s1 + $0xd8] sm:$0xff] }
 0x148   :  { %v330_v9 = vpop.f32.mrf.mxu0 }
 0x149   :  { %v247_v5 = vpop.f32.mrf.mxu3  ;;  %v359_v10 = vpop.f32.mrf.mxu1  ;;  %v1856_v11 = vadd.f32 %v328_v63, %v219_v4 }
 0x14a   :  { %v248_v8 = vadd.f32 %v247_v5, %v1784_v7 }
 0x14c   :  { %v1858_v12 = vadd.f32 %v357_v0, %v248_v8 }
 0x14e   :  { %v220_v13 = vpop.f32.mrf.mxu2 }
 0x14f   :  { %v221_v14 = vadd.f32 %v220_v13, %v1786_v15 }
 0x150   :  { %v333_v19 = vpop.f32.mrf.mxu0 }
 0x151   :  { %v249_v17 = vpop.f32.mrf.mxu3  ;;  %v362_v20 = vpop.f32.mrf.mxu1  ;;  %v1868_v23 = vadd.f32 %v330_v9, %v221_v14 }
 0x152   :  { %v250_v7 = vadd.f32 %v249_v17, %v1788_v16 }
 0x153   :  { %1472 = vmatmul.msk.bf16.gmra.mxu2 %vm86_vm2, %v1601_v18  ;;  %1504 = vmatmul.msk.bf16.gmra.mxu0 %vm86_vm2, %v1605_v6 }
 0x154   :  { %v1870_v24 = vadd.f32 %v359_v10, %v250_v7  ;;  %1508 = vmatmul.msk.bf16.gmra.mxu1 %vm86_vm2, %v1605_v6  ;;  %v1145_v7 = vld [vmem:[%s2129_s2 + $0x30] sm:$0xff] }
 0x155   :  { %1179 = vperm.xlu1 %1626, %v1145_v7  }
 0x156   :  { %1476 = vmatmul.msk.bf16.gmra.mxu3 %vm86_vm2, %v1601_v18  ;;  %v223_v15 = vpop.f32.mrf.mxu2  ;;  %v1608_v18 = vld [vmem:[%s2128_s1 + $0xf0] sm:$0xff] }
 0x157   :  { %v224_v27 = vadd.f32 %v223_v15, %v1800_v21 }
 0x158   :  { %v335_v29 = vpop.f32.mrf.mxu0 }
 0x159   :  { %v252_v28 = vpop.f32.mrf.mxu3  ;;  %v364_v32 = vpop.f32.mrf.mxu1  ;;  %v1881_v33 = vadd.f32 %v333_v19, %v224_v27  ;;  %v1144_v19 = vld [vmem:[%s2129_s2 + $0x28] sm:$0xff] }
 0x15a   :  { %v253_v16 = vadd.f32 %v252_v28, %v1802_v22  ;;  %v1606_v22 = vld [vmem:[%s2128_s1 + $0xe0] sm:$0xff]  ;;  %1174 = vperm.xlu0 %1625, %v1144_v19  }
 0x15c   :  { %v1883_v34 = vadd.f32 %v362_v20, %v253_v16 }
 0x15e   :  { %v225_v35 = vpop.f32.mrf.mxu2 }
 0x15f   :  { %v226_v21 = vadd.f32 %v225_v35, %v1804_v25 }
 0x160   :  { %v570_v41 = vpop.f32.mrf.mxu0 }
 0x161   :  { %v254_v36 = vpop.f32.mrf.mxu3  ;;  %v599_v43 = vpop.f32.mrf.mxu1  ;;  %v1896_v44 = vadd.f32 %v335_v29, %v226_v21 }
 0x162   :  { %v255_v40 = vadd.f32 %v254_v36, %v1806_v26 }
 0x163   :  { %1533 = vmatmul.msk.bf16.vlgmr.msra.gmra.mxu2 %vm86_vm2, %v1606_v22  ;;  %1565 = vmatmul.msk.bf16.vlgmr.msra.gmra.mxu0 %vm86_vm2, %v1610_v39 }
 0x164   :  { %v1898_v25 = vadd.f32 %v364_v32, %v255_v40  ;;  %1569 = vmatmul.msk.bf16.vlgmr.msra.gmra.mxu1 %vm86_vm2, %v1610_v39  ;;  %v1609_v39 = vld [vmem:[%s2128_s1 + $0xf8] sm:$0xff] }
 0x166   :  { %1537 = vmatmul.msk.bf16.vlgmr.msra.gmra.mxu3 %vm86_vm2, %v1606_v22  ;;  %v444_v26 = vpop.f32.mrf.mxu2 }
 0x167   :  { %v493_v45 = vadd.f32 %v444_v26, %v1818_v37  ;;  %v1611_v37 = vld [vmem:[%s2128_s1 + $0x108] sm:$0xff] }
 0x168   :  { %v572_v50 = vpop.f32.mrf.mxu0 }
 0x169   :  { %v473_v46 = vpop.f32.mrf.mxu3  ;;  %v601_v51 = vpop.f32.mrf.mxu1  ;;  %v1906_v52 = vadd.f32 %v570_v41, %v493_v45  ;;  %v1143_v41 = vld [vmem:[%s2129_s2 + $0x20] sm:$0xff] }
 0x16a   :  { %v494_v49 = vadd.f32 %v473_v46, %v1820_v38 }
 0x16c   :  { %v1908_v53 = vadd.f32 %v599_v43, %v494_v49 }
 0x16e   :  { %v446_v54 = vpop.f32.mrf.mxu2 }
 0x16f   :  { %v495_v57 = vadd.f32 %v446_v54, %v1828_v47 }
 0x170   :  { %v575_v60 = vpop.f32.mrf.mxu0 }
 0x171   :  { %v475_v58 = vpop.f32.mrf.mxu3  ;;  %v604_v62 = vpop.f32.mrf.mxu1  ;;  %v1921_v63 = vadd.f32 %v572_v50, %v495_v57  ;;  %v1146_v50 = vld [vmem:[%s2129_s2 + $0x38] sm:$0xff] }
 0x172   :  { %v496_v38 = vadd.f32 %v475_v58, %v1830_v48 }
 0x173   :  { %1534 = vmatmul.msk.bf16.gmra.mxu2 %vm86_vm2, %v1607_v59  ;;  %1566 = vmatmul.msk.bf16.gmra.mxu0 %vm86_vm2, %v1611_v37 }
 0x174   :  { %v1923_v47 = vadd.f32 %v601_v51, %v496_v38  ;;  %1570 = vmatmul.msk.bf16.gmra.mxu1 %vm86_vm2, %v1611_v37 }
 0x176   :  { %1538 = vmatmul.msk.bf16.gmra.mxu3 %vm86_vm2, %v1607_v59  ;;  %v449_v48 = vpop.f32.mrf.mxu2 }
 0x177   :  { %v497_v0 = vadd.f32 %v449_v48, %v1836_v55  ;;  %v1612_v55 = vld [vmem:[%s2128_s1 + $0x110] sm:$0xff] }
 0x178   :  { %v577_v5 = vpop.f32.mrf.mxu0 }
 0x179   :  { %v478_v3 = vpop.f32.mrf.mxu3  ;;  %v606_v8 = vpop.f32.mrf.mxu1  ;;  %v1931_v9 = vadd.f32 %v575_v60, %v497_v0 }
 0x17a   :  { %v498_v4 = vadd.f32 %v478_v3, %v1838_v56 }
 0x17c   :  { %v1933_v10 = vadd.f32 %v604_v62, %v498_v4 }
 0x17e   :  { %v451_v13 = vpop.f32.mrf.mxu2 }
 0x17f   :  { %v499_v14 = vadd.f32 %v451_v13, %v1846_v1  ;;  %v1141_v1 = vld [vmem:[%s2129_s2 + $0x10] sm:$0xff] }
 0x180   :  { %v580_v6 = vpop.f32.mrf.mxu0  ;;  %1159 = vperm.xlu2 %1627, %v1141_v1  }
 0x181   :  { %v480_v17 = vpop.f32.mrf.mxu3  ;;  %v609_v20 = vpop.f32.mrf.mxu1  ;;  %v1952_v15 = vadd.f32 %v577_v5, %v499_v14 }
 0x182   :  { %v500_v56 = vadd.f32 %v480_v17, %v1848_v2 }
 0x183   :  { %1535 = vmatmul.msk.bf16.gmra.mxu2 %vm86_vm2, %v1608_v18  ;;  %1567 = vmatmul.msk.bf16.gmra.mxu0 %vm86_vm2, %v1612_v55 }
 0x184   :  { %v1954_v2 = vadd.f32 %v606_v8, %v500_v56  ;;  %1571 = vmatmul.msk.bf16.gmra.mxu1 %vm86_vm2, %v1612_v55 }
 0x186   :  { %1539 = vmatmul.msk.bf16.gmra.mxu3 %vm86_vm2, %v1608_v18  ;;  %v454_v27 = vpop.f32.mrf.mxu2 }
 0x187   :  { %v501_v28 = vadd.f32 %v454_v27, %v1856_v11  ;;  %v1613_v11 = vld [vmem:[%s2128_s1 + $0x118] sm:$0xff] }
 0x188   :  { %v582_v30 = vpop.f32.mrf.mxu0  ;;  %1169 = vperm.xlu2 %1627, %v1143_v41  }
 0x189   :  { %v483_v16 = vpop.f32.mrf.mxu3  ;;  %v611_v31 = vpop.f32.mrf.mxu1  ;;  %v1962_v32 = vadd.f32 %v580_v6, %v501_v28 }
 0x18a   :  { %v502_v29 = vadd.f32 %v483_v16, %v1858_v12 }
 0x18c   :  { %v1964_v35 = vadd.f32 %v609_v20, %v502_v29 }
 0x18e   :  { %v456_v21 = vpop.f32.mrf.mxu2 }
 0x18f   :  { %v503_v36 = vadd.f32 %v456_v21, %v1868_v23 }
 0x190   :  { %v585_v40 = vpop.f32.mrf.mxu0  ;;  %1184 = vperm.xlu2 %1627, %v1146_v50  }
 0x191   :  { %v485_v22 = vpop.f32.mrf.mxu3  ;;  %v614_v42 = vpop.f32.mrf.mxu1  ;;  %v1977_v43 = vadd.f32 %v582_v30, %v503_v36 }
 0x192   :  { %v504_v12 = vadd.f32 %v485_v22, %v1870_v24 }
 0x193   :  { %1536 = vmatmul.msk.bf16.gmra.mxu2 %vm86_vm2, %v1609_v39  ;;  %1568 = vmatmul.msk.bf16.gmra.mxu0 %vm86_vm2, %v1613_v11 }
 0x194   :  { %v1979_v23 = vadd.f32 %v611_v31, %v504_v12  ;;  %1572 = vmatmul.msk.bf16.gmra.mxu1 %vm86_vm2, %v1613_v11 }
 0x196   :  { %1540 = vmatmul.msk.bf16.gmra.mxu3 %vm86_vm2, %v1609_v39  ;;  %v459_v24 = vpop.f32.mrf.mxu2 }
 0x197   :  { %v505_v26 = vadd.f32 %v459_v24, %v1881_v33 }
 0x198   :  { %v587_v49 = vpop.f32.mrf.mxu0 }
 0x199   :  { %v488_v45 = vpop.f32.mrf.mxu3  ;;  %v616_v51 = vpop.f32.mrf.mxu1  ;;  %v1990_v54 = vadd.f32 %v585_v40, %v505_v26 }
 0x19a   :  { %v506_v46 = vadd.f32 %v488_v45, %v1883_v34 }
 0x19c   :  { %v1992_v57 = vadd.f32 %v614_v42, %v506_v46 }
 0x19e   :  { %v461_v58 = vpop.f32.mrf.mxu2 }
 0x19f   :  { %v507_v59 = vadd.f32 %v461_v58, %v1896_v44 }
 0x1a0   :  { %v822_v38 = vpop.f32.mrf.mxu0 }
 0x1a1   :  { %v490_v37 = vpop.f32.mrf.mxu3  ;;  %v851_v60 = vpop.f32.mrf.mxu1  ;;  %v1996_v34 = vadd.f32 %v587_v49, %v507_v59 }
 0x1a2   :  { %v508_v33 = vadd.f32 %v490_v37, %v1898_v25 }
 0x1a4   :  { %v1998_v61 = vadd.f32 %v616_v51, %v508_v33  ;;  %v1150_v51 = vpop.permute.xlu0 %1149 }
 0x1a6   :  { %v696_v62 = vpop.f32.mrf.mxu2 }
 0x1a7   :  { %v745_v12 = vadd.f32 %v696_v62, %v1906_v52  ;;  %v2051_v52 = vstv %s2130_s3 }
 0x1a8   :  { %v824_v0 = vpop.f32.mrf.mxu0 }
 0x1a9   :  { %v725_v48 = vpop.f32.mrf.mxu3  ;;  %v853_v3 = vpop.f32.mrf.mxu1  ;;  %v871_v42 = vadd.f32 %v822_v38, %v745_v12 }
 0x1aa   :  { %v746_v41 = vadd.f32 %v725_v48, %v1908_v53 }
 0x1ac   :  { %v872_v26 = vadd.f32 %v851_v60, %v746_v41 }
 0x1ae   :  { %v698_v4 = vpop.f32.mrf.mxu2 }
 0x1af   :  { %v747_v58 = vadd.f32 %v698_v4, %v1921_v63 }
 0x1b0   :  { %v2000_v8 = vpop.f32.mrf.mxu0 }
 0x1b1   :  { %v727_v5 = vpop.f32.mrf.mxu3  ;;  %v2002_v13 = vpop.f32.mrf.mxu1  ;;  %v873_v62 = vadd.f32 %v824_v0, %v747_v58 }
 0x1b2   :  { %v748_v33 = vadd.f32 %v727_v5, %v1923_v47 }
 0x1b4   :  { %v874_v4 = vadd.f32 %v853_v3, %v748_v33 }
 0x1b6   :  { %v701_v44 = vpop.f32.mrf.mxu2 }
 0x1b8   :  { %v2004_v17 = vpop.f32.mrf.mxu0 }
 0x1b9   :  { %v730_v14 = vpop.f32.mrf.mxu3  ;;  %v2006_v25 = vpop.f32.mrf.mxu1 }
 0x1be   :  { %v2008_v18 = vpop.f32.mrf.mxu2 }
 0x1c0   :  { %v2012_v56 = vpop.f32.mrf.mxu0 }
 0x1c1   :  { %v2010_v55 = vpop.f32.mrf.mxu3  ;;  %v2014_v6 = vpop.f32.mrf.mxu1 }
 0x1c6   :  { %v2016_v7 = vpop.f32.mrf.mxu2 }
 0x1c8   :  { %v2020_v19 = vpop.f32.mrf.mxu0 }
 0x1c9   :  { %v2018_v1 = vpop.f32.mrf.mxu3  ;;  %v2022_v20 = vpop.f32.mrf.mxu1 }
 0x1ce   :  { %v2024_v27 = vpop.f32.mrf.mxu2 }
 0x1d0   :  { %v2028_v16 = vpop.f32.mrf.mxu0 }
 0x1d1   :  { %v2026_v28 = vpop.f32.mrf.mxu3  ;;  %v2030_v29 = vpop.f32.mrf.mxu1 }
 0x1d6   :  { %v2032_v30 = vpop.f32.mrf.mxu2 }
 0x1d8   :  { %v2036_v21 = vpop.f32.mrf.mxu0 }
 0x1d9   :  { %v2034_v31 = vpop.f32.mrf.mxu3  ;;  %v2038_v36 = vpop.f32.mrf.mxu1 }
 0x1da   :  { %2132 = vst [vmem:[#allocation3_spill] sm:$0xff] %v2038_v36 }
 0x1de   :  { %v2040_v22 = vpop.f32.mrf.mxu2 }
 0x1e0   :  { %v1074_v11 = vpop.f32.mrf.mxu0 }
 0x1e1   :  { %v2042_v39 = vpop.f32.mrf.mxu3  ;;  %v1103_v40 = vpop.f32.mrf.mxu1 }
 0x1e6   :  { %v948_v24 = vpop.f32.mrf.mxu2 }
 0x1e7   :  { %v997_v45 = vadd.f32 %v948_v24, %v871_v42  ;;  %v1155_v42 = vpop.permute.xlu1 %1154  ;;  %v749_v24 = vadd.f32 %v701_v44, %v1931_v9 }
 0x1e8   :  { %v1076_v50 = vpop.f32.mrf.mxu0 }
 0x1e9   :  { %v977_v46 = vpop.f32.mrf.mxu3  ;;  %v1123_v59 = vadd.f32 %v1074_v11, %v997_v45  ;;  %v1105_v37 = vpop.f32.mrf.mxu1  ;;  %v875_v58 = vadd.f32 %v2000_v8, %v749_v24  ;;  %v752_v8 = vadd.f32 %v2010_v55, %v1954_v2 }
 0x1ea   :  { %v998_v49 = vadd.f32 %v977_v46, %v872_v26  ;;  %v750_v46 = vadd.f32 %v730_v14, %v1933_v10 }
 0x1eb   :  { %v1187_v53 = vadd.f32 %v1150_v51, %v1123_v59 }
 0x1ec   :  { %v1124_v36 = vadd.f32 %v1103_v40, %v998_v49 }
 0x1ed   :  { %vm1204_vm9 = vcmp.ge.f32.partialorder %v1187_v53, 0.0  ;;  %v1221_v60 = vmul.f32 %v2051_v52, %v1187_v53 }
 0x1ee   :  { %v1188_v38 = vadd.f32 %v1150_v51, %v1124_v36  ;;  %v950_v63 = vpop.f32.mrf.mxu2 }
 0x1ef   :  { %v1237_v11 = vsel %vm1204_vm9, %v1187_v53, %v1221_v60  ;;  %v999_v12 = vadd.f32 %v950_v63, %v873_v62  ;;  %v751_v60 = vadd.f32 %v2008_v18, %v1952_v15  ;;  %v1165_v24 = vpop.permute.xlu1 %1164 }
 0x1f0   :  { %vm1205_vm10 = vcmp.ge.f32.partialorder %v1188_v38, 0.0  ;;  %v1222_v48 = vmul.f32 %v2051_v52, %v1188_v38  ;;  %v1079_v41 = vpop.f32.mrf.mxu0 }
 0x1f1   :  { %v979_v47 = vpop.f32.mrf.mxu3  ;;  %v1125_v36 = vadd.f32 %v1076_v50, %v999_v12  ;;  %v1108_v45 = vpop.f32.mrf.mxu1  ;;  %v876_v50 = vadd.f32 %v2002_v13, %v750_v46 }
 0x1f2   :  { %v1238_v5 = vsel %vm1205_vm10, %v1188_v38, %v1222_v48  ;;  %v1000_v40 = vadd.f32 %v979_v47, %v874_v4  ;;  %v1160_v38 = vpop.permute.xlu2 %1159  ;;  %v877_v47 = vadd.f32 %v2004_v17, %v751_v60  ;;  %v754_v17 = vadd.f32 %v2018_v1, %v1964_v35 }
 0x1f3   :  { %v1253_v26 = vpack.c.bf16 %v1238_v5, %v1237_v11  ;;  %v1189_v3 = vadd.f32 %v1155_v42, %v1125_v36  ;;  %v878_v5 = vadd.f32 %v2006_v25, %v752_v8 }
 0x1f4   :  { %v1126_v0 = vadd.f32 %v1105_v37, %v1000_v40  ;;  %v880_v35 = vadd.f32 %v2014_v6, %v754_v17  ;;  %v759_v17 = vadd.f32 %v2040_v22, %v1996_v34 }
 0x1f5   :  { %1261 = vst [vmem:[%s2131_s4] sm:$0xff] %v1253_v26  ;;  %vm1206_vm11 = vcmp.ge.f32.partialorder %v1189_v3, 0.0  ;;  %v1223_v51 = vmul.f32 %v2051_v52, %v1189_v3  ;;  %v753_v26 = vadd.f32 %v2016_v7, %v1962_v32 }
 0x1f6   :  { %v1190_v49 = vadd.f32 %v1155_v42, %v1126_v0  ;;  %v953_v44 = vpop.f32.mrf.mxu2 }
 0x1f7   :  { %v1239_v59 = vsel %vm1206_vm11, %v1189_v3, %v1223_v51  ;;  %v1001_v10 = vadd.f32 %v953_v44, %v875_v58  ;;  %v879_v58 = vadd.f32 %v2012_v56, %v753_v26  ;;  %v756_v56 = vadd.f32 %v2026_v28, %v1979_v23 }
 0x1f8   :  { %vm1207_vm12 = vcmp.ge.f32.partialorder %v1190_v49, 0.0  ;;  %v1224_v9 = vmul.f32 %v2051_v52, %v1190_v49  ;;  %v1081_v53 = vpop.f32.mrf.mxu0 }
 0x1f9   :  { %v982_v14 = vpop.f32.mrf.mxu3  ;;  %v1127_v48 = vadd.f32 %v1079_v41, %v1001_v10  ;;  %v1110_v63 = vpop.f32.mrf.mxu1  ;;  %v882_v23 = vadd.f32 %v2022_v20, %v756_v56 }
 0x1fa   :  { %v1240_v37 = vsel %vm1207_vm12, %v1190_v49, %v1224_v9  ;;  %v1002_v33 = vadd.f32 %v982_v14, %v876_v50  ;;  %v1170_v10 = vpop.permute.xlu2 %1169  ;;  %v755_v14 = vadd.f32 %v2024_v27, %v1977_v43 }
 0x1fb   :  { %v1254_v62 = vpack.c.bf16 %v1240_v37, %v1239_v59  ;;  %v1191_v13 = vadd.f32 %v1160_v38, %v1127_v48 }
 0x1fc   :  { %v1128_v4 = vadd.f32 %v1108_v45, %v1002_v33 }
 0x1fd   :  { %1262 = vst [vmem:[%s2131_s4 + $0x8] sm:$0xff] %v1254_v62  ;;  %vm1208_vm13 = vcmp.ge.f32.partialorder %v1191_v13, 0.0  ;;  %v1225_v12 = vmul.f32 %v2051_v52, %v1191_v13 }
 0x1fe   :  { %v1192_v11 = vadd.f32 %v1160_v38, %v1128_v4  ;;  %v955_v18 = vpop.f32.mrf.mxu2 }
 0x1ff   :  { %v1241_v40 = vsel %vm1208_vm13, %v1191_v13, %v1225_v12  ;;  %v1003_v2 = vadd.f32 %v955_v18, %v877_v47  ;;  %v1175_v12 = vpop.permute.xlu0 %1174  ;;  %v757_v47 = vadd.f32 %v2032_v30, %v1990_v54 }
 0x200   :  { %vm1209_vm14 = vcmp.ge.f32.partialorder %v1192_v11, 0.0  ;;  %v1226_v15 = vmul.f32 %v2051_v52, %v1192_v11  ;;  %v1084_v0 = vpop.f32.mrf.mxu0 }
 0x201   :  { %v984_v55 = vpop.f32.mrf.mxu3  ;;  %v1129_v45 = vadd.f32 %v1081_v53, %v1003_v2  ;;  %v1113_v25 = vpop.f32.mrf.mxu1 }
 0x202   :  { %v1242_v41 = vsel %vm1209_vm14, %v1192_v11, %v1226_v15  ;;  %v1004_v42 = vadd.f32 %v984_v55, %v878_v5  ;;  %v883_v55 = vadd.f32 %v2028_v16, %v757_v47  ;;  %v760_v16 = vadd.f32 %v2042_v39, %v1998_v61 }
 0x203   :  { %v1255_v36 = vpack.c.bf16 %v1242_v41, %v1241_v40  ;;  %v1193_v3 = vadd.f32 %v1165_v24, %v1129_v45 }
 0x204   :  { %v1130_v46 = vadd.f32 %v1110_v63, %v1004_v42  ;;  %v881_v63 = vadd.f32 %v2020_v19, %v755_v14  ;;  %v758_v19 = vadd.f32 %v2034_v31, %v1992_v57  ;;  %v1185_v14 = vpop.permute.xlu2 %1184 }
 0x205   :  { %1263 = vst [vmem:[%s2131_s4 + $0x10] sm:$0xff] %v1255_v36  ;;  %vm1210_vm15 = vcmp.ge.f32.partialorder %v1193_v3, 0.0  ;;  %v1227_v51 = vmul.f32 %v2051_v52, %v1193_v3 }
 0x206   :  { %v1194_v49 = vadd.f32 %v1165_v24, %v1130_v46  ;;  %v958_v7 = vpop.f32.mrf.mxu2  ;;  %v884_v42 = vadd.f32 %v2030_v29, %v758_v19 }
 0x207   :  { %v1243_v1 = vsel %vm1210_vm15, %v1193_v3, %v1227_v51  ;;  %v1005_v9 = vadd.f32 %v958_v7, %v879_v58  ;;  %v885_v58 = vadd.f32 %v2036_v21, %v759_v17 }
 0x208   :  { %vm1211_vm0 = vcmp.ge.f32.partialorder %v1194_v49, 0.0  ;;  %v1228_v32 = vmul.f32 %v2051_v52, %v1194_v49  ;;  %v1086_v38 = vpop.f32.mrf.mxu0 }
 0x209   :  { %v987_v44 = vpop.f32.mrf.mxu3  ;;  %v1131_v33 = vadd.f32 %v1084_v0, %v1005_v9  ;;  %v1115_v62 = vpop.f32.mrf.mxu1 }
 0x20a   :  { %v1244_v50 = vsel %vm1211_vm0, %v1194_v49, %v1228_v32  ;;  %v1006_v59 = vadd.f32 %v987_v44, %v880_v35  ;;  %v2133_v32 = vld [vmem:[#allocation3_spill] sm:$0xff] }
 0x20b   :  { %v1256_v37 = vpack.c.bf16 %v1244_v50, %v1243_v1  ;;  %v1195_v6 = vadd.f32 %v1170_v10, %v1131_v33  ;;  %v886_v7 = vadd.f32 %v2133_v32, %v760_v16 }
 0x20c   :  { %v1132_v53 = vadd.f32 %v1113_v25, %v1006_v59  ;;  %v1180_v25 = vpop.permute.xlu1 %1179 }
 0x20d   :  { %1264 = vst [vmem:[%s2131_s4 + $0x18] sm:$0xff] %v1256_v37  ;;  %vm1212_vm1 = vcmp.ge.f32.partialorder %v1195_v6, 0.0  ;;  %v1229_v48 = vmul.f32 %v2051_v52, %v1195_v6 }
 0x20e   :  { %v1196_v60 = vadd.f32 %v1170_v10, %v1132_v53  ;;  %v960_v27 = vpop.f32.mrf.mxu2 }
 0x20f   :  { %v1245_v28 = vsel %vm1212_vm1, %v1195_v6, %v1229_v48  ;;  %v1007_v8 = vadd.f32 %v960_v27, %v881_v63 }
 0x210   :  { %vm1213_vm2 = vcmp.ge.f32.partialorder %v1196_v60, 0.0  ;;  %v1230_v43 = vmul.f32 %v2051_v52, %v1196_v60  ;;  %v1089_v41 = vpop.f32.mrf.mxu0 }
 0x211   :  { %v989_v4 = vpop.f32.mrf.mxu3  ;;  %v1133_v18 = vadd.f32 %v1086_v38, %v1007_v8  ;;  %v1118_v57 = vpop.f32.mrf.mxu1 }
 0x212   :  { %v1246_v13 = vsel %vm1213_vm2, %v1196_v60, %v1230_v43  ;;  %v1008_v11 = vadd.f32 %v989_v4, %v882_v23 }
 0x213   :  { %v1257_v15 = vpack.c.bf16 %v1246_v13, %v1245_v28  ;;  %v1197_v20 = vadd.f32 %v1175_v12, %v1133_v18 }
 0x214   :  { %v1134_v5 = vadd.f32 %v1115_v62, %v1008_v11 }
 0x215   :  { %1265 = vst [vmem:[%s2131_s4 + $0x20] sm:$0xff] %v1257_v15  ;;  %vm1214_vm3 = vcmp.ge.f32.partialorder %v1197_v20, 0.0  ;;  %v1231_v2 = vmul.f32 %v2051_v52, %v1197_v20 }
 0x216   :  { %v1198_v40 = vadd.f32 %v1175_v12, %v1134_v5  ;;  %v963_v30 = vpop.f32.mrf.mxu2 }
 0x217   :  { %v1247_v31 = vsel %vm1214_vm3, %v1197_v20, %v1231_v2  ;;  %v1009_v24 = vadd.f32 %v963_v30, %v883_v55 }
 0x218   :  { %vm1215_vm4 = vcmp.ge.f32.partialorder %v1198_v40, 0.0  ;;  %v1232_v54 = vmul.f32 %v2051_v52, %v1198_v40  ;;  %v1091_v9 = vpop.f32.mrf.mxu0 }
 0x219   :  { %v992_v26 = vpop.f32.mrf.mxu3  ;;  %v1135_v0 = vadd.f32 %v1089_v41, %v1009_v24  ;;  %v1120_v59 = vpop.f32.mrf.mxu1 }
 0x21a   :  { %v1248_v36 = vsel %vm1215_vm4, %v1198_v40, %v1232_v54  ;;  %v1010_v45 = vadd.f32 %v992_v26, %v884_v42 }
 0x21b   :  { %v1258_v46 = vpack.c.bf16 %v1248_v36, %v1247_v31  ;;  %v1199_v29 = vadd.f32 %v1180_v25, %v1135_v0 }
 0x21c   :  { %v1136_v3 = vadd.f32 %v1118_v57, %v1010_v45 }
 0x21d   :  { %1266 = vst [vmem:[%s2131_s4 + $0x28] sm:$0xff] %v1258_v46  ;;  %vm1216_vm5 = vcmp.ge.f32.partialorder %v1199_v29, 0.0  ;;  %v1233_v51 = vmul.f32 %v2051_v52, %v1199_v29 }
 0x21e   :  { %v1200_v49 = vadd.f32 %v1180_v25, %v1136_v3  ;;  %v965_v22 = vpop.f32.mrf.mxu2 }
 0x21f   :  { %v1249_v61 = vsel %vm1216_vm5, %v1199_v29, %v1233_v51  ;;  %v1011_v39 = vadd.f32 %v965_v22, %v885_v58 }
 0x220   :  { %vm1217_vm6 = vcmp.ge.f32.partialorder %v1200_v49, 0.0  ;;  %v1234_v34 = vmul.f32 %v2051_v52, %v1200_v49 }
 0x221   :  { %v994_v35 = vpop.f32.mrf.mxu3  ;;  %v1137_v10 = vadd.f32 %v1091_v9, %v1011_v39 }
 0x222   :  { %v1250_v1 = vsel %vm1217_vm6, %v1200_v49, %v1234_v34  ;;  %v1012_v44 = vadd.f32 %v994_v35, %v886_v7 }
 0x223   :  { %v1259_v50 = vpack.c.bf16 %v1250_v1, %v1249_v61  ;;  %v1201_v21 = vadd.f32 %v1185_v14, %v1137_v10 }
 0x224   :  { %v1138_v37 = vadd.f32 %v1120_v59, %v1012_v44 }
 0x225   :  { %1267 = vst [vmem:[%s2131_s4 + $0x30] sm:$0xff] %v1259_v50  ;;  %vm1218_vm7 = vcmp.ge.f32.partialorder %v1201_v21, 0.0  ;;  %v1235_v56 = vmul.f32 %v2051_v52, %v1201_v21 }
 0x226   :  { %v1202_v33 = vadd.f32 %v1185_v14, %v1138_v37 }
 0x227   :  { %v1251_v6 = vsel %vm1218_vm7, %v1201_v21, %v1235_v56 }
 0x228   :  { %vm1219_vm8 = vcmp.ge.f32.partialorder %v1202_v33, 0.0  ;;  %v1236_v53 = vmul.f32 %v2051_v52, %v1202_v33 }
 0x22a   :  { %v1252_v38 = vsel %vm1219_vm8, %v1202_v33, %v1236_v53 }
 0x22b   :  { %v1260_v60 = vpack.c.bf16 %v1252_v38, %v1251_v6 }
 0x22d   :  { %1268 = vst [vmem:[%s2131_s4 + $0x38] sm:$0xff] %v1260_v60 }

// kernel: net6_forward.47
= control target key start
LH: loop header
LB: loop body
LE: loop exit
PB: predicated region body
PF: predicated region fallthrough
CT: control target
= control target key end

     0   :  { %s1070_s25 = smov 127   ;;  %s1071_s13 = smov 126   ;;  %vm129_vm0 = vcmask 1039360   ;;  %vm286_vm1 = vcmask 1031168   ;;  %vm146_vm2 = vcmask 523264   ;;  %vm370_vm3 = vcmask 965632   ;;  %s1555_s0 = inlined_call_operand.vmem [shape: bf16[64,384], index: 0, kind: input, shape index: {}]   ;;  %s1556_s1 = inlined_call_operand.vmem [shape: bf16[9,16,64], index: 1, kind: input, shape index: {}]   ;;  %s1557_s2 = inlined_call_operand.vmem [shape: f32[16,1], index: 2, kind: input, shape index: {}]   ;;  %s1558_s3 = inlined_call_operand.<no memory space> [shape: f32[1,1], index: 3, kind: input, shape index: {}]   ;;  %s1559_s4 = inlined_call_operand.vmem [shape: bf16[16,256], index: 4, kind: output, shape index: {}]  }
   0x1   :  { %v896_v0 = vld [vmem:[%s1555_s0 + $0x8] sm:$0xf]  ;;  %v1042_v1 = vld [vmem:[%s1555_s0 + $0x10] sm:$0xf0]  ;;  %v888_v2 = vld [vmem:[%s1555_s0] sm:$0xf] }
   0x2   :  { %v1113_v3 = vor.u32 %v1042_v1, %v896_v0  ;;  %v1041_v4 = vld [vmem:[%s1555_s0 + $0x8] sm:$0xf0]  ;;  %v1043_v6 = vld [vmem:[%s1555_s0 + $0x1c] sm:$0xf]  ;;  %v902_v7 = vld [vmem:[%s1555_s0 + $0x24] sm:$0xf0] }
   0x3   :  { %v1118_v5 = vor.u32 %v1041_v4, %v888_v2  ;;  %v900_v8 = vld [vmem:[%s1555_s0 + $0x18] sm:$0xf]  ;;  %v1044_v9 = vld [vmem:[%s1555_s0 + $0x20] sm:$0xf0]  ;;  %v1136_v10 = vor.u32 %v1043_v6, %v902_v7  ;;  %v890_v12 = vld [vmem:[%s1555_s0 + $0xc] sm:$0xf0] }
   0x4   :  { %109 = vrot.lane.b32.xlu1 %v1113_v3, %s1070_s25  ;;  %v1040_v11 = vld [vmem:[%s1555_s0 + $0x4] sm:$0xf]  ;;  %v1146_v13 = vor.u32 %v1044_v9, %v900_v8  ;;  %v908_v14 = vld [vmem:[%s1555_s0 + $0x20] sm:$0xf]  ;;  %v1045_v15 = vld [vmem:[%s1555_s0 + $0x28] sm:$0xf0] }
   0x5   :  { %105 = vrot.lane.b32.xlu0 %v1118_v5, %s1070_s25  ;;  %113 = vrot.lane.b32.xlu2 %v1136_v10, %s1070_s25  ;;  %v1154_v16 = vor.u32 %v1040_v11, %v890_v12  ;;  %v1156_v17 = vor.u32 %v1045_v15, %v908_v14  ;;  %v1046_v18 = vld [vmem:[%s1555_s0 + $0x34] sm:$0xf]  ;;  %v914_v19 = vld [vmem:[%s1555_s0 + $0x3c] sm:$0xf0]  ;;  %s1073_s14 = smov 117   ;;  %s1074_s15 = smov 116  }
   0x6   :  { %v912_v20 = vld [vmem:[%s1555_s0 + $0x30] sm:$0xf]  ;;  %v1047_v21 = vld [vmem:[%s1555_s0 + $0x38] sm:$0xf0]  ;;  %v1176_v22 = vor.u32 %v1046_v18, %v914_v19  ;;  %v920_v23 = vld [vmem:[%s1555_s0 + $0x38] sm:$0xf] }
   0x7   :  { %v1048_v24 = vld [vmem:[%s1555_s0 + $0x40] sm:$0xf0]  ;;  %v1184_v25 = vor.u32 %v1047_v21, %v912_v20  ;;  %v1049_v27 = vld [vmem:[%s1555_s0 + $0x4c] sm:$0xf]  ;;  %v926_v28 = vld [vmem:[%s1555_s0 + $0x54] sm:$0xf0] }
   0x8   :  { %v1186_v26 = vor.u32 %v1048_v24, %v920_v23  ;;  %v924_v29 = vld [vmem:[%s1555_s0 + $0x48] sm:$0xf]  ;;  %v1050_v30 = vld [vmem:[%s1555_s0 + $0x50] sm:$0xf0]  ;;  %v1206_v31 = vor.u32 %v1049_v27, %v926_v28  ;;  %v932_v32 = vld [vmem:[%s1555_s0 + $0x50] sm:$0xf] }
   0x9   :  { %v1051_v33 = vld [vmem:[%s1555_s0 + $0x58] sm:$0xf0]  ;;  %v1214_v34 = vor.u32 %v1050_v30, %v924_v29  ;;  %v966_v48 = vld [vmem:[%s1555_s0 + $0x48] sm:$0xf]  ;;  %v1038_v49 = vld [vmem:[%s1555_s0 + $0x50] sm:$0xf0] }
   0xa   :  { %v1216_v35 = vor.u32 %v1051_v33, %v932_v32  ;;  %v1037_v50 = vld [vmem:[%s1555_s0 + $0x4c] sm:$0xf]  ;;  %v967_v51 = vor.u32 %v1038_v49, %v966_v48  ;;  %v968_v52 = vld [vmem:[%s1555_s0 + $0x54] sm:$0xf0]  ;;  %v958_v54 = vld [vmem:[%s1555_s0 + $0x30] sm:$0xf] }
   0xb   :  { %v971_v53 = vor.u32 %v1037_v50, %v968_v52  ;;  %v1036_v55 = vld [vmem:[%s1555_s0 + $0x38] sm:$0xf0]  ;;  %v1035_v56 = vld [vmem:[%s1555_s0 + $0x34] sm:$0xf]  ;;  %v960_v59 = vld [vmem:[%s1555_s0 + $0x3c] sm:$0xf0] }
   0xc   :  { %111 = vrot.lane.b32.xlu1 %v1146_v13, %s1070_s25  ;;  %230 = vmatpush.bf16.msra.mxu2 %v967_v51  ;;  %v959_v58 = vor.u32 %v1036_v55, %v958_v54  ;;  %v963_v62 = vor.u32 %v1035_v56, %v960_v59  ;;  %v950_v1 = vld [vmem:[%s1555_s0 + $0x18] sm:$0xf]  ;;  %v1034_v2 = vld [vmem:[%s1555_s0 + $0x20] sm:$0xf0]  ;;  %v1033_v4 = vld [vmem:[%s1555_s0 + $0x1c] sm:$0xf] }
   0xd   :  { %107 = vrot.lane.b32.xlu0 %v1154_v16, %s1070_s25  ;;  %115 = vrot.lane.b32.xlu2 %v1156_v17, %s1070_s25  ;;  %v951_v6 = vor.u32 %v1034_v2, %v950_v1  ;;  %v952_v7 = vld [vmem:[%s1555_s0 + $0x24] sm:$0xf0]  ;;  %v942_v12 = vld [vmem:[%s1555_s0] sm:$0xf]  ;;  %s1076_s24 = smov 107   ;;  %vm454_vm4 = vcmask 957440  }
   0xe   :  { %244 = vmatpush.bf16.msra.mxu3 %v971_v53  ;;  %v955_v9 = vor.u32 %v1033_v4, %v952_v7  ;;  %v1032_v14 = vld [vmem:[%s1555_s0 + $0x8] sm:$0xf0]  ;;  %v1031_v15 = vld [vmem:[%s1555_s0 + $0x4] sm:$0xf]  ;;  %v944_v20 = vld [vmem:[%s1555_s0 + $0xc] sm:$0xf0] }
   0xf   :  { %v943_v19 = vor.u32 %v1032_v14, %v942_v12  ;;  %v947_v24 = vor.u32 %v1031_v15, %v944_v20  ;;  %s1075_s0 = smov 108   ;;  %s1077_s28 = smov 106   ;;  %vm538_vm5 = vcmask 949248   ;;  %vm622_vm6 = vcmask 883712  }
  0x10   :  { %231 = vmatpush.bf16.msra.mxu2 %v959_v58  ;;  %vm706_vm7 = vcmask 875520   ;;  %vm790_vm8 = vcmask 867328  }
  0x12   :  { %245 = vmatpush.bf16.msra.mxu3 %v963_v62 }
  0x14   :  { %119 = vrot.lane.b32.xlu1 %v1176_v22, %s1070_s25  ;;  %232 = vmatpush.bf16.msra.mxu2 %v951_v6 }
  0x15   :  { %117 = vrot.lane.b32.xlu0 %v1184_v25, %s1070_s25  ;;  %121 = vrot.lane.b32.xlu2 %v1186_v26, %s1070_s25 }
  0x16   :  { %246 = vmatpush.bf16.msra.mxu3 %v955_v9 }
  0x18   :  { %233 = vmatpush.bf16.msra.mxu2 %v943_v19 }
  0x1a   :  { %247 = vmatpush.bf16.msra.mxu3 %v947_v24 }
  0x1c   :  { %125 = vrot.lane.b32.xlu1 %v1206_v31, %s1070_s25 }
  0x1d   :  { %123 = vrot.lane.b32.xlu0 %v1214_v34, %s1070_s25  ;;  %127 = vrot.lane.b32.xlu2 %v1216_v35, %s1070_s25  ;;  %s1072_s25 = smov 118  }
  0x24   :  { %264 = vrot.lane.b32.xlu1 %v1154_v16, %s1071_s13 }
  0x25   :  { %262 = vrot.lane.b32.xlu0 %v1118_v5, %s1071_s13  ;;  %266 = vrot.lane.b32.xlu2 %v1113_v3, %s1071_s13 }
  0x2c   :  { %270 = vrot.lane.b32.xlu1 %v1136_v10, %s1071_s13 }
  0x2d   :  { %268 = vrot.lane.b32.xlu0 %v1146_v13, %s1071_s13  ;;  %272 = vrot.lane.b32.xlu2 %v1156_v17, %s1071_s13 }
  0x34   :  { %282 = vrot.lane.b32.xlu1 %v1206_v31, %s1071_s13 }
  0x35   :  { %280 = vrot.lane.b32.xlu0 %v1214_v34, %s1071_s13  ;;  %284 = vrot.lane.b32.xlu2 %v1216_v35, %s1071_s13 }
  0x3c   :  { %276 = vrot.lane.b32.xlu1 %v1176_v22, %s1071_s13 }
  0x3d   :  { %274 = vrot.lane.b32.xlu0 %v1184_v25, %s1071_s13  ;;  %278 = vrot.lane.b32.xlu2 %v1186_v26, %s1071_s13 }
  0x44   :  { %366 = vrot.lane.b32.xlu1 %v1206_v31, %s1072_s25 }
  0x45   :  { %364 = vrot.lane.b32.xlu0 %v1214_v34, %s1072_s25  ;;  %368 = vrot.lane.b32.xlu2 %v1216_v35, %s1072_s25 }
  0x4c   :  { %360 = vrot.lane.b32.xlu1 %v1176_v22, %s1072_s25 }
  0x4d   :  { %358 = vrot.lane.b32.xlu0 %v1184_v25, %s1072_s25  ;;  %362 = vrot.lane.b32.xlu2 %v1186_v26, %s1072_s25 }
  0x54   :  { %354 = vrot.lane.b32.xlu1 %v1136_v10, %s1072_s25 }
  0x55   :  { %352 = vrot.lane.b32.xlu0 %v1146_v13, %s1072_s25  ;;  %356 = vrot.lane.b32.xlu2 %v1156_v17, %s1072_s25 }
  0x5c   :  { %450 = vrot.lane.b32.xlu1 %v1206_v31, %s1073_s14 }
  0x5d   :  { %448 = vrot.lane.b32.xlu0 %v1214_v34, %s1073_s14  ;;  %452 = vrot.lane.b32.xlu2 %v1216_v35, %s1073_s14 }
  0x5f   :  { %v1248_v36 = vpop.permute.xlu2 %113 }
  0x64   :  { %348 = vrot.lane.b32.xlu1 %v1154_v16, %s1072_s25 }
  0x65   :  { %346 = vrot.lane.b32.xlu0 %v1118_v5, %s1072_s25  ;;  %350 = vrot.lane.b32.xlu2 %v1113_v3, %s1072_s25 }
  0x67   :  { %v1253_v37 = vpop.permute.xlu2 %115 }
  0x68   :  { %v133_v23 = vsel %vm129_vm0, %v1248_v36, %v1253_v37 }
  0x6c   :  { %444 = vrot.lane.b32.xlu1 %v1176_v22, %s1073_s14 }
  0x6d   :  { %442 = vrot.lane.b32.xlu0 %v1184_v25, %s1073_s14  ;;  %446 = vrot.lane.b32.xlu2 %v1186_v26, %s1073_s14 }
  0x6f   :  { %v122_v38 = vpop.permute.xlu2 %121 }
  0x74   :  { %438 = vrot.lane.b32.xlu1 %v1136_v10, %s1073_s14 }
  0x75   :  { %436 = vrot.lane.b32.xlu0 %v1146_v13, %s1073_s14  ;;  %440 = vrot.lane.b32.xlu2 %v1156_v17, %s1073_s14 }
  0x76   :  { %v1260_v39 = vpop.permute.xlu1 %109 }
  0x77   :  { %v1262_v40 = vpop.permute.xlu0 %105  ;;  %v128_v41 = vpop.permute.xlu2 %127 }
  0x7c   :  { %534 = vrot.lane.b32.xlu1 %v1206_v31, %s1074_s15 }
  0x7d   :  { %532 = vrot.lane.b32.xlu0 %v1214_v34, %s1074_s15  ;;  %536 = vrot.lane.b32.xlu2 %v1216_v35, %s1074_s15 }
  0x7e   :  { %v112_v42 = vpop.permute.xlu1 %111 }
  0x7f   :  { %v1269_v43 = vpop.permute.xlu0 %107  ;;  %v1273_v44 = vpop.permute.xlu2 %266  ;;  %v132_v27 = vsel %vm129_vm0, %v112_v42, %v1248_v36 }
  0x80   :  { %v131_v29 = vsel %vm129_vm0, %v1269_v43, %v1260_v39  ;;  %v130_v30 = vsel %vm129_vm0, %v1262_v40, %v1269_v43 }
  0x84   :  { %432 = vrot.lane.b32.xlu1 %v1154_v16, %s1073_s14 }
  0x85   :  { %430 = vrot.lane.b32.xlu0 %v1118_v5, %s1073_s14  ;;  %434 = vrot.lane.b32.xlu2 %v1113_v3, %s1073_s14 }
  0x86   :  { %v120_v45 = vpop.permute.xlu1 %119 }
  0x87   :  { %v118_v46 = vpop.permute.xlu0 %117  ;;  %v1278_v47 = vpop.permute.xlu2 %272  ;;  %v135_v8 = vsel %vm129_vm0, %v120_v45, %v122_v38 }
  0x88   :  { %v134_v11 = vsel %vm129_vm0, %v118_v46, %v120_v45  ;;  %v1039_v46 = vld [vmem:[%s1556_s1 + $0x8] sm:$0xff] }
  0x8c   :  { %528 = vrot.lane.b32.xlu1 %v1176_v22, %s1074_s15 }
  0x8d   :  { %526 = vrot.lane.b32.xlu0 %v1184_v25, %s1074_s15  ;;  %530 = vrot.lane.b32.xlu2 %v1186_v26, %s1074_s15 }
  0x8e   :  { %v126_v57 = vpop.permute.xlu1 %125 }
  0x8f   :  { %v124_v60 = vpop.permute.xlu0 %123  ;;  %v137_v61 = vsel %vm129_vm0, %v126_v57, %v128_v41  ;;  %v285_v0 = vpop.permute.xlu2 %284 }
  0x90   :  { %v136_v63 = vsel %vm129_vm0, %v124_v60, %v126_v57  ;;  %168 = vmatpush.bf16.msra.mxu1 %v137_v61 }
  0x91   :  { %154 = vmatpush.bf16.msra.mxu0 %v136_v63 }
  0x94   :  { %169 = vmatpush.bf16.msra.mxu1 %v135_v8  ;;  %522 = vrot.lane.b32.xlu1 %v1136_v10, %s1074_s15  ;;  %v1030_v8 = vld [vmem:[%s1556_s1] sm:$0xff] }
  0x95   :  { %520 = vrot.lane.b32.xlu0 %v1146_v13, %s1074_s15  ;;  %155 = vmatpush.bf16.msra.mxu0 %v134_v11 }
  0x96   :  { %v1339_v18 = vpop.permute.xlu1 %264  ;;  %524 = vrot.lane.b32.xlu2 %v1156_v17, %s1074_s15  ;;  %972 = vmatmul.msk.bf16.vlgmr.msra.gmra.mxu2 %vm146_vm2, %v1030_v8 }
  0x97   :  { %v263_v21 = vpop.permute.xlu0 %262  ;;  %v279_v28 = vpop.permute.xlu2 %278  ;;  %v288_v54 = vsel %vm286_vm1, %v1339_v18, %v1273_v44  ;;  %973 = vmatmul.msk.bf16.vlgmr.msra.gmra.mxu3 %vm146_vm2, %v1030_v8 }
  0x98   :  { %170 = vmatpush.bf16.msra.mxu1 %v133_v23 }
  0x99   :  { %156 = vmatpush.bf16.msra.mxu0 %v132_v27 }
  0x9c   :  { %618 = vrot.lane.b32.xlu1 %v1206_v31, %s1075_s0  ;;  %171 = vmatpush.bf16.msra.mxu1 %v131_v29 }
  0x9d   :  { %616 = vrot.lane.b32.xlu0 %v1214_v34, %s1075_s0  ;;  %157 = vmatpush.bf16.msra.mxu0 %v130_v30 }
  0x9e   :  { %v271_v32 = vpop.permute.xlu1 %270  ;;  %620 = vrot.lane.b32.xlu2 %v1216_v35, %s1075_s0 }
  0x9f   :  { %v269_v33 = vpop.permute.xlu0 %268  ;;  %v369_v36 = vpop.permute.xlu2 %368  ;;  %935 = vmatmul.msk.bf16.vlgmr.msra.gmra.mxu1 %vm146_vm2, %v1039_v46  ;;  %v290_v50 = vsel %vm286_vm1, %v271_v32, %v1278_v47  ;;  %v287_v47 = vsel %vm286_vm1, %v263_v21, %v1339_v18 }
  0xa0   :  { %934 = vmatmul.msk.bf16.vlgmr.msra.gmra.mxu0 %vm146_vm2, %v1039_v46  ;;  %v289_v51 = vsel %vm286_vm1, %v269_v33, %v271_v32 }
  0xa4   :  { %516 = vrot.lane.b32.xlu1 %v1154_v16, %s1074_s15 }
  0xa5   :  { %514 = vrot.lane.b32.xlu0 %v1118_v5, %s1074_s15 }
  0xa6   :  { %v283_v37 = vpop.permute.xlu1 %282  ;;  %518 = vrot.lane.b32.xlu2 %v1113_v3, %s1074_s15 }
  0xa7   :  { %v281_v38 = vpop.permute.xlu0 %280  ;;  %v294_v39 = vsel %vm286_vm1, %v283_v37, %v285_v0  ;;  %v363_v41 = vpop.permute.xlu2 %362 }
  0xa8   :  { %v293_v40 = vsel %vm286_vm1, %v281_v38, %v283_v37  ;;  %324 = vmatpush.bf16.msrb.mxu1 %v294_v39 }
  0xa9   :  { %310 = vmatpush.bf16.msrb.mxu0 %v293_v40 }
  0xac   :  { %612 = vrot.lane.b32.xlu1 %v1176_v22, %s1075_s0 }
  0xad   :  { %610 = vrot.lane.b32.xlu0 %v1184_v25, %s1075_s0 }
  0xae   :  { %v277_v42 = vpop.permute.xlu1 %276  ;;  %614 = vrot.lane.b32.xlu2 %v1186_v26, %s1075_s0 }
  0xaf   :  { %v275_v43 = vpop.permute.xlu0 %274  ;;  %v292_v45 = vsel %vm286_vm1, %v277_v42, %v279_v28  ;;  %v357_v49 = vpop.permute.xlu2 %356 }
  0xb0   :  { %v291_v48 = vsel %vm286_vm1, %v275_v43, %v277_v42  ;;  %325 = vmatpush.bf16.msrb.mxu1 %v292_v45 }
  0xb1   :  { %311 = vmatpush.bf16.msrb.mxu0 %v291_v48 }
  0xb4   :  { %606 = vrot.lane.b32.xlu1 %v1136_v10, %s1075_s0  ;;  %326 = vmatpush.bf16.msrb.mxu1 %v290_v50 }
  0xb5   :  { %604 = vrot.lane.b32.xlu0 %v1146_v13, %s1075_s0  ;;  %312 = vmatpush.bf16.msrb.mxu0 %v289_v51 }
  0xb6   :  { %v367_v52 = vpop.permute.xlu1 %366  ;;  %608 = vrot.lane.b32.xlu2 %v1156_v17, %s1075_s0 }
  0xb7   :  { %v365_v53 = vpop.permute.xlu0 %364  ;;  %v378_v55 = vsel %vm370_vm3, %v367_v52, %v369_v36  ;;  %v453_v57 = vpop.permute.xlu2 %452  ;;  %v1052_v36 = vld [vmem:[%s1556_s1 + $0x10] sm:$0xff] }
  0xb8   :  { %327 = vmatpush.bf16.msrb.mxu1 %v288_v54  ;;  %v377_v56 = vsel %vm370_vm3, %v365_v53, %v367_v52  ;;  %408 = vmatpush.bf16.msrb.mxu3 %v378_v55 }
  0xb9   :  { %313 = vmatpush.bf16.msrb.mxu0 %v287_v47  ;;  %394 = vmatpush.bf16.msrb.mxu2 %v377_v56  ;;  %v1055_v56 = vld [vmem:[%s1556_s1 + $0x28] sm:$0xff] }
  0xbb   :  { %981 = vmatmul.msk.bf16.vlgmr.msrb.gmra.mxu1 %vm146_vm2, %v1052_v36 }
  0xbc   :  { %702 = vrot.lane.b32.xlu1 %v1206_v31, %s1076_s24  ;;  %980 = vmatmul.msk.bf16.vlgmr.msrb.gmra.mxu0 %vm146_vm2, %v1052_v36 }
  0xbd   :  { %700 = vrot.lane.b32.xlu0 %v1214_v34, %s1076_s24 }
  0xbe   :  { %v361_v44 = vpop.permute.xlu1 %360  ;;  %704 = vrot.lane.b32.xlu2 %v1216_v35, %s1076_s24 }
  0xbf   :  { %v359_v58 = vpop.permute.xlu0 %358  ;;  %v376_v59 = vsel %vm370_vm3, %v361_v44, %v363_v41  ;;  %v351_v61 = vpop.permute.xlu2 %350 }
  0xc0   :  { %v375_v60 = vsel %vm370_vm3, %v359_v58, %v361_v44  ;;  %409 = vmatpush.bf16.msrb.mxu3 %v376_v59 }
  0xc1   :  { %395 = vmatpush.bf16.msrb.mxu2 %v375_v60 }
  0xc4   :  { %600 = vrot.lane.b32.xlu1 %v1154_v16, %s1075_s0 }
  0xc5   :  { %598 = vrot.lane.b32.xlu0 %v1118_v5, %s1075_s0 }
  0xc6   :  { %v355_v62 = vpop.permute.xlu1 %354  ;;  %602 = vrot.lane.b32.xlu2 %v1113_v3, %s1075_s0 }
  0xc7   :  { %v353_v63 = vpop.permute.xlu0 %352  ;;  %v374_v0 = vsel %vm370_vm3, %v355_v62, %v357_v49  ;;  %v447_v2 = vpop.permute.xlu2 %446  ;;  %v1054_v49 = vld [vmem:[%s1556_s1 + $0x20] sm:$0xff] }
  0xc8   :  { %v373_v1 = vsel %vm370_vm3, %v353_v63, %v355_v62  ;;  %410 = vmatpush.bf16.msrb.mxu3 %v374_v0 }
  0xc9   :  { %396 = vmatpush.bf16.msrb.mxu2 %v373_v1 }
  0xcc   :  { %696 = vrot.lane.b32.xlu1 %v1176_v22, %s1076_s24 }
  0xcd   :  { %694 = vrot.lane.b32.xlu0 %v1184_v25, %s1076_s24 }
  0xce   :  { %v451_v4 = vpop.permute.xlu1 %450  ;;  %698 = vrot.lane.b32.xlu2 %v1186_v26, %s1076_s24 }
  0xcf   :  { %v462_v6 = vsel %vm454_vm4, %v451_v4, %v453_v57  ;;  %v449_v7 = vpop.permute.xlu0 %448  ;;  %v441_v11 = vpop.permute.xlu2 %440 }
  0xd0   :  { %v461_v9 = vsel %vm454_vm4, %v449_v7, %v451_v4  ;;  %492 = vmatpush.bf16.msra.mxu1 %v462_v6 }
  0xd1   :  { %478 = vmatpush.bf16.msra.mxu0 %v461_v9 }
  0xd4   :  { %690 = vrot.lane.b32.xlu1 %v1136_v10, %s1076_s24 }
  0xd5   :  { %688 = vrot.lane.b32.xlu0 %v1146_v13, %s1076_s24 }
  0xd6   :  { %v349_v12 = vpop.permute.xlu1 %348  ;;  %692 = vrot.lane.b32.xlu2 %v1156_v17, %s1076_s24 }
  0xd7   :  { %v347_v14 = vpop.permute.xlu0 %346  ;;  %v372_v15 = vsel %vm370_vm3, %v349_v12, %v351_v61  ;;  %v537_v19 = vpop.permute.xlu2 %536 }
  0xd8   :  { %v371_v18 = vsel %vm370_vm3, %v347_v14, %v349_v12  ;;  %411 = vmatpush.bf16.msrb.mxu3 %v372_v15  ;;  %v1056_v15 = vld [vmem:[%s1556_s1 + $0x30] sm:$0xff] }
  0xd9   :  { %397 = vmatpush.bf16.msrb.mxu2 %v371_v18 }
  0xdc   :  { %786 = vrot.lane.b32.xlu1 %v1206_v31, %s1077_s28 }
  0xdd   :  { %784 = vrot.lane.b32.xlu0 %v1214_v34, %s1077_s28 }
  0xde   :  { %v445_v20 = vpop.permute.xlu1 %444  ;;  %788 = vrot.lane.b32.xlu2 %v1216_v35, %s1077_s28 }
  0xdf   :  { %v443_v21 = vpop.permute.xlu0 %442  ;;  %v460_v23 = vsel %vm454_vm4, %v445_v20, %v447_v2  ;;  %v435_v27 = vpop.permute.xlu2 %434 }
  0xe0   :  { %v459_v24 = vsel %vm454_vm4, %v443_v21, %v445_v20  ;;  %493 = vmatpush.bf16.msra.mxu1 %v460_v23 }
  0xe1   :  { %479 = vmatpush.bf16.msra.mxu0 %v459_v24 }
  0xe4   :  { %684 = vrot.lane.b32.xlu1 %v1154_v16, %s1076_s24 }
  0xe5   :  { %682 = vrot.lane.b32.xlu0 %v1118_v5, %s1076_s24 }
  0xe6   :  { %v439_v31 = vpop.permute.xlu1 %438  ;;  %686 = vrot.lane.b32.xlu2 %v1113_v3, %s1076_s24 }
  0xe7   :  { %v437_v34 = vpop.permute.xlu0 %436  ;;  %v458_v28 = vsel %vm454_vm4, %v439_v31, %v441_v11  ;;  %v531_v29 = vpop.permute.xlu2 %530 }
  0xe8   :  { %v457_v35 = vsel %vm454_vm4, %v437_v34, %v439_v31  ;;  %494 = vmatpush.bf16.msra.mxu1 %v458_v28 }
  0xe9   :  { %480 = vmatpush.bf16.msra.mxu0 %v457_v35 }
  0xec   :  { %780 = vrot.lane.b32.xlu1 %v1176_v22, %s1077_s28 }
  0xed   :  { %778 = vrot.lane.b32.xlu0 %v1184_v25, %s1077_s28 }
  0xee   :  { %v535_v30 = vpop.permute.xlu1 %534  ;;  %782 = vrot.lane.b32.xlu2 %v1186_v26, %s1077_s28 }
  0xef   :  { %v546_v32 = vsel %vm538_vm5, %v535_v30, %v537_v19  ;;  %v533_v33 = vpop.permute.xlu0 %532 }
  0xf0   :  { %v545_v37 = vsel %vm538_vm5, %v533_v33, %v535_v30  ;;  %576 = vmatpush.bf16.msra.mxu3 %v546_v32  ;;  %v525_v22 = vpop.permute.xlu2 %524 }
  0xf1   :  { %562 = vmatpush.bf16.msra.mxu2 %v545_v37  ;;  %v842_v37 = vld [vmem:[%s1557_s2] sm:$0xff] }
  0xf4   :  { %774 = vrot.lane.b32.xlu1 %v1136_v10, %s1077_s28  ;;  %v1053_v10 = vld [vmem:[%s1556_s1 + $0x18] sm:$0xff] }
  0xf5   :  { %772 = vrot.lane.b32.xlu0 %v1146_v13, %s1077_s28  ;;  %988 = vmatmul.msk.bf16.vlgmr.msrb.gmra.mxu2 %vm146_vm2, %v1053_v10 }
  0xf6   :  { %v433_v25 = vpop.permute.xlu1 %432  ;;  %776 = vrot.lane.b32.xlu2 %v1156_v17, %s1077_s28  ;;  %989 = vmatmul.msk.bf16.vlgmr.msrb.gmra.mxu3 %vm146_vm2, %v1053_v10 }
  0xf7   :  { %v431_v26 = vpop.permute.xlu0 %430  ;;  %v456_v38 = vsel %vm454_vm4, %v433_v25, %v435_v27 }
  0xf8   :  { %v455_v39 = vsel %vm454_vm4, %v431_v26, %v433_v25  ;;  %495 = vmatpush.bf16.msra.mxu1 %v456_v38  ;;  %v621_v40 = vpop.permute.xlu2 %620  ;;  %v1078_v25 = vmov 0  }
  0xf9   :  { %481 = vmatpush.bf16.msra.mxu0 %v455_v39  ;;  %1068 = vset.pattern.permute.xlu0 %v1078_v25 }
  0xfa   :  { %1069 = vset.pattern.permute.xlu1 %v1078_v25 }
  0xfb   :  { %997 = vmatmul.msk.bf16.vlgmr.msra.gmra.mxu1 %vm146_vm2, %v1054_v49 }
  0xfc   :  { %768 = vrot.lane.b32.xlu1 %v1154_v16, %s1077_s28  ;;  %996 = vmatmul.msk.bf16.vlgmr.msra.gmra.mxu0 %vm146_vm2, %v1054_v49 }
  0xfd   :  { %766 = vrot.lane.b32.xlu0 %v1118_v5, %s1077_s28 }
  0xfe   :  { %v529_v13 = vpop.permute.xlu1 %528  ;;  %770 = vrot.lane.b32.xlu2 %v1113_v3, %s1077_s28 }
  0xff   :  { %v527_v17 = vpop.permute.xlu0 %526  ;;  %v544_v41 = vsel %vm538_vm5, %v529_v13, %v531_v29 }
 0x100   :  { %v543_v16 = vsel %vm538_vm5, %v527_v17, %v529_v13  ;;  %577 = vmatpush.bf16.msra.mxu3 %v544_v41  ;;  %v519_v42 = vpop.permute.xlu2 %518 }
 0x101   :  { %563 = vmatpush.bf16.msra.mxu2 %v543_v16 }
 0x105   :  { %846 = vperm.xlu0 %1068, %v842_v37  }
 0x106   :  { %v523_v43 = vpop.permute.xlu1 %522 }
 0x107   :  { %v521_v45 = vpop.permute.xlu0 %520  ;;  %v542_v5 = vsel %vm538_vm5, %v523_v43, %v525_v22  ;;  %v843_v22 = vld [vmem:[%s1557_s2 + $0x8] sm:$0xff] }
 0x108   :  { %v541_v46 = vsel %vm538_vm5, %v521_v45, %v523_v43  ;;  %578 = vmatpush.bf16.msra.mxu3 %v542_v5  ;;  %v615_v48 = vpop.permute.xlu2 %614  ;;  %851 = vperm.xlu1 %1069, %v843_v22  }
 0x109   :  { %564 = vmatpush.bf16.msra.mxu2 %v541_v46 }
 0x10e   :  { %v619_v3 = vpop.permute.xlu1 %618 }
 0x10f   :  { %v630_v50 = vsel %vm622_vm6, %v619_v3, %v621_v40  ;;  %v617_v51 = vpop.permute.xlu0 %616  ;;  %v1057_v40 = vld [vmem:[%s1556_s1 + $0x38] sm:$0xff] }
 0x110   :  { %v629_v52 = vsel %vm622_vm6, %v617_v51, %v619_v3  ;;  %660 = vmatpush.bf16.msrb.mxu1 %v630_v50  ;;  %v609_v53 = vpop.permute.xlu2 %608 }
 0x111   :  { %646 = vmatpush.bf16.msrb.mxu0 %v629_v52  ;;  %v1058_v52 = vld [vmem:[%s1556_s1 + $0x40] sm:$0xff] }
 0x116   :  { %v517_v54 = vpop.permute.xlu1 %516 }
 0x117   :  { %v515_v55 = vpop.permute.xlu0 %514  ;;  %v540_v47 = vsel %vm538_vm5, %v517_v54, %v519_v42 }
 0x118   :  { %v539_v57 = vsel %vm538_vm5, %v515_v55, %v517_v54  ;;  %579 = vmatpush.bf16.msra.mxu3 %v540_v47  ;;  %v705_v44 = vpop.permute.xlu2 %704 }
 0x119   :  { %565 = vmatpush.bf16.msra.mxu2 %v539_v57 }
 0x11a   :  { %v249_v57 = vpop.f32.mrf.mxu3 }
 0x11b   :  { %1005 = vmatmul.msk.bf16.vlgmr.msra.gmra.mxu3 %vm146_vm2, %v1055_v56 }
 0x11c   :  { %1004 = vmatmul.msk.bf16.vlgmr.msra.gmra.mxu2 %vm146_vm2, %v1055_v56  ;;  %v173_v54 = vpop.f32.mrf.mxu1 }
 0x11d   :  { %v159_v55 = vpop.f32.mrf.mxu0 }
 0x11e   :  { %v613_v58 = vpop.permute.xlu1 %612 }
 0x11f   :  { %v611_v59 = vpop.permute.xlu0 %610  ;;  %v628_v60 = vsel %vm622_vm6, %v613_v58, %v615_v48 }
 0x120   :  { %v627_v61 = vsel %vm622_vm6, %v611_v59, %v613_v58  ;;  %661 = vmatpush.bf16.msrb.mxu1 %v628_v60  ;;  %v603_v63 = vpop.permute.xlu2 %602 }
 0x121   :  { %647 = vmatpush.bf16.msrb.mxu0 %v627_v61 }
 0x122   :  { %v251_v60 = vpop.f32.mrf.mxu3 }
 0x124   :  { %v175_v47 = vpop.f32.mrf.mxu1 }
 0x125   :  { %v161_v56 = vpop.f32.mrf.mxu0 }
 0x126   :  { %v607_v62 = vpop.permute.xlu1 %606 }
 0x127   :  { %v605_v0 = vpop.permute.xlu0 %604  ;;  %v626_v1 = vsel %vm622_vm6, %v607_v62, %v609_v53 }
 0x128   :  { %v625_v2 = vsel %vm622_vm6, %v605_v0, %v607_v62  ;;  %662 = vmatpush.bf16.msrb.mxu1 %v626_v1  ;;  %v699_v9 = vpop.permute.xlu2 %698 }
 0x129   :  { %648 = vmatpush.bf16.msrb.mxu0 %v625_v2 }
 0x12e   :  { %v703_v4 = vpop.permute.xlu1 %702 }
 0x12f   :  { %v714_v6 = vsel %vm706_vm7, %v703_v4, %v705_v44  ;;  %v701_v7 = vpop.permute.xlu0 %700  ;;  %v235_v44 = vpop.f32.mrf.mxu2 }
 0x130   :  { %v713_v8 = vsel %vm706_vm7, %v701_v7, %v703_v4  ;;  %744 = vmatpush.bf16.msrb.mxu3 %v714_v6  ;;  %v693_v19 = vpop.permute.xlu2 %692 }
 0x131   :  { %730 = vmatpush.bf16.msrb.mxu2 %v713_v8 }
 0x136   :  { %v601_v11 = vpop.permute.xlu1 %600 }
 0x137   :  { %v599_v12 = vpop.permute.xlu0 %598  ;;  %v624_v14 = vsel %vm622_vm6, %v601_v11, %v603_v63  ;;  %v237_v61 = vpop.f32.mrf.mxu2 }
 0x138   :  { %v623_v18 = vsel %vm622_vm6, %v599_v12, %v601_v11  ;;  %663 = vmatpush.bf16.msrb.mxu1 %v624_v14  ;;  %v789_v27 = vpop.permute.xlu2 %788  ;;  %v329_v58 = vpop.f32.mrf.mxu1  ;;  %v250_v12 = vadd.f32 %v249_v57, %v173_v54 }
 0x139   :  { %649 = vmatpush.bf16.msrb.mxu0 %v623_v18  ;;  %v315_v59 = vpop.f32.mrf.mxu0 }
 0x13a   :  { %v335_v18 = vadd.f32 %v329_v58, %v250_v12 }
 0x13b   :  { %1013 = vmatmul.msk.bf16.vlgmr.msrb.gmra.mxu1 %vm146_vm2, %v1056_v15 }
 0x13c   :  { %1012 = vmatmul.msk.bf16.vlgmr.msrb.gmra.mxu0 %vm146_vm2, %v1056_v15  ;;  %v236_v15 = vadd.f32 %v235_v44, %v159_v55 }
 0x13e   :  { %v697_v20 = vpop.permute.xlu1 %696 }
 0x13f   :  { %v695_v21 = vpop.permute.xlu0 %694  ;;  %v712_v23 = vsel %vm706_vm7, %v697_v20, %v699_v9 }
 0x140   :  { %v711_v24 = vsel %vm706_vm7, %v695_v21, %v697_v20  ;;  %745 = vmatpush.bf16.msrb.mxu3 %v712_v23  ;;  %v687_v30 = vpop.permute.xlu2 %686  ;;  %v331_v62 = vpop.f32.mrf.mxu1 }
 0x141   :  { %731 = vmatpush.bf16.msrb.mxu2 %v711_v24  ;;  %v317_v63 = vpop.f32.mrf.mxu0 }
 0x146   :  { %v691_v31 = vpop.permute.xlu1 %690 }
 0x147   :  { %v689_v34 = vpop.permute.xlu0 %688  ;;  %v710_v28 = vsel %vm706_vm7, %v691_v31, %v693_v19  ;;  %v334_v19 = vadd.f32 %v315_v59, %v236_v15 }
 0x148   :  { %v709_v35 = vsel %vm706_vm7, %v689_v34, %v691_v31  ;;  %746 = vmatpush.bf16.msrb.mxu3 %v710_v28  ;;  %v783_v13 = vpop.permute.xlu2 %782  ;;  %v252_v31 = vadd.f32 %v251_v60, %v175_v47  ;;  %v238_v28 = vadd.f32 %v237_v61, %v161_v56 }
 0x149   :  { %732 = vmatpush.bf16.msrb.mxu2 %v709_v35 }
 0x14e   :  { %v787_v29 = vpop.permute.xlu1 %786 }
 0x14f   :  { %v798_v32 = vsel %vm790_vm8, %v787_v29, %v789_v27  ;;  %v785_v33 = vpop.permute.xlu0 %784 }
 0x150   :  { %v797_v36 = vsel %vm790_vm8, %v785_v33, %v787_v29  ;;  %828 = vmatpush.bf16.msra.mxu1 %v798_v32  ;;  %v777_v43 = vpop.permute.xlu2 %776  ;;  %v336_v32 = vadd.f32 %v317_v63, %v238_v28 }
 0x151   :  { %814 = vmatpush.bf16.msra.mxu0 %v797_v36 }
 0x156   :  { %v685_v26 = vpop.permute.xlu1 %684 }
 0x157   :  { %v683_v38 = vpop.permute.xlu0 %682  ;;  %v708_v39 = vsel %vm706_vm7, %v685_v26, %v687_v30  ;;  %v337_v30 = vadd.f32 %v331_v62, %v252_v31 }
 0x158   :  { %v707_v10 = vsel %vm706_vm7, %v683_v38, %v685_v26  ;;  %747 = vmatpush.bf16.msrb.mxu3 %v708_v39  ;;  %v771_v49 = vpop.permute.xlu2 %770 }
 0x159   :  { %733 = vmatpush.bf16.msrb.mxu2 %v707_v10 }
 0x15b   :  { %1021 = vmatmul.msk.bf16.vlgmr.msrb.gmra.mxu3 %vm146_vm2, %v1057_v40 }
 0x15c   :  { %1020 = vmatmul.msk.bf16.vlgmr.msrb.gmra.mxu2 %vm146_vm2, %v1057_v40 }
 0x15e   :  { %v781_v17 = vpop.permute.xlu1 %780 }
 0x15f   :  { %v779_v41 = vpop.permute.xlu0 %778  ;;  %v796_v16 = vsel %vm790_vm8, %v781_v17, %v783_v13 }
 0x160   :  { %v795_v42 = vsel %vm790_vm8, %v779_v41, %v781_v17  ;;  %829 = vmatpush.bf16.msra.mxu1 %v796_v16 }
 0x161   :  { %815 = vmatpush.bf16.msra.mxu0 %v795_v42 }
 0x166   :  { %v775_v45 = vpop.permute.xlu1 %774 }
 0x167   :  { %v773_v5 = vpop.permute.xlu0 %772  ;;  %v794_v46 = vsel %vm790_vm8, %v775_v45, %v777_v43 }
 0x168   :  { %v793_v48 = vsel %vm790_vm8, %v773_v5, %v775_v45  ;;  %830 = vmatpush.bf16.msra.mxu1 %v794_v46 }
 0x169   :  { %816 = vmatpush.bf16.msra.mxu0 %v793_v48  ;;  %v863_v48 = vstv %s1558_s3 }
 0x16e   :  { %v769_v3 = vpop.permute.xlu1 %768 }
 0x16f   :  { %v767_v50 = vpop.permute.xlu0 %766  ;;  %v792_v51 = vsel %vm790_vm8, %v769_v3, %v771_v49 }
 0x170   :  { %v791_v53 = vsel %vm790_vm8, %v767_v50, %v769_v3  ;;  %831 = vmatpush.bf16.msra.mxu1 %v792_v51 }
 0x171   :  { %817 = vmatpush.bf16.msra.mxu0 %v791_v53 }
 0x173   :  { %1029 = vmatmul.msk.bf16.vlgmr.msra.gmra.mxu1 %vm146_vm2, %v1058_v52 }
 0x174   :  { %1028 = vmatmul.msk.bf16.vlgmr.msra.gmra.mxu0 %vm146_vm2, %v1058_v52 }
 0x177   :  { %v847_v43 = vpop.permute.xlu0 %846 }
 0x178   :  { %v399_v1 = vpop.f32.mrf.mxu2  ;;  %v497_v2 = vpop.f32.mrf.mxu1 }
 0x179   :  { %v413_v0 = vpop.f32.mrf.mxu3  ;;  %v483_v4 = vpop.f32.mrf.mxu0  ;;  %v418_v24 = vadd.f32 %v399_v1, %v334_v19 }
 0x17a   :  { %v419_v23 = vadd.f32 %v413_v0, %v335_v18  ;;  %v852_v61 = vpop.permute.xlu1 %851 }
 0x17b   :  { %v502_v29 = vadd.f32 %v483_v4, %v418_v24 }
 0x17c   :  { %v503_v35 = vadd.f32 %v497_v2, %v419_v23 }
 0x180   :  { %v401_v7 = vpop.f32.mrf.mxu2  ;;  %v499_v8 = vpop.f32.mrf.mxu1 }
 0x181   :  { %v415_v6 = vpop.f32.mrf.mxu3  ;;  %v485_v9 = vpop.f32.mrf.mxu0  ;;  %v420_v39 = vadd.f32 %v401_v7, %v336_v32 }
 0x182   :  { %v421_v26 = vadd.f32 %v415_v6, %v337_v30 }
 0x183   :  { %v504_v41 = vadd.f32 %v485_v9, %v420_v39 }
 0x184   :  { %v505_v13 = vadd.f32 %v499_v8, %v421_v26 }
 0x19e   :  { %v581_v11 = vpop.f32.mrf.mxu3 }
 0x19f   :  { %v567_v14 = vpop.f32.mrf.mxu2  ;;  %v587_v36 = vadd.f32 %v581_v11, %v503_v35 }
 0x1a0   :  { %v586_v22 = vadd.f32 %v567_v14, %v502_v29 }
 0x1a6   :  { %v583_v27 = vpop.f32.mrf.mxu3 }
 0x1a7   :  { %v569_v34 = vpop.f32.mrf.mxu2  ;;  %v589_v49 = vadd.f32 %v583_v27, %v505_v13 }
 0x1a8   :  { %v588_v50 = vadd.f32 %v569_v34, %v504_v41 }
 0x1b8   :  { %v665_v20 = vpop.f32.mrf.mxu1 }
 0x1b9   :  { %v651_v21 = vpop.f32.mrf.mxu0  ;;  %v671_v40 = vadd.f32 %v665_v20, %v587_v36 }
 0x1ba   :  { %v670_v10 = vadd.f32 %v651_v21, %v586_v22 }
 0x1c0   :  { %v667_v33 = vpop.f32.mrf.mxu1 }
 0x1c1   :  { %v653_v37 = vpop.f32.mrf.mxu0  ;;  %v673_v53 = vadd.f32 %v667_v33, %v589_v49 }
 0x1c2   :  { %v672_v47 = vadd.f32 %v653_v37, %v588_v50 }
 0x1de   :  { %v749_v25 = vpop.f32.mrf.mxu3 }
 0x1df   :  { %v735_v38 = vpop.f32.mrf.mxu2  ;;  %v755_v17 = vadd.f32 %v749_v25, %v671_v40 }
 0x1e0   :  { %v754_v16 = vadd.f32 %v735_v38, %v670_v10 }
 0x1e6   :  { %v751_v51 = vpop.f32.mrf.mxu3 }
 0x1e7   :  { %v737_v54 = vpop.f32.mrf.mxu2  ;;  %v757_v57 = vadd.f32 %v751_v51, %v673_v53 }
 0x1e8   :  { %v756_v58 = vadd.f32 %v737_v54, %v672_v47 }
 0x1f0   :  { %v833_v42 = vpop.f32.mrf.mxu1 }
 0x1f1   :  { %v819_v45 = vpop.f32.mrf.mxu0  ;;  %v839_v5 = vadd.f32 %v833_v42, %v755_v17 }
 0x1f2   :  { %v838_v46 = vadd.f32 %v819_v45, %v754_v16 }
 0x1f3   :  { %v855_v3 = vadd.f32 %v847_v43, %v839_v5 }
 0x1f4   :  { %v854_v52 = vadd.f32 %v847_v43, %v838_v46 }
 0x1f5   :  { %vm860_vm9 = vcmp.ge.f32.partialorder %v855_v3, 0.0  ;;  %v865_v55 = vmul.f32 %v863_v48, %v855_v3 }
 0x1f6   :  { %vm859_vm10 = vcmp.ge.f32.partialorder %v854_v52, 0.0  ;;  %v864_v56 = vmul.f32 %v863_v48, %v854_v52 }
 0x1f7   :  { %v869_v44 = vsel %vm860_vm9, %v855_v3, %v865_v55 }
 0x1f8   :  { %v868_v59 = vsel %vm859_vm10, %v854_v52, %v864_v56  ;;  %v835_v60 = vpop.f32.mrf.mxu1 }
 0x1f9   :  { %v872_v62 = vpack.c.bf16 %v869_v44, %v868_v59  ;;  %v821_v63 = vpop.f32.mrf.mxu0  ;;  %v841_v0 = vadd.f32 %v835_v60, %v757_v57 }
 0x1fa   :  { %v840_v1 = vadd.f32 %v821_v63, %v756_v58 }
 0x1fb   :  { %874 = vst [vmem:[%s1559_s4] sm:$0xff] %v872_v62  ;;  %v857_v2 = vadd.f32 %v852_v61, %v841_v0 }
 0x1fc   :  { %v856_v4 = vadd.f32 %v852_v61, %v840_v1 }
 0x1fd   :  { %vm862_vm11 = vcmp.ge.f32.partialorder %v857_v2, 0.0  ;;  %v867_v6 = vmul.f32 %v863_v48, %v857_v2 }
 0x1fe   :  { %vm861_vm12 = vcmp.ge.f32.partialorder %v856_v4, 0.0  ;;  %v866_v7 = vmul.f32 %v863_v48, %v856_v4 }
 0x1ff   :  { %v871_v8 = vsel %vm862_vm11, %v857_v2, %v867_v6 }
 0x200   :  { %v870_v9 = vsel %vm861_vm12, %v856_v4, %v866_v7 }
 0x201   :  { %v873_v11 = vpack.c.bf16 %v871_v8, %v870_v9 }
 0x203   :  { %875 = vst [vmem:[%s1559_s4 + $0x8] sm:$0xff] %v873_v11 }

// kernel: net6_forward.55
= control target key start
LH: loop header
LB: loop body
LE: loop exit
PB: predicated region body
PF: predicated region fallthrough
CT: control target
= control target key end

     0   :  { %v314_v27 = vmov 0   ;;  %vm59_vm0 = vcmask 130048   ;;  %s417_s2 = inlined_call_operand.vmem [shape: bf16[16,32], index: 2, kind: input, shape index: {}]   ;;  %s418_s1 = inlined_call_operand.vmem [shape: bf16[16,512], index: 1, kind: input, shape index: {}]   ;;  %s419_s0 = inlined_call_operand.vmem [shape: bf16[16,512], index: 0, kind: input, shape index: {}]   ;;  %s420_s3 = inlined_call_operand.vmem [shape: f32[16,1], index: 3, kind: input, shape index: {}]   ;;  %s421_s4 = inlined_call_operand.<no memory space> [shape: f32[1,1], index: 4, kind: input, shape index: {}]   ;;  %s422_s5 = inlined_call_operand.vmem [shape: bf16[16,512], index: 5, kind: output, shape index: {}]  }
   0x1   :  { %v300_v0 = vld [vmem:[%s417_s2] sm:$0xff]  ;;  %v307_v2 = vld [vmem:[%s418_s1 + $0xc] sm:$0xf0]  ;;  %v264_v5 = vld [vmem:[%s418_s1 + $0x10] sm:$0xf0]  ;;  %s313_s2 = smov 112   ;;  %311 = vset.pattern.permute.xlu0 %v314_v27  ;;  %312 = vset.pattern.permute.xlu1 %v314_v27  ;;  %v227_v42 = vstv %s421_s4 }
   0x2   :  { %v262_v1 = vld [vmem:[%s418_s1] sm:$0xf]  ;;  %v305_v4 = vld [vmem:[%s418_s1 + $0x4] sm:$0xf]  ;;  %v270_v6 = vld [vmem:[%s418_s1 + $0x8] sm:$0xf]  ;;  %37 = vrot.lane.b32.xlu0 %v300_v0, %s313_s2 }
   0x3   :  { %v263_v3 = vor.u32 %v307_v2, %v262_v1  ;;  %v267_v7 = vor.u32 %v305_v4, %v264_v5  ;;  %v308_v8 = vld [vmem:[%s418_s1 + $0x14] sm:$0xf0]  ;;  %v306_v9 = vld [vmem:[%s418_s1 + $0xc] sm:$0xf]  ;;  %v272_v10 = vld [vmem:[%s418_s1 + $0x18] sm:$0xf0] }
   0x4   :  { %v271_v11 = vor.u32 %v308_v8, %v270_v6  ;;  %v275_v12 = vor.u32 %v306_v9, %v272_v10  ;;  %v290_v13 = vld [vmem:[%s419_s0 + $0x8] sm:$0xf]  ;;  %v304_v14 = vld [vmem:[%s419_s0 + $0x14] sm:$0xf0]  ;;  %v302_v15 = vld [vmem:[%s419_s0 + $0xc] sm:$0xf] }
   0x5   :  { %70 = vmatpush.bf16.msra.mxu0 %v263_v3  ;;  %84 = vmatpush.bf16.msra.mxu1 %v267_v7  ;;  %v291_v16 = vor.u32 %v304_v14, %v290_v13  ;;  %v292_v17 = vld [vmem:[%s419_s0 + $0x18] sm:$0xf0]  ;;  %v282_v18 = vld [vmem:[%s419_s0] sm:$0xf]  ;;  %v303_v19 = vld [vmem:[%s419_s0 + $0xc] sm:$0xf0] }
   0x6   :  { %98 = vmatpush.bf16.msra.mxu2 %v271_v11  ;;  %112 = vmatpush.bf16.msra.mxu3 %v275_v12  ;;  %v295_v20 = vor.u32 %v302_v15, %v292_v17  ;;  %v283_v21 = vor.u32 %v303_v19, %v282_v18  ;;  %v301_v22 = vld [vmem:[%s419_s0 + $0x4] sm:$0xf]  ;;  %v284_v23 = vld [vmem:[%s419_s0 + $0x10] sm:$0xf0]  ;;  %v199_v26 = vld [vmem:[%s420_s3 + $0x8] sm:$0xff] }
   0x7   :  { %v287_v24 = vor.u32 %v301_v22, %v284_v23  ;;  %v198_v25 = vld [vmem:[%s420_s3] sm:$0xff]  ;;  %207 = vperm.xlu1 %312, %v199_v26  }
   0x9   :  { %149 = vmatpush.bf16.msrb.mxu0 %v283_v21  ;;  %163 = vmatpush.bf16.msrb.mxu1 %v287_v24 }
   0xa   :  { %177 = vmatpush.bf16.msrb.mxu2 %v291_v16  ;;  %191 = vmatpush.bf16.msrb.mxu3 %v295_v20 }
   0xb   :  { %202 = vperm.xlu0 %311, %v198_v25  }
  0x74   :  { %v38_v28 = vpop.permute.xlu0 %37 }
  0x75   :  { %276 = vmatmul.msk.bf16.vlgmr.msra.gmra.mxu0 %vm59_vm0, %v38_v28  ;;  %277 = vmatmul.msk.bf16.vlgmr.msra.gmra.mxu1 %vm59_vm0, %v38_v28 }
  0x76   :  { %278 = vmatmul.msk.bf16.vlgmr.msra.gmra.mxu2 %vm59_vm0, %v38_v28  ;;  %279 = vmatmul.msk.bf16.vlgmr.msra.gmra.mxu3 %vm59_vm0, %v38_v28 }
  0x79   :  { %v208_v47 = vpop.permute.xlu1 %207 }
  0x7d   :  { %v203_v35 = vpop.permute.xlu0 %202 }
  0x85   :  { %296 = vmatmul.msk.bf16.vlgmr.msrb.gmra.mxu0 %vm59_vm0, %v300_v0  ;;  %297 = vmatmul.msk.bf16.vlgmr.msrb.gmra.mxu1 %vm59_vm0, %v300_v0 }
  0x86   :  { %298 = vmatmul.msk.bf16.vlgmr.msrb.gmra.mxu2 %vm59_vm0, %v300_v0  ;;  %299 = vmatmul.msk.bf16.vlgmr.msrb.gmra.mxu3 %vm59_vm0, %v300_v0 }
  0xf2   :  { %v72_v29 = vpop.f32.mrf.mxu0  ;;  %v86_v30 = vpop.f32.mrf.mxu1 }
  0xf9   :  { %v100_v31 = vpop.f32.mrf.mxu2  ;;  %v114_v32 = vpop.f32.mrf.mxu3 }
  0xfa   :  { %v74_v33 = vpop.f32.mrf.mxu0  ;;  %v88_v34 = vpop.f32.mrf.mxu1 }
 0x101   :  { %v102_v36 = vpop.f32.mrf.mxu2  ;;  %v116_v37 = vpop.f32.mrf.mxu3 }
 0x102   :  { %v151_v38 = vpop.f32.mrf.mxu0  ;;  %v165_v39 = vpop.f32.mrf.mxu1 }
 0x103   :  { %v152_v40 = vadd.f32 %v151_v38, %v72_v29  ;;  %v166_v41 = vadd.f32 %v165_v39, %v86_v30 }
 0x105   :  { %v210_v43 = vadd.f32 %v203_v35, %v152_v40  ;;  %v211_v44 = vadd.f32 %v203_v35, %v166_v41 }
 0x107   :  { %vm219_vm1 = vcmp.ge.f32.partialorder %v210_v43, 0.0  ;;  %vm220_vm2 = vcmp.ge.f32.partialorder %v211_v44, 0.0  ;;  %v228_v45 = vmul.f32 %v227_v42, %v210_v43  ;;  %v229_v46 = vmul.f32 %v227_v42, %v211_v44 }
 0x109   :  { %v236_v48 = vsel %vm219_vm1, %v210_v43, %v228_v45  ;;  %v237_v49 = vsel %vm220_vm2, %v211_v44, %v229_v46  ;;  %v179_v50 = vpop.f32.mrf.mxu2  ;;  %v193_v51 = vpop.f32.mrf.mxu3 }
 0x10a   :  { %v244_v52 = vpack.c.bf16 %v237_v49, %v236_v48  ;;  %v180_v53 = vadd.f32 %v179_v50, %v100_v31  ;;  %v194_v54 = vadd.f32 %v193_v51, %v114_v32  ;;  %v153_v55 = vpop.f32.mrf.mxu0  ;;  %v167_v56 = vpop.f32.mrf.mxu1 }
 0x10b   :  { %v154_v57 = vadd.f32 %v153_v55, %v74_v33  ;;  %v168_v58 = vadd.f32 %v167_v56, %v88_v34 }
 0x10c   :  { %248 = vst [vmem:[%s422_s5] sm:$0xff] %v244_v52  ;;  %v212_v59 = vadd.f32 %v203_v35, %v180_v53  ;;  %v213_v60 = vadd.f32 %v203_v35, %v194_v54 }
 0x10d   :  { %v214_v61 = vadd.f32 %v208_v47, %v154_v57  ;;  %v215_v62 = vadd.f32 %v208_v47, %v168_v58 }
 0x10e   :  { %vm221_vm3 = vcmp.ge.f32.partialorder %v212_v59, 0.0  ;;  %v230_v63 = vmul.f32 %v227_v42, %v212_v59  ;;  %vm222_vm4 = vcmp.ge.f32.partialorder %v213_v60, 0.0  ;;  %v231_v0 = vmul.f32 %v227_v42, %v213_v60 }
 0x10f   :  { %vm223_vm5 = vcmp.ge.f32.partialorder %v214_v61, 0.0  ;;  %vm224_vm6 = vcmp.ge.f32.partialorder %v215_v62, 0.0  ;;  %v232_v1 = vmul.f32 %v227_v42, %v214_v61  ;;  %v233_v2 = vmul.f32 %v227_v42, %v215_v62 }
 0x110   :  { %v238_v3 = vsel %vm221_vm3, %v212_v59, %v230_v63  ;;  %v239_v4 = vsel %vm222_vm4, %v213_v60, %v231_v0 }
 0x111   :  { %v245_v5 = vpack.c.bf16 %v239_v4, %v238_v3  ;;  %v240_v6 = vsel %vm223_vm5, %v214_v61, %v232_v1  ;;  %v241_v7 = vsel %vm224_vm6, %v215_v62, %v233_v2  ;;  %v181_v8 = vpop.f32.mrf.mxu2  ;;  %v195_v9 = vpop.f32.mrf.mxu3 }
 0x112   :  { %v246_v10 = vpack.c.bf16 %v241_v7, %v240_v6  ;;  %v182_v11 = vadd.f32 %v181_v8, %v102_v36  ;;  %v196_v12 = vadd.f32 %v195_v9, %v116_v37 }
 0x113   :  { %249 = vst [vmem:[%s422_s5 + $0x8] sm:$0xff] %v245_v5 }
 0x114   :  { %250 = vst [vmem:[%s422_s5 + $0x10] sm:$0xff] %v246_v10  ;;  %v216_v13 = vadd.f32 %v208_v47, %v182_v11  ;;  %v217_v14 = vadd.f32 %v208_v47, %v196_v12 }
 0x116   :  { %vm225_vm7 = vcmp.ge.f32.partialorder %v216_v13, 0.0  ;;  %v234_v15 = vmul.f32 %v227_v42, %v216_v13  ;;  %vm226_vm8 = vcmp.ge.f32.partialorder %v217_v14, 0.0  ;;  %v235_v16 = vmul.f32 %v227_v42, %v217_v14 }
 0x118   :  { %v242_v17 = vsel %vm225_vm7, %v216_v13, %v234_v15  ;;  %v243_v18 = vsel %vm226_vm8, %v217_v14, %v235_v16 }
 0x119   :  { %v247_v19 = vpack.c.bf16 %v243_v18, %v242_v17 }
 0x11b   :  { %251 = vst [vmem:[%s422_s5 + $0x18] sm:$0xff] %v247_v19 }

// kernel: net6_forward.67
= control target key start
LH: loop header
LB: loop body
LE: loop exit
PB: predicated region body
PF: predicated region fallthrough
CT: control target
= control target key end

     0   :  { %s177_s27 = smov 96   ;;  %s178_s28 = smov 112   ;;  %vm44_vm0 = vcmask 130048   ;;  %v179_v5 = vmov 0   ;;  %s239_s3 = inlined_call_operand.vmem [shape: bf16[16,48], index: 3, kind: input, shape index: {}]   ;;  %s240_s0 = inlined_call_operand.vmem [shape: bf16[16,128], index: 0, kind: input, shape index: {}]   ;;  %s241_s2 = inlined_call_operand.vmem [shape: bf16[16,128], index: 2, kind: input, shape index: {}]   ;;  %s242_s1 = inlined_call_operand.vmem [shape: bf16[16,128], index: 1, kind: input, shape index: {}]   ;;  %s243_s4 = inlined_call_operand.vmem [shape: f32[16,1], index: 4, kind: input, shape index: {}]   ;;  %s244_s5 = inlined_call_operand.<no memory space> [shape: f32[1,1], index: 5, kind: input, shape index: {}]   ;;  %s245_s6 = inlined_call_operand.vmem [shape: bf16[16,128], index: 6, kind: output, shape index: {}]  }
   0x1   :  { %v163_v0 = vld [vmem:[%s239_s3] sm:$0xff]  ;;  %175 = vset.pattern.permute.xlu1 %v179_v5  ;;  %176 = vset.pattern.permute.xlu0 %v179_v5  ;;  %v115_v6 = vld [vmem:[%s243_s4 + $0x8] sm:$0xff]  ;;  %v131_v19 = vstv %s244_s5 }
   0x2   :  { %v164_v1 = vld [vmem:[%s240_s0] sm:$0xff]  ;;  %87 = vrot.lane.b32.xlu0 %v163_v0, %s177_s27 }
   0x3   :  { %v166_v2 = vld [vmem:[%s241_s2] sm:$0xff]  ;;  %78 = vmatpush.bf16.msra.mxu1 %v164_v1 }
   0x4   :  { %105 = vmatpush.bf16.msra.mxu2 %v166_v2  ;;  %v165_v3 = vld [vmem:[%s242_s1] sm:$0xff] }
   0x5   :  { %55 = vmatpush.bf16.msra.mxu0 %v165_v3  ;;  %v114_v4 = vld [vmem:[%s243_s4] sm:$0xff] }
   0x6   :  { %157 = vmatmul.msk.bf16.vlgmr.msra.gmra.mxu1 %vm44_vm0, %v163_v0  ;;  %118 = vperm.xlu1 %175, %v114_v4  }
   0xa   :  { %36 = vrot.lane.b32.xlu0 %v163_v0, %s178_s28 }
   0xe   :  { %123 = vperm.xlu1 %175, %v115_v6  }
  0x74   :  { %v88_v7 = vpop.permute.xlu0 %87 }
  0x75   :  { %162 = vmatmul.msk.bf16.vlgmr.msra.gmra.mxu2 %vm44_vm0, %v88_v7 }
  0x78   :  { %v119_v13 = vpop.permute.xlu1 %118 }
  0x7c   :  { %v37_v8 = vpop.permute.xlu0 %36 }
  0x7d   :  { %152 = vmatmul.msk.bf16.vlgmr.msra.gmra.mxu0 %vm44_vm0, %v37_v8 }
  0x80   :  { %v124_v22 = vpop.permute.xlu1 %123 }
  0x83   :  { %v80_v9 = vpop.f32.mrf.mxu1 }
  0x8b   :  { %v82_v15 = vpop.f32.mrf.mxu1 }
  0xf8   :  { %v107_v10 = vpop.f32.mrf.mxu2 }
  0xfa   :  { %v57_v11 = vpop.f32.mrf.mxu0 }
  0xfb   :  { %v81_v12 = vadd.f32 %v80_v9, %v57_v11 }
  0xfd   :  { %v112_v14 = vadd.f32 %v107_v10, %v81_v12 }
  0xff   :  { %v126_v17 = vadd.f32 %v119_v13, %v112_v14 }
 0x100   :  { %v109_v20 = vpop.f32.mrf.mxu2 }
 0x101   :  { %v132_v23 = vmul.f32 %v131_v19, %v126_v17  ;;  %vm129_vm1 = vcmp.ge.f32.partialorder %v126_v17, 0.0 }
 0x102   :  { %v59_v16 = vpop.f32.mrf.mxu0 }
 0x103   :  { %v83_v18 = vadd.f32 %v82_v15, %v59_v16  ;;  %v134_v26 = vsel %vm129_vm1, %v126_v17, %v132_v23 }
 0x105   :  { %v113_v21 = vadd.f32 %v109_v20, %v83_v18 }
 0x107   :  { %v127_v24 = vadd.f32 %v124_v22, %v113_v21 }
 0x109   :  { %vm130_vm2 = vcmp.ge.f32.partialorder %v127_v24, 0.0  ;;  %v133_v25 = vmul.f32 %v131_v19, %v127_v24 }
 0x10b   :  { %v135_v27 = vsel %vm130_vm2, %v127_v24, %v133_v25 }
 0x10c   :  { %v170_v28 = vpack.c.bf16 %v135_v27, %v134_v26 }
 0x10e   :  { %171 = vst [vmem:[%s245_s6] sm:$0xff] %v170_v28  }

// kernel: net6_forward.63
= control target key start
LH: loop header
LB: loop body
LE: loop exit
PB: predicated region body
PF: predicated region fallthrough
CT: control target
= control target key end

     0   :  { %s434_s8 = smov 112   ;;  %s435_s15 = smov 96   ;;  %vm62_vm0 = vcmask 130048   ;;  %v436_v39 = vmov 0   ;;  %s588_s3 = inlined_call_operand.vmem [shape: bf16[16,48], index: 3, kind: input, shape index: {}]   ;;  %s589_s1 = inlined_call_operand.vmem [shape: bf16[16,512], index: 1, kind: input, shape index: {}]   ;;  %s590_s0 = inlined_call_operand.vmem [shape: bf16[16,512], index: 0, kind: input, shape index: {}]   ;;  %s591_s2 = inlined_call_operand.vmem [shape: bf16[16,512], index: 2, kind: input, shape index: {}]   ;;  %s592_s4 = inlined_call_operand.vmem [shape: f32[16,1], index: 4, kind: input, shape index: {}]   ;;  %s593_s5 = inlined_call_operand.<no memory space> [shape: f32[1,1], index: 5, kind: input, shape index: {}]   ;;  %s594_s6 = inlined_call_operand.vmem [shape: bf16[16,512], index: 6, kind: output, shape index: {}]  }
   0x1   :  { %v475_v0 = vld [vmem:[%s588_s3] sm:$0xff]  ;;  %v423_v2 = vld [vmem:[%s589_s1 + $0xc] sm:$0xf0]  ;;  %v360_v5 = vld [vmem:[%s589_s1 + $0x10] sm:$0xf0]  ;;  %432 = vset.pattern.permute.xlu1 %v436_v39  ;;  %433 = vset.pattern.permute.xlu0 %v436_v39 }
   0x2   :  { %v358_v1 = vld [vmem:[%s589_s1] sm:$0xf]  ;;  %v421_v4 = vld [vmem:[%s589_s1 + $0x4] sm:$0xf]  ;;  %v366_v6 = vld [vmem:[%s589_s1 + $0x8] sm:$0xf]  ;;  %40 = vrot.lane.b32.xlu0 %v475_v0, %s434_s8 }
   0x3   :  { %v359_v3 = vor.u32 %v423_v2, %v358_v1  ;;  %v363_v7 = vor.u32 %v421_v4, %v360_v5  ;;  %v424_v8 = vld [vmem:[%s589_s1 + $0x14] sm:$0xf0]  ;;  %v422_v9 = vld [vmem:[%s589_s1 + $0xc] sm:$0xf]  ;;  %v368_v10 = vld [vmem:[%s589_s1 + $0x18] sm:$0xf0]  ;;  %v323_v1 = vstv %s593_s5 }
   0x4   :  { %v367_v11 = vor.u32 %v424_v8, %v366_v6  ;;  %v371_v12 = vor.u32 %v422_v9, %v368_v10  ;;  %v386_v13 = vld [vmem:[%s590_s0 + $0x8] sm:$0xf]  ;;  %v420_v14 = vld [vmem:[%s590_s0 + $0x14] sm:$0xf0]  ;;  %v418_v15 = vld [vmem:[%s590_s0 + $0xc] sm:$0xf] }
   0x5   :  { %73 = vmatpush.bf16.msra.mxu0 %v359_v3  ;;  %87 = vmatpush.bf16.msra.mxu1 %v363_v7  ;;  %v387_v16 = vor.u32 %v420_v14, %v386_v13  ;;  %v388_v17 = vld [vmem:[%s590_s0 + $0x18] sm:$0xf0]  ;;  %v378_v18 = vld [vmem:[%s590_s0] sm:$0xf]  ;;  %v419_v19 = vld [vmem:[%s590_s0 + $0xc] sm:$0xf0] }
   0x6   :  { %101 = vmatpush.bf16.msra.mxu2 %v367_v11  ;;  %115 = vmatpush.bf16.msra.mxu3 %v371_v12  ;;  %v391_v20 = vor.u32 %v418_v15, %v388_v17  ;;  %v379_v21 = vor.u32 %v419_v19, %v378_v18  ;;  %v417_v22 = vld [vmem:[%s590_s0 + $0x4] sm:$0xf]  ;;  %v380_v23 = vld [vmem:[%s590_s0 + $0x10] sm:$0xf0]  ;;  %v406_v25 = vld [vmem:[%s591_s2 + $0x8] sm:$0xf] }
   0x7   :  { %v383_v24 = vor.u32 %v417_v22, %v380_v23  ;;  %v428_v26 = vld [vmem:[%s591_s2 + $0x14] sm:$0xf0]  ;;  %v426_v27 = vld [vmem:[%s591_s2 + $0xc] sm:$0xf]  ;;  %v408_v28 = vld [vmem:[%s591_s2 + $0x18] sm:$0xf0] }
   0x8   :  { %v398_v29 = vld [vmem:[%s591_s2] sm:$0xf]  ;;  %v427_v30 = vld [vmem:[%s591_s2 + $0xc] sm:$0xf0]  ;;  %v425_v31 = vld [vmem:[%s591_s2 + $0x4] sm:$0xf]  ;;  %v407_v33 = vor.u32 %v428_v26, %v406_v25  ;;  %v411_v34 = vor.u32 %v426_v27, %v408_v28 }
   0x9   :  { %152 = vmatpush.bf16.msrb.mxu0 %v379_v21  ;;  %166 = vmatpush.bf16.msrb.mxu1 %v383_v24  ;;  %v400_v32 = vld [vmem:[%s591_s2 + $0x10] sm:$0xf0]  ;;  %v399_v36 = vor.u32 %v427_v30, %v398_v29  ;;  %v294_v38 = vld [vmem:[%s592_s4] sm:$0xff]  ;;  %v295_v40 = vld [vmem:[%s592_s4 + $0x8] sm:$0xff] }
   0xa   :  { %205 = vrot.lane.b32.xlu0 %v475_v0, %s435_s15  ;;  %180 = vmatpush.bf16.msrb.mxu2 %v387_v16  ;;  %v403_v37 = vor.u32 %v425_v31, %v400_v32 }
   0xb   :  { %194 = vmatpush.bf16.msrb.mxu3 %v391_v20  ;;  %298 = vperm.xlu1 %432, %v294_v38  }
  0x13   :  { %303 = vperm.xlu1 %432, %v295_v40  }
  0x74   :  { %v41_v35 = vpop.permute.xlu0 %40 }
  0x75   :  { %372 = vmatmul.msk.bf16.vlgmr.msra.gmra.mxu0 %vm62_vm0, %v41_v35  ;;  %373 = vmatmul.msk.bf16.vlgmr.msra.gmra.mxu1 %vm62_vm0, %v41_v35 }
  0x76   :  { %374 = vmatmul.msk.bf16.vlgmr.msra.gmra.mxu2 %vm62_vm0, %v41_v35  ;;  %375 = vmatmul.msk.bf16.vlgmr.msra.gmra.mxu3 %vm62_vm0, %v41_v35 }
  0x77   :  { %265 = vmatpush.bf16.msra.mxu2 %v407_v33  ;;  %279 = vmatpush.bf16.msra.mxu3 %v411_v34 }
  0x78   :  { %237 = vmatpush.bf16.msra.mxu0 %v399_v36  ;;  %251 = vmatpush.bf16.msra.mxu1 %v403_v37 }
  0x7c   :  { %v206_v41 = vpop.permute.xlu0 %205 }
  0x7d   :  { %v299_v56 = vpop.permute.xlu1 %298 }
  0x85   :  { %392 = vmatmul.msk.bf16.vlgmr.msrb.gmra.mxu0 %vm62_vm0, %v475_v0  ;;  %393 = vmatmul.msk.bf16.vlgmr.msrb.gmra.mxu1 %vm62_vm0, %v475_v0  ;;  %v304_v23 = vpop.permute.xlu1 %303 }
  0x86   :  { %394 = vmatmul.msk.bf16.vlgmr.msrb.gmra.mxu2 %vm62_vm0, %v475_v0  ;;  %395 = vmatmul.msk.bf16.vlgmr.msrb.gmra.mxu3 %vm62_vm0, %v475_v0 }
  0x95   :  { %412 = vmatmul.msk.bf16.vlgmr.msra.gmra.mxu0 %vm62_vm0, %v206_v41  ;;  %413 = vmatmul.msk.bf16.vlgmr.msra.gmra.mxu1 %vm62_vm0, %v206_v41 }
  0x96   :  { %414 = vmatmul.msk.bf16.vlgmr.msra.gmra.mxu2 %vm62_vm0, %v206_v41  ;;  %415 = vmatmul.msk.bf16.vlgmr.msra.gmra.mxu3 %vm62_vm0, %v206_v41 }
  0xf2   :  { %v75_v42 = vpop.f32.mrf.mxu0  ;;  %v89_v43 = vpop.f32.mrf.mxu1 }
  0xf9   :  { %v103_v44 = vpop.f32.mrf.mxu2  ;;  %v117_v45 = vpop.f32.mrf.mxu3 }
  0xfa   :  { %v77_v46 = vpop.f32.mrf.mxu0  ;;  %v91_v47 = vpop.f32.mrf.mxu1 }
 0x101   :  { %v105_v48 = vpop.f32.mrf.mxu2  ;;  %v119_v49 = vpop.f32.mrf.mxu3 }
 0x102   :  { %v154_v50 = vpop.f32.mrf.mxu0  ;;  %v168_v51 = vpop.f32.mrf.mxu1 }
 0x103   :  { %v155_v57 = vadd.f32 %v154_v50, %v75_v42  ;;  %v169_v58 = vadd.f32 %v168_v51, %v89_v43 }
 0x109   :  { %v182_v52 = vpop.f32.mrf.mxu2  ;;  %v196_v53 = vpop.f32.mrf.mxu3 }
 0x10a   :  { %v156_v54 = vpop.f32.mrf.mxu0  ;;  %v170_v55 = vpop.f32.mrf.mxu1  ;;  %v183_v6 = vadd.f32 %v182_v52, %v103_v44  ;;  %v197_v7 = vadd.f32 %v196_v53, %v117_v45 }
 0x10b   :  { %v157_v8 = vadd.f32 %v156_v54, %v77_v46  ;;  %v171_v9 = vadd.f32 %v170_v55, %v91_v47 }
 0x111   :  { %v184_v59 = vpop.f32.mrf.mxu2  ;;  %v198_v60 = vpop.f32.mrf.mxu3 }
 0x112   :  { %v239_v61 = vpop.f32.mrf.mxu0  ;;  %v253_v62 = vpop.f32.mrf.mxu1  ;;  %v185_v30 = vadd.f32 %v184_v59, %v105_v48  ;;  %v199_v31 = vadd.f32 %v198_v60, %v119_v49 }
 0x113   :  { %v286_v63 = vadd.f32 %v239_v61, %v155_v57  ;;  %v287_v0 = vadd.f32 %v253_v62, %v169_v58 }
 0x115   :  { %v306_v2 = vadd.f32 %v299_v56, %v286_v63  ;;  %v307_v3 = vadd.f32 %v299_v56, %v287_v0 }
 0x117   :  { %vm315_vm1 = vcmp.ge.f32.partialorder %v306_v2, 0.0  ;;  %v324_v4 = vmul.f32 %v323_v1, %v306_v2  ;;  %vm316_vm2 = vcmp.ge.f32.partialorder %v307_v3, 0.0  ;;  %v325_v5 = vmul.f32 %v323_v1, %v307_v3 }
 0x119   :  { %v332_v10 = vsel %vm315_vm1, %v306_v2, %v324_v4  ;;  %v333_v11 = vsel %vm316_vm2, %v307_v3, %v325_v5  ;;  %v267_v12 = vpop.f32.mrf.mxu2  ;;  %v281_v13 = vpop.f32.mrf.mxu3 }
 0x11a   :  { %v340_v14 = vpack.c.bf16 %v333_v11, %v332_v10  ;;  %v288_v15 = vadd.f32 %v267_v12, %v183_v6  ;;  %v289_v16 = vadd.f32 %v281_v13, %v197_v7  ;;  %v241_v17 = vpop.f32.mrf.mxu0  ;;  %v255_v18 = vpop.f32.mrf.mxu1 }
 0x11b   :  { %v290_v19 = vadd.f32 %v241_v17, %v157_v8  ;;  %v291_v20 = vadd.f32 %v255_v18, %v171_v9 }
 0x11c   :  { %344 = vst [vmem:[%s594_s6] sm:$0xff] %v340_v14  ;;  %v308_v21 = vadd.f32 %v299_v56, %v288_v15  ;;  %v309_v22 = vadd.f32 %v299_v56, %v289_v16 }
 0x11d   :  { %v310_v24 = vadd.f32 %v304_v23, %v290_v19  ;;  %v311_v25 = vadd.f32 %v304_v23, %v291_v20 }
 0x11e   :  { %vm317_vm3 = vcmp.ge.f32.partialorder %v308_v21, 0.0  ;;  %v326_v26 = vmul.f32 %v323_v1, %v308_v21  ;;  %vm318_vm4 = vcmp.ge.f32.partialorder %v309_v22, 0.0  ;;  %v327_v27 = vmul.f32 %v323_v1, %v309_v22 }
 0x11f   :  { %vm319_vm5 = vcmp.ge.f32.partialorder %v310_v24, 0.0  ;;  %v328_v28 = vmul.f32 %v323_v1, %v310_v24  ;;  %vm320_vm6 = vcmp.ge.f32.partialorder %v311_v25, 0.0  ;;  %v329_v29 = vmul.f32 %v323_v1, %v311_v25 }
 0x120   :  { %v334_v32 = vsel %vm317_vm3, %v308_v21, %v326_v26  ;;  %v335_v33 = vsel %vm318_vm4, %v309_v22, %v327_v27 }
 0x121   :  { %v341_v34 = vpack.c.bf16 %v335_v33, %v334_v32  ;;  %v336_v35 = vsel %vm319_vm5, %v310_v24, %v328_v28  ;;  %v337_v36 = vsel %vm320_vm6, %v311_v25, %v329_v29  ;;  %v269_v37 = vpop.f32.mrf.mxu2  ;;  %v283_v38 = vpop.f32.mrf.mxu3 }
 0x122   :  { %v342_v39 = vpack.c.bf16 %v337_v36, %v336_v35  ;;  %v292_v40 = vadd.f32 %v269_v37, %v185_v30  ;;  %v293_v41 = vadd.f32 %v283_v38, %v199_v31 }
 0x123   :  { %345 = vst [vmem:[%s594_s6 + $0x8] sm:$0xff] %v341_v34 }
 0x124   :  { %346 = vst [vmem:[%s594_s6 + $0x10] sm:$0xff] %v342_v39  ;;  %v312_v42 = vadd.f32 %v304_v23, %v292_v40  ;;  %v313_v43 = vadd.f32 %v304_v23, %v293_v41 }
 0x126   :  { %vm321_vm7 = vcmp.ge.f32.partialorder %v312_v42, 0.0  ;;  %v330_v44 = vmul.f32 %v323_v1, %v312_v42  ;;  %vm322_vm8 = vcmp.ge.f32.partialorder %v313_v43, 0.0  ;;  %v331_v45 = vmul.f32 %v323_v1, %v313_v43 }
 0x128   :  { %v338_v46 = vsel %vm321_vm7, %v312_v42, %v330_v44  ;;  %v339_v47 = vsel %vm322_vm8, %v313_v43, %v331_v45 }
 0x129   :  { %v343_v48 = vpack.c.bf16 %v339_v47, %v338_v46 }
 0x12b   :  { %347 = vst [vmem:[%s594_s6 + $0x18] sm:$0xff] %v343_v48 }

// kernel: net6_forward.59
= control target key start
LH: loop header
LB: loop body
LE: loop exit
PB: predicated region body
PF: predicated region fallthrough
CT: control target
= control target key end

     0   :  { %s138_s24 = smov 112   ;;  %vm41_vm0 = vcmask 130048   ;;  %v139_v5 = vmov 0   ;;  %s191_s2 = inlined_call_operand.vmem [shape: bf16[16,32], index: 2, kind: input, shape index: {}]   ;;  %s192_s0 = inlined_call_operand.vmem [shape: bf16[16,128], index: 0, kind: input, shape index: {}]   ;;  %s193_s1 = inlined_call_operand.vmem [shape: bf16[16,128], index: 1, kind: input, shape index: {}]   ;;  %s194_s3 = inlined_call_operand.vmem [shape: f32[16,1], index: 3, kind: input, shape index: {}]   ;;  %s195_s4 = inlined_call_operand.<no memory space> [shape: f32[1,1], index: 4, kind: input, shape index: {}]   ;;  %s196_s5 = inlined_call_operand.vmem [shape: bf16[16,128], index: 5, kind: output, shape index: {}]  }
   0x1   :  { %v126_v0 = vld [vmem:[%s191_s2] sm:$0xff]  ;;  %v83_v4 = vld [vmem:[%s194_s3 + $0x8] sm:$0xff]  ;;  %136 = vset.pattern.permute.xlu0 %v139_v5  ;;  %137 = vset.pattern.permute.xlu1 %v139_v5  ;;  %v99_v13 = vstv %s195_s4 }
   0x2   :  { %v127_v1 = vld [vmem:[%s192_s0] sm:$0xff]  ;;  %33 = vrot.lane.b32.xlu0 %v126_v0, %s138_s24  ;;  %91 = vperm.xlu1 %137, %v83_v4  }
   0x3   :  { %v128_v2 = vld [vmem:[%s193_s1] sm:$0xff]  ;;  %75 = vmatpush.bf16.msra.mxu1 %v127_v1 }
   0x4   :  { %52 = vmatpush.bf16.msra.mxu0 %v128_v2  ;;  %v82_v3 = vld [vmem:[%s194_s3] sm:$0xff] }
   0x6   :  { %125 = vmatmul.msk.bf16.vlgmr.msra.gmra.mxu1 %vm41_vm0, %v126_v0 }
   0xa   :  { %86 = vperm.xlu0 %136, %v82_v3  }
  0x74   :  { %v34_v6 = vpop.permute.xlu0 %33  ;;  %v92_v15 = vpop.permute.xlu1 %91 }
  0x75   :  { %120 = vmatmul.msk.bf16.vlgmr.msra.gmra.mxu0 %vm41_vm0, %v34_v6 }
  0x7c   :  { %v87_v10 = vpop.permute.xlu0 %86 }
  0x83   :  { %v77_v7 = vpop.f32.mrf.mxu1 }
  0x8b   :  { %v79_v11 = vpop.f32.mrf.mxu1 }
  0xf2   :  { %v54_v8 = vpop.f32.mrf.mxu0 }
  0xf3   :  { %v78_v9 = vadd.f32 %v77_v7, %v54_v8 }
  0xf5   :  { %v94_v12 = vadd.f32 %v87_v10, %v78_v9 }
  0xf7   :  { %v100_v17 = vmul.f32 %v99_v13, %v94_v12  ;;  %vm97_vm1 = vcmp.ge.f32.partialorder %v94_v12, 0.0 }
  0xf9   :  { %v102_v20 = vsel %vm97_vm1, %v94_v12, %v100_v17 }
  0xfa   :  { %v56_v14 = vpop.f32.mrf.mxu0 }
  0xfb   :  { %v80_v16 = vadd.f32 %v79_v11, %v56_v14 }
  0xfd   :  { %v95_v18 = vadd.f32 %v92_v15, %v80_v16 }
  0xff   :  { %vm98_vm2 = vcmp.ge.f32.partialorder %v95_v18, 0.0  ;;  %v101_v19 = vmul.f32 %v99_v13, %v95_v18 }
 0x101   :  { %v103_v21 = vsel %vm98_vm2, %v95_v18, %v101_v19 }
 0x102   :  { %v132_v22 = vpack.c.bf16 %v103_v21, %v102_v20 }
 0x104   :  { %133 = vst [vmem:[%s196_s5] sm:$0xff] %v132_v22  }

// kernel: net6_forward.75
= control target key start
LH: loop header
LB: loop body
LE: loop exit
PB: predicated region body
PF: predicated region fallthrough
CT: control target
= control target key end

     0   :  { %s217_s28 = smov 96   ;;  %s218_s29 = smov 112   ;;  %vm47_vm0 = vcmask 130048   ;;  %v220_v7 = vmov 0   ;;  %s292_s4 = inlined_call_operand.vmem [shape: bf16[16,64], index: 4, kind: input, shape index: {}]   ;;  %s293_s2 = inlined_call_operand.vmem [shape: bf16[16,128], index: 2, kind: input, shape index: {}]   ;;  %s294_s1 = inlined_call_operand.vmem [shape: bf16[16,128], index: 1, kind: input, shape index: {}]   ;;  %s295_s0 = inlined_call_operand.vmem [shape: bf16[16,128], index: 0, kind: input, shape index: {}]   ;;  %s296_s3 = inlined_call_operand.vmem [shape: bf16[16,128], index: 3, kind: input, shape index: {}]   ;;  %s297_s5 = inlined_call_operand.vmem [shape: f32[16,1], index: 5, kind: input, shape index: {}]   ;;  %s298_s6 = inlined_call_operand.<no memory space> [shape: f32[1,1], index: 6, kind: input, shape index: {}]   ;;  %s299_s7 = inlined_call_operand.vmem [shape: bf16[16,128], index: 7, kind: output, shape index: {}]  }
   0x1   :  { %v200_v0 = vld [vmem:[%s292_s4] sm:$0xff]  ;;  %s219_s30 = smov 80   ;;  %v147_v6 = vld [vmem:[%s297_s5 + $0x8] sm:$0xff]  ;;  %214 = vset.pattern.permute.xlu1 %v220_v7  ;;  %215 = vset.pattern.permute.xlu2 %v220_v7  ;;  %v163_v25 = vstv %s298_s6 }
   0x2   :  { %v203_v1 = vld [vmem:[%s293_s2] sm:$0xff]  ;;  %90 = vrot.lane.b32.xlu0 %v200_v0, %s217_s28  ;;  %39 = vrot.lane.b32.xlu1 %v200_v0, %s218_s29 }
   0x3   :  { %108 = vmatpush.bf16.msra.mxu2 %v203_v1  ;;  %v202_v2 = vld [vmem:[%s294_s1] sm:$0xff]  ;;  %155 = vperm.xlu2 %215, %v147_v6  }
   0x4   :  { %v201_v3 = vld [vmem:[%s295_s0] sm:$0xff]  ;;  %58 = vmatpush.bf16.msra.mxu0 %v202_v2  ;;  %216 = vset.pattern.permute.xlu0 %v220_v7 }
   0x5   :  { %81 = vmatpush.bf16.msra.mxu1 %v201_v3  ;;  %v204_v4 = vld [vmem:[%s296_s3] sm:$0xff] }
   0x6   :  { %137 = vmatpush.bf16.msra.mxu3 %v204_v4  ;;  %v146_v5 = vld [vmem:[%s297_s5] sm:$0xff] }
   0x8   :  { %189 = vmatmul.msk.bf16.vlgmr.msra.gmra.mxu1 %vm47_vm0, %v200_v0 }
   0xa   :  { %119 = vrot.lane.b32.xlu0 %v200_v0, %s219_s30  ;;  %150 = vperm.xlu1 %214, %v146_v5  }
  0x5d   :  { %v156_v27 = vpop.permute.xlu2 %155 }
  0x74   :  { %v91_v8 = vpop.permute.xlu0 %90  ;;  %v40_v9 = vpop.permute.xlu1 %39 }
  0x75   :  { %194 = vmatmul.msk.bf16.vlgmr.msra.gmra.mxu2 %vm47_vm0, %v91_v8  ;;  %184 = vmatmul.msk.bf16.vlgmr.msra.gmra.mxu0 %vm47_vm0, %v40_v9 }
  0x7c   :  { %v120_v10 = vpop.permute.xlu0 %119  ;;  %v151_v21 = vpop.permute.xlu1 %150 }
  0x7d   :  { %199 = vmatmul.msk.bf16.vlgmr.msra.gmra.mxu3 %vm47_vm0, %v120_v10 }
  0x85   :  { %v83_v12 = vpop.f32.mrf.mxu1 }
  0x8d   :  { %v85_v18 = vpop.f32.mrf.mxu1 }
  0xf2   :  { %v60_v11 = vpop.f32.mrf.mxu0 }
  0xf3   :  { %v84_v14 = vadd.f32 %v83_v12, %v60_v11 }
  0xf8   :  { %v110_v13 = vpop.f32.mrf.mxu2 }
  0xf9   :  { %v115_v16 = vadd.f32 %v110_v13, %v84_v14 }
  0xfa   :  { %v62_v17 = vpop.f32.mrf.mxu0 }
  0xfb   :  { %v86_v22 = vadd.f32 %v85_v18, %v62_v17 }
 0x100   :  { %v139_v15 = vpop.f32.mrf.mxu3  ;;  %v112_v20 = vpop.f32.mrf.mxu2 }
 0x101   :  { %v144_v19 = vadd.f32 %v139_v15, %v115_v16  ;;  %v116_v23 = vadd.f32 %v112_v20, %v86_v22 }
 0x103   :  { %v158_v24 = vadd.f32 %v151_v21, %v144_v19 }
 0x105   :  { %v164_v29 = vmul.f32 %v163_v25, %v158_v24  ;;  %vm161_vm1 = vcmp.ge.f32.partialorder %v158_v24, 0.0 }
 0x107   :  { %v166_v32 = vsel %vm161_vm1, %v158_v24, %v164_v29 }
 0x108   :  { %v141_v26 = vpop.f32.mrf.mxu3 }
 0x109   :  { %v145_v28 = vadd.f32 %v141_v26, %v116_v23 }
 0x10b   :  { %v159_v30 = vadd.f32 %v156_v27, %v145_v28 }
 0x10d   :  { %vm162_vm2 = vcmp.ge.f32.partialorder %v159_v30, 0.0  ;;  %v165_v31 = vmul.f32 %v163_v25, %v159_v30 }
 0x10f   :  { %v167_v33 = vsel %vm162_vm2, %v159_v30, %v165_v31 }
 0x110   :  { %v208_v34 = vpack.c.bf16 %v167_v33, %v166_v32 }
 0x112   :  { %209 = vst [vmem:[%s299_s7] sm:$0xff] %v208_v34  }

// kernel: net6_forward.71
= control target key start
LH: loop header
LB: loop body
LE: loop exit
PB: predicated region body
PF: predicated region fallthrough
CT: control target
= control target key end

     0   :  { %s556_s12 = smov 112   ;;  %s557_s13 = smov 80   ;;  %vm65_vm0 = vcmask 130048   ;;  %v559_v52 = vmov 0   ;;  %s745_s4 = inlined_call_operand.vmem [shape: bf16[16,64], index: 4, kind: input, shape index: {}]   ;;  %s746_s1 = inlined_call_operand.vmem [shape: bf16[16,512], index: 1, kind: input, shape index: {}]   ;;  %s747_s0 = inlined_call_operand.vmem [shape: bf16[16,512], index: 0, kind: input, shape index: {}]   ;;  %s748_s2 = inlined_call_operand.vmem [shape: bf16[16,512], index: 2, kind: input, shape index: {}]   ;;  %s749_s3 = inlined_call_operand.vmem [shape: bf16[16,512], index: 3, kind: input, shape index: {}]   ;;  %s750_s5 = inlined_call_operand.vmem [shape: f32[16,1], index: 5, kind: input, shape index: {}]   ;;  %s751_s6 = inlined_call_operand.<no memory space> [shape: f32[1,1], index: 6, kind: input, shape index: {}]   ;;  %s752_s7 = inlined_call_operand.vmem [shape: bf16[16,512], index: 7, kind: output, shape index: {}]  }
   0x1   :  { %v603_v0 = vld [vmem:[%s745_s4] sm:$0xff]  ;;  %v539_v2 = vld [vmem:[%s746_s1 + $0xc] sm:$0xf0]  ;;  %v456_v5 = vld [vmem:[%s746_s1 + $0x10] sm:$0xf0]  ;;  %s558_s20 = smov 96   ;;  %553 = vset.pattern.permute.xlu1 %v559_v52  ;;  %554 = vset.pattern.permute.xlu2 %v559_v52 }
   0x2   :  { %v454_v1 = vld [vmem:[%s746_s1] sm:$0xf]  ;;  %v537_v4 = vld [vmem:[%s746_s1 + $0x4] sm:$0xf]  ;;  %v462_v6 = vld [vmem:[%s746_s1 + $0x8] sm:$0xf]  ;;  %43 = vrot.lane.b32.xlu0 %v603_v0, %s556_s12 }
   0x3   :  { %v455_v3 = vor.u32 %v539_v2, %v454_v1  ;;  %301 = vrot.lane.b32.xlu1 %v603_v0, %s557_s13  ;;  %v459_v7 = vor.u32 %v537_v4, %v456_v5  ;;  %v540_v8 = vld [vmem:[%s746_s1 + $0x14] sm:$0xf0]  ;;  %v538_v9 = vld [vmem:[%s746_s1 + $0xc] sm:$0xf]  ;;  %v464_v11 = vld [vmem:[%s746_s1 + $0x18] sm:$0xf0]  ;;  %555 = vset.pattern.permute.xlu0 %v559_v52 }
   0x4   :  { %v463_v10 = vor.u32 %v540_v8, %v462_v6  ;;  %v467_v12 = vor.u32 %v538_v9, %v464_v11  ;;  %v482_v13 = vld [vmem:[%s747_s0 + $0x8] sm:$0xf]  ;;  %v536_v14 = vld [vmem:[%s747_s0 + $0x14] sm:$0xf0]  ;;  %v534_v15 = vld [vmem:[%s747_s0 + $0xc] sm:$0xf] }
   0x5   :  { %76 = vmatpush.bf16.msra.mxu0 %v455_v3  ;;  %90 = vmatpush.bf16.msra.mxu1 %v459_v7  ;;  %v483_v16 = vor.u32 %v536_v14, %v482_v13  ;;  %v484_v17 = vld [vmem:[%s747_s0 + $0x18] sm:$0xf0]  ;;  %v474_v18 = vld [vmem:[%s747_s0] sm:$0xf]  ;;  %v535_v19 = vld [vmem:[%s747_s0 + $0xc] sm:$0xf0] }
   0x6   :  { %104 = vmatpush.bf16.msra.mxu2 %v463_v10  ;;  %118 = vmatpush.bf16.msra.mxu3 %v467_v12  ;;  %v487_v20 = vor.u32 %v534_v15, %v484_v17  ;;  %v475_v21 = vor.u32 %v535_v19, %v474_v18  ;;  %v533_v22 = vld [vmem:[%s747_s0 + $0x4] sm:$0xf]  ;;  %v476_v23 = vld [vmem:[%s747_s0 + $0x10] sm:$0xf0]  ;;  %v502_v25 = vld [vmem:[%s748_s2 + $0x8] sm:$0xf] }
   0x7   :  { %v479_v24 = vor.u32 %v533_v22, %v476_v23  ;;  %v544_v26 = vld [vmem:[%s748_s2 + $0x14] sm:$0xf0]  ;;  %v542_v27 = vld [vmem:[%s748_s2 + $0xc] sm:$0xf]  ;;  %v504_v28 = vld [vmem:[%s748_s2 + $0x18] sm:$0xf0] }
   0x8   :  { %v494_v29 = vld [vmem:[%s748_s2] sm:$0xf]  ;;  %v543_v30 = vld [vmem:[%s748_s2 + $0xc] sm:$0xf0]  ;;  %v541_v31 = vld [vmem:[%s748_s2 + $0x4] sm:$0xf]  ;;  %v503_v33 = vor.u32 %v544_v26, %v502_v25  ;;  %v507_v34 = vor.u32 %v542_v27, %v504_v28 }
   0x9   :  { %155 = vmatpush.bf16.msrb.mxu0 %v475_v21  ;;  %169 = vmatpush.bf16.msrb.mxu1 %v479_v24  ;;  %v496_v32 = vld [vmem:[%s748_s2 + $0x10] sm:$0xf0]  ;;  %v495_v36 = vor.u32 %v543_v30, %v494_v29  ;;  %v522_v38 = vld [vmem:[%s749_s3 + $0x8] sm:$0xf]  ;;  %v548_v39 = vld [vmem:[%s749_s3 + $0x14] sm:$0xf0]  ;;  %v419_v24 = vstv %s751_s6 }
   0xa   :  { %208 = vrot.lane.b32.xlu0 %v603_v0, %s558_s20  ;;  %183 = vmatpush.bf16.msrb.mxu2 %v483_v16  ;;  %v499_v37 = vor.u32 %v541_v31, %v496_v32  ;;  %v546_v40 = vld [vmem:[%s749_s3 + $0xc] sm:$0xf]  ;;  %v524_v41 = vld [vmem:[%s749_s3 + $0x18] sm:$0xf0]  ;;  %v514_v42 = vld [vmem:[%s749_s3] sm:$0xf]  ;;  %v523_v46 = vor.u32 %v548_v39, %v522_v38 }
   0xb   :  { %197 = vmatpush.bf16.msrb.mxu3 %v487_v20  ;;  %v547_v43 = vld [vmem:[%s749_s3 + $0xc] sm:$0xf0]  ;;  %v545_v44 = vld [vmem:[%s749_s3 + $0x4] sm:$0xf]  ;;  %v516_v45 = vld [vmem:[%s749_s3 + $0x10] sm:$0xf0]  ;;  %v527_v47 = vor.u32 %v546_v40, %v524_v41 }
   0xc   :  { %v515_v48 = vor.u32 %v547_v43, %v514_v42  ;;  %v519_v49 = vor.u32 %v545_v44, %v516_v45  ;;  %v390_v50 = vld [vmem:[%s750_s5] sm:$0xff]  ;;  %v391_v51 = vld [vmem:[%s750_s5 + $0x8] sm:$0xff] }
   0xd   :  { %394 = vperm.xlu1 %553, %v390_v50   ;;  %399 = vperm.xlu2 %554, %v391_v51  }
  0x74   :  { %v44_v35 = vpop.permute.xlu0 %43 }
  0x75   :  { %468 = vmatmul.msk.bf16.vlgmr.msra.gmra.mxu0 %vm65_vm0, %v44_v35  ;;  %469 = vmatmul.msk.bf16.vlgmr.msra.gmra.mxu1 %vm65_vm0, %v44_v35  ;;  %v302_v54 = vpop.permute.xlu1 %301 }
  0x76   :  { %470 = vmatmul.msk.bf16.vlgmr.msra.gmra.mxu2 %vm65_vm0, %v44_v35  ;;  %471 = vmatmul.msk.bf16.vlgmr.msra.gmra.mxu3 %vm65_vm0, %v44_v35  ;;  %v400_v35 = vpop.permute.xlu2 %399 }
  0x77   :  { %268 = vmatpush.bf16.msra.mxu2 %v503_v33  ;;  %282 = vmatpush.bf16.msra.mxu3 %v507_v34 }
  0x78   :  { %240 = vmatpush.bf16.msra.mxu0 %v495_v36  ;;  %254 = vmatpush.bf16.msra.mxu1 %v499_v37 }
  0x7c   :  { %v209_v53 = vpop.permute.xlu0 %208 }
  0x7f   :  { %v395_v15 = vpop.permute.xlu1 %394 }
  0x85   :  { %488 = vmatmul.msk.bf16.vlgmr.msrb.gmra.mxu0 %vm65_vm0, %v603_v0  ;;  %489 = vmatmul.msk.bf16.vlgmr.msrb.gmra.mxu1 %vm65_vm0, %v603_v0 }
  0x86   :  { %490 = vmatmul.msk.bf16.vlgmr.msrb.gmra.mxu2 %vm65_vm0, %v603_v0  ;;  %491 = vmatmul.msk.bf16.vlgmr.msrb.gmra.mxu3 %vm65_vm0, %v603_v0 }
  0x87   :  { %361 = vmatpush.bf16.msrb.mxu2 %v523_v46  ;;  %375 = vmatpush.bf16.msrb.mxu3 %v527_v47 }
  0x88   :  { %333 = vmatpush.bf16.msrb.mxu0 %v515_v48  ;;  %347 = vmatpush.bf16.msrb.mxu1 %v519_v49 }
  0x95   :  { %508 = vmatmul.msk.bf16.vlgmr.msra.gmra.mxu0 %vm65_vm0, %v209_v53  ;;  %509 = vmatmul.msk.bf16.vlgmr.msra.gmra.mxu1 %vm65_vm0, %v209_v53 }
  0x96   :  { %510 = vmatmul.msk.bf16.vlgmr.msra.gmra.mxu2 %vm65_vm0, %v209_v53  ;;  %511 = vmatmul.msk.bf16.vlgmr.msra.gmra.mxu3 %vm65_vm0, %v209_v53 }
  0xa5   :  { %528 = vmatmul.msk.bf16.vlgmr.msrb.gmra.mxu0 %vm65_vm0, %v302_v54  ;;  %529 = vmatmul.msk.bf16.vlgmr.msrb.gmra.mxu1 %vm65_vm0, %v302_v54 }
  0xa6   :  { %530 = vmatmul.msk.bf16.vlgmr.msrb.gmra.mxu2 %vm65_vm0, %v302_v54  ;;  %531 = vmatmul.msk.bf16.vlgmr.msrb.gmra.mxu3 %vm65_vm0, %v302_v54 }
  0xf2   :  { %v78_v55 = vpop.f32.mrf.mxu0  ;;  %v92_v56 = vpop.f32.mrf.mxu1 }
  0xf9   :  { %v106_v57 = vpop.f32.mrf.mxu2  ;;  %v120_v58 = vpop.f32.mrf.mxu3 }
  0xfa   :  { %v80_v59 = vpop.f32.mrf.mxu0  ;;  %v94_v60 = vpop.f32.mrf.mxu1 }
 0x101   :  { %v108_v61 = vpop.f32.mrf.mxu2  ;;  %v122_v62 = vpop.f32.mrf.mxu3 }
 0x102   :  { %v157_v63 = vpop.f32.mrf.mxu0  ;;  %v171_v0 = vpop.f32.mrf.mxu1 }
 0x103   :  { %v158_v13 = vadd.f32 %v157_v63, %v78_v55  ;;  %v172_v14 = vadd.f32 %v171_v0, %v92_v56 }
 0x109   :  { %v185_v1 = vpop.f32.mrf.mxu2  ;;  %v199_v2 = vpop.f32.mrf.mxu3 }
 0x10a   :  { %v159_v3 = vpop.f32.mrf.mxu0  ;;  %v173_v4 = vpop.f32.mrf.mxu1  ;;  %v186_v27 = vadd.f32 %v185_v1, %v106_v57  ;;  %v200_v28 = vadd.f32 %v199_v2, %v120_v58 }
 0x10b   :  { %v160_v29 = vadd.f32 %v159_v3, %v80_v59  ;;  %v174_v30 = vadd.f32 %v173_v4, %v94_v60 }
 0x111   :  { %v187_v5 = vpop.f32.mrf.mxu2  ;;  %v201_v6 = vpop.f32.mrf.mxu3 }
 0x112   :  { %v242_v7 = vpop.f32.mrf.mxu0  ;;  %v256_v8 = vpop.f32.mrf.mxu1  ;;  %v188_v51 = vadd.f32 %v187_v5, %v108_v61  ;;  %v202_v52 = vadd.f32 %v201_v6, %v122_v62 }
 0x113   :  { %v289_v16 = vadd.f32 %v242_v7, %v158_v13  ;;  %v290_v17 = vadd.f32 %v256_v8, %v172_v14 }
 0x119   :  { %v270_v9 = vpop.f32.mrf.mxu2  ;;  %v284_v10 = vpop.f32.mrf.mxu3 }
 0x11a   :  { %v244_v11 = vpop.f32.mrf.mxu0  ;;  %v258_v12 = vpop.f32.mrf.mxu1  ;;  %v291_v33 = vadd.f32 %v270_v9, %v186_v27  ;;  %v292_v34 = vadd.f32 %v284_v10, %v200_v28 }
 0x11b   :  { %v293_v36 = vadd.f32 %v244_v11, %v160_v29  ;;  %v294_v37 = vadd.f32 %v258_v12, %v174_v30 }
 0x121   :  { %v272_v18 = vpop.f32.mrf.mxu2  ;;  %v286_v19 = vpop.f32.mrf.mxu3 }
 0x122   :  { %v335_v20 = vpop.f32.mrf.mxu0  ;;  %v349_v21 = vpop.f32.mrf.mxu1  ;;  %v295_v59 = vadd.f32 %v272_v18, %v188_v51  ;;  %v296_v60 = vadd.f32 %v286_v19, %v202_v52 }
 0x123   :  { %v382_v22 = vadd.f32 %v335_v20, %v289_v16  ;;  %v383_v23 = vadd.f32 %v349_v21, %v290_v17 }
 0x125   :  { %v402_v25 = vadd.f32 %v395_v15, %v382_v22  ;;  %v403_v26 = vadd.f32 %v395_v15, %v383_v23 }
 0x127   :  { %vm411_vm1 = vcmp.ge.f32.partialorder %v402_v25, 0.0  ;;  %vm412_vm2 = vcmp.ge.f32.partialorder %v403_v26, 0.0  ;;  %v420_v31 = vmul.f32 %v419_v24, %v402_v25  ;;  %v421_v32 = vmul.f32 %v419_v24, %v403_v26 }
 0x129   :  { %v428_v38 = vsel %vm411_vm1, %v402_v25, %v420_v31  ;;  %v429_v39 = vsel %vm412_vm2, %v403_v26, %v421_v32  ;;  %v363_v40 = vpop.f32.mrf.mxu2  ;;  %v377_v41 = vpop.f32.mrf.mxu3 }
 0x12a   :  { %v436_v42 = vpack.c.bf16 %v429_v39, %v428_v38  ;;  %v384_v43 = vadd.f32 %v363_v40, %v291_v33  ;;  %v385_v44 = vadd.f32 %v377_v41, %v292_v34  ;;  %v337_v45 = vpop.f32.mrf.mxu0  ;;  %v351_v46 = vpop.f32.mrf.mxu1 }
 0x12b   :  { %v386_v47 = vadd.f32 %v337_v45, %v293_v36  ;;  %v387_v48 = vadd.f32 %v351_v46, %v294_v37 }
 0x12c   :  { %440 = vst [vmem:[%s752_s7] sm:$0xff] %v436_v42  ;;  %v404_v49 = vadd.f32 %v395_v15, %v384_v43  ;;  %v405_v50 = vadd.f32 %v395_v15, %v385_v44 }
 0x12d   :  { %v406_v53 = vadd.f32 %v400_v35, %v386_v47  ;;  %v407_v54 = vadd.f32 %v400_v35, %v387_v48 }
 0x12e   :  { %vm413_vm3 = vcmp.ge.f32.partialorder %v404_v49, 0.0  ;;  %v422_v55 = vmul.f32 %v419_v24, %v404_v49  ;;  %vm414_vm4 = vcmp.ge.f32.partialorder %v405_v50, 0.0  ;;  %v423_v56 = vmul.f32 %v419_v24, %v405_v50 }
 0x12f   :  { %vm415_vm5 = vcmp.ge.f32.partialorder %v406_v53, 0.0  ;;  %vm416_vm6 = vcmp.ge.f32.partialorder %v407_v54, 0.0  ;;  %v424_v57 = vmul.f32 %v419_v24, %v406_v53  ;;  %v425_v58 = vmul.f32 %v419_v24, %v407_v54 }
 0x130   :  { %v430_v63 = vsel %vm413_vm3, %v404_v49, %v422_v55  ;;  %v431_v0 = vsel %vm414_vm4, %v405_v50, %v423_v56 }
 0x131   :  { %v437_v1 = vpack.c.bf16 %v431_v0, %v430_v63  ;;  %v432_v2 = vsel %vm415_vm5, %v406_v53, %v424_v57  ;;  %v433_v3 = vsel %vm416_vm6, %v407_v54, %v425_v58  ;;  %v365_v4 = vpop.f32.mrf.mxu2  ;;  %v379_v61 = vpop.f32.mrf.mxu3 }
 0x132   :  { %v438_v62 = vpack.c.bf16 %v433_v3, %v432_v2  ;;  %v388_v5 = vadd.f32 %v365_v4, %v295_v59  ;;  %v389_v6 = vadd.f32 %v379_v61, %v296_v60 }
 0x133   :  { %441 = vst [vmem:[%s752_s7 + $0x8] sm:$0xff] %v437_v1 }
 0x134   :  { %442 = vst [vmem:[%s752_s7 + $0x10] sm:$0xff] %v438_v62  ;;  %v408_v7 = vadd.f32 %v400_v35, %v388_v5  ;;  %v409_v8 = vadd.f32 %v400_v35, %v389_v6 }
 0x136   :  { %vm417_vm7 = vcmp.ge.f32.partialorder %v408_v7, 0.0  ;;  %v426_v9 = vmul.f32 %v419_v24, %v408_v7  ;;  %vm418_vm8 = vcmp.ge.f32.partialorder %v409_v8, 0.0  ;;  %v427_v10 = vmul.f32 %v419_v24, %v409_v8 }
 0x138   :  { %v434_v11 = vsel %vm417_vm7, %v408_v7, %v426_v9  ;;  %v435_v12 = vsel %vm418_vm8, %v409_v8, %v427_v10 }
 0x139   :  { %v439_v13 = vpack.c.bf16 %v435_v12, %v434_v11 }
 0x13b   :  { %443 = vst [vmem:[%s752_s7 + $0x18] sm:$0xff] %v439_v13 }

// kernel: net6_forward.79
= control target key start
LH: loop header
LB: loop body
LE: loop exit
PB: predicated region body
PF: predicated region fallthrough
CT: control target
= control target key end

     0   :  { %s676_s15 = smov 112   ;;  %s678_s24 = smov 96   ;;  %vm68_vm0 = vcmask 130048   ;;  %s916_s5 = inlined_call_operand.vmem [shape: bf16[16,80], index: 5, kind: input, shape index: {}]   ;;  %s917_s1 = inlined_call_operand.vmem [shape: bf16[16,512], index: 1, kind: input, shape index: {}]   ;;  %s918_s0 = inlined_call_operand.vmem [shape: bf16[16,512], index: 0, kind: input, shape index: {}]   ;;  %s919_s2 = inlined_call_operand.vmem [shape: bf16[16,512], index: 2, kind: input, shape index: {}]   ;;  %s920_s3 = inlined_call_operand.vmem [shape: bf16[16,512], index: 3, kind: input, shape index: {}]   ;;  %s921_s4 = inlined_call_operand.vmem [shape: bf16[16,512], index: 4, kind: input, shape index: {}]   ;;  %s922_s6 = inlined_call_operand.vmem [shape: f32[16,1], index: 6, kind: input, shape index: {}]   ;;  %s923_s7 = inlined_call_operand.<no memory space> [shape: f32[1,1], index: 7, kind: input, shape index: {}]   ;;  %s924_s8 = inlined_call_operand.vmem [shape: bf16[16,512], index: 8, kind: output, shape index: {}]  }
   0x1   :  { %v729_v0 = vld [vmem:[%s916_s5] sm:$0xff]  ;;  %v655_v2 = vld [vmem:[%s917_s1 + $0xc] sm:$0xf0]  ;;  %v552_v4 = vld [vmem:[%s917_s1 + $0x10] sm:$0xf0]  ;;  %s677_s5 = smov 80  }
   0x2   :  { %v550_v1 = vld [vmem:[%s917_s1] sm:$0xf]  ;;  %v653_v3 = vld [vmem:[%s917_s1 + $0x4] sm:$0xf]  ;;  %46 = vrot.lane.b32.xlu0 %v729_v0, %s676_s15  ;;  %304 = vrot.lane.b32.xlu1 %v729_v0, %s677_s5  ;;  %s679_s25 = smov 64  }
   0x3   :  { %v551_v5 = vor.u32 %v655_v2, %v550_v1  ;;  %v555_v6 = vor.u32 %v653_v3, %v552_v4  ;;  %v558_v7 = vld [vmem:[%s917_s1 + $0x8] sm:$0xf]  ;;  %v656_v8 = vld [vmem:[%s917_s1 + $0x14] sm:$0xf0]  ;;  %v654_v10 = vld [vmem:[%s917_s1 + $0xc] sm:$0xf] }
   0x4   :  { %v559_v9 = vor.u32 %v656_v8, %v558_v7  ;;  %v560_v11 = vld [vmem:[%s917_s1 + $0x18] sm:$0xf0]  ;;  %v578_v13 = vld [vmem:[%s918_s0 + $0x8] sm:$0xf]  ;;  %v652_v14 = vld [vmem:[%s918_s0 + $0x14] sm:$0xf0] }
   0x5   :  { %79 = vmatpush.bf16.msra.mxu0 %v551_v5  ;;  %93 = vmatpush.bf16.msra.mxu1 %v555_v6  ;;  %v563_v12 = vor.u32 %v654_v10, %v560_v11  ;;  %v650_v15 = vld [vmem:[%s918_s0 + $0xc] sm:$0xf]  ;;  %v579_v16 = vor.u32 %v652_v14, %v578_v13  ;;  %v580_v17 = vld [vmem:[%s918_s0 + $0x18] sm:$0xf0]  ;;  %v570_v18 = vld [vmem:[%s918_s0] sm:$0xf] }
   0x6   :  { %107 = vmatpush.bf16.msra.mxu2 %v559_v9  ;;  %v651_v19 = vld [vmem:[%s918_s0 + $0xc] sm:$0xf0]  ;;  %v583_v20 = vor.u32 %v650_v15, %v580_v17  ;;  %v649_v22 = vld [vmem:[%s918_s0 + $0x4] sm:$0xf]  ;;  %v572_v23 = vld [vmem:[%s918_s0 + $0x10] sm:$0xf0] }
   0x7   :  { %121 = vmatpush.bf16.msra.mxu3 %v563_v12  ;;  %v571_v21 = vor.u32 %v651_v19, %v570_v18  ;;  %v575_v24 = vor.u32 %v649_v22, %v572_v23  ;;  %v598_v25 = vld [vmem:[%s919_s2 + $0x8] sm:$0xf]  ;;  %v660_v26 = vld [vmem:[%s919_s2 + $0x14] sm:$0xf0]  ;;  %v658_v27 = vld [vmem:[%s919_s2 + $0xc] sm:$0xf] }
   0x8   :  { %v600_v28 = vld [vmem:[%s919_s2 + $0x18] sm:$0xf0]  ;;  %v590_v29 = vld [vmem:[%s919_s2] sm:$0xf]  ;;  %v659_v30 = vld [vmem:[%s919_s2 + $0xc] sm:$0xf0]  ;;  %v599_v33 = vor.u32 %v660_v26, %v598_v25 }
   0x9   :  { %158 = vmatpush.bf16.msrb.mxu0 %v571_v21  ;;  %172 = vmatpush.bf16.msrb.mxu1 %v575_v24  ;;  %v657_v31 = vld [vmem:[%s919_s2 + $0x4] sm:$0xf]  ;;  %v592_v32 = vld [vmem:[%s919_s2 + $0x10] sm:$0xf0]  ;;  %v603_v34 = vor.u32 %v658_v27, %v600_v28  ;;  %v591_v36 = vor.u32 %v659_v30, %v590_v29  ;;  %v618_v38 = vld [vmem:[%s920_s3 + $0x8] sm:$0xf] }
   0xa   :  { %211 = vrot.lane.b32.xlu0 %v729_v0, %s678_s24  ;;  %397 = vrot.lane.b32.xlu1 %v729_v0, %s679_s25  ;;  %v595_v37 = vor.u32 %v657_v31, %v592_v32  ;;  %v664_v39 = vld [vmem:[%s920_s3 + $0x14] sm:$0xf0]  ;;  %v662_v40 = vld [vmem:[%s920_s3 + $0xc] sm:$0xf] }
   0xb   :  { %186 = vmatpush.bf16.msrb.mxu2 %v579_v16  ;;  %200 = vmatpush.bf16.msrb.mxu3 %v583_v20  ;;  %v620_v41 = vld [vmem:[%s920_s3 + $0x18] sm:$0xf0]  ;;  %v610_v42 = vld [vmem:[%s920_s3] sm:$0xf]  ;;  %v663_v43 = vld [vmem:[%s920_s3 + $0xc] sm:$0xf0]  ;;  %v619_v46 = vor.u32 %v664_v39, %v618_v38 }
   0xc   :  { %v661_v44 = vld [vmem:[%s920_s3 + $0x4] sm:$0xf]  ;;  %v612_v45 = vld [vmem:[%s920_s3 + $0x10] sm:$0xf0]  ;;  %v623_v47 = vor.u32 %v662_v40, %v620_v41  ;;  %v611_v48 = vor.u32 %v663_v43, %v610_v42  ;;  %v638_v50 = vld [vmem:[%s921_s4 + $0x8] sm:$0xf] }
   0xd   :  { %v615_v49 = vor.u32 %v661_v44, %v612_v45  ;;  %v668_v51 = vld [vmem:[%s921_s4 + $0x14] sm:$0xf0]  ;;  %v666_v52 = vld [vmem:[%s921_s4 + $0xc] sm:$0xf]  ;;  %v640_v53 = vld [vmem:[%s921_s4 + $0x18] sm:$0xf0] }
   0xe   :  { %v630_v54 = vld [vmem:[%s921_s4] sm:$0xf]  ;;  %v667_v55 = vld [vmem:[%s921_s4 + $0xc] sm:$0xf0]  ;;  %v665_v56 = vld [vmem:[%s921_s4 + $0x4] sm:$0xf]  ;;  %v639_v59 = vor.u32 %v668_v51, %v638_v50  ;;  %v643_v60 = vor.u32 %v666_v52, %v640_v53  ;;  %v892_v51 = vstv %s923_s7 }
   0xf   :  { %v632_v57 = vld [vmem:[%s921_s4 + $0x10] sm:$0xf0]  ;;  %v631_v61 = vor.u32 %v667_v55, %v630_v54  ;;  %v486_v63 = vld [vmem:[%s922_s6] sm:$0xff]  ;;  %v487_v1 = vld [vmem:[%s922_s6 + $0x8] sm:$0xff] }
  0x10   :  { %v635_v62 = vor.u32 %v665_v56, %v632_v57 }
  0x74   :  { %v47_v35 = vpop.permute.xlu0 %46  ;;  %v305_v2 = vpop.permute.xlu1 %304 }
  0x75   :  { %564 = vmatmul.msk.bf16.vlgmr.msra.gmra.mxu0 %vm68_vm0, %v47_v35  ;;  %565 = vmatmul.msk.bf16.vlgmr.msra.gmra.mxu1 %vm68_vm0, %v47_v35 }
  0x76   :  { %566 = vmatmul.msk.bf16.vlgmr.msra.gmra.mxu2 %vm68_vm0, %v47_v35  ;;  %567 = vmatmul.msk.bf16.vlgmr.msra.gmra.mxu3 %vm68_vm0, %v47_v35 }
  0x77   :  { %271 = vmatpush.bf16.msra.mxu2 %v599_v33  ;;  %285 = vmatpush.bf16.msra.mxu3 %v603_v34 }
  0x78   :  { %243 = vmatpush.bf16.msra.mxu0 %v591_v36  ;;  %257 = vmatpush.bf16.msra.mxu1 %v595_v37 }
  0x7c   :  { %v212_v58 = vpop.permute.xlu0 %211  ;;  %v398_v3 = vpop.permute.xlu1 %397 }
  0x85   :  { %584 = vmatmul.msk.bf16.vlgmr.msrb.gmra.mxu0 %vm68_vm0, %v729_v0  ;;  %585 = vmatmul.msk.bf16.vlgmr.msrb.gmra.mxu1 %vm68_vm0, %v729_v0 }
  0x86   :  { %586 = vmatmul.msk.bf16.vlgmr.msrb.gmra.mxu2 %vm68_vm0, %v729_v0  ;;  %587 = vmatmul.msk.bf16.vlgmr.msrb.gmra.mxu3 %vm68_vm0, %v729_v0  ;;  %v680_v0 = vmov 0  }
  0x87   :  { %364 = vmatpush.bf16.msrb.mxu2 %v619_v46  ;;  %378 = vmatpush.bf16.msrb.mxu3 %v623_v47 }
  0x88   :  { %336 = vmatpush.bf16.msrb.mxu0 %v611_v48  ;;  %350 = vmatpush.bf16.msrb.mxu1 %v615_v49 }
  0x89   :  { %674 = vset.pattern.permute.xlu2 %v680_v0  ;;  %675 = vset.pattern.permute.xlu0 %v680_v0 }
  0x8a   :  { %490 = vperm.xlu2 %674, %v486_v63  }
  0x92   :  { %495 = vperm.xlu2 %674, %v487_v1  }
  0x95   :  { %604 = vmatmul.msk.bf16.vlgmr.msra.gmra.mxu0 %vm68_vm0, %v212_v58  ;;  %605 = vmatmul.msk.bf16.vlgmr.msra.gmra.mxu1 %vm68_vm0, %v212_v58 }
  0x96   :  { %606 = vmatmul.msk.bf16.vlgmr.msra.gmra.mxu2 %vm68_vm0, %v212_v58  ;;  %607 = vmatmul.msk.bf16.vlgmr.msra.gmra.mxu3 %vm68_vm0, %v212_v58 }
  0x97   :  { %457 = vmatpush.bf16.msra.mxu2 %v639_v59  ;;  %471 = vmatpush.bf16.msra.mxu3 %v643_v60 }
  0x98   :  { %429 = vmatpush.bf16.msra.mxu0 %v631_v61  ;;  %443 = vmatpush.bf16.msra.mxu1 %v635_v62 }
  0xa5   :  { %624 = vmatmul.msk.bf16.vlgmr.msrb.gmra.mxu0 %vm68_vm0, %v305_v2  ;;  %625 = vmatmul.msk.bf16.vlgmr.msrb.gmra.mxu1 %vm68_vm0, %v305_v2 }
  0xa6   :  { %626 = vmatmul.msk.bf16.vlgmr.msrb.gmra.mxu2 %vm68_vm0, %v305_v2  ;;  %627 = vmatmul.msk.bf16.vlgmr.msrb.gmra.mxu3 %vm68_vm0, %v305_v2 }
  0xb5   :  { %644 = vmatmul.msk.bf16.vlgmr.msra.gmra.mxu0 %vm68_vm0, %v398_v3  ;;  %645 = vmatmul.msk.bf16.vlgmr.msra.gmra.mxu1 %vm68_vm0, %v398_v3 }
  0xb6   :  { %646 = vmatmul.msk.bf16.vlgmr.msra.gmra.mxu2 %vm68_vm0, %v398_v3  ;;  %647 = vmatmul.msk.bf16.vlgmr.msra.gmra.mxu3 %vm68_vm0, %v398_v3 }
  0xe4   :  { %v491_v38 = vpop.permute.xlu2 %490 }
  0xf2   :  { %v81_v4 = vpop.f32.mrf.mxu0  ;;  %v95_v5 = vpop.f32.mrf.mxu1 }
  0xf9   :  { %v109_v6 = vpop.f32.mrf.mxu2  ;;  %v123_v7 = vpop.f32.mrf.mxu3 }
  0xfa   :  { %v83_v8 = vpop.f32.mrf.mxu0  ;;  %v97_v9 = vpop.f32.mrf.mxu1 }
 0x101   :  { %v885_v10 = vpop.f32.mrf.mxu2  ;;  %v887_v11 = vpop.f32.mrf.mxu3 }
 0x102   :  { %v160_v12 = vpop.f32.mrf.mxu0  ;;  %v174_v13 = vpop.f32.mrf.mxu1 }
 0x103   :  { %v161_v34 = vadd.f32 %v160_v12, %v81_v4  ;;  %v175_v35 = vadd.f32 %v174_v13, %v95_v5 }
 0x109   :  { %v188_v14 = vpop.f32.mrf.mxu2  ;;  %v202_v15 = vpop.f32.mrf.mxu3 }
 0x10a   :  { %v162_v16 = vpop.f32.mrf.mxu0  ;;  %v176_v17 = vpop.f32.mrf.mxu1  ;;  %v189_v45 = vadd.f32 %v188_v14, %v109_v6  ;;  %v203_v48 = vadd.f32 %v202_v15, %v123_v7 }
 0x10b   :  { %v163_v49 = vadd.f32 %v162_v16, %v83_v8  ;;  %v177_v50 = vadd.f32 %v176_v17, %v97_v9  ;;  %v496_v17 = vpop.permute.xlu2 %495 }
 0x111   :  { %v190_v18 = vpop.f32.mrf.mxu2  ;;  %v204_v19 = vpop.f32.mrf.mxu3 }
 0x112   :  { %v245_v20 = vpop.f32.mrf.mxu0  ;;  %v259_v21 = vpop.f32.mrf.mxu1  ;;  %v191_v9 = vadd.f32 %v190_v18, %v885_v10  ;;  %v205_v12 = vadd.f32 %v204_v19, %v887_v11 }
 0x113   :  { %v292_v36 = vadd.f32 %v245_v20, %v161_v34  ;;  %v293_v37 = vadd.f32 %v259_v21, %v175_v35 }
 0x119   :  { %v273_v22 = vpop.f32.mrf.mxu2  ;;  %v287_v23 = vpop.f32.mrf.mxu3 }
 0x11a   :  { %v247_v24 = vpop.f32.mrf.mxu0  ;;  %v261_v25 = vpop.f32.mrf.mxu1  ;;  %v294_v54 = vadd.f32 %v273_v22, %v189_v45  ;;  %v295_v55 = vadd.f32 %v287_v23, %v203_v48 }
 0x11b   :  { %v296_v56 = vadd.f32 %v247_v24, %v163_v49  ;;  %v297_v57 = vadd.f32 %v261_v25, %v177_v50 }
 0x121   :  { %v275_v26 = vpop.f32.mrf.mxu2  ;;  %v289_v27 = vpop.f32.mrf.mxu3 }
 0x122   :  { %v338_v28 = vpop.f32.mrf.mxu0  ;;  %v352_v29 = vpop.f32.mrf.mxu1  ;;  %v298_v20 = vadd.f32 %v275_v26, %v191_v9  ;;  %v299_v21 = vadd.f32 %v289_v27, %v205_v12 }
 0x123   :  { %v385_v39 = vadd.f32 %v338_v28, %v292_v36  ;;  %v386_v40 = vadd.f32 %v352_v29, %v293_v37 }
 0x129   :  { %v366_v30 = vpop.f32.mrf.mxu2  ;;  %v380_v31 = vpop.f32.mrf.mxu3 }
 0x12a   :  { %v340_v32 = vpop.f32.mrf.mxu0  ;;  %v354_v33 = vpop.f32.mrf.mxu1  ;;  %v387_v60 = vadd.f32 %v366_v30, %v294_v54  ;;  %v388_v61 = vadd.f32 %v380_v31, %v295_v55 }
 0x12b   :  { %v389_v62 = vadd.f32 %v340_v32, %v296_v56  ;;  %v390_v63 = vadd.f32 %v354_v33, %v297_v57 }
 0x131   :  { %v368_v41 = vpop.f32.mrf.mxu2  ;;  %v382_v42 = vpop.f32.mrf.mxu3 }
 0x132   :  { %v431_v43 = vpop.f32.mrf.mxu0  ;;  %v445_v44 = vpop.f32.mrf.mxu1  ;;  %v391_v19 = vadd.f32 %v368_v41, %v298_v20  ;;  %v392_v25 = vadd.f32 %v382_v42, %v299_v21 }
 0x133   :  { %v478_v46 = vadd.f32 %v431_v43, %v385_v39  ;;  %v479_v47 = vadd.f32 %v445_v44, %v386_v40 }
 0x135   :  { %v498_v52 = vadd.f32 %v491_v38, %v478_v46  ;;  %v499_v53 = vadd.f32 %v491_v38, %v479_v47 }
 0x137   :  { %vm507_vm1 = vcmp.ge.f32.partialorder %v498_v52, 0.0  ;;  %v516_v58 = vmul.f32 %v892_v51, %v498_v52  ;;  %vm508_vm2 = vcmp.ge.f32.partialorder %v499_v53, 0.0  ;;  %v517_v59 = vmul.f32 %v892_v51, %v499_v53 }
 0x139   :  { %v524_v0 = vsel %vm507_vm1, %v498_v52, %v516_v58  ;;  %v525_v1 = vsel %vm508_vm2, %v499_v53, %v517_v59  ;;  %v459_v2 = vpop.f32.mrf.mxu2  ;;  %v473_v3 = vpop.f32.mrf.mxu3 }
 0x13a   :  { %v532_v4 = vpack.c.bf16 %v525_v1, %v524_v0  ;;  %v480_v5 = vadd.f32 %v459_v2, %v387_v60  ;;  %v481_v6 = vadd.f32 %v473_v3, %v388_v61  ;;  %v433_v7 = vpop.f32.mrf.mxu0  ;;  %v447_v8 = vpop.f32.mrf.mxu1 }
 0x13b   :  { %v482_v13 = vadd.f32 %v433_v7, %v389_v62  ;;  %v483_v14 = vadd.f32 %v447_v8, %v390_v63 }
 0x13c   :  { %536 = vst [vmem:[%s924_s8] sm:$0xff] %v532_v4  ;;  %v500_v15 = vadd.f32 %v491_v38, %v480_v5  ;;  %v501_v16 = vadd.f32 %v491_v38, %v481_v6 }
 0x13d   :  { %v502_v22 = vadd.f32 %v496_v17, %v482_v13  ;;  %v503_v23 = vadd.f32 %v496_v17, %v483_v14 }
 0x13e   :  { %vm509_vm3 = vcmp.ge.f32.partialorder %v500_v15, 0.0  ;;  %v518_v24 = vmul.f32 %v892_v51, %v500_v15  ;;  %vm510_vm4 = vcmp.ge.f32.partialorder %v501_v16, 0.0  ;;  %v519_v10 = vmul.f32 %v892_v51, %v501_v16 }
 0x13f   :  { %vm511_vm5 = vcmp.ge.f32.partialorder %v502_v22, 0.0  ;;  %v520_v11 = vmul.f32 %v892_v51, %v502_v22  ;;  %vm512_vm6 = vcmp.ge.f32.partialorder %v503_v23, 0.0  ;;  %v521_v18 = vmul.f32 %v892_v51, %v503_v23 }
 0x140   :  { %v526_v28 = vsel %vm509_vm3, %v500_v15, %v518_v24  ;;  %v527_v29 = vsel %vm510_vm4, %v501_v16, %v519_v10 }
 0x141   :  { %v533_v26 = vpack.c.bf16 %v527_v29, %v526_v28  ;;  %v528_v27 = vsel %vm511_vm5, %v502_v22, %v520_v11  ;;  %v529_v30 = vsel %vm512_vm6, %v503_v23, %v521_v18  ;;  %v461_v31 = vpop.f32.mrf.mxu2  ;;  %v475_v32 = vpop.f32.mrf.mxu3 }
 0x142   :  { %v534_v33 = vpack.c.bf16 %v529_v30, %v528_v27  ;;  %v484_v34 = vadd.f32 %v461_v31, %v391_v19  ;;  %v485_v35 = vadd.f32 %v475_v32, %v392_v25 }
 0x143   :  { %537 = vst [vmem:[%s924_s8 + $0x8] sm:$0xff] %v533_v26 }
 0x144   :  { %538 = vst [vmem:[%s924_s8 + $0x10] sm:$0xff] %v534_v33  ;;  %v504_v36 = vadd.f32 %v496_v17, %v484_v34  ;;  %v505_v37 = vadd.f32 %v496_v17, %v485_v35 }
 0x146   :  { %vm513_vm7 = vcmp.ge.f32.partialorder %v504_v36, 0.0  ;;  %v522_v38 = vmul.f32 %v892_v51, %v504_v36  ;;  %vm514_vm8 = vcmp.ge.f32.partialorder %v505_v37, 0.0  ;;  %v523_v39 = vmul.f32 %v892_v51, %v505_v37 }
 0x148   :  { %v530_v40 = vsel %vm513_vm7, %v504_v36, %v522_v38  ;;  %v531_v41 = vsel %vm514_vm8, %v505_v37, %v523_v39 }
 0x149   :  { %v535_v42 = vpack.c.bf16 %v531_v41, %v530_v40 }
 0x14b   :  { %539 = vst [vmem:[%s924_s8 + $0x18] sm:$0xff] %v535_v42 }

// kernel: net6_forward.83
= control target key start
LH: loop header
LB: loop body
LE: loop exit
PB: predicated region body
PF: predicated region fallthrough
CT: control target
= control target key end

     0   :  { %s255_s11 = smov 112   ;;  %s256_s12 = smov 80   ;;  %vm50_vm0 = vcmask 130048   ;;  %v259_v7 = vmov 0   ;;  %s340_s5 = inlined_call_operand.vmem [shape: bf16[16,80], index: 5, kind: input, shape index: {}]   ;;  %s341_s1 = inlined_call_operand.vmem [shape: bf16[16,128], index: 1, kind: input, shape index: {}]   ;;  %s342_s0 = inlined_call_operand.vmem [shape: bf16[16,128], index: 0, kind: input, shape index: {}]   ;;  %s343_s3 = inlined_call_operand.vmem [shape: bf16[16,128], index: 3, kind: input, shape index: {}]   ;;  %s344_s4 = inlined_call_operand.vmem [shape: bf16[16,128], index: 4, kind: input, shape index: {}]   ;;  %s345_s2 = inlined_call_operand.vmem [shape: bf16[16,128], index: 2, kind: input, shape index: {}]   ;;  %s346_s6 = inlined_call_operand.vmem [shape: f32[16,1], index: 6, kind: input, shape index: {}]   ;;  %s347_s7 = inlined_call_operand.<no memory space> [shape: f32[1,1], index: 7, kind: input, shape index: {}]   ;;  %s348_s8 = inlined_call_operand.vmem [shape: bf16[16,128], index: 8, kind: output, shape index: {}]  }
   0x1   :  { %v237_v0 = vld [vmem:[%s340_s5] sm:$0xff]  ;;  %s257_s13 = smov 96   ;;  %s258_s14 = smov 64   ;;  %253 = vset.pattern.permute.xlu2 %v259_v7  ;;  %254 = vset.pattern.permute.xlu0 %v259_v7  ;;  %v179_v8 = vld [vmem:[%s346_s6 + $0x8] sm:$0xff]  ;;  %v195_v31 = vstv %s347_s7 }
   0x2   :  { %v239_v1 = vld [vmem:[%s341_s1] sm:$0xff]  ;;  %42 = vrot.lane.b32.xlu0 %v237_v0, %s255_s11  ;;  %122 = vrot.lane.b32.xlu1 %v237_v0, %s256_s12 }
   0x3   :  { %v238_v2 = vld [vmem:[%s342_s0] sm:$0xff]  ;;  %61 = vmatpush.bf16.msra.mxu0 %v239_v1 }
   0x4   :  { %84 = vmatpush.bf16.msra.mxu1 %v238_v2  ;;  %v241_v3 = vld [vmem:[%s343_s3] sm:$0xff] }
   0x5   :  { %140 = vmatpush.bf16.msra.mxu3 %v241_v3  ;;  %v242_v4 = vld [vmem:[%s344_s4] sm:$0xff] }
   0x6   :  { %v240_v5 = vld [vmem:[%s345_s2] sm:$0xff] }
   0x7   :  { %221 = vmatmul.msk.bf16.vlgmr.msra.gmra.mxu1 %vm50_vm0, %v237_v0  ;;  %169 = vmatpush.bf16.msrb.mxu0 %v242_v4  ;;  %v178_v6 = vld [vmem:[%s346_s6] sm:$0xff] }
   0x8   :  { %111 = vmatpush.bf16.msra.mxu2 %v240_v5  ;;  %182 = vperm.xlu2 %253, %v178_v6  }
   0xa   :  { %93 = vrot.lane.b32.xlu0 %v237_v0, %s257_s13  ;;  %151 = vrot.lane.b32.xlu1 %v237_v0, %s258_s14 }
  0x10   :  { %187 = vperm.xlu2 %253, %v179_v8  }
  0x62   :  { %v183_v23 = vpop.permute.xlu2 %182 }
  0x6a   :  { %v188_v34 = vpop.permute.xlu2 %187 }
  0x74   :  { %v43_v9 = vpop.permute.xlu0 %42  ;;  %v123_v10 = vpop.permute.xlu1 %122 }
  0x75   :  { %216 = vmatmul.msk.bf16.vlgmr.msra.gmra.mxu0 %vm50_vm0, %v43_v9  ;;  %231 = vmatmul.msk.bf16.vlgmr.msra.gmra.mxu3 %vm50_vm0, %v123_v10 }
  0x7c   :  { %v94_v11 = vpop.permute.xlu0 %93  ;;  %v152_v12 = vpop.permute.xlu1 %151 }
  0x7d   :  { %226 = vmatmul.msk.bf16.vlgmr.msra.gmra.mxu2 %vm50_vm0, %v94_v11 }
  0x84   :  { %v86_v14 = vpop.f32.mrf.mxu1 }
  0x85   :  { %236 = vmatmul.msk.bf16.vlgmr.msrb.gmra.mxu0 %vm50_vm0, %v152_v12 }
  0x8c   :  { %v88_v22 = vpop.f32.mrf.mxu1 }
  0xf2   :  { %v63_v13 = vpop.f32.mrf.mxu0 }
  0xf3   :  { %v87_v16 = vadd.f32 %v86_v14, %v63_v13 }
  0xf8   :  { %v142_v17 = vpop.f32.mrf.mxu3 }
  0xfa   :  { %v65_v15 = vpop.f32.mrf.mxu0 }
  0xfb   :  { %v89_v24 = vadd.f32 %v88_v22, %v65_v15 }
 0x100   :  { %v113_v18 = vpop.f32.mrf.mxu2  ;;  %v144_v28 = vpop.f32.mrf.mxu3 }
 0x101   :  { %v118_v19 = vadd.f32 %v113_v18, %v87_v16 }
 0x102   :  { %v171_v20 = vpop.f32.mrf.mxu0 }
 0x103   :  { %v147_v21 = vadd.f32 %v142_v17, %v118_v19 }
 0x105   :  { %v176_v25 = vadd.f32 %v171_v20, %v147_v21 }
 0x107   :  { %v190_v29 = vadd.f32 %v183_v23, %v176_v25 }
 0x108   :  { %v115_v26 = vpop.f32.mrf.mxu2 }
 0x109   :  { %v119_v27 = vadd.f32 %v115_v26, %v89_v24  ;;  %v196_v35 = vmul.f32 %v195_v31, %v190_v29  ;;  %vm193_vm1 = vcmp.ge.f32.partialorder %v190_v29, 0.0 }
 0x10a   :  { %v173_v32 = vpop.f32.mrf.mxu0 }
 0x10b   :  { %v148_v30 = vadd.f32 %v144_v28, %v119_v27  ;;  %v198_v38 = vsel %vm193_vm1, %v190_v29, %v196_v35 }
 0x10d   :  { %v177_v33 = vadd.f32 %v173_v32, %v148_v30 }
 0x10f   :  { %v191_v36 = vadd.f32 %v188_v34, %v177_v33 }
 0x111   :  { %vm194_vm2 = vcmp.ge.f32.partialorder %v191_v36, 0.0  ;;  %v197_v37 = vmul.f32 %v195_v31, %v191_v36 }
 0x113   :  { %v199_v39 = vsel %vm194_vm2, %v191_v36, %v197_v37 }
 0x114   :  { %v246_v40 = vpack.c.bf16 %v199_v39, %v198_v38 }
 0x116   :  { %247 = vst [vmem:[%s348_s8] sm:$0xff] %v246_v40  }

// kernel: net6_forward.87
= control target key start
LH: loop header
LB: loop body
LE: loop exit
PB: predicated region body
PF: predicated region fallthrough
CT: control target
= control target key end

     0   :  { %s2982_s24 = smov 127   ;;  %s2983_s25 = smov 126   ;;  %vm360_vm0 = vcmask 1039360   ;;  %vm433_vm1 = vcmask 785408   ;;  %vm862_vm2 = vcmask 1031168   ;;  %vm1108_vm3 = vcmask 900096   ;;  %s5505_s0 = inlined_call_operand.vmem [shape: bf16[96,896], index: 0, kind: input, shape index: {}]   ;;  %s5506_s1 = inlined_call_operand.vmem [shape: bf16[9,8,96], index: 1, kind: input, shape index: {}]   ;;  %s5507_s2 = inlined_call_operand.vmem [shape: f32[8,1], index: 2, kind: input, shape index: {}]   ;;  %s5508_s3 = inlined_call_operand.vmem [shape: bf16[8,768], index: 3, kind: output, shape index: {}]  }
   0x1   :  { %v2539_v0 = vld [vmem:[%s5505_s0 + $0x10] sm:$0xf]  ;;  %v2935_v1 = vld [vmem:[%s5505_s0 + $0x28] sm:$0xf0]  ;;  %v2531_v2 = vld [vmem:[%s5505_s0 + $0x8] sm:$0xf] }
   0x2   :  { %v3020_v3 = vor.u32 %v2935_v1, %v2539_v0  ;;  %v2934_v4 = vld [vmem:[%s5505_s0 + $0x20] sm:$0xf0]  ;;  %v2523_v5 = vld [vmem:[%s5505_s0] sm:$0xf]  ;;  %v2933_v6 = vld [vmem:[%s5505_s0 + $0x18] sm:$0xf0] }
   0x3   :  { %v3031_v7 = vor.u32 %v2934_v4, %v2531_v2  ;;  %v3033_v8 = vor.u32 %v2933_v6, %v2523_v5  ;;  %v2932_v9 = vld [vmem:[%s5505_s0 + $0x14] sm:$0xf]  ;;  %v2541_v10 = vld [vmem:[%s5505_s0 + $0x2c] sm:$0xf0]  ;;  %v2931_v11 = vld [vmem:[%s5505_s0 + $0xc] sm:$0xf] }
   0x4   :  { %5599 = vst [vmem:[#allocation2_spill] sm:$0xff] %v3020_v3  ;;  %284 = vrot.lane.b32.xlu2 %v3020_v3, %s2982_s24  ;;  %v2533_v12 = vld [vmem:[%s5505_s0 + $0x24] sm:$0xf0]  ;;  %v2930_v13 = vld [vmem:[%s5505_s0 + $0x4] sm:$0xf]  ;;  %v3059_v15 = vor.u32 %v2932_v9, %v2541_v10  ;;  %s2986_s18 = smov 108  }
   0x5   :  { %5600 = vst [vmem:[#allocation3_spill] sm:$0xff] %v3031_v7  ;;  %280 = vrot.lane.b32.xlu1 %v3031_v7, %s2982_s24  ;;  %276 = vrot.lane.b32.xlu0 %v3033_v8, %s2982_s24  ;;  %v2525_v14 = vld [vmem:[%s5505_s0 + $0x1c] sm:$0xf0]  ;;  %v3061_v16 = vor.u32 %v2931_v11, %v2533_v12  ;;  %v2937_v18 = vld [vmem:[%s5505_s0 + $0x3c] sm:$0xf]  ;;  %vm1354_vm4 = vcmask 891904  }
   0x6   :  { %5601 = vst [vmem:[#allocation4_spill] sm:$0xff] %v3033_v8  ;;  %v3063_v17 = vor.u32 %v2930_v13, %v2525_v14  ;;  %v2553_v19 = vld [vmem:[%s5505_s0 + $0x54] sm:$0xf0]  ;;  %v2940_v21 = vld [vmem:[%s5505_s0 + $0x50] sm:$0xf0]  ;;  %s2987_s21 = smov 92  }
   0x7   :  { %5602 = vst [vmem:[#allocation5_spill] sm:$0xff] %v3059_v15  ;;  %v2551_v20 = vld [vmem:[%s5505_s0 + $0x38] sm:$0xf]  ;;  %v2936_v23 = vld [vmem:[%s5505_s0 + $0x30] sm:$0xf0]  ;;  %v3089_v24 = vor.u32 %v2937_v18, %v2553_v19  ;;  %vm1600_vm5 = vcmask 883712  }
   0x8   :  { %5603 = vst [vmem:[#allocation6_spill] sm:$0xff] %v3061_v16  ;;  %v2547_v22 = vld [vmem:[%s5505_s0 + $0x18] sm:$0xf]  ;;  %v3091_v25 = vor.u32 %v2940_v21, %v2551_v20  ;;  %v2567_v27 = vld [vmem:[%s5505_s0 + $0x48] sm:$0xf]  ;;  %vm1846_vm6 = vcmask 752640  }
   0x9   :  { %5604 = vst [vmem:[#allocation7_spill] sm:$0xff] %v3063_v17  ;;  %v3093_v26 = vor.u32 %v2936_v23, %v2547_v22  ;;  %v2942_v28 = vld [vmem:[%s5505_s0 + $0x60] sm:$0xf0]  ;;  %v2561_v30 = vld [vmem:[%s5505_s0 + $0x5c] sm:$0xf0]  ;;  %s2989_s28 = smov 90  }
   0xa   :  { %5605 = vst [vmem:[#allocation8_spill] sm:$0xff] %v3089_v24  ;;  %v2938_v29 = vld [vmem:[%s5505_s0 + $0x44] sm:$0xf]  ;;  %v2559_v31 = vld [vmem:[%s5505_s0 + $0x40] sm:$0xf]  ;;  %v3119_v33 = vor.u32 %v2942_v28, %v2567_v27  ;;  %vm2092_vm7 = vcmask 744448  }
   0xb   :  { %5606 = vst [vmem:[#allocation9_spill] sm:$0xff] %v3091_v25  ;;  %v2941_v32 = vld [vmem:[%s5505_s0 + $0x58] sm:$0xf0]  ;;  %v3121_v34 = vor.u32 %v2938_v29, %v2561_v30  ;;  %v2579_v36 = vld [vmem:[%s5505_s0 + $0x70] sm:$0xf]  ;;  %vm2338_vm8 = vcmask 736256  }
   0xc   :  { %286 = vrot.lane.b32.xlu2 %v3059_v15, %s2982_s24  ;;  %5607 = vst [vmem:[#allocation10_spill] sm:$0xff] %v3093_v26  ;;  %v3123_v35 = vor.u32 %v2941_v32, %v2559_v31  ;;  %v2947_v37 = vld [vmem:[%s5505_s0 + $0x88] sm:$0xf0]  ;;  %v2575_v38 = vld [vmem:[%s5505_s0 + $0x50] sm:$0xf] }
   0xd   :  { %282 = vrot.lane.b32.xlu1 %v3061_v16, %s2982_s24  ;;  %278 = vrot.lane.b32.xlu0 %v3063_v17, %s2982_s24  ;;  %5608 = vst [vmem:[#allocation11_spill] sm:$0xff] %v3119_v33  ;;  %v2943_v39 = vld [vmem:[%s5505_s0 + $0x68] sm:$0xf0]  ;;  %v2569_v41 = vld [vmem:[%s5505_s0 + $0x64] sm:$0xf0]  ;;  %v3149_v42 = vor.u32 %v2947_v37, %v2579_v36 }
   0xe   :  { %5609 = vst [vmem:[#allocation12_spill] sm:$0xff] %v3121_v34  ;;  %v2939_v40 = vld [vmem:[%s5505_s0 + $0x4c] sm:$0xf]  ;;  %v3151_v43 = vor.u32 %v2943_v39, %v2575_v38  ;;  %v2945_v45 = vld [vmem:[%s5505_s0 + $0x7c] sm:$0xf] }
   0xf   :  { %5610 = vst [vmem:[#allocation13_spill] sm:$0xff] %v3123_v35  ;;  %v3153_v44 = vor.u32 %v2939_v40, %v2569_v41  ;;  %v2589_v46 = vld [vmem:[%s5505_s0 + $0x94] sm:$0xf0]  ;;  %v2948_v48 = vld [vmem:[%s5505_s0 + $0x90] sm:$0xf0] }
  0x10   :  { %5611 = vst [vmem:[#allocation14_spill] sm:$0xff] %v3149_v42  ;;  %v2587_v47 = vld [vmem:[%s5505_s0 + $0x78] sm:$0xf]  ;;  %v2944_v49 = vld [vmem:[%s5505_s0 + $0x74] sm:$0xf]  ;;  %v3179_v51 = vor.u32 %v2945_v45, %v2589_v46 }
  0x11   :  { %5612 = vst [vmem:[#allocation15_spill] sm:$0xff] %v3151_v43  ;;  %v2581_v50 = vld [vmem:[%s5505_s0 + $0x8c] sm:$0xf0]  ;;  %v3181_v52 = vor.u32 %v2948_v48, %v2587_v47  ;;  %v2603_v54 = vld [vmem:[%s5505_s0 + $0x88] sm:$0xf] }
  0x12   :  { %5613 = vst [vmem:[#allocation16_spill] sm:$0xff] %v3153_v44  ;;  %v3183_v53 = vor.u32 %v2944_v49, %v2581_v50  ;;  %v2950_v55 = vld [vmem:[%s5505_s0 + $0xa0] sm:$0xf0]  ;;  %v2597_v57 = vld [vmem:[%s5505_s0 + $0x9c] sm:$0xf0] }
  0x13   :  { %5614 = vst [vmem:[#allocation17_spill] sm:$0xff] %v3179_v51  ;;  %v2946_v56 = vld [vmem:[%s5505_s0 + $0x84] sm:$0xf]  ;;  %v2595_v58 = vld [vmem:[%s5505_s0 + $0x80] sm:$0xf]  ;;  %v3209_v60 = vor.u32 %v2950_v55, %v2603_v54 }
  0x14   :  { %292 = vrot.lane.b32.xlu2 %v3089_v24, %s2982_s24  ;;  %5615 = vst [vmem:[#allocation18_spill] sm:$0xff] %v3181_v52  ;;  %v2949_v59 = vld [vmem:[%s5505_s0 + $0x98] sm:$0xf0]  ;;  %v3211_v61 = vor.u32 %v2946_v56, %v2597_v57  ;;  %v2615_v63 = vld [vmem:[%s5505_s0 + $0xb0] sm:$0xf] }
  0x15   :  { %290 = vrot.lane.b32.xlu1 %v3091_v25, %s2982_s24  ;;  %288 = vrot.lane.b32.xlu0 %v3093_v26, %s2982_s24  ;;  %5616 = vst [vmem:[#allocation19_spill] sm:$0xff] %v3183_v53  ;;  %v3213_v62 = vor.u32 %v2949_v59, %v2595_v58  ;;  %v2955_v0 = vld [vmem:[%s5505_s0 + $0xc8] sm:$0xf0]  ;;  %v2609_v2 = vld [vmem:[%s5505_s0 + $0xc4] sm:$0xf0] }
  0x16   :  { %5617 = vst [vmem:[#allocation20_spill] sm:$0xff] %v3209_v60  ;;  %v2951_v1 = vld [vmem:[%s5505_s0 + $0xac] sm:$0xf]  ;;  %v2607_v4 = vld [vmem:[%s5505_s0 + $0xa8] sm:$0xf]  ;;  %v3239_v6 = vor.u32 %v2955_v0, %v2615_v63 }
  0x17   :  { %5618 = vst [vmem:[#allocation21_spill] sm:$0xff] %v3211_v61  ;;  %v2954_v5 = vld [vmem:[%s5505_s0 + $0xc0] sm:$0xf0]  ;;  %v3241_v9 = vor.u32 %v2951_v1, %v2609_v2  ;;  %v2953_v11 = vld [vmem:[%s5505_s0 + $0xbc] sm:$0xf] }
  0x18   :  { %5619 = vst [vmem:[#allocation22_spill] sm:$0xff] %v3213_v62  ;;  %v3243_v10 = vor.u32 %v2954_v5, %v2607_v4  ;;  %v2625_v12 = vld [vmem:[%s5505_s0 + $0xd4] sm:$0xf0]  ;;  %v2956_v14 = vld [vmem:[%s5505_s0 + $0xd0] sm:$0xf0] }
  0x19   :  { %5620 = vst [vmem:[#allocation23_spill] sm:$0xff] %v3239_v6  ;;  %v2623_v13 = vld [vmem:[%s5505_s0 + $0xb8] sm:$0xf]  ;;  %v2952_v18 = vld [vmem:[%s5505_s0 + $0xb4] sm:$0xf]  ;;  %v3269_v20 = vor.u32 %v2953_v11, %v2625_v12 }
  0x1a   :  { %5621 = vst [vmem:[#allocation24_spill] sm:$0xff] %v3241_v9  ;;  %v2617_v19 = vld [vmem:[%s5505_s0 + $0xcc] sm:$0xf0]  ;;  %v3271_v21 = vor.u32 %v2956_v14, %v2623_v13  ;;  %v2958_v23 = vld [vmem:[%s5505_s0 + $0xe4] sm:$0xf] }
  0x1b   :  { %5622 = vst [vmem:[#allocation25_spill] sm:$0xff] %v3243_v10  ;;  %v3273_v22 = vor.u32 %v2952_v18, %v2617_v19  ;;  %v2637_v27 = vld [vmem:[%s5505_s0 + $0xfc] sm:$0xf0]  ;;  %v2961_v29 = vld [vmem:[%s5505_s0 + $0xf8] sm:$0xf0] }
  0x1c   :  { %298 = vrot.lane.b32.xlu2 %v3119_v33, %s2982_s24  ;;  %5623 = vst [vmem:[#allocation26_spill] sm:$0xff] %v3269_v20  ;;  %v2635_v28 = vld [vmem:[%s5505_s0 + $0xe0] sm:$0xf]  ;;  %v2957_v31 = vld [vmem:[%s5505_s0 + $0xd8] sm:$0xf0]  ;;  %v3299_v32 = vor.u32 %v2958_v23, %v2637_v27 }
  0x1d   :  { %296 = vrot.lane.b32.xlu1 %v3121_v34, %s2982_s24  ;;  %294 = vrot.lane.b32.xlu0 %v3123_v35, %s2982_s24  ;;  %5624 = vst [vmem:[#allocation27_spill] sm:$0xff] %v3271_v21  ;;  %v2631_v30 = vld [vmem:[%s5505_s0 + $0xc0] sm:$0xf]  ;;  %v3301_v36 = vor.u32 %v2961_v29, %v2635_v28  ;;  %v2651_v38 = vld [vmem:[%s5505_s0 + $0xf0] sm:$0xf] }
  0x1e   :  { %5625 = vst [vmem:[#allocation28_spill] sm:$0xff] %v3273_v22  ;;  %v3303_v37 = vor.u32 %v2957_v31, %v2631_v30  ;;  %v2963_v39 = vld [vmem:[%s5505_s0 + $0x108] sm:$0xf0]  ;;  %v2645_v41 = vld [vmem:[%s5505_s0 + $0x104] sm:$0xf0] }
  0x1f   :  { %5626 = vst [vmem:[#allocation29_spill] sm:$0xff] %v3299_v32  ;;  %v2959_v40 = vld [vmem:[%s5505_s0 + $0xec] sm:$0xf]  ;;  %v2643_v45 = vld [vmem:[%s5505_s0 + $0xe8] sm:$0xf]  ;;  %v3329_v47 = vor.u32 %v2963_v39, %v2651_v38 }
  0x20   :  { %5627 = vst [vmem:[#allocation30_spill] sm:$0xff] %v3301_v36  ;;  %v2962_v46 = vld [vmem:[%s5505_s0 + $0x100] sm:$0xf0]  ;;  %v3331_v48 = vor.u32 %v2959_v40, %v2645_v41  ;;  %v2663_v50 = vld [vmem:[%s5505_s0 + $0x118] sm:$0xf] }
  0x21   :  { %5628 = vst [vmem:[#allocation31_spill] sm:$0xff] %v3303_v37  ;;  %v3333_v49 = vor.u32 %v2962_v46, %v2643_v45  ;;  %v2968_v54 = vld [vmem:[%s5505_s0 + $0x130] sm:$0xf0]  ;;  %v2659_v55 = vld [vmem:[%s5505_s0 + $0xf8] sm:$0xf] }
  0x22   :  { %5629 = vst [vmem:[#allocation32_spill] sm:$0xff] %v3329_v47  ;;  %v2964_v56 = vld [vmem:[%s5505_s0 + $0x110] sm:$0xf0]  ;;  %v2653_v58 = vld [vmem:[%s5505_s0 + $0x10c] sm:$0xf0]  ;;  %v3359_v59 = vor.u32 %v2968_v54, %v2663_v50 }
  0x23   :  { %5630 = vst [vmem:[#allocation33_spill] sm:$0xff] %v3331_v48  ;;  %v2960_v57 = vld [vmem:[%s5505_s0 + $0xf4] sm:$0xf]  ;;  %v3361_v63 = vor.u32 %v2964_v56, %v2659_v55  ;;  %v2966_v1 = vld [vmem:[%s5505_s0 + $0x124] sm:$0xf] }
  0x24   :  { %304 = vrot.lane.b32.xlu2 %v3149_v42, %s2982_s24  ;;  %5631 = vst [vmem:[#allocation34_spill] sm:$0xff] %v3333_v49  ;;  %v3363_v0 = vor.u32 %v2960_v57, %v2653_v58  ;;  %v2673_v2 = vld [vmem:[%s5505_s0 + $0x13c] sm:$0xf0]  ;;  %v2969_v11 = vld [vmem:[%s5505_s0 + $0x138] sm:$0xf0] }
  0x25   :  { %302 = vrot.lane.b32.xlu1 %v3151_v43, %s2982_s24  ;;  %300 = vrot.lane.b32.xlu0 %v3153_v44, %s2982_s24  ;;  %5632 = vst [vmem:[#allocation35_spill] sm:$0xff] %v3359_v59  ;;  %v2671_v4 = vld [vmem:[%s5505_s0 + $0x120] sm:$0xf]  ;;  %v2965_v12 = vld [vmem:[%s5505_s0 + $0x11c] sm:$0xf]  ;;  %v3391_v14 = vor.u32 %v2966_v1, %v2673_v2 }
  0x26   :  { %5633 = vst [vmem:[#allocation36_spill] sm:$0xff] %v3361_v63  ;;  %v2665_v13 = vld [vmem:[%s5505_s0 + $0x134] sm:$0xf0]  ;;  %v3393_v18 = vor.u32 %v2969_v11, %v2671_v4  ;;  %v2687_v23 = vld [vmem:[%s5505_s0 + $0x130] sm:$0xf] }
  0x27   :  { %5634 = vst [vmem:[#allocation37_spill] sm:$0xff] %v3363_v0  ;;  %v3395_v19 = vor.u32 %v2965_v12, %v2665_v13  ;;  %v2971_v27 = vld [vmem:[%s5505_s0 + $0x148] sm:$0xf0]  ;;  %v2681_v30 = vld [vmem:[%s5505_s0 + $0x144] sm:$0xf0] }
  0x28   :  { %5635 = vst [vmem:[#allocation38_spill] sm:$0xff] %v3391_v14  ;;  %v2967_v28 = vld [vmem:[%s5505_s0 + $0x12c] sm:$0xf]  ;;  %v2679_v31 = vld [vmem:[%s5505_s0 + $0x128] sm:$0xf]  ;;  %v3423_v39 = vor.u32 %v2971_v27, %v2687_v23 }
  0x29   :  { %5636 = vst [vmem:[#allocation39_spill] sm:$0xff] %v3393_v18  ;;  %v2970_v38 = vld [vmem:[%s5505_s0 + $0x140] sm:$0xf0]  ;;  %v3425_v40 = vor.u32 %v2967_v28, %v2681_v30 }
  0x2a   :  { %5637 = vst [vmem:[#allocation40_spill] sm:$0xff] %v3395_v19  ;;  %v3427_v41 = vor.u32 %v2970_v38, %v2679_v31 }
  0x2b   :  { %5638 = vst [vmem:[#allocation41_spill] sm:$0xff] %v3423_v39 }
  0x2c   :  { %310 = vrot.lane.b32.xlu2 %v3179_v51, %s2982_s24  ;;  %5639 = vst [vmem:[#allocation42_spill] sm:$0xff] %v3425_v40 }
  0x2d   :  { %308 = vrot.lane.b32.xlu1 %v3181_v52, %s2982_s24  ;;  %306 = vrot.lane.b32.xlu0 %v3183_v53, %s2982_s24  ;;  %5640 = vst [vmem:[#allocation43_spill] sm:$0xff] %v3427_v41 }
  0x34   :  { %316 = vrot.lane.b32.xlu2 %v3209_v60, %s2982_s24 }
  0x35   :  { %314 = vrot.lane.b32.xlu1 %v3211_v61, %s2982_s24  ;;  %312 = vrot.lane.b32.xlu0 %v3213_v62, %s2982_s24 }
  0x3c   :  { %322 = vrot.lane.b32.xlu2 %v3239_v6, %s2982_s24 }
  0x3d   :  { %320 = vrot.lane.b32.xlu1 %v3241_v9, %s2982_s24  ;;  %318 = vrot.lane.b32.xlu0 %v3243_v10, %s2982_s24 }
  0x44   :  { %328 = vrot.lane.b32.xlu2 %v3269_v20, %s2982_s24 }
  0x45   :  { %326 = vrot.lane.b32.xlu1 %v3271_v21, %s2982_s24  ;;  %324 = vrot.lane.b32.xlu0 %v3273_v22, %s2982_s24 }
  0x4c   :  { %334 = vrot.lane.b32.xlu2 %v3299_v32, %s2982_s24 }
  0x4d   :  { %332 = vrot.lane.b32.xlu1 %v3301_v36, %s2982_s24  ;;  %330 = vrot.lane.b32.xlu0 %v3303_v37, %s2982_s24 }
  0x54   :  { %340 = vrot.lane.b32.xlu2 %v3329_v47, %s2982_s24 }
  0x55   :  { %338 = vrot.lane.b32.xlu1 %v3331_v48, %s2982_s24  ;;  %336 = vrot.lane.b32.xlu0 %v3333_v49, %s2982_s24 }
  0x5c   :  { %346 = vrot.lane.b32.xlu2 %v3359_v59, %s2982_s24 }
  0x5d   :  { %344 = vrot.lane.b32.xlu1 %v3361_v63, %s2982_s24  ;;  %342 = vrot.lane.b32.xlu0 %v3363_v0, %s2982_s24 }
  0x5e   :  { %v3380_v5 = vpop.permute.xlu2 %284 }
  0x64   :  { %352 = vrot.lane.b32.xlu2 %v3391_v14, %s2982_s24 }
  0x65   :  { %350 = vrot.lane.b32.xlu1 %v3393_v18, %s2982_s24  ;;  %348 = vrot.lane.b32.xlu0 %v3395_v19, %s2982_s24 }
  0x66   :  { %v3412_v29 = vpop.permute.xlu2 %286 }
  0x6c   :  { %358 = vrot.lane.b32.xlu2 %v3423_v39, %s2982_s24 }
  0x6d   :  { %356 = vrot.lane.b32.xlu1 %v3425_v40, %s2982_s24  ;;  %354 = vrot.lane.b32.xlu0 %v3427_v41, %s2982_s24  ;;  %s2984_s24 = smov 110  }
  0x6e   :  { %v3435_v45 = vpop.permute.xlu2 %292 }
  0x74   :  { %782 = vrot.lane.b32.xlu2 %v3031_v7, %s2983_s25 }
  0x75   :  { %780 = vrot.lane.b32.xlu1 %v3063_v17, %s2983_s25  ;;  %778 = vrot.lane.b32.xlu0 %v3033_v8, %s2983_s25 }
  0x76   :  { %v3443_v46 = vpop.permute.xlu2 %298 }
  0x77   :  { %v3445_v50 = vpop.permute.xlu1 %280  ;;  %v3447_v54 = vpop.permute.xlu0 %276 }
  0x7c   :  { %788 = vrot.lane.b32.xlu2 %v3059_v15, %s2983_s25 }
  0x7d   :  { %786 = vrot.lane.b32.xlu1 %v3020_v3, %s2983_s25  ;;  %784 = vrot.lane.b32.xlu0 %v3061_v16, %s2983_s25 }
  0x7e   :  { %v3455_v55 = vpop.permute.xlu2 %304 }
  0x7f   :  { %v3457_v56 = vpop.permute.xlu1 %282  ;;  %v3459_v57 = vpop.permute.xlu0 %278 }
  0x84   :  { %794 = vrot.lane.b32.xlu2 %v3089_v24, %s2983_s25 }
  0x85   :  { %792 = vrot.lane.b32.xlu1 %v3091_v25, %s2983_s25  ;;  %790 = vrot.lane.b32.xlu0 %v3093_v26, %s2983_s25 }
  0x86   :  { %v3467_v58 = vpop.permute.xlu2 %310 }
  0x87   :  { %v3469_v1 = vpop.permute.xlu1 %290  ;;  %v3471_v2 = vpop.permute.xlu0 %288 }
  0x8c   :  { %800 = vrot.lane.b32.xlu2 %v3119_v33, %s2983_s25 }
  0x8d   :  { %798 = vrot.lane.b32.xlu1 %v3121_v34, %s2983_s25  ;;  %796 = vrot.lane.b32.xlu0 %v3123_v35, %s2983_s25 }
  0x8e   :  { %v3479_v4 = vpop.permute.xlu2 %316 }
  0x8f   :  { %v3481_v11 = vpop.permute.xlu1 %296  ;;  %v3483_v12 = vpop.permute.xlu0 %294 }
  0x94   :  { %806 = vrot.lane.b32.xlu2 %v3149_v42, %s2983_s25 }
  0x95   :  { %804 = vrot.lane.b32.xlu1 %v3151_v43, %s2983_s25  ;;  %802 = vrot.lane.b32.xlu0 %v3153_v44, %s2983_s25 }
  0x96   :  { %v3491_v13 = vpop.permute.xlu2 %322 }
  0x97   :  { %v3493_v23 = vpop.permute.xlu1 %302  ;;  %v3495_v27 = vpop.permute.xlu0 %300 }
  0x9c   :  { %812 = vrot.lane.b32.xlu2 %v3179_v51, %s2983_s25 }
  0x9d   :  { %810 = vrot.lane.b32.xlu1 %v3181_v52, %s2983_s25  ;;  %808 = vrot.lane.b32.xlu0 %v3183_v53, %s2983_s25 }
  0x9e   :  { %v3503_v28 = vpop.permute.xlu2 %328 }
  0x9f   :  { %v3505_v30 = vpop.permute.xlu1 %308  ;;  %v3507_v31 = vpop.permute.xlu0 %306 }
  0xa4   :  { %818 = vrot.lane.b32.xlu2 %v3209_v60, %s2983_s25 }
  0xa5   :  { %816 = vrot.lane.b32.xlu1 %v3211_v61, %s2983_s25  ;;  %814 = vrot.lane.b32.xlu0 %v3213_v62, %s2983_s25 }
  0xa6   :  { %v335_v38 = vpop.permute.xlu2 %334 }
  0xa7   :  { %v3515_v52 = vpop.permute.xlu1 %314  ;;  %v3517_v51 = vpop.permute.xlu0 %312 }
  0xac   :  { %824 = vrot.lane.b32.xlu2 %v3239_v6, %s2983_s25 }
  0xad   :  { %822 = vrot.lane.b32.xlu1 %v3241_v9, %s2983_s25  ;;  %820 = vrot.lane.b32.xlu0 %v3243_v10, %s2983_s25 }
  0xae   :  { %v3525_v60 = vpop.permute.xlu2 %340 }
  0xaf   :  { %v321_v61 = vpop.permute.xlu1 %320  ;;  %v319_v53 = vpop.permute.xlu0 %318 }
  0xb4   :  { %830 = vrot.lane.b32.xlu2 %v3269_v20, %s2983_s25 }
  0xb5   :  { %828 = vrot.lane.b32.xlu1 %v3271_v21, %s2983_s25  ;;  %826 = vrot.lane.b32.xlu0 %v3273_v22, %s2983_s25 }
  0xb6   :  { %v347_v6 = vpop.permute.xlu2 %346 }
  0xb7   :  { %v3533_v62 = vpop.permute.xlu1 %326  ;;  %v3535_v9 = vpop.permute.xlu0 %324 }
  0xbc   :  { %836 = vrot.lane.b32.xlu2 %v3299_v32, %s2983_s25 }
  0xbd   :  { %834 = vrot.lane.b32.xlu1 %v3301_v36, %s2983_s25  ;;  %832 = vrot.lane.b32.xlu0 %v3303_v37, %s2983_s25 }
  0xbe   :  { %v353_v20 = vpop.permute.xlu2 %352 }
  0xbf   :  { %v333_v10 = vpop.permute.xlu1 %332  ;;  %v3543_v21 = vpop.permute.xlu0 %330 }
  0xc4   :  { %842 = vrot.lane.b32.xlu2 %v3329_v47, %s2983_s25 }
  0xc5   :  { %840 = vrot.lane.b32.xlu1 %v3331_v48, %s2983_s25  ;;  %838 = vrot.lane.b32.xlu0 %v3333_v49, %s2983_s25 }
  0xc6   :  { %v3551_v32 = vpop.permute.xlu2 %358 }
  0xc7   :  { %v339_v22 = vpop.permute.xlu1 %338  ;;  %v337_v36 = vpop.permute.xlu0 %336 }
  0xcc   :  { %848 = vrot.lane.b32.xlu2 %v3359_v59, %s2983_s25 }
  0xcd   :  { %846 = vrot.lane.b32.xlu1 %v3361_v63, %s2983_s25  ;;  %844 = vrot.lane.b32.xlu0 %v3363_v0, %s2983_s25 }
  0xce   :  { %v3559_v47 = vpop.permute.xlu2 %782 }
  0xcf   :  { %5641 = vst [vmem:[#allocation44_spill] sm:$0xff] %v3559_v47  ;;  %v3561_v37 = vpop.permute.xlu1 %344  ;;  %v3563_v48 = vpop.permute.xlu0 %342 }
  0xd4   :  { %854 = vrot.lane.b32.xlu2 %v3391_v14, %s2983_s25 }
  0xd5   :  { %852 = vrot.lane.b32.xlu1 %v3393_v18, %s2983_s25  ;;  %850 = vrot.lane.b32.xlu0 %v3395_v19, %s2983_s25 }
  0xd6   :  { %v3571_v59 = vpop.permute.xlu2 %788 }
  0xd7   :  { %5642 = vst [vmem:[#allocation45_spill] sm:$0xff] %v3571_v59  ;;  %v351_v63 = vpop.permute.xlu1 %350  ;;  %v349_v49 = vpop.permute.xlu0 %348  ;;  %v385_v59 = vsel %vm360_vm0, %v333_v10, %v335_v38  ;;  %v381_v10 = vsel %vm360_vm0, %v3491_v13, %v3535_v9 }
  0xd8   :  { %v391_v47 = vsel %vm360_vm0, %v347_v6, %v349_v49  ;;  %v392_v0 = vsel %vm360_vm0, %v349_v49, %v351_v63  ;;  %v393_v44 = vsel %vm360_vm0, %v351_v63, %v353_v20  ;;  %v386_v6 = vsel %vm360_vm0, %v335_v38, %v337_v36 }
  0xd9   :  { %439 = vmatpush.bf16.msra.mxu0 %v391_v47  ;;  %452 = vmatpush.bf16.msra.mxu1 %v392_v0  ;;  %v387_v49 = vsel %vm360_vm0, %v337_v36, %v339_v22  ;;  %v388_v36 = vsel %vm360_vm0, %v339_v22, %v3525_v60  ;;  %v369_v22 = vsel %vm360_vm0, %v3483_v12, %v3481_v11 }
  0xda   :  { %465 = vmatpush.bf16.msra.mxu2 %v393_v44 }
  0xdc   :  { %860 = vrot.lane.b32.xlu2 %v3423_v39, %s2983_s25 }
  0xdd   :  { %858 = vrot.lane.b32.xlu1 %v3425_v40, %s2983_s25  ;;  %856 = vrot.lane.b32.xlu0 %v3427_v41, %s2983_s25  ;;  %v379_v40 = vsel %vm360_vm0, %v319_v53, %v321_v61  ;;  %v380_v41 = vsel %vm360_vm0, %v321_v61, %v3491_v13  ;;  %v373_v53 = vsel %vm360_vm0, %v3455_v55, %v3507_v31  ;;  %s2988_s25 = smov 91  }
  0xde   :  { %440 = vmatpush.bf16.msra.mxu0 %v385_v59  ;;  %453 = vmatpush.bf16.msra.mxu1 %v386_v6  ;;  %v3585_v47 = vpop.permute.xlu2 %794  ;;  %v374_v61 = vsel %vm360_vm0, %v3507_v31, %v3505_v30  ;;  %v367_v55 = vsel %vm360_vm0, %v3469_v1, %v3435_v45  ;;  %v368_v13 = vsel %vm360_vm0, %v3435_v45, %v3483_v12 }
  0xdf   :  { %466 = vmatpush.bf16.msra.mxu2 %v387_v49  ;;  %v357_v44 = vpop.permute.xlu1 %356  ;;  %v355_v63 = vpop.permute.xlu0 %354  ;;  %v361_v45 = vsel %vm360_vm0, %v3447_v54, %v3459_v57  ;;  %v362_v1 = vsel %vm360_vm0, %v3459_v57, %v3445_v50  ;;  %v376_v12 = vsel %vm360_vm0, %v3467_v58, %v3517_v51  ;;  %v390_v49 = vsel %vm360_vm0, %v3563_v48, %v3561_v37 }
  0xe0   :  { %v394_v0 = vsel %vm360_vm0, %v353_v20, %v355_v63  ;;  %v375_v20 = vsel %vm360_vm0, %v3505_v30, %v3467_v58  ;;  %v382_v30 = vsel %vm360_vm0, %v3535_v9, %v3533_v62  ;;  %v363_v9 = vsel %vm360_vm0, %v3445_v50, %v3457_v56 }
  0xe1   :  { %478 = vmatpush.bf16.msra.mxu3 %v394_v0  ;;  %v395_v54 = vsel %vm360_vm0, %v355_v63, %v357_v44  ;;  %v396_v38 = vsel %vm360_vm0, %v357_v44, %v3551_v32  ;;  %v370_v50 = vsel %vm360_vm0, %v3481_v11, %v3443_v46  ;;  %v389_v58 = vsel %vm360_vm0, %v3525_v60, %v3563_v48 }
  0xe2   :  { %441 = vmatpush.bf16.msra.mxu0 %v379_v40  ;;  %454 = vmatpush.bf16.msra.mxu1 %v380_v41  ;;  %v364_v32 = vsel %vm360_vm0, %v3457_v56, %v3380_v5  ;;  %v383_v37 = vsel %vm360_vm0, %v3533_v62, %v3503_v28  ;;  %v384_v48 = vsel %vm360_vm0, %v3503_v28, %v3543_v21 }
  0xe3   :  { %467 = vmatpush.bf16.msra.mxu2 %v381_v10  ;;  %v377_v56 = vsel %vm360_vm0, %v3517_v51, %v3515_v52  ;;  %v378_v63 = vsel %vm360_vm0, %v3515_v52, %v3479_v4  ;;  %v2817_v51 = vld [vmem:[%s5505_s0 + $0x118] sm:$0xf]  ;;  %v2927_v52 = vld [vmem:[%s5505_s0 + $0x130] sm:$0xf0]  ;;  %v371_v21 = vsel %vm360_vm0, %v3443_v46, %v3495_v27  ;;  %v372_v4 = vsel %vm360_vm0, %v3495_v27, %v3493_v23 }
  0xe4   :  { %1028 = vrot.lane.b32.xlu2 %v3031_v7, %s2984_s24  ;;  %v2818_v10 = vor.u32 %v2927_v52, %v2817_v51  ;;  %v365_v23 = vsel %vm360_vm0, %v3380_v5, %v3412_v29  ;;  %v366_v27 = vsel %vm360_vm0, %v3412_v29, %v3471_v2  ;;  %v2769_v5 = vld [vmem:[%s5505_s0 + $0xa8] sm:$0xf]  ;;  %v2915_v29 = vld [vmem:[%s5505_s0 + $0xc0] sm:$0xf0]  ;;  %v2924_v2 = vld [vmem:[%s5505_s0 + $0x11c] sm:$0xf] }
  0xe5   :  { %1026 = vrot.lane.b32.xlu1 %v3063_v17, %s2984_s24  ;;  %1024 = vrot.lane.b32.xlu0 %v3033_v8, %s2984_s24 }
  0xe6   :  { %442 = vmatpush.bf16.msra.mxu0 %v373_v53  ;;  %455 = vmatpush.bf16.msra.mxu1 %v374_v61  ;;  %v3611_v59 = vpop.permute.xlu2 %800  ;;  %v2793_v53 = vld [vmem:[%s5505_s0 + $0xe0] sm:$0xf]  ;;  %v2921_v61 = vld [vmem:[%s5505_s0 + $0xf8] sm:$0xf0] }
  0xe7   :  { %468 = vmatpush.bf16.msra.mxu2 %v375_v20  ;;  %479 = vmatpush.bf16.msra.mxu3 %v388_v36  ;;  %v3613_v40 = vpop.permute.xlu1 %780  ;;  %v3615_v41 = vpop.permute.xlu0 %778  ;;  %v2794_v46 = vor.u32 %v2921_v61, %v2793_v53  ;;  %v5643_v20 = vld [vmem:[#allocation16_spill] sm:$0xff]  ;;  %v2897_v53 = vld [vmem:[%s5505_s0 + $0x18] sm:$0xf0] }
  0xea   :  { %443 = vmatpush.bf16.msra.mxu0 %v367_v55  ;;  %456 = vmatpush.bf16.msra.mxu1 %v368_v13 }
  0xeb   :  { %469 = vmatpush.bf16.msra.mxu2 %v369_v22  ;;  %480 = vmatpush.bf16.msra.mxu3 %v382_v30  ;;  %v2770_v22 = vor.u32 %v2915_v29, %v2769_v5  ;;  %v2819_v30 = vld [vmem:[%s5505_s0 + $0x134] sm:$0xf0]  ;;  %v2825_v5 = vld [vmem:[%s5505_s0 + $0x120] sm:$0xf]  ;;  %v2928_v29 = vld [vmem:[%s5505_s0 + $0x138] sm:$0xf0] }
  0xec   :  { %1034 = vrot.lane.b32.xlu2 %v3059_v15, %s2984_s24 }
  0xed   :  { %1032 = vrot.lane.b32.xlu1 %v3020_v3, %s2984_s24  ;;  %1030 = vrot.lane.b32.xlu0 %v3061_v16, %s2984_s24 }
  0xee   :  { %444 = vmatpush.bf16.msra.mxu0 %v361_v45  ;;  %457 = vmatpush.bf16.msra.mxu1 %v362_v1  ;;  %v3647_v31 = vpop.permute.xlu2 %806  ;;  %v2745_v45 = vld [vmem:[%s5505_s0 + $0x70] sm:$0xf]  ;;  %v2909_v1 = vld [vmem:[%s5505_s0 + $0x88] sm:$0xf0] }
  0xef   :  { %470 = vmatpush.bf16.msra.mxu2 %v363_v9  ;;  %481 = vmatpush.bf16.msra.mxu3 %v376_v12  ;;  %v3652_v57 = vpop.permute.xlu1 %786  ;;  %v3654_v6 = vpop.permute.xlu0 %784  ;;  %v2822_v9 = vor.u32 %v2924_v2, %v2819_v30  ;;  %v2918_v12 = vld [vmem:[%s5505_s0 + $0xe4] sm:$0xf] }
  0xf0   :  { %v2925_v30 = vld [vmem:[%s5505_s0 + $0x124] sm:$0xf] }
  0xf2   :  { %491 = vmatpush.bf16.msrb.mxu0 %v395_v54  ;;  %504 = vmatpush.bf16.msrb.mxu1 %v396_v38  ;;  %v2795_v54 = vld [vmem:[%s5505_s0 + $0xfc] sm:$0xf0]  ;;  %v2746_v38 = vor.u32 %v2909_v1, %v2745_v45  ;;  %v2833_v1 = vld [vmem:[%s5505_s0 + $0x128] sm:$0xf] }
  0xf3   :  { %482 = vmatpush.bf16.msra.mxu3 %v370_v50  ;;  %700 = vmatpush.bf16.msrb.mxu2 %v2818_v10  ;;  %v2798_v50 = vor.u32 %v2918_v12, %v2795_v54  ;;  %v2697_v10 = vld [vmem:[%s5505_s0] sm:$0xf]  ;;  %v2929_v54 = vld [vmem:[%s5505_s0 + $0x140] sm:$0xf0] }
  0xf4   :  { %1040 = vrot.lane.b32.xlu2 %v3089_v24, %s2984_s24  ;;  %v2698_v2 = vor.u32 %v2897_v53, %v2697_v10  ;;  %v2827_v45 = vld [vmem:[%s5505_s0 + $0x13c] sm:$0xf0] }
  0xf5   :  { %1038 = vrot.lane.b32.xlu1 %v3091_v25, %s2984_s24  ;;  %1036 = vrot.lane.b32.xlu0 %v3093_v26, %s2984_s24  ;;  %v2830_v12 = vor.u32 %v2925_v30, %v2827_v45  ;;  %v2923_v30 = vld [vmem:[%s5505_s0 + $0x108] sm:$0xf0] }
  0xf6   :  { %492 = vmatpush.bf16.msrb.mxu0 %v389_v58  ;;  %505 = vmatpush.bf16.msrb.mxu1 %v390_v49  ;;  %v3674_v60 = vpop.permute.xlu2 %812  ;;  %v5644_v58 = vld [vmem:[#allocation17_spill] sm:$0xff]  ;;  %v5645_v49 = vld [vmem:[#allocation18_spill] sm:$0xff] }
  0xf7   :  { %483 = vmatpush.bf16.msra.mxu3 %v364_v32  ;;  %v3682_v11 = vpop.permute.xlu1 %792  ;;  %v3684_v44 = vpop.permute.xlu0 %790  ;;  %701 = vmatpush.bf16.msrb.mxu2 %v2794_v46  ;;  %v5646_v32 = vld [vmem:[#allocation19_spill] sm:$0xff]  ;;  %v2906_v46 = vld [vmem:[%s5505_s0 + $0x74] sm:$0xf] }
  0xfa   :  { %493 = vmatpush.bf16.msrb.mxu0 %v383_v37  ;;  %506 = vmatpush.bf16.msrb.mxu1 %v384_v48  ;;  %v2721_v48 = vld [vmem:[%s5505_s0 + $0x38] sm:$0xf] }
  0xfb   :  { %702 = vmatpush.bf16.msrb.mxu2 %v2770_v22  ;;  %713 = vmatpush.bf16.msrb.mxu3 %v2822_v9  ;;  %v2826_v22 = vor.u32 %v2928_v29, %v2825_v5  ;;  %v2919_v5 = vld [vmem:[%s5505_s0 + $0xec] sm:$0xf] }
  0xfc   :  { %1046 = vrot.lane.b32.xlu2 %v3119_v33, %s2984_s24 }
  0xfd   :  { %1044 = vrot.lane.b32.xlu1 %v3121_v34, %s2984_s24  ;;  %1042 = vrot.lane.b32.xlu0 %v3123_v35, %s2984_s24 }
  0xfe   :  { %494 = vmatpush.bf16.msrb.mxu0 %v377_v56  ;;  %507 = vmatpush.bf16.msrb.mxu1 %v378_v63  ;;  %v3698_v62 = vpop.permute.xlu2 %818  ;;  %v2903_v56 = vld [vmem:[%s5505_s0 + $0x50] sm:$0xf0]  ;;  %v2912_v63 = vld [vmem:[%s5505_s0 + $0xac] sm:$0xf] }
  0xff   :  { %v3712_v28 = vpop.permute.xlu1 %798  ;;  %v3714_v0 = vpop.permute.xlu0 %796  ;;  %703 = vmatpush.bf16.msrb.mxu2 %v2746_v38  ;;  %714 = vmatpush.bf16.msrb.mxu3 %v2798_v50  ;;  %v2834_v38 = vor.u32 %v2929_v54, %v2833_v1  ;;  %v5647_v50 = vld [vmem:[#allocation20_spill] sm:$0xff] }
 0x100   :  { %v2777_v54 = vld [vmem:[%s5505_s0 + $0xb0] sm:$0xf] }
 0x102   :  { %495 = vmatpush.bf16.msrb.mxu0 %v371_v21  ;;  %508 = vmatpush.bf16.msrb.mxu1 %v372_v4  ;;  %v2722_v21 = vor.u32 %v2903_v56, %v2721_v48  ;;  %v2771_v4 = vld [vmem:[%s5505_s0 + $0xc4] sm:$0xf0]  ;;  %v5648_v48 = vld [vmem:[#allocation21_spill] sm:$0xff]  ;;  %v5649_v56 = vld [vmem:[#allocation22_spill] sm:$0xff] }
 0x103   :  { %v2774_v61 = vor.u32 %v2912_v63, %v2771_v4  ;;  %v2723_v4 = vld [vmem:[%s5505_s0 + $0x54] sm:$0xf0] }
 0x104   :  { %1052 = vrot.lane.b32.xlu2 %v3149_v42, %s2984_s24  ;;  %704 = vmatpush.bf16.msrb.mxu2 %v2722_v21  ;;  %v2900_v21 = vld [vmem:[%s5505_s0 + $0x3c] sm:$0xf] }
 0x105   :  { %1050 = vrot.lane.b32.xlu1 %v3151_v43, %s2984_s24  ;;  %1048 = vrot.lane.b32.xlu0 %v5643_v20, %s2984_s24 }
 0x106   :  { %496 = vmatpush.bf16.msrb.mxu0 %v365_v23  ;;  %509 = vmatpush.bf16.msrb.mxu1 %v366_v27  ;;  %v3734_v36 = vpop.permute.xlu2 %824  ;;  %v2747_v23 = vld [vmem:[%s5505_s0 + $0x8c] sm:$0xf0]  ;;  %v3803_v27 = vld [vmem:[%s5506_s1 + $0x4] sm:$0xf] }
 0x107   :  { %v3745_v55 = vpop.permute.xlu1 %804  ;;  %v3747_v13 = vpop.permute.xlu0 %802  ;;  %2689 = vmatmul.msk.bf16.vlgmr.msra.gmra.mxu0 %vm433_vm1, %v3803_v27  ;;  %715 = vmatpush.bf16.msrb.mxu3 %v2774_v61  ;;  %v2750_v9 = vor.u32 %v2906_v46, %v2747_v23  ;;  %v2726_v61 = vor.u32 %v2900_v21, %v2723_v4  ;;  %v2801_v46 = vld [vmem:[%s5505_s0 + $0xe8] sm:$0xf]  ;;  %v2922_v23 = vld [vmem:[%s5505_s0 + $0x100] sm:$0xf0]  ;;  %v2913_v21 = vld [vmem:[%s5505_s0 + $0xb4] sm:$0xf] }
 0x108   :  { %2690 = vmatmul.msk.bf16.vlgmr.msra.gmra.mxu1 %vm433_vm1, %v3803_v27  ;;  %2691 = vmatmul.msk.bf16.vlgmr.msra.gmra.mxu2 %vm433_vm1, %v3803_v27  ;;  %v2802_v29 = vor.u32 %v2922_v23, %v2801_v46  ;;  %v2779_v4 = vld [vmem:[%s5505_s0 + $0xcc] sm:$0xf0] }
 0x109   :  { %705 = vmatpush.bf16.msrb.mxu2 %v2698_v2  ;;  %v2803_v2 = vld [vmem:[%s5505_s0 + $0x104] sm:$0xf0]  ;;  %2692 = vmatmul.msk.bf16.vlgmr.msra.gmra.mxu3 %vm433_vm1, %v3803_v27 }
 0x10a   :  { %726 = vmatpush.bf16.msra.mxu0 %v2826_v22  ;;  %739 = vmatpush.bf16.msra.mxu1 %v2830_v12  ;;  %v2809_v22 = vld [vmem:[%s5505_s0 + $0xf0] sm:$0xf]  ;;  %v2806_v45 = vor.u32 %v2919_v5, %v2803_v2  ;;  %v2699_v12 = vld [vmem:[%s5505_s0 + $0x1c] sm:$0xf0]  ;;  %v2782_v5 = vor.u32 %v2913_v21, %v2779_v4  ;;  %v2917_v2 = vld [vmem:[%s5505_s0 + $0xd0] sm:$0xf0] }
 0x10b   :  { %716 = vmatpush.bf16.msrb.mxu3 %v2750_v9  ;;  %v2810_v1 = vor.u32 %v2923_v30, %v2809_v22  ;;  %v2894_v9 = vld [vmem:[%s5505_s0 + $0x4] sm:$0xf]  ;;  %v2926_v22 = vld [vmem:[%s5505_s0 + $0x12c] sm:$0xf]  ;;  %v2753_v4 = vld [vmem:[%s5505_s0 + $0x78] sm:$0xf] }
 0x10c   :  { %1058 = vrot.lane.b32.xlu2 %v5644_v58, %s2984_s24  ;;  %v2702_v46 = vor.u32 %v2894_v9, %v2699_v12  ;;  %v5651_v9 = vld [vmem:[#allocation24_spill] sm:$0xff] }
 0x10d   :  { %1056 = vrot.lane.b32.xlu1 %v5645_v49, %s2984_s24  ;;  %1054 = vrot.lane.b32.xlu0 %v5646_v32, %s2984_s24 }
 0x10e   :  { %v3770_v37 = vpop.permute.xlu2 %830  ;;  %752 = vmatpush.bf16.msra.mxu2 %v2834_v38  ;;  %727 = vmatpush.bf16.msra.mxu0 %v2802_v29  ;;  %v2916_v38 = vld [vmem:[%s5505_s0 + $0xc8] sm:$0xf0]  ;;  %v2785_v29 = vld [vmem:[%s5505_s0 + $0xb8] sm:$0xf] }
 0x10f   :  { %v3781_v51 = vpop.permute.xlu1 %810  ;;  %v3783_v52 = vpop.permute.xlu0 %808  ;;  %717 = vmatpush.bf16.msrb.mxu3 %v2726_v61  ;;  %740 = vmatpush.bf16.msra.mxu1 %v2806_v45  ;;  %v2778_v23 = vor.u32 %v2916_v38, %v2777_v54  ;;  %v2786_v30 = vor.u32 %v2917_v2, %v2785_v29  ;;  %v2835_v61 = vld [vmem:[%s5505_s0 + $0x144] sm:$0xf0]  ;;  %v5652_v54 = vld [vmem:[#allocation25_spill] sm:$0xff]  ;;  %v2910_v29 = vld [vmem:[%s5505_s0 + $0x90] sm:$0xf0] }
 0x110   :  { %v5650_v45 = vld [vmem:[#allocation23_spill] sm:$0xff]  ;;  %v2838_v12 = vor.u32 %v2926_v22, %v2835_v61  ;;  %v2907_v2 = vld [vmem:[%s5505_s0 + $0x7c] sm:$0xf] }
 0x111   :  { %v2911_v22 = vld [vmem:[%s5505_s0 + $0x98] sm:$0xf0] }
 0x112   :  { %753 = vmatpush.bf16.msra.mxu2 %v2810_v1  ;;  %728 = vmatpush.bf16.msra.mxu0 %v2778_v23  ;;  %v2754_v23 = vor.u32 %v2910_v29, %v2753_v4  ;;  %v2729_v4 = vld [vmem:[%s5505_s0 + $0x40] sm:$0xf] }
 0x113   :  { %718 = vmatpush.bf16.msrb.mxu3 %v2702_v46  ;;  %741 = vmatpush.bf16.msra.mxu1 %v2782_v5  ;;  %v2755_v46 = vld [vmem:[%s5505_s0 + $0x94] sm:$0xf0]  ;;  %v2761_v5 = vld [vmem:[%s5505_s0 + $0x80] sm:$0xf] }
 0x114   :  { %1064 = vrot.lane.b32.xlu2 %v5647_v50, %s2984_s24  ;;  %v2758_v61 = vor.u32 %v2907_v2, %v2755_v46  ;;  %v2901_v2 = vld [vmem:[%s5505_s0 + $0x44] sm:$0xf]  ;;  %v2731_v46 = vld [vmem:[%s5505_s0 + $0x5c] sm:$0xf0] }
 0x115   :  { %1062 = vrot.lane.b32.xlu1 %v5648_v48, %s2984_s24  ;;  %1060 = vrot.lane.b32.xlu0 %v5649_v56, %s2984_s24 }
 0x116   :  { %v3835_v63 = vpop.permute.xlu2 %836  ;;  %754 = vmatpush.bf16.msra.mxu2 %v2786_v30  ;;  %v2920_v30 = vld [vmem:[%s5505_s0 + $0xf4] sm:$0xf]  ;;  %729 = vmatpush.bf16.msra.mxu0 %v2754_v23  ;;  %v2737_v23 = vld [vmem:[%s5505_s0 + $0x48] sm:$0xf] }
 0x117   :  { %v3843_v10 = vpop.permute.xlu1 %816  ;;  %v3845_v53 = vpop.permute.xlu0 %814  ;;  %765 = vmatpush.bf16.msra.mxu3 %v2838_v12  ;;  %v2811_v12 = vld [vmem:[%s5505_s0 + $0x10c] sm:$0xf0]  ;;  %742 = vmatpush.bf16.msra.mxu1 %v2758_v61 }
 0x118   :  { %v2814_v29 = vor.u32 %v2920_v30, %v2811_v12  ;;  %v2905_v30 = vld [vmem:[%s5505_s0 + $0x60] sm:$0xf0]  ;;  %v2914_v12 = vld [vmem:[%s5505_s0 + $0xbc] sm:$0xf]  ;;  %2693 = vmatmul.msk.bf16.vlgmr.msrb.gmra.mxu0 %vm433_vm1, %v3803_v27  ;;  %2694 = vmatmul.msk.bf16.vlgmr.msrb.gmra.mxu1 %vm433_vm1, %v3803_v27 }
 0x119   :  { %v2738_v61 = vor.u32 %v2905_v30, %v2737_v23  ;;  %v2705_v23 = vld [vmem:[%s5505_s0 + $0x8] sm:$0xf]  ;;  %v2898_v30 = vld [vmem:[%s5505_s0 + $0x20] sm:$0xf0] }
 0x11b   :  { %766 = vmatpush.bf16.msra.mxu3 %v2814_v29 }
 0x11c   :  { %1070 = vrot.lane.b32.xlu2 %v5650_v45, %s2984_s24  ;;  %v5655_v45 = vld [vmem:[#allocation28_spill] sm:$0xff] }
 0x11d   :  { %1068 = vrot.lane.b32.xlu1 %v5651_v9, %s2984_s24  ;;  %1066 = vrot.lane.b32.xlu0 %v5652_v54, %s2984_s24  ;;  %v2762_v54 = vor.u32 %v2911_v22, %v2761_v5  ;;  %v2904_v9 = vld [vmem:[%s5505_s0 + $0x58] sm:$0xf0]  ;;  %v2734_v22 = vor.u32 %v2901_v2, %v2731_v46  ;;  %v5654_v2 = vld [vmem:[#allocation27_spill] sm:$0xff] }
 0x11e   :  { %v3903_v38 = vpop.permute.xlu2 %842  ;;  %v2730_v5 = vor.u32 %v2904_v9, %v2729_v4  ;;  %v2787_v9 = vld [vmem:[%s5505_s0 + $0xd4] sm:$0xf0]  ;;  %v5653_v4 = vld [vmem:[#allocation26_spill] sm:$0xff] }
 0x11f   :  { %v3905_v21 = vpop.permute.xlu1 %822  ;;  %v3907_v1 = vpop.permute.xlu0 %820  ;;  %755 = vmatpush.bf16.msra.mxu2 %v2762_v54  ;;  %v2790_v46 = vor.u32 %v2914_v12, %v2787_v9  ;;  %743 = vmatpush.bf16.msra.mxu1 %v2734_v22  ;;  %v2895_v12 = vld [vmem:[%s5505_s0 + $0xc] sm:$0xf]  ;;  %v2707_v9 = vld [vmem:[%s5505_s0 + $0x24] sm:$0xf0]  ;;  %v2713_v22 = vld [vmem:[%s5505_s0 + $0x10] sm:$0xf] }
 0x120   :  { %730 = vmatpush.bf16.msra.mxu0 %v2730_v5  ;;  %v2706_v5 = vor.u32 %v2898_v30, %v2705_v23  ;;  %v15_v23 = vld [vmem:[%s5506_s1] sm:$0xf] }
 0x121   :  { %767 = vmatpush.bf16.msra.mxu3 %v2790_v46  ;;  %v2763_v46 = vld [vmem:[%s5505_s0 + $0x9c] sm:$0xf0]  ;;  %2839 = vmatmul.msk.bf16.vlgmr.msrb.gmra.mxu2 %vm433_vm1, %v15_v23 }
 0x122   :  { %2840 = vmatmul.msk.bf16.vlgmr.msrb.gmra.mxu3 %vm433_vm1, %v15_v23 }
 0x123   :  { %756 = vmatpush.bf16.msra.mxu2 %v2738_v61  ;;  %v2908_v61 = vld [vmem:[%s5505_s0 + $0x84] sm:$0xf] }
 0x124   :  { %1076 = vrot.lane.b32.xlu2 %v5653_v4, %s2984_s24  ;;  %731 = vmatpush.bf16.msra.mxu0 %v2706_v5  ;;  %v2766_v30 = vor.u32 %v2908_v61, %v2763_v46  ;;  %v5657_v5 = vld [vmem:[#allocation30_spill] sm:$0xff] }
 0x125   :  { %1074 = vrot.lane.b32.xlu1 %v5654_v2, %s2984_s24  ;;  %1072 = vrot.lane.b32.xlu0 %v5655_v45, %s2984_s24  ;;  %v2899_v45 = vld [vmem:[%s5505_s0 + $0x28] sm:$0xf0]  ;;  %v2710_v2 = vor.u32 %v2895_v12, %v2707_v9  ;;  %v2739_v12 = vld [vmem:[%s5505_s0 + $0x64] sm:$0xf0]  ;;  %v5656_v9 = vld [vmem:[#allocation29_spill] sm:$0xff] }
 0x126   :  { %v3965_v56 = vpop.permute.xlu2 %848  ;;  %v2714_v4 = vor.u32 %v2899_v45, %v2713_v22  ;;  %v2902_v45 = vld [vmem:[%s5505_s0 + $0x4c] sm:$0xf]  ;;  %768 = vmatpush.bf16.msra.mxu3 %v2766_v30 }
 0x127   :  { %v3967_v54 = vpop.permute.xlu1 %828  ;;  %v3969_v29 = vpop.permute.xlu0 %826  ;;  %744 = vmatpush.bf16.msra.mxu1 %v2710_v2  ;;  %v2742_v27 = vor.u32 %v2902_v45, %v2739_v12  ;;  %v5658_v22 = vld [vmem:[#allocation31_spill] sm:$0xff]  ;;  %v2896_v2 = vld [vmem:[%s5505_s0 + $0x14] sm:$0xf]  ;;  %v5660_v12 = vld [vmem:[#allocation33_spill] sm:$0xff] }
 0x128   :  { %757 = vmatpush.bf16.msra.mxu2 %v2714_v4  ;;  %v2715_v4 = vld [vmem:[%s5505_s0 + $0x2c] sm:$0xf0]  ;;  %2841 = vmatmul.msk.bf16.vlgmr.msra.gmra.mxu0 %vm433_vm1, %v15_v23  ;;  %s2985_s0 = smov 109  }
 0x129   :  { %v2718_v30 = vor.u32 %v2896_v2, %v2715_v4  ;;  %v5659_v45 = vld [vmem:[#allocation32_spill] sm:$0xff]  ;;  %v5664_v4 = vld [vmem:[#allocation37_spill] sm:$0xff] }
 0x12a   :  { %769 = vmatpush.bf16.msra.mxu3 %v2742_v27  ;;  %2842 = vmatmul.msk.bf16.vlgmr.msra.gmra.mxu1 %vm433_vm1, %v15_v23  ;;  %v5662_v27 = vld [vmem:[#allocation35_spill] sm:$0xff]  ;;  %v5663_v2 = vld [vmem:[#allocation36_spill] sm:$0xff] }
 0x12c   :  { %1082 = vrot.lane.b32.xlu2 %v5656_v9, %s2984_s24 }
 0x12d   :  { %1080 = vrot.lane.b32.xlu1 %v5657_v5, %s2984_s24  ;;  %1078 = vrot.lane.b32.xlu0 %v5658_v22, %s2984_s24  ;;  %v5661_v22 = vld [vmem:[#allocation34_spill] sm:$0xff] }
 0x12e   :  { %v855_v61 = vpop.permute.xlu2 %854  ;;  %770 = vmatpush.bf16.msra.mxu3 %v2718_v30 }
 0x12f   :  { %v835_v46 = vpop.permute.xlu1 %834  ;;  %v4014_v48 = vpop.permute.xlu0 %832 }
 0x131   :  { %2843 = vmatmul.msk.bf16.vlgmr.msra.gmra.mxu2 %vm433_vm1, %v15_v23 }
 0x132   :  { %2844 = vmatmul.msk.bf16.vlgmr.msra.gmra.mxu3 %vm433_vm1, %v15_v23 }
 0x134   :  { %1088 = vrot.lane.b32.xlu2 %v5659_v45, %s2984_s24 }
 0x135   :  { %1086 = vrot.lane.b32.xlu1 %v5660_v12, %s2984_s24  ;;  %1084 = vrot.lane.b32.xlu0 %v5661_v22, %s2984_s24 }
 0x136   :  { %v4029_v5 = vpop.permute.xlu2 %860 }
 0x137   :  { %v841_v9 = vpop.permute.xlu1 %840  ;;  %v839_v50 = vpop.permute.xlu0 %838 }
 0x13c   :  { %1094 = vrot.lane.b32.xlu2 %v5662_v27, %s2984_s24 }
 0x13d   :  { %1092 = vrot.lane.b32.xlu1 %v5663_v2, %s2984_s24  ;;  %1090 = vrot.lane.b32.xlu0 %v5664_v4, %s2984_s24 }
 0x13e   :  { %v4040_v30 = vpop.permute.xlu2 %1028 }
 0x13f   :  { %5665 = vst [vmem:[#allocation46_spill] sm:$0xff] %v4040_v30  ;;  %v4042_v22 = vpop.permute.xlu1 %846  ;;  %v4044_v12 = vpop.permute.xlu0 %844 }
 0x144   :  { %1100 = vrot.lane.b32.xlu2 %v3391_v14, %s2984_s24 }
 0x145   :  { %1098 = vrot.lane.b32.xlu1 %v3393_v18, %s2984_s24  ;;  %1096 = vrot.lane.b32.xlu0 %v3395_v19, %s2984_s24  ;;  %v5667_v19 = vld [vmem:[#allocation42_spill] sm:$0xff]  ;;  %v5668_v18 = vld [vmem:[#allocation43_spill] sm:$0xff] }
 0x146   :  { %v4052_v23 = vpop.permute.xlu2 %1034 }
 0x147   :  { %5666 = vst [vmem:[#allocation47_spill] sm:$0xff] %v4052_v23  ;;  %v853_v2 = vpop.permute.xlu1 %852  ;;  %v851_v27 = vpop.permute.xlu0 %850  ;;  %v887_v23 = vsel %vm862_vm2, %v835_v46, %v3835_v63 }
 0x148   :  { %v893_v30 = vsel %vm862_vm2, %v3965_v56, %v851_v27  ;;  %v894_v4 = vsel %vm862_vm2, %v851_v27, %v853_v2  ;;  %v895_v45 = vsel %vm862_vm2, %v853_v2, %v855_v61  ;;  %v888_v56 = vsel %vm862_vm2, %v3835_v63, %v839_v50 }
 0x149   :  { %940 = vmatpush.bf16.msrb.mxu0 %v893_v30  ;;  %953 = vmatpush.bf16.msrb.mxu1 %v894_v4  ;;  %v889_v27 = vsel %vm862_vm2, %v839_v50, %v841_v9  ;;  %v881_v30 = vsel %vm862_vm2, %v3907_v1, %v3905_v21  ;;  %v883_v50 = vsel %vm862_vm2, %v3734_v36, %v3969_v29 }
 0x14a   :  { %966 = vmatpush.bf16.msrb.mxu2 %v895_v45  ;;  %v875_v63 = vsel %vm862_vm2, %v3647_v31, %v3783_v52  ;;  %v890_v1 = vsel %vm862_vm2, %v841_v9, %v3903_v38  ;;  %v871_v9 = vsel %vm862_vm2, %v3714_v0, %v3712_v28 }
 0x14c   :  { %1106 = vrot.lane.b32.xlu2 %v3423_v39, %s2984_s24 }
 0x14d   :  { %1104 = vrot.lane.b32.xlu1 %v5667_v19, %s2984_s24  ;;  %1102 = vrot.lane.b32.xlu0 %v5668_v18, %s2984_s24 }
 0x14e   :  { %941 = vmatpush.bf16.msrb.mxu0 %v887_v23  ;;  %954 = vmatpush.bf16.msrb.mxu1 %v888_v56  ;;  %v4069_v45 = vpop.permute.xlu2 %1040  ;;  %v882_v23 = vsel %vm862_vm2, %v3905_v21, %v3734_v36  ;;  %v876_v36 = vsel %vm862_vm2, %v3783_v52, %v3781_v51  ;;  %v877_v21 = vsel %vm862_vm2, %v3781_v51, %v3674_v60 }
 0x14f   :  { %967 = vmatpush.bf16.msrb.mxu2 %v889_v27  ;;  %v859_v2 = vpop.permute.xlu1 %858  ;;  %v857_v4 = vpop.permute.xlu0 %856  ;;  %v869_v52 = vsel %vm862_vm2, %v3682_v11, %v3585_v47  ;;  %v870_v51 = vsel %vm862_vm2, %v3585_v47, %v3714_v0  ;;  %v884_v27 = vsel %vm862_vm2, %v3969_v29, %v3967_v54  ;;  %v863_v47 = vsel %vm862_vm2, %v3615_v41, %v3613_v40  ;;  %v5669_v11 = vld [vmem:[#allocation44_spill] sm:$0xff] }
 0x150   :  { %v896_v46 = vsel %vm862_vm2, %v855_v61, %v857_v4  ;;  %v864_v0 = vsel %vm862_vm2, %v3613_v40, %v5669_v11  ;;  %v865_v29 = vsel %vm862_vm2, %v5669_v11, %v3654_v6  ;;  %v897_v41 = vsel %vm862_vm2, %v857_v4, %v859_v2 }
 0x151   :  { %979 = vmatpush.bf16.msrb.mxu3 %v896_v46  ;;  %v898_v40 = vsel %vm862_vm2, %v859_v2, %v4029_v5  ;;  %v892_v4 = vsel %vm862_vm2, %v4044_v12, %v4042_v22 }
 0x152   :  { %942 = vmatpush.bf16.msrb.mxu0 %v881_v30  ;;  %955 = vmatpush.bf16.msrb.mxu1 %v882_v23  ;;  %v878_v30 = vsel %vm862_vm2, %v3674_v60, %v3845_v53  ;;  %v891_v60 = vsel %vm862_vm2, %v3903_v38, %v4044_v12  ;;  %v885_v38 = vsel %vm862_vm2, %v3967_v54, %v3770_v37 }
 0x153   :  { %968 = vmatpush.bf16.msrb.mxu2 %v883_v50  ;;  %v886_v12 = vsel %vm862_vm2, %v3770_v37, %v4014_v48  ;;  %v880_v54 = vsel %vm862_vm2, %v3843_v10, %v3698_v62  ;;  %v873_v37 = vsel %vm862_vm2, %v3611_v59, %v3747_v13  ;;  %v874_v62 = vsel %vm862_vm2, %v3747_v13, %v3745_v55 }
 0x154   :  { %1274 = vrot.lane.b32.xlu2 %v3031_v7, %s2985_s0 }
 0x155   :  { %1272 = vrot.lane.b32.xlu1 %v3063_v17, %s2985_s0  ;;  %1270 = vrot.lane.b32.xlu0 %v3033_v8, %s2985_s0 }
 0x156   :  { %943 = vmatpush.bf16.msrb.mxu0 %v875_v63  ;;  %956 = vmatpush.bf16.msrb.mxu1 %v876_v36  ;;  %v4098_v61 = vpop.permute.xlu2 %1046  ;;  %v872_v63 = vsel %vm862_vm2, %v3712_v28, %v3611_v59  ;;  %v866_v28 = vsel %vm862_vm2, %v3654_v6, %v3652_v57  ;;  %v879_v6 = vsel %vm862_vm2, %v3845_v53, %v3843_v10  ;;  %v5670_v36 = vld [vmem:[#allocation45_spill] sm:$0xff] }
 0x157   :  { %969 = vmatpush.bf16.msrb.mxu2 %v877_v21  ;;  %v4100_v31 = vpop.permute.xlu1 %1026  ;;  %980 = vmatpush.bf16.msrb.mxu3 %v890_v1  ;;  %v4102_v56 = vpop.permute.xlu0 %1024  ;;  %v867_v21 = vsel %vm862_vm2, %v3652_v57, %v5670_v36  ;;  %v868_v59 = vsel %vm862_vm2, %v5670_v36, %v3684_v44  ;;  %v5681_v36 = vld [vmem:[#allocation30_spill] sm:$0xff] }
 0x15a   :  { %944 = vmatpush.bf16.msrb.mxu0 %v869_v52  ;;  %957 = vmatpush.bf16.msrb.mxu1 %v870_v51  ;;  %v5671_v51 = vld [vmem:[#allocation20_spill] sm:$0xff] }
 0x15b   :  { %970 = vmatpush.bf16.msrb.mxu2 %v871_v9  ;;  %981 = vmatpush.bf16.msrb.mxu3 %v884_v27  ;;  %v5672_v9 = vld [vmem:[#allocation21_spill] sm:$0xff]  ;;  %v5673_v27 = vld [vmem:[#allocation22_spill] sm:$0xff] }
 0x15c   :  { %1280 = vrot.lane.b32.xlu2 %v3059_v15, %s2985_s0 }
 0x15d   :  { %1278 = vrot.lane.b32.xlu1 %v3020_v3, %s2985_s0  ;;  %1276 = vrot.lane.b32.xlu0 %v3061_v16, %s2985_s0 }
 0x15e   :  { %945 = vmatpush.bf16.msrb.mxu0 %v863_v47  ;;  %958 = vmatpush.bf16.msrb.mxu1 %v864_v0  ;;  %v4135_v46 = vpop.permute.xlu2 %1052 }
 0x15f   :  { %971 = vmatpush.bf16.msrb.mxu2 %v865_v29  ;;  %v4137_v23 = vpop.permute.xlu1 %1032  ;;  %982 = vmatpush.bf16.msrb.mxu3 %v878_v30  ;;  %v4141_v50 = vpop.permute.xlu0 %1030  ;;  %v5674_v29 = vld [vmem:[#allocation23_spill] sm:$0xff]  ;;  %v5675_v30 = vld [vmem:[#allocation24_spill] sm:$0xff] }
 0x162   :  { %992 = vmatpush.bf16.msra.mxu0 %v897_v41  ;;  %1005 = vmatpush.bf16.msra.mxu1 %v898_v40  ;;  %v5676_v41 = vld [vmem:[#allocation25_spill] sm:$0xff] }
 0x163   :  { %983 = vmatpush.bf16.msrb.mxu3 %v872_v63 }
 0x164   :  { %1286 = vrot.lane.b32.xlu2 %v3089_v24, %s2985_s0 }
 0x165   :  { %1284 = vrot.lane.b32.xlu1 %v3091_v25, %s2985_s0  ;;  %1282 = vrot.lane.b32.xlu0 %v3093_v26, %s2985_s0 }
 0x166   :  { %993 = vmatpush.bf16.msra.mxu0 %v891_v60  ;;  %1006 = vmatpush.bf16.msra.mxu1 %v892_v4  ;;  %v4164_v5 = vpop.permute.xlu2 %1058  ;;  %v5677_v4 = vld [vmem:[#allocation26_spill] sm:$0xff] }
 0x167   :  { %v4166_v22 = vpop.permute.xlu1 %1038  ;;  %984 = vmatpush.bf16.msrb.mxu3 %v866_v28  ;;  %v4171_v2 = vpop.permute.xlu0 %1036  ;;  %v5678_v28 = vld [vmem:[#allocation27_spill] sm:$0xff] }
 0x16a   :  { %994 = vmatpush.bf16.msra.mxu0 %v885_v38  ;;  %1007 = vmatpush.bf16.msra.mxu1 %v886_v12  ;;  %v5679_v38 = vld [vmem:[#allocation28_spill] sm:$0xff] }
 0x16c   :  { %1292 = vrot.lane.b32.xlu2 %v3119_v33, %s2985_s0 }
 0x16d   :  { %1290 = vrot.lane.b32.xlu1 %v3121_v34, %s2985_s0  ;;  %1288 = vrot.lane.b32.xlu0 %v3123_v35, %s2985_s0 }
 0x16e   :  { %995 = vmatpush.bf16.msra.mxu0 %v879_v6  ;;  %1008 = vmatpush.bf16.msra.mxu1 %v880_v54  ;;  %v4188_v48 = vpop.permute.xlu2 %1064 }
 0x16f   :  { %v4190_v53 = vpop.permute.xlu1 %1044  ;;  %v4195_v10 = vpop.permute.xlu0 %1042 }
 0x172   :  { %996 = vmatpush.bf16.msra.mxu0 %v873_v37  ;;  %1009 = vmatpush.bf16.msra.mxu1 %v874_v62  ;;  %v2845_v37 = vld [vmem:[%s5506_s1 + $0x8] sm:$0xf]  ;;  %v5680_v62 = vld [vmem:[#allocation29_spill] sm:$0xff] }
 0x173   :  { %2846 = vmatmul.msk.bf16.vlgmr.msrb.gmra.mxu0 %vm433_vm1, %v2845_v37  ;;  %2847 = vmatmul.msk.bf16.vlgmr.msrb.gmra.mxu1 %vm433_vm1, %v2845_v37 }
 0x174   :  { %1298 = vrot.lane.b32.xlu2 %v3149_v42, %s2985_s0  ;;  %2848 = vmatmul.msk.bf16.vlgmr.msrb.gmra.mxu2 %vm433_vm1, %v2845_v37 }
 0x175   :  { %1296 = vrot.lane.b32.xlu1 %v3151_v43, %s2985_s0  ;;  %1294 = vrot.lane.b32.xlu0 %v5643_v20, %s2985_s0 }
 0x176   :  { %997 = vmatpush.bf16.msra.mxu0 %v867_v21  ;;  %1010 = vmatpush.bf16.msra.mxu1 %v868_v59  ;;  %v4209_v55 = vpop.permute.xlu2 %1070  ;;  %v5682_v21 = vld [vmem:[#allocation31_spill] sm:$0xff] }
 0x177   :  { %v4211_v13 = vpop.permute.xlu1 %1050  ;;  %v4213_v57 = vpop.permute.xlu0 %1048  ;;  %2849 = vmatmul.msk.bf16.vlgmr.msrb.gmra.mxu3 %vm433_vm1, %v2845_v37 }
 0x17c   :  { %1304 = vrot.lane.b32.xlu2 %v5644_v58, %s2985_s0 }
 0x17d   :  { %1302 = vrot.lane.b32.xlu1 %v5645_v49, %s2985_s0  ;;  %1300 = vrot.lane.b32.xlu0 %v5646_v32, %s2985_s0 }
 0x17e   :  { %v4221_v44 = vpop.permute.xlu2 %1076 }
 0x17f   :  { %v4223_v1 = vpop.permute.xlu1 %1056  ;;  %v4225_v52 = vpop.permute.xlu0 %1054 }
 0x183   :  { %2850 = vmatmul.msk.bf16.vlgmr.msra.gmra.mxu0 %vm433_vm1, %v2845_v37  ;;  %2851 = vmatmul.msk.bf16.vlgmr.msra.gmra.mxu1 %vm433_vm1, %v2845_v37  ;;  %v5690_v37 = vld [vmem:[#allocation39_spill] sm:$0xff] }
 0x184   :  { %1310 = vrot.lane.b32.xlu2 %v5671_v51, %s2985_s0 }
 0x185   :  { %1308 = vrot.lane.b32.xlu1 %v5672_v9, %s2985_s0  ;;  %1306 = vrot.lane.b32.xlu0 %v5673_v27, %s2985_s0  ;;  %v5687_v27 = vld [vmem:[#allocation36_spill] sm:$0xff] }
 0x186   :  { %v1083_v47 = vpop.permute.xlu2 %1082 }
 0x187   :  { %v4233_v11 = vpop.permute.xlu1 %1062  ;;  %v4235_v0 = vpop.permute.xlu0 %1060 }
 0x18c   :  { %1316 = vrot.lane.b32.xlu2 %v5674_v29, %s2985_s0 }
 0x18d   :  { %1314 = vrot.lane.b32.xlu1 %v5675_v30, %s2985_s0  ;;  %1312 = vrot.lane.b32.xlu0 %v5676_v41, %s2985_s0  ;;  %v5684_v41 = vld [vmem:[#allocation33_spill] sm:$0xff]  ;;  %v5685_v30 = vld [vmem:[#allocation34_spill] sm:$0xff] }
 0x18e   :  { %v4243_v40 = vpop.permute.xlu2 %1088 }
 0x18f   :  { %v4245_v63 = vpop.permute.xlu1 %1068  ;;  %v1067_v60 = vpop.permute.xlu0 %1066 }
 0x194   :  { %1322 = vrot.lane.b32.xlu2 %v5677_v4, %s2985_s0  ;;  %v5683_v4 = vld [vmem:[#allocation32_spill] sm:$0xff] }
 0x195   :  { %1320 = vrot.lane.b32.xlu1 %v5678_v28, %s2985_s0  ;;  %1318 = vrot.lane.b32.xlu0 %v5679_v38, %s2985_s0 }
 0x196   :  { %v1095_v12 = vpop.permute.xlu2 %1094 }
 0x197   :  { %v4253_v6 = vpop.permute.xlu1 %1074  ;;  %v4255_v54 = vpop.permute.xlu0 %1072 }
 0x19c   :  { %1328 = vrot.lane.b32.xlu2 %v5680_v62, %s2985_s0 }
 0x19d   :  { %1326 = vrot.lane.b32.xlu1 %v5681_v36, %s2985_s0  ;;  %1324 = vrot.lane.b32.xlu0 %v5682_v21, %s2985_s0  ;;  %v5686_v21 = vld [vmem:[#allocation35_spill] sm:$0xff] }
 0x19e   :  { %v1101_v59 = vpop.permute.xlu2 %1100 }
 0x19f   :  { %v1081_v38 = vpop.permute.xlu1 %1080  ;;  %v4270_v28 = vpop.permute.xlu0 %1078 }
 0x1a4   :  { %1334 = vrot.lane.b32.xlu2 %v5683_v4, %s2985_s0  ;;  %v5688_v4 = vld [vmem:[#allocation37_spill] sm:$0xff] }
 0x1a5   :  { %1332 = vrot.lane.b32.xlu1 %v5684_v41, %s2985_s0  ;;  %1330 = vrot.lane.b32.xlu0 %v5685_v30, %s2985_s0 }
 0x1a6   :  { %v4278_v62 = vpop.permute.xlu2 %1106 }
 0x1a7   :  { %v1087_v29 = vpop.permute.xlu1 %1086  ;;  %v1085_v36 = vpop.permute.xlu0 %1084 }
 0x1ac   :  { %1340 = vrot.lane.b32.xlu2 %v5686_v21, %s2985_s0  ;;  %v5691_v21 = vld [vmem:[#allocation40_spill] sm:$0xff] }
 0x1ad   :  { %1338 = vrot.lane.b32.xlu1 %v5687_v27, %s2985_s0  ;;  %1336 = vrot.lane.b32.xlu0 %v5688_v4, %s2985_s0 }
 0x1ae   :  { %v4288_v41 = vpop.permute.xlu2 %1274 }
 0x1af   :  { %5689 = vst [vmem:[#allocation44_spill] sm:$0xff] %v4288_v41  ;;  %v4290_v30 = vpop.permute.xlu1 %1092  ;;  %v4292_v9 = vpop.permute.xlu0 %1090 }
 0x1b4   :  { %1346 = vrot.lane.b32.xlu2 %v3391_v14, %s2985_s0  ;;  %v1135_v14 = vsel %vm1108_vm3, %v1085_v36, %v1087_v29 }
 0x1b5   :  { %1344 = vrot.lane.b32.xlu1 %v5690_v37, %s2985_s0  ;;  %1342 = vrot.lane.b32.xlu0 %v5691_v21, %s2985_s0 }
 0x1b6   :  { %v4300_v51 = vpop.permute.xlu2 %1280 }
 0x1b7   :  { %5692 = vst [vmem:[#allocation45_spill] sm:$0xff] %v4300_v51  ;;  %v1099_v27 = vpop.permute.xlu1 %1098  ;;  %v1097_v4 = vpop.permute.xlu0 %1096  ;;  %v1133_v51 = vsel %vm1108_vm3, %v1081_v38, %v1083_v47 }
 0x1b8   :  { %v1141_v41 = vsel %vm1108_vm3, %v1099_v27, %v1101_v59  ;;  %v1139_v32 = vsel %vm1108_vm3, %v1095_v12, %v1097_v4  ;;  %v1140_v49 = vsel %vm1108_vm3, %v1097_v4, %v1099_v27  ;;  %v1134_v12 = vsel %vm1108_vm3, %v1083_v47, %v1085_v36 }
 0x1b9   :  { %1212 = vmatpush.bf16.msrb.mxu0 %v1141_v41  ;;  %1186 = vmatpush.bf16.msra.mxu2 %v1139_v32  ;;  %v1127_v4 = vsel %vm1108_vm3, %v1067_v60, %v4245_v63  ;;  %v1128_v47 = vsel %vm1108_vm3, %v4245_v63, %v4209_v55  ;;  %v1122_v63 = vsel %vm1108_vm3, %v4225_v52, %v4223_v1 }
 0x1ba   :  { %1199 = vmatpush.bf16.msra.mxu3 %v1140_v49  ;;  %v1136_v60 = vsel %vm1108_vm3, %v1087_v29, %v4243_v40  ;;  %v1130_v29 = vsel %vm1108_vm3, %v4255_v54, %v4253_v6 }
 0x1bc   :  { %1352 = vrot.lane.b32.xlu2 %v3423_v39, %s2985_s0 }
 0x1bd   :  { %1213 = vmatpush.bf16.msrb.mxu0 %v1135_v14  ;;  %1350 = vrot.lane.b32.xlu1 %v5667_v19, %s2985_s0  ;;  %v1129_v14 = vsel %vm1108_vm3, %v4209_v55, %v4255_v54  ;;  %v1121_v55 = vsel %vm1108_vm3, %v4135_v46, %v4225_v52  ;;  %v1117_v46 = vsel %vm1108_vm3, %v4195_v10, %v4190_v53 }
 0x1be   :  { %1348 = vrot.lane.b32.xlu0 %v5668_v18, %s2985_s0  ;;  %1187 = vmatpush.bf16.msra.mxu2 %v1133_v51  ;;  %v4314_v32 = vpop.permute.xlu2 %1286  ;;  %v1123_v51 = vsel %vm1108_vm3, %v4223_v1, %v4164_v5  ;;  %v1115_v1 = vsel %vm1108_vm3, %v4166_v22, %v4069_v45  ;;  %v1116_v52 = vsel %vm1108_vm3, %v4069_v45, %v4195_v10 }
 0x1bf   :  { %1200 = vmatpush.bf16.msra.mxu3 %v1134_v12  ;;  %v1105_v49 = vpop.permute.xlu1 %1104  ;;  %v1103_v27 = vpop.permute.xlu0 %1102  ;;  %v5693_v12 = vld [vmem:[#allocation46_spill] sm:$0xff]  ;;  %v1109_v45 = vsel %vm1108_vm3, %v4102_v56, %v4100_v31  ;;  %v1124_v10 = vsel %vm1108_vm3, %v4164_v5, %v4235_v0  ;;  %v1137_v5 = vsel %vm1108_vm3, %v4243_v40, %v4292_v9  ;;  %v1131_v40 = vsel %vm1108_vm3, %v4253_v6, %v4221_v44 }
 0x1c0   :  { %v1142_v41 = vsel %vm1108_vm3, %v1101_v59, %v1103_v27  ;;  %v1110_v22 = vsel %vm1108_vm3, %v4100_v31, %v5693_v12  ;;  %v1143_v54 = vsel %vm1108_vm3, %v1103_v27, %v1105_v49  ;;  %v1144_v56 = vsel %vm1108_vm3, %v1105_v49, %v4278_v62 }
 0x1c1   :  { %1214 = vmatpush.bf16.msrb.mxu0 %v1129_v14  ;;  %1225 = vmatpush.bf16.msrb.mxu1 %v1142_v41  ;;  %v1111_v14 = vsel %vm1108_vm3, %v5693_v12, %v4141_v50  ;;  %v1118_v31 = vsel %vm1108_vm3, %v4190_v53, %v4098_v61  ;;  %v1138_v27 = vsel %vm1108_vm3, %v4292_v9, %v4290_v30  ;;  %v5699_v12 = vld [vmem:[#allocation22_spill] sm:$0xff] }
 0x1c2   :  { %1188 = vmatpush.bf16.msra.mxu2 %v1127_v4  ;;  %v1112_v53 = vsel %vm1108_vm3, %v4141_v50, %v4137_v23  ;;  %v1132_v9 = vsel %vm1108_vm3, %v4221_v44, %v4270_v28  ;;  %v1125_v50 = vsel %vm1108_vm3, %v4235_v0, %v4233_v11  ;;  %v1126_v6 = vsel %vm1108_vm3, %v4233_v11, %v4188_v48 }
 0x1c3   :  { %1201 = vmatpush.bf16.msra.mxu3 %v1128_v47  ;;  %v1119_v44 = vsel %vm1108_vm3, %v4098_v61, %v4213_v57  ;;  %v1120_v48 = vsel %vm1108_vm3, %v4213_v57, %v4211_v13 }
 0x1c4   :  { %1520 = vrot.lane.b32.xlu2 %v3031_v7, %s2986_s18 }
 0x1c5   :  { %1215 = vmatpush.bf16.msrb.mxu0 %v1123_v51  ;;  %1518 = vrot.lane.b32.xlu1 %v3063_v17, %s2986_s18  ;;  %v5694_v51 = vld [vmem:[#allocation47_spill] sm:$0xff] }
 0x1c6   :  { %1516 = vrot.lane.b32.xlu0 %v3033_v8, %s2986_s18  ;;  %1189 = vmatpush.bf16.msra.mxu2 %v1121_v55  ;;  %v4342_v38 = vpop.permute.xlu2 %1292  ;;  %v1113_v55 = vsel %vm1108_vm3, %v4137_v23, %v5694_v51  ;;  %v1114_v61 = vsel %vm1108_vm3, %v5694_v51, %v4171_v2  ;;  %v5695_v2 = vld [vmem:[#allocation18_spill] sm:$0xff]  ;;  %v5706_v51 = vld [vmem:[#allocation29_spill] sm:$0xff] }
 0x1c7   :  { %1202 = vmatpush.bf16.msra.mxu3 %v1122_v63  ;;  %v4344_v36 = vpop.permute.xlu1 %1272  ;;  %1226 = vmatpush.bf16.msrb.mxu1 %v1136_v60  ;;  %v4346_v59 = vpop.permute.xlu0 %1270  ;;  %v5696_v63 = vld [vmem:[#allocation19_spill] sm:$0xff] }
 0x1c9   :  { %1216 = vmatpush.bf16.msrb.mxu0 %v1117_v46 }
 0x1ca   :  { %1190 = vmatpush.bf16.msra.mxu2 %v1115_v1 }
 0x1cb   :  { %1203 = vmatpush.bf16.msra.mxu3 %v1116_v52  ;;  %1227 = vmatpush.bf16.msrb.mxu1 %v1130_v29  ;;  %v5697_v52 = vld [vmem:[#allocation20_spill] sm:$0xff]  ;;  %v5698_v29 = vld [vmem:[#allocation21_spill] sm:$0xff] }
 0x1cc   :  { %1526 = vrot.lane.b32.xlu2 %v3059_v15, %s2986_s18 }
 0x1cd   :  { %1217 = vmatpush.bf16.msrb.mxu0 %v1111_v14  ;;  %1524 = vrot.lane.b32.xlu1 %v3020_v3, %s2986_s18 }
 0x1ce   :  { %1522 = vrot.lane.b32.xlu0 %v3061_v16, %s2986_s18  ;;  %1191 = vmatpush.bf16.msra.mxu2 %v1109_v45  ;;  %v4379_v41 = vpop.permute.xlu2 %1298 }
 0x1cf   :  { %1204 = vmatpush.bf16.msra.mxu3 %v1110_v22  ;;  %v4381_v4 = vpop.permute.xlu1 %1278  ;;  %1228 = vmatpush.bf16.msrb.mxu1 %v1124_v10  ;;  %v4385_v47 = vpop.permute.xlu0 %1276  ;;  %v5700_v10 = vld [vmem:[#allocation23_spill] sm:$0xff] }
 0x1d2   :  { %1238 = vmatpush.bf16.msrb.mxu2 %v1143_v54  ;;  %v5701_v54 = vld [vmem:[#allocation24_spill] sm:$0xff] }
 0x1d3   :  { %1251 = vmatpush.bf16.msrb.mxu3 %v1144_v56  ;;  %1229 = vmatpush.bf16.msrb.mxu1 %v1118_v31  ;;  %v5702_v56 = vld [vmem:[#allocation25_spill] sm:$0xff] }
 0x1d4   :  { %1532 = vrot.lane.b32.xlu2 %v3089_v24, %s2986_s18 }
 0x1d5   :  { %1530 = vrot.lane.b32.xlu1 %v3091_v25, %s2986_s18 }
 0x1d6   :  { %1239 = vmatpush.bf16.msrb.mxu2 %v1137_v5  ;;  %1528 = vrot.lane.b32.xlu0 %v3093_v26, %s2986_s18  ;;  %v4408_v62 = vpop.permute.xlu2 %1304 }
 0x1d7   :  { %1252 = vmatpush.bf16.msrb.mxu3 %v1138_v27  ;;  %1230 = vmatpush.bf16.msrb.mxu1 %v1112_v53  ;;  %v4413_v30 = vpop.permute.xlu1 %1284  ;;  %v4415_v49 = vpop.permute.xlu0 %1282  ;;  %v5703_v53 = vld [vmem:[#allocation26_spill] sm:$0xff] }
 0x1da   :  { %1240 = vmatpush.bf16.msrb.mxu2 %v1131_v40  ;;  %v5704_v40 = vld [vmem:[#allocation27_spill] sm:$0xff] }
 0x1db   :  { %1253 = vmatpush.bf16.msrb.mxu3 %v1132_v9  ;;  %v5705_v9 = vld [vmem:[#allocation28_spill] sm:$0xff] }
 0x1dc   :  { %1538 = vrot.lane.b32.xlu2 %v3119_v33, %s2986_s18 }
 0x1dd   :  { %1536 = vrot.lane.b32.xlu1 %v3121_v34, %s2986_s18 }
 0x1de   :  { %1241 = vmatpush.bf16.msrb.mxu2 %v1125_v50  ;;  %1534 = vrot.lane.b32.xlu0 %v3123_v35, %s2986_s18  ;;  %v4432_v0 = vpop.permute.xlu2 %1310 }
 0x1df   :  { %1254 = vmatpush.bf16.msrb.mxu3 %v1126_v6  ;;  %v4437_v11 = vpop.permute.xlu1 %1290  ;;  %v4439_v28 = vpop.permute.xlu0 %1288 }
 0x1e2   :  { %1242 = vmatpush.bf16.msrb.mxu2 %v1119_v44 }
 0x1e3   :  { %1255 = vmatpush.bf16.msrb.mxu3 %v1120_v48  ;;  %v2852_v48 = vld [vmem:[%s5506_s1 + $0xc] sm:$0xf] }
 0x1e4   :  { %1544 = vrot.lane.b32.xlu2 %v3149_v42, %s2986_s18  ;;  %2853 = vmatmul.msk.bf16.vlgmr.msra.gmra.mxu2 %vm433_vm1, %v2852_v48 }
 0x1e5   :  { %1542 = vrot.lane.b32.xlu1 %v3151_v43, %s2986_s18  ;;  %2854 = vmatmul.msk.bf16.vlgmr.msra.gmra.mxu3 %vm433_vm1, %v2852_v48 }
 0x1e6   :  { %1243 = vmatpush.bf16.msrb.mxu2 %v1113_v55  ;;  %1540 = vrot.lane.b32.xlu0 %v5643_v20, %s2986_s18  ;;  %v4453_v13 = vpop.permute.xlu2 %1316  ;;  %v5707_v55 = vld [vmem:[#allocation30_spill] sm:$0xff] }
 0x1e7   :  { %1256 = vmatpush.bf16.msrb.mxu3 %v1114_v61  ;;  %v4455_v57 = vpop.permute.xlu1 %1296  ;;  %v4457_v23 = vpop.permute.xlu0 %1294  ;;  %2855 = vmatmul.msk.bf16.vlgmr.msrb.gmra.mxu0 %vm433_vm1, %v2852_v48  ;;  %v5708_v61 = vld [vmem:[#allocation31_spill] sm:$0xff] }
 0x1e8   :  { %2856 = vmatmul.msk.bf16.vlgmr.msrb.gmra.mxu1 %vm433_vm1, %v2852_v48 }
 0x1ec   :  { %1550 = vrot.lane.b32.xlu2 %v5644_v58, %s2986_s18 }
 0x1ed   :  { %1548 = vrot.lane.b32.xlu1 %v5695_v2, %s2986_s18 }
 0x1ee   :  { %1546 = vrot.lane.b32.xlu0 %v5696_v63, %s2986_s18  ;;  %v4465_v60 = vpop.permute.xlu2 %1322  ;;  %v5716_v63 = vld [vmem:[#allocation38_spill] sm:$0xff] }
 0x1ef   :  { %v4467_v46 = vpop.permute.xlu1 %1302  ;;  %v4469_v1 = vpop.permute.xlu0 %1300 }
 0x1f4   :  { %1556 = vrot.lane.b32.xlu2 %v5697_v52, %s2986_s18  ;;  %2857 = vmatmul.msk.bf16.vlgmr.msrb.gmra.mxu2 %vm433_vm1, %v2852_v48 }
 0x1f5   :  { %1554 = vrot.lane.b32.xlu1 %v5698_v29, %s2986_s18  ;;  %2858 = vmatmul.msk.bf16.vlgmr.msrb.gmra.mxu3 %vm433_vm1, %v2852_v48  ;;  %v5713_v29 = vld [vmem:[#allocation36_spill] sm:$0xff] }
 0x1f6   :  { %1552 = vrot.lane.b32.xlu0 %v5699_v12, %s2986_s18  ;;  %v1329_v14 = vpop.permute.xlu2 %1328 }
 0x1f7   :  { %v4477_v45 = vpop.permute.xlu1 %1308  ;;  %v4479_v22 = vpop.permute.xlu0 %1306 }
 0x1fc   :  { %1562 = vrot.lane.b32.xlu2 %v5700_v10, %s2986_s18  ;;  %v5711_v10 = vld [vmem:[#allocation34_spill] sm:$0xff] }
 0x1fd   :  { %1560 = vrot.lane.b32.xlu1 %v5701_v54, %s2986_s18  ;;  %v5710_v54 = vld [vmem:[#allocation33_spill] sm:$0xff] }
 0x1fe   :  { %1558 = vrot.lane.b32.xlu0 %v5702_v56, %s2986_s18  ;;  %v4487_v31 = vpop.permute.xlu2 %1334  ;;  %v5709_v56 = vld [vmem:[#allocation32_spill] sm:$0xff] }
 0x1ff   :  { %v1315_v5 = vpop.permute.xlu1 %1314  ;;  %v1313_v27 = vpop.permute.xlu0 %1312 }
 0x204   :  { %1568 = vrot.lane.b32.xlu2 %v5703_v53, %s2986_s18 }
 0x205   :  { %1566 = vrot.lane.b32.xlu1 %v5704_v40, %s2986_s18 }
 0x206   :  { %1564 = vrot.lane.b32.xlu0 %v5705_v9, %s2986_s18  ;;  %v1341_v50 = vpop.permute.xlu2 %1340 }
 0x207   :  { %v4495_v6 = vpop.permute.xlu1 %1320  ;;  %v4497_v44 = vpop.permute.xlu0 %1318 }
 0x20c   :  { %1574 = vrot.lane.b32.xlu2 %v5706_v51, %s2986_s18 }
 0x20d   :  { %1572 = vrot.lane.b32.xlu1 %v5707_v55, %s2986_s18 }
 0x20e   :  { %1570 = vrot.lane.b32.xlu0 %v5708_v61, %s2986_s18  ;;  %v1347_v9 = vpop.permute.xlu2 %1346  ;;  %v5712_v61 = vld [vmem:[#allocation35_spill] sm:$0xff] }
 0x20f   :  { %v1327_v40 = vpop.permute.xlu1 %1326  ;;  %v4512_v53 = vpop.permute.xlu0 %1324 }
 0x214   :  { %1580 = vrot.lane.b32.xlu2 %v5709_v56, %s2986_s18  ;;  %v5714_v56 = vld [vmem:[#allocation37_spill] sm:$0xff] }
 0x215   :  { %1578 = vrot.lane.b32.xlu1 %v5710_v54, %s2986_s18 }
 0x216   :  { %1576 = vrot.lane.b32.xlu0 %v5711_v10, %s2986_s18  ;;  %v4520_v51 = vpop.permute.xlu2 %1352 }
 0x217   :  { %v1333_v12 = vpop.permute.xlu1 %1332  ;;  %v1331_v55 = vpop.permute.xlu0 %1330 }
 0x21c   :  { %1586 = vrot.lane.b32.xlu2 %v5712_v61, %s2986_s18 }
 0x21d   :  { %1584 = vrot.lane.b32.xlu1 %v5713_v29, %s2986_s18 }
 0x21e   :  { %1582 = vrot.lane.b32.xlu0 %v5714_v56, %s2986_s18  ;;  %v4530_v54 = vpop.permute.xlu2 %1520 }
 0x21f   :  { %5715 = vst [vmem:[#allocation39_spill] sm:$0xff] %v4530_v54  ;;  %v4532_v10 = vpop.permute.xlu1 %1338  ;;  %v4534_v52 = vpop.permute.xlu0 %1336 }
 0x224   :  { %1592 = vrot.lane.b32.xlu2 %v5716_v63, %s2986_s18 }
 0x225   :  { %1590 = vrot.lane.b32.xlu1 %v5690_v37, %s2986_s18 }
 0x226   :  { %1588 = vrot.lane.b32.xlu0 %v5691_v21, %s2986_s18  ;;  %v4542_v48 = vpop.permute.xlu2 %1526 }
 0x227   :  { %5717 = vst [vmem:[#allocation40_spill] sm:$0xff] %v4542_v48  ;;  %v1345_v29 = vpop.permute.xlu1 %1344  ;;  %v1343_v61 = vpop.permute.xlu0 %1342  ;;  %v1379_v48 = vsel %vm1354_vm4, %v1327_v40, %v1329_v14 }
 0x228   :  { %v1385_v54 = vsel %vm1354_vm4, %v1341_v50, %v1343_v61  ;;  %v1386_v56 = vsel %vm1354_vm4, %v1343_v61, %v1345_v29  ;;  %v1387_v2 = vsel %vm1354_vm4, %v1345_v29, %v1347_v9  ;;  %v1380_v50 = vsel %vm1354_vm4, %v1329_v14, %v1331_v55 }
 0x229   :  { %1432 = vmatpush.bf16.msra.mxu0 %v1385_v54  ;;  %1445 = vmatpush.bf16.msra.mxu1 %v1386_v56  ;;  %v1381_v29 = vsel %vm1354_vm4, %v1331_v55, %v1333_v12  ;;  %v1375_v14 = vsel %vm1354_vm4, %v4453_v13, %v4497_v44  ;;  %v1370_v55 = vsel %vm1354_vm4, %v4408_v62, %v4479_v22 }
 0x22a   :  { %1458 = vmatpush.bf16.msra.mxu2 %v1387_v2 }
 0x22c   :  { %1598 = vrot.lane.b32.xlu2 %v3423_v39, %s2986_s18 }
 0x22d   :  { %1596 = vrot.lane.b32.xlu1 %v5667_v19, %s2986_s18  ;;  %1433 = vmatpush.bf16.msra.mxu0 %v1379_v48  ;;  %v1373_v19 = vsel %vm1354_vm4, %v1313_v27, %v1315_v5 }
 0x22e   :  { %1594 = vrot.lane.b32.xlu0 %v5668_v18, %s2986_s18  ;;  %1446 = vmatpush.bf16.msra.mxu1 %v1380_v50  ;;  %v4556_v54 = vpop.permute.xlu2 %1532  ;;  %v1374_v18 = vsel %vm1354_vm4, %v1315_v5, %v4453_v13  ;;  %v1369_v13 = vsel %vm1354_vm4, %v4467_v46, %v4408_v62  ;;  %v1382_v5 = vsel %vm1354_vm4, %v1333_v12, %v4487_v31 }
 0x22f   :  { %1459 = vmatpush.bf16.msra.mxu2 %v1381_v29  ;;  %v1351_v2 = vpop.permute.xlu1 %1350  ;;  %v1376_v12 = vsel %vm1354_vm4, %v4497_v44, %v4495_v6  ;;  %v1383_v62 = vsel %vm1354_vm4, %v4487_v31, %v4534_v52 }
 0x230   :  { %v1349_v56 = vpop.permute.xlu0 %1348  ;;  %v1390_v50 = vsel %vm1354_vm4, %v1351_v2, %v4520_v51 }
 0x231   :  { %v1388_v61 = vsel %vm1354_vm4, %v1347_v9, %v1349_v56  ;;  %1434 = vmatpush.bf16.msra.mxu0 %v1373_v19  ;;  %v1367_v19 = vsel %vm1354_vm4, %v4379_v41, %v4469_v1  ;;  %v1362_v9 = vsel %vm1354_vm4, %v4314_v32, %v4439_v28 }
 0x232   :  { %1471 = vmatpush.bf16.msra.mxu3 %v1388_v61  ;;  %1447 = vmatpush.bf16.msra.mxu1 %v1374_v18  ;;  %v1368_v18 = vsel %vm1354_vm4, %v4469_v1, %v4467_v46  ;;  %v1361_v1 = vsel %vm1354_vm4, %v4413_v30, %v4314_v32  ;;  %v1363_v46 = vsel %vm1354_vm4, %v4439_v28, %v4437_v11  ;;  %v5718_v30 = vld [vmem:[#allocation44_spill] sm:$0xff] }
 0x233   :  { %1460 = vmatpush.bf16.msra.mxu2 %v1375_v14  ;;  %v1355_v32 = vsel %vm1354_vm4, %v4346_v59, %v4344_v36  ;;  %v1356_v28 = vsel %vm1354_vm4, %v4344_v36, %v5718_v30  ;;  %v1357_v44 = vsel %vm1354_vm4, %v5718_v30, %v4385_v47  ;;  %v1389_v59 = vsel %vm1354_vm4, %v1349_v56, %v1351_v2 }
 0x234   :  { %1766 = vrot.lane.b32.xlu2 %v3031_v7, %s2987_s21  ;;  %v1364_v61 = vsel %vm1354_vm4, %v4437_v11, %v4342_v38  ;;  %v1384_v56 = vsel %vm1354_vm4, %v4534_v52, %v4532_v10  ;;  %v1358_v11 = vsel %vm1354_vm4, %v4385_v47, %v4381_v4  ;;  %v1377_v52 = vsel %vm1354_vm4, %v4495_v6, %v4465_v60  ;;  %v5719_v6 = vld [vmem:[#allocation45_spill] sm:$0xff] }
 0x235   :  { %1764 = vrot.lane.b32.xlu1 %v3063_v17, %s2987_s21  ;;  %1435 = vmatpush.bf16.msra.mxu0 %v1367_v19  ;;  %v1378_v10 = vsel %vm1354_vm4, %v4465_v60, %v4512_v53  ;;  %v1371_v47 = vsel %vm1354_vm4, %v4479_v22, %v4477_v45  ;;  %v1372_v14 = vsel %vm1354_vm4, %v4477_v45, %v4432_v0 }
 0x236   :  { %1762 = vrot.lane.b32.xlu0 %v3033_v8, %s2987_s21  ;;  %1448 = vmatpush.bf16.msra.mxu1 %v1368_v18  ;;  %v4582_v27 = vpop.permute.xlu2 %1538  ;;  %v1365_v22 = vsel %vm1354_vm4, %v4342_v38, %v4457_v23  ;;  %v1366_v0 = vsel %vm1354_vm4, %v4457_v23, %v4455_v57  ;;  %v1359_v19 = vsel %vm1354_vm4, %v4381_v4, %v5719_v6  ;;  %v5721_v23 = vld [vmem:[#allocation19_spill] sm:$0xff] }
 0x237   :  { %1461 = vmatpush.bf16.msra.mxu2 %v1369_v13  ;;  %1472 = vmatpush.bf16.msra.mxu3 %v1382_v5  ;;  %v4584_v40 = vpop.permute.xlu1 %1518  ;;  %v1360_v18 = vsel %vm1354_vm4, %v5719_v6, %v4415_v49  ;;  %v5720_v49 = vld [vmem:[#allocation18_spill] sm:$0xff] }
 0x238   :  { %v4586_v41 = vpop.permute.xlu0 %1516  ;;  %v5732_v6 = vld [vmem:[#allocation30_spill] sm:$0xff] }
 0x239   :  { %1436 = vmatpush.bf16.msra.mxu0 %v1361_v1 }
 0x23a   :  { %1449 = vmatpush.bf16.msra.mxu1 %v1362_v9  ;;  %v5722_v9 = vld [vmem:[#allocation20_spill] sm:$0xff] }
 0x23b   :  { %1462 = vmatpush.bf16.msra.mxu2 %v1363_v46  ;;  %1473 = vmatpush.bf16.msra.mxu3 %v1376_v12  ;;  %v5723_v46 = vld [vmem:[#allocation21_spill] sm:$0xff]  ;;  %v5724_v12 = vld [vmem:[#allocation22_spill] sm:$0xff] }
 0x23c   :  { %1772 = vrot.lane.b32.xlu2 %v3059_v15, %s2987_s21 }
 0x23d   :  { %1770 = vrot.lane.b32.xlu1 %v3020_v3, %s2987_s21  ;;  %1437 = vmatpush.bf16.msra.mxu0 %v1355_v32 }
 0x23e   :  { %1768 = vrot.lane.b32.xlu0 %v3061_v16, %s2987_s21  ;;  %1450 = vmatpush.bf16.msra.mxu1 %v1356_v28  ;;  %v4618_v48 = vpop.permute.xlu2 %1544 }
 0x23f   :  { %1463 = vmatpush.bf16.msra.mxu2 %v1357_v44  ;;  %1474 = vmatpush.bf16.msra.mxu3 %v1370_v55  ;;  %v4623_v36 = vpop.permute.xlu1 %1524  ;;  %v5725_v44 = vld [vmem:[#allocation23_spill] sm:$0xff]  ;;  %v5726_v55 = vld [vmem:[#allocation24_spill] sm:$0xff] }
 0x240   :  { %v4625_v29 = vpop.permute.xlu0 %1522 }
 0x241   :  { %1484 = vmatpush.bf16.msrb.mxu0 %v1389_v59  ;;  %v5727_v59 = vld [vmem:[#allocation25_spill] sm:$0xff] }
 0x242   :  { %1497 = vmatpush.bf16.msrb.mxu1 %v1390_v50 }
 0x243   :  { %1475 = vmatpush.bf16.msra.mxu3 %v1364_v61 }
 0x244   :  { %1778 = vrot.lane.b32.xlu2 %v3089_v24, %s2987_s21 }
 0x245   :  { %1485 = vmatpush.bf16.msrb.mxu0 %v1383_v62  ;;  %1776 = vrot.lane.b32.xlu1 %v3091_v25, %s2987_s21 }
 0x246   :  { %1498 = vmatpush.bf16.msrb.mxu1 %v1384_v56  ;;  %1774 = vrot.lane.b32.xlu0 %v3093_v26, %s2987_s21  ;;  %v4645_v31 = vpop.permute.xlu2 %1550  ;;  %v5728_v56 = vld [vmem:[#allocation26_spill] sm:$0xff] }
 0x247   :  { %1476 = vmatpush.bf16.msra.mxu3 %v1358_v11  ;;  %v4653_v51 = vpop.permute.xlu1 %1530  ;;  %v5729_v11 = vld [vmem:[#allocation27_spill] sm:$0xff] }
 0x248   :  { %v4655_v2 = vpop.permute.xlu0 %1528 }
 0x249   :  { %1486 = vmatpush.bf16.msrb.mxu0 %v1377_v52  ;;  %v5730_v52 = vld [vmem:[#allocation28_spill] sm:$0xff] }
 0x24a   :  { %1499 = vmatpush.bf16.msrb.mxu1 %v1378_v10 }
 0x24c   :  { %1784 = vrot.lane.b32.xlu2 %v3119_v33, %s2987_s21 }
 0x24d   :  { %1487 = vmatpush.bf16.msrb.mxu0 %v1371_v47  ;;  %1782 = vrot.lane.b32.xlu1 %v3121_v34, %s2987_s21 }
 0x24e   :  { %1500 = vmatpush.bf16.msrb.mxu1 %v1372_v14  ;;  %1780 = vrot.lane.b32.xlu0 %v3123_v35, %s2987_s21  ;;  %v4669_v60 = vpop.permute.xlu2 %1556  ;;  %v5739_v35 = vld [vmem:[#allocation37_spill] sm:$0xff] }
 0x24f   :  { %v4677_v45 = vpop.permute.xlu1 %1536 }
 0x250   :  { %v4679_v53 = vpop.permute.xlu0 %1534 }
 0x251   :  { %1488 = vmatpush.bf16.msrb.mxu0 %v1365_v22  ;;  %v2859_v22 = vld [vmem:[%s5506_s1 + $0x10] sm:$0xf] }
 0x252   :  { %1501 = vmatpush.bf16.msrb.mxu1 %v1366_v0  ;;  %2860 = vmatmul.msk.bf16.vlgmr.msra.gmra.mxu0 %vm433_vm1, %v2859_v22  ;;  %v5731_v0 = vld [vmem:[#allocation29_spill] sm:$0xff] }
 0x253   :  { %2861 = vmatmul.msk.bf16.vlgmr.msra.gmra.mxu1 %vm433_vm1, %v2859_v22  ;;  %2862 = vmatmul.msk.bf16.vlgmr.msra.gmra.mxu2 %vm433_vm1, %v2859_v22 }
 0x254   :  { %1790 = vrot.lane.b32.xlu2 %v3149_v42, %s2987_s21  ;;  %2863 = vmatmul.msk.bf16.vlgmr.msra.gmra.mxu3 %vm433_vm1, %v2859_v22 }
 0x255   :  { %1489 = vmatpush.bf16.msrb.mxu0 %v1359_v19  ;;  %1788 = vrot.lane.b32.xlu1 %v3151_v43, %s2987_s21  ;;  %v5733_v19 = vld [vmem:[#allocation31_spill] sm:$0xff] }
 0x256   :  { %1502 = vmatpush.bf16.msrb.mxu1 %v1360_v18  ;;  %1786 = vrot.lane.b32.xlu0 %v5643_v20, %s2987_s21  ;;  %v4693_v38 = vpop.permute.xlu2 %1562 }
 0x257   :  { %v4695_v57 = vpop.permute.xlu1 %1542 }
 0x258   :  { %v4697_v4 = vpop.permute.xlu0 %1540 }
 0x25c   :  { %1796 = vrot.lane.b32.xlu2 %v5644_v58, %s2987_s21 }
 0x25d   :  { %1794 = vrot.lane.b32.xlu1 %v5720_v49, %s2987_s21 }
 0x25e   :  { %1792 = vrot.lane.b32.xlu0 %v5721_v23, %s2987_s21  ;;  %v4705_v13 = vpop.permute.xlu2 %1568 }
 0x25f   :  { %v4707_v5 = vpop.permute.xlu1 %1548 }
 0x260   :  { %v4709_v1 = vpop.permute.xlu0 %1546 }
 0x262   :  { %2864 = vmatmul.msk.bf16.vlgmr.msrb.gmra.mxu0 %vm433_vm1, %v2859_v22 }
 0x263   :  { %2865 = vmatmul.msk.bf16.vlgmr.msrb.gmra.mxu1 %vm433_vm1, %v2859_v22 }
 0x264   :  { %1802 = vrot.lane.b32.xlu2 %v5722_v9, %s2987_s21  ;;  %v5734_v9 = vld [vmem:[#allocation32_spill] sm:$0xff] }
 0x265   :  { %1800 = vrot.lane.b32.xlu1 %v5723_v46, %s2987_s21  ;;  %v5735_v46 = vld [vmem:[#allocation33_spill] sm:$0xff] }
 0x266   :  { %1798 = vrot.lane.b32.xlu0 %v5724_v12, %s2987_s21  ;;  %v1575_v32 = vpop.permute.xlu2 %1574  ;;  %v5738_v12 = vld [vmem:[#allocation36_spill] sm:$0xff] }
 0x267   :  { %v4717_v30 = vpop.permute.xlu1 %1554 }
 0x268   :  { %v4719_v28 = vpop.permute.xlu0 %1552 }
 0x26c   :  { %1808 = vrot.lane.b32.xlu2 %v5725_v44, %s2987_s21  ;;  %v5740_v44 = vld [vmem:[#allocation42_spill] sm:$0xff] }
 0x26d   :  { %1806 = vrot.lane.b32.xlu1 %v5726_v55, %s2987_s21 }
 0x26e   :  { %1804 = vrot.lane.b32.xlu0 %v5727_v59, %s2987_s21  ;;  %v4727_v50 = vpop.permute.xlu2 %1580 }
 0x26f   :  { %v1561_v61 = vpop.permute.xlu1 %1560 }
 0x270   :  { %v1559_v62 = vpop.permute.xlu0 %1558 }
 0x274   :  { %1814 = vrot.lane.b32.xlu2 %v5728_v56, %s2987_s21  ;;  %v5736_v56 = vld [vmem:[#allocation34_spill] sm:$0xff] }
 0x275   :  { %1812 = vrot.lane.b32.xlu1 %v5729_v11, %s2987_s21 }
 0x276   :  { %1810 = vrot.lane.b32.xlu0 %v5730_v52, %s2987_s21  ;;  %v1587_v10 = vpop.permute.xlu2 %1586 }
 0x277   :  { %v4735_v47 = vpop.permute.xlu1 %1566 }
 0x278   :  { %v4737_v14 = vpop.permute.xlu0 %1564 }
 0x27c   :  { %1820 = vrot.lane.b32.xlu2 %v5731_v0, %s2987_s21 }
 0x27d   :  { %1818 = vrot.lane.b32.xlu1 %v5732_v6, %s2987_s21 }
 0x27e   :  { %1816 = vrot.lane.b32.xlu0 %v5733_v19, %s2987_s21  ;;  %v1593_v18 = vpop.permute.xlu2 %1592  ;;  %v5737_v19 = vld [vmem:[#allocation35_spill] sm:$0xff] }
 0x27f   :  { %v1573_v20 = vpop.permute.xlu1 %1572 }
 0x280   :  { %v4752_v43 = vpop.permute.xlu0 %1570 }
 0x284   :  { %1826 = vrot.lane.b32.xlu2 %v5734_v9, %s2987_s21  ;;  %v5741_v9 = vld [vmem:[#allocation43_spill] sm:$0xff] }
 0x285   :  { %1824 = vrot.lane.b32.xlu1 %v5735_v46, %s2987_s21  ;;  %v1625_v46 = vsel %vm1600_vm5, %v1573_v20, %v1575_v32  ;;  %v1620_v20 = vsel %vm1600_vm5, %v1561_v61, %v4693_v38 }
 0x286   :  { %1822 = vrot.lane.b32.xlu0 %v5736_v56, %s2987_s21  ;;  %v4760_v34 = vpop.permute.xlu2 %1598 }
 0x287   :  { %v1579_v33 = vpop.permute.xlu1 %1578 }
 0x288   :  { %v1577_v58 = vpop.permute.xlu0 %1576 }
 0x289   :  { %v1626_v59 = vsel %vm1600_vm5, %v1575_v32, %v1577_v58  ;;  %v1615_v32 = vsel %vm1600_vm5, %v4707_v5, %v4645_v31 }
 0x28c   :  { %1832 = vrot.lane.b32.xlu2 %v5737_v19, %s2987_s21 }
 0x28d   :  { %1830 = vrot.lane.b32.xlu1 %v5738_v12, %s2987_s21 }
 0x28e   :  { %1828 = vrot.lane.b32.xlu0 %v5739_v35, %s2987_s21  ;;  %v4770_v52 = vpop.permute.xlu2 %1766 }
 0x28f   :  { %v4772_v11 = vpop.permute.xlu1 %1584 }
 0x290   :  { %v4774_v24 = vpop.permute.xlu0 %1582 }
 0x294   :  { %1838 = vrot.lane.b32.xlu2 %v5716_v63, %s2987_s21 }
 0x295   :  { %1836 = vrot.lane.b32.xlu1 %v5690_v37, %s2987_s21 }
 0x296   :  { %1834 = vrot.lane.b32.xlu0 %v5691_v21, %s2987_s21  ;;  %v4782_v22 = vpop.permute.xlu2 %1772 }
 0x297   :  { %v1591_v12 = vpop.permute.xlu1 %1590 }
 0x298   :  { %v1589_v35 = vpop.permute.xlu0 %1588  ;;  %v1633_v42 = vsel %vm1600_vm5, %v1591_v12, %v1593_v18 }
 0x299   :  { %v1631_v23 = vsel %vm1600_vm5, %v1587_v10, %v1589_v35  ;;  %v1632_v49 = vsel %vm1600_vm5, %v1589_v35, %v1591_v12  ;;  %1704 = vmatpush.bf16.msra.mxu0 %v1633_v42  ;;  %v1627_v10 = vsel %vm1600_vm5, %v1577_v58, %v1579_v33  ;;  %v1619_v12 = vsel %vm1600_vm5, %v1559_v62, %v1561_v61 }
 0x29a   :  { %1678 = vmatpush.bf16.msrb.mxu2 %v1631_v23  ;;  %1691 = vmatpush.bf16.msrb.mxu3 %v1632_v49  ;;  %v1613_v58 = vsel %vm1600_vm5, %v4618_v48, %v4709_v1 }
 0x29c   :  { %1844 = vrot.lane.b32.xlu2 %v3423_v39, %s2987_s21 }
 0x29d   :  { %1842 = vrot.lane.b32.xlu1 %v5740_v44, %s2987_s21  ;;  %1705 = vmatpush.bf16.msra.mxu0 %v1627_v10  ;;  %v1609_v10 = vsel %vm1600_vm5, %v4679_v53, %v4677_v45 }
 0x29e   :  { %1840 = vrot.lane.b32.xlu0 %v5741_v9, %s2987_s21  ;;  %1679 = vmatpush.bf16.msrb.mxu2 %v1625_v46  ;;  %v4796_v35 = vpop.permute.xlu2 %1778  ;;  %v1621_v46 = vsel %vm1600_vm5, %v4693_v38, %v4737_v14  ;;  %v1614_v38 = vsel %vm1600_vm5, %v4709_v1, %v4707_v5  ;;  %v1607_v1 = vsel %vm1600_vm5, %v4653_v51, %v4556_v54  ;;  %v5742_v51 = vld [vmem:[#allocation39_spill] sm:$0xff] }
 0x29f   :  { %1692 = vmatpush.bf16.msrb.mxu3 %v1626_v59  ;;  %v1597_v42 = vpop.permute.xlu1 %1596  ;;  %v1628_v59 = vsel %vm1600_vm5, %v1579_v33, %v4727_v50  ;;  %v1608_v33 = vsel %vm1600_vm5, %v4556_v54, %v4679_v53  ;;  %v1601_v54 = vsel %vm1600_vm5, %v4586_v41, %v4584_v40  ;;  %v1602_v53 = vsel %vm1600_vm5, %v4584_v40, %v5742_v51 }
 0x2a0   :  { %v1595_v49 = vpop.permute.xlu0 %1594  ;;  %v1616_v41 = vsel %vm1600_vm5, %v4645_v31, %v4719_v28 }
 0x2a1   :  { %v1634_v23 = vsel %vm1600_vm5, %v1593_v18, %v1595_v49  ;;  %1706 = vmatpush.bf16.msra.mxu0 %v1621_v46 }
 0x2a2   :  { %1680 = vmatpush.bf16.msrb.mxu2 %v1619_v12  ;;  %1717 = vmatpush.bf16.msra.mxu1 %v1634_v23  ;;  %v1622_v23 = vsel %vm1600_vm5, %v4737_v14, %v4735_v47  ;;  %v1603_v14 = vsel %vm1600_vm5, %v5742_v51, %v4625_v29  ;;  %v1635_v12 = vsel %vm1600_vm5, %v1595_v49, %v1597_v42 }
 0x2a3   :  { %1693 = vmatpush.bf16.msrb.mxu3 %v1620_v20 }
 0x2a4   :  { %2012 = vrot.lane.b32.xlu2 %v3031_v7, %s2988_s25 }
 0x2a5   :  { %2010 = vrot.lane.b32.xlu1 %v3063_v17, %s2988_s25  ;;  %1707 = vmatpush.bf16.msra.mxu0 %v1615_v32  ;;  %v1610_v32 = vsel %vm1600_vm5, %v4677_v45, %v4582_v27  ;;  %v1604_v45 = vsel %vm1600_vm5, %v4625_v29, %v4623_v36 }
 0x2a6   :  { %2008 = vrot.lane.b32.xlu0 %v3033_v8, %s2988_s25  ;;  %1681 = vmatpush.bf16.msrb.mxu2 %v1613_v58  ;;  %v4822_v61 = vpop.permute.xlu2 %1784  ;;  %v1636_v58 = vsel %vm1600_vm5, %v1597_v42, %v4760_v34  ;;  %v1629_v34 = vsel %vm1600_vm5, %v4727_v50, %v4774_v24  ;;  %v1630_v42 = vsel %vm1600_vm5, %v4774_v24, %v4772_v11 }
 0x2a7   :  { %1694 = vmatpush.bf16.msrb.mxu3 %v1614_v38  ;;  %v1765_v48 = vpop.permute.xlu1 %1764  ;;  %1718 = vmatpush.bf16.msra.mxu1 %v1628_v59  ;;  %v1623_v50 = vsel %vm1600_vm5, %v4735_v47, %v4705_v13  ;;  %v1624_v11 = vsel %vm1600_vm5, %v4705_v13, %v4752_v43  ;;  %v1617_v47 = vsel %vm1600_vm5, %v4719_v28, %v4717_v30 }
 0x2a8   :  { %v1763_v62 = vpop.permute.xlu0 %1762  ;;  %v4826_v18 = vsel %vm1846_vm6, %v1765_v48, %v4770_v52  ;;  %v1611_v43 = vsel %vm1600_vm5, %v4582_v27, %v4697_v4  ;;  %v5743_v27 = vld [vmem:[#allocation40_spill] sm:$0xff] }
 0x2a9   :  { %v4832_v5 = vsel %vm1846_vm6, %v1763_v62, %v1765_v48  ;;  %1708 = vmatpush.bf16.msra.mxu0 %v1609_v10  ;;  %v1618_v62 = vsel %vm1600_vm5, %v4717_v30, %v4669_v60  ;;  %v1612_v60 = vsel %vm1600_vm5, %v4697_v4, %v4695_v57  ;;  %v1605_v10 = vsel %vm1600_vm5, %v4623_v36, %v5743_v27 }
 0x2aa   :  { %1682 = vmatpush.bf16.msrb.mxu2 %v1607_v1  ;;  %v1606_v57 = vsel %vm1600_vm5, %v5743_v27, %v4655_v2 }
 0x2ab   :  { %1695 = vmatpush.bf16.msrb.mxu3 %v1608_v33  ;;  %1719 = vmatpush.bf16.msra.mxu1 %v1622_v23 }
 0x2ac   :  { %2018 = vrot.lane.b32.xlu2 %v3059_v15, %s2988_s25  ;;  %v485_v15 = vpop.f32.mrf.mxu3 }
 0x2ad   :  { %2016 = vrot.lane.b32.xlu1 %v3020_v3, %s2988_s25  ;;  %1709 = vmatpush.bf16.msra.mxu0 %v1603_v14 }
 0x2ae   :  { %2014 = vrot.lane.b32.xlu0 %v3061_v16, %s2988_s25  ;;  %1683 = vmatpush.bf16.msrb.mxu2 %v1601_v54  ;;  %v4862_v20 = vpop.permute.xlu2 %1790  ;;  %v5744_v54 = vld [vmem:[#allocation25_spill] sm:$0xff] }
 0x2af   :  { %1696 = vmatpush.bf16.msrb.mxu3 %v1602_v53  ;;  %v1771_v46 = vpop.permute.xlu1 %1770  ;;  %1720 = vmatpush.bf16.msra.mxu1 %v1616_v41  ;;  %v5757_v16 = vld [vmem:[#allocation17_spill] sm:$0xff] }
 0x2b0   :  { %v1769_v40 = vpop.permute.xlu0 %1768  ;;  %v4868_v38 = vsel %vm1846_vm6, %v1771_v46, %v4782_v22 }
 0x2b1   :  { %v4872_v49 = vsel %vm1846_vm6, %v4770_v52, %v1769_v40  ;;  %v4875_v31 = vsel %vm1846_vm6, %v1769_v40, %v1771_v46  ;;  %v5745_v46 = vld [vmem:[#allocation32_spill] sm:$0xff]  ;;  %v5747_v40 = vld [vmem:[#allocation23_spill] sm:$0xff] }
 0x2b2   :  { %1730 = vmatpush.bf16.msra.mxu2 %v1635_v12 }
 0x2b3   :  { %1743 = vmatpush.bf16.msra.mxu3 %v1636_v58  ;;  %1721 = vmatpush.bf16.msra.mxu1 %v1610_v32  ;;  %v5746_v58 = vld [vmem:[#allocation33_spill] sm:$0xff] }
 0x2b4   :  { %2078 = vrot.lane.b32.xlu2 %v5737_v19, %s2988_s25 }
 0x2b5   :  { %2022 = vrot.lane.b32.xlu1 %v3091_v25, %s2988_s25 }
 0x2b6   :  { %1731 = vmatpush.bf16.msra.mxu2 %v1629_v34  ;;  %2020 = vrot.lane.b32.xlu0 %v3093_v26, %s2988_s25  ;;  %v1797_v52 = vpop.permute.xlu2 %1796  ;;  %v5755_v26 = vld [vmem:[#allocation37_spill] sm:$0xff] }
 0x2b7   :  { %1744 = vmatpush.bf16.msra.mxu3 %v1630_v42  ;;  %v1777_v24 = vpop.permute.xlu1 %1776  ;;  %1722 = vmatpush.bf16.msra.mxu1 %v1604_v45 }
 0x2b8   :  { %v1775_v59 = vpop.permute.xlu0 %1774  ;;  %v4903_v48 = vsel %vm1846_vm6, %v1777_v24, %v4796_v35 }
 0x2b9   :  { %v4907_v29 = vsel %vm1846_vm6, %v4782_v22, %v1775_v59  ;;  %v5749_v59 = vld [vmem:[#allocation19_spill] sm:$0xff] }
 0x2ba   :  { %1732 = vmatpush.bf16.msra.mxu2 %v1623_v50 }
 0x2bb   :  { %1745 = vmatpush.bf16.msra.mxu3 %v1624_v11  ;;  %v5748_v11 = vld [vmem:[#allocation18_spill] sm:$0xff] }
 0x2bc   :  { %2064 = vrot.lane.b32.xlu2 %v5732_v6, %s2988_s25 }
 0x2bd   :  { %2082 = vrot.lane.b32.xlu1 %v5690_v37, %s2988_s25 }
 0x2be   :  { %1733 = vmatpush.bf16.msra.mxu2 %v1617_v47  ;;  %2080 = vrot.lane.b32.xlu0 %v5691_v21, %s2988_s25  ;;  %v1803_v13 = vpop.permute.xlu2 %1802  ;;  %v5750_v47 = vld [vmem:[#allocation14_spill] sm:$0xff] }
 0x2bf   :  { %1746 = vmatpush.bf16.msra.mxu3 %v1618_v62  ;;  %v1783_v28 = vpop.permute.xlu1 %1782 }
 0x2c0   :  { %v1781_v30 = vpop.permute.xlu0 %1780  ;;  %v4929_v22 = vsel %vm1846_vm6, %v1783_v28, %v4822_v61 }
 0x2c1   :  { %v4933_v1 = vsel %vm1846_vm6, %v4796_v35, %v1781_v30  ;;  %v4936_v33 = vsel %vm1846_vm6, %v1781_v30, %v1783_v28  ;;  %v5752_v28 = vld [vmem:[#allocation27_spill] sm:$0xff] }
 0x2c2   :  { %1734 = vmatpush.bf16.msra.mxu2 %v1611_v43 }
 0x2c3   :  { %1747 = vmatpush.bf16.msra.mxu3 %v1612_v60  ;;  %v5753_v60 = vld [vmem:[#allocation28_spill] sm:$0xff] }
 0x2c4   :  { %2084 = vrot.lane.b32.xlu2 %v5716_v63, %s2988_s25 }
 0x2c5   :  { %2068 = vrot.lane.b32.xlu1 %v5736_v56, %s2988_s25 }
 0x2c6   :  { %1735 = vmatpush.bf16.msra.mxu2 %v1605_v10  ;;  %2066 = vrot.lane.b32.xlu0 %v5731_v0, %s2988_s25  ;;  %v4950_v4 = vpop.permute.xlu2 %1808 }
 0x2c7   :  { %1748 = vmatpush.bf16.msra.mxu3 %v1606_v57  ;;  %v1789_v35 = vpop.permute.xlu1 %1788  ;;  %v5754_v57 = vld [vmem:[#allocation13_spill] sm:$0xff] }
 0x2c8   :  { %v1787_v23 = vpop.permute.xlu0 %1786 }
 0x2c9   :  { %v4954_v36 = vsel %vm1846_vm6, %v4822_v61, %v1787_v23  ;;  %v4957_v2 = vsel %vm1846_vm6, %v1787_v23, %v1789_v35  ;;  %v446_v35 = vpop.f32.mrf.mxu0  ;;  %v459_v23 = vpop.f32.mrf.mxu1 }
 0x2cc   :  { %2052 = vrot.lane.b32.xlu2 %v5726_v55, %s2988_s25 }
 0x2cd   :  { %2050 = vrot.lane.b32.xlu1 %v5744_v54, %s2988_s25 }
 0x2ce   :  { %2086 = vrot.lane.b32.xlu0 %v5741_v9, %s2988_s25  ;;  %v4965_v51 = vpop.permute.xlu2 %1814 }
 0x2cf   :  { %v1795_v53 = vpop.permute.xlu1 %1794 }
 0x2d0   :  { %v1793_v14 = vpop.permute.xlu0 %1792  ;;  %v4968_v12 = vsel %vm1846_vm6, %v1795_v53, %v1797_v52 }
 0x2d1   :  { %v4972_v61 = vsel %vm1846_vm6, %v4862_v20, %v1793_v14  ;;  %v4975_v41 = vsel %vm1846_vm6, %v1793_v14, %v1795_v53  ;;  %v2866_v20 = vld [vmem:[%s5506_s1 + $0x14] sm:$0xf]  ;;  %v448_v3 = vpop.f32.mrf.mxu0  ;;  %v461_v17 = vpop.f32.mrf.mxu1 }
 0x2d2   :  { %2867 = vmatmul.msk.bf16.vlgmr.msrb.gmra.mxu2 %vm433_vm1, %v2866_v20  ;;  %2868 = vmatmul.msk.bf16.vlgmr.msrb.gmra.mxu3 %vm433_vm1, %v2866_v20 }
 0x2d3   :  { %2869 = vmatmul.msk.bf16.vlgmr.msra.gmra.mxu0 %vm433_vm1, %v2866_v20  ;;  %2870 = vmatmul.msk.bf16.vlgmr.msra.gmra.mxu1 %vm433_vm1, %v2866_v20 }
 0x2d4   :  { %2072 = vrot.lane.b32.xlu2 %v5745_v46, %s2988_s25 }
 0x2d5   :  { %2070 = vrot.lane.b32.xlu1 %v5746_v58, %s2988_s25 }
 0x2d6   :  { %2054 = vrot.lane.b32.xlu0 %v5747_v40, %s2988_s25  ;;  %v4983_v32 = vpop.permute.xlu2 %1820 }
 0x2d7   :  { %v1801_v34 = vpop.permute.xlu1 %1800 }
 0x2d8   :  { %v1799_v42 = vpop.permute.xlu0 %1798  ;;  %v4989_v45 = vsel %vm1846_vm6, %v1801_v34, %v1803_v13  ;;  %v5751_v13 = vld [vmem:[#allocation8_spill] sm:$0xff] }
 0x2d9   :  { %v4994_v50 = vsel %vm1846_vm6, %v1797_v52, %v1799_v42  ;;  %v4997_v24 = vsel %vm1846_vm6, %v1799_v42, %v1801_v34  ;;  %v472_v42 = vpop.f32.mrf.mxu2 }
 0x2dc   :  { %2040 = vrot.lane.b32.xlu2 %v5748_v11, %s2988_s25 }
 0x2dd   :  { %2038 = vrot.lane.b32.xlu1 %v5749_v59, %s2988_s25 }
 0x2de   :  { %2036 = vrot.lane.b32.xlu0 %v5750_v47, %s2988_s25  ;;  %v5007_v62 = vpop.permute.xlu2 %1826 }
 0x2df   :  { %v5009_v52 = vpop.permute.xlu1 %1806 }
 0x2e0   :  { %v5011_v43 = vpop.permute.xlu0 %1804 }
 0x2e1   :  { %v474_v8 = vpop.f32.mrf.mxu2 }
 0x2e2   :  { %2871 = vmatmul.msk.bf16.vlgmr.msra.gmra.mxu2 %vm433_vm1, %v2866_v20  ;;  %2872 = vmatmul.msk.bf16.vlgmr.msra.gmra.mxu3 %vm433_vm1, %v2866_v20  ;;  %v5756_v20 = vld [vmem:[#allocation22_spill] sm:$0xff] }
 0x2e4   :  { %2024 = vrot.lane.b32.xlu2 %v5751_v13, %s2988_s25 }
 0x2e5   :  { %2058 = vrot.lane.b32.xlu1 %v5752_v28, %s2988_s25 }
 0x2e6   :  { %2056 = vrot.lane.b32.xlu0 %v5753_v60, %s2988_s25  ;;  %v1833_v30 = vpop.permute.xlu2 %1832 }
 0x2e7   :  { %v5019_v27 = vpop.permute.xlu1 %1812 }
 0x2e8   :  { %v5021_v10 = vpop.permute.xlu0 %1810 }
 0x2e9   :  { %v707_v25 = vpop.f32.mrf.mxu2 }
 0x2ec   :  { %2090 = vrot.lane.b32.xlu2 %v3423_v39, %s2988_s25  ;;  %v498_v39 = vpop.f32.mrf.mxu0 }
 0x2ed   :  { %2088 = vrot.lane.b32.xlu1 %v5740_v44, %s2988_s25  ;;  %v5758_v44 = vld [vmem:[#allocation11_spill] sm:$0xff] }
 0x2ee   :  { %2026 = vrot.lane.b32.xlu0 %v5754_v57, %s2988_s25  ;;  %v1839_v53 = vpop.permute.xlu2 %1838  ;;  %v487_v57 = vpop.f32.mrf.mxu3 }
 0x2ef   :  { %v1819_v14 = vpop.permute.xlu1 %1818  ;;  %v5055_v57 = vadd.f32 %v707_v25, %v446_v35 }
 0x2f0   :  { %v5031_v34 = vpop.permute.xlu0 %1816 }
 0x2f4   :  { %2074 = vrot.lane.b32.xlu2 %v5755_v26, %s2988_s25  ;;  %v5759_v26 = vld [vmem:[#allocation12_spill] sm:$0xff] }
 0x2f5   :  { %2044 = vrot.lane.b32.xlu1 %v5756_v20, %s2988_s25  ;;  %v5760_v20 = vld [vmem:[#allocation36_spill] sm:$0xff] }
 0x2f6   :  { %2042 = vrot.lane.b32.xlu0 %v5757_v16, %s2988_s25  ;;  %v5039_v7 = vpop.permute.xlu2 %1844  ;;  %v511_v16 = vpop.f32.mrf.mxu1 }
 0x2f7   :  { %v5041_v60 = vpop.permute.xlu1 %1824  ;;  %v720_v8 = vpop.f32.mrf.mxu3 }
 0x2f8   :  { %v1823_v28 = vpop.permute.xlu0 %1822  ;;  %v5057_v13 = vadd.f32 %v720_v8, %v459_v23 }
 0x2fc   :  { %2030 = vrot.lane.b32.xlu2 %v5758_v44, %s2988_s25  ;;  %v500_v44 = vpop.f32.mrf.mxu0 }
 0x2fd   :  { %2028 = vrot.lane.b32.xlu1 %v5759_v26, %s2988_s25  ;;  %v5762_v44 = vld [vmem:[#allocation26_spill] sm:$0xff] }
 0x2fe   :  { %2076 = vrot.lane.b32.xlu0 %v5760_v20, %s2988_s25  ;;  %v5049_v3 = vpop.permute.xlu2 %2012  ;;  %v513_v26 = vpop.f32.mrf.mxu1 }
 0x2ff   :  { %v5051_v17 = vpop.permute.xlu1 %1830  ;;  %v722_v11 = vpop.f32.mrf.mxu3  ;;  %v5761_v26 = vld [vmem:[#allocation31_spill] sm:$0xff] }
 0x300   :  { %v5053_v46 = vpop.permute.xlu0 %1828  ;;  %v1872_v11 = vsel %vm1846_vm6, %v4983_v32, %v1823_v28 }
 0x304   :  { %2328 = vrot.lane.b32.xlu2 %v5690_v37, %s2989_s28  ;;  %v709_v37 = vpop.f32.mrf.mxu2 }
 0x305   :  { %2326 = vrot.lane.b32.xlu1 %v5691_v21, %s2989_s28  ;;  %v1873_v21 = vsel %vm1846_vm6, %v1823_v28, %v5041_v60  ;;  %v1867_v37 = vsel %vm1846_vm6, %v4950_v4, %v5021_v10 }
 0x306   :  { %2324 = vrot.lane.b32.xlu0 %v5737_v19, %s2989_s28  ;;  %v5065_v20 = vpop.permute.xlu2 %2018  ;;  %v1871_v19 = vsel %vm1846_vm6, %v1819_v14, %v4983_v32 }
 0x307   :  { %v1837_v59 = vpop.permute.xlu1 %1836  ;;  %v772_v28 = vpop.f32.mrf.mxu3 }
 0x308   :  { %v1879_v25 = vsel %vm1846_vm6, %v1837_v59, %v1839_v53  ;;  %v1835_v35 = vpop.permute.xlu0 %1834 }
 0x309   :  { %v1877_v23 = vsel %vm1846_vm6, %v1833_v30, %v1835_v35  ;;  %v1878_v8 = vsel %vm1846_vm6, %v1835_v35, %v1837_v59  ;;  %1950 = vmatpush.bf16.msrb.mxu2 %v1879_v25  ;;  %v733_v59 = vpop.f32.mrf.mxu0  ;;  %v746_v30 = vpop.f32.mrf.mxu1 }
 0x30a   :  { %1924 = vmatpush.bf16.msrb.mxu0 %v1877_v23  ;;  %1937 = vmatpush.bf16.msrb.mxu1 %v1878_v8  ;;  %v5084_v35 = vadd.f32 %v733_v59, %v472_v42  ;;  %v5086_v23 = vadd.f32 %v746_v30, %v485_v15  ;;  %v1866_v42 = vsel %vm1846_vm6, %v5009_v52, %v4950_v4 }
 0x30c   :  { %2310 = vrot.lane.b32.xlu2 %v5732_v6, %s2989_s28  ;;  %v759_v32 = vpop.f32.mrf.mxu2 }
 0x30d   :  { %1951 = vmatpush.bf16.msrb.mxu2 %v1873_v21  ;;  %2062 = vrot.lane.b32.xlu1 %v5761_v26, %s2988_s25  ;;  %v1865_v21 = vsel %vm1846_vm6, %v5011_v43, %v5009_v52  ;;  %v5098_v15 = vadd.f32 %v759_v32, %v498_v39 }
 0x30e   :  { %2060 = vrot.lane.b32.xlu0 %v5762_v44, %s2988_s25  ;;  %1925 = vmatpush.bf16.msrb.mxu0 %v1871_v19  ;;  %v5082_v25 = vpop.permute.xlu2 %2078  ;;  %v5100_v19 = vadd.f32 %v772_v28, %v511_v16  ;;  %v1874_v16 = vsel %vm1846_vm6, %v5041_v60, %v5007_v62 }
 0x30f   :  { %1938 = vmatpush.bf16.msrb.mxu1 %v1872_v11  ;;  %v1843_v6 = vpop.permute.xlu1 %1842  ;;  %v774_v11 = vpop.f32.mrf.mxu3 }
 0x310   :  { %v1841_v8 = vpop.permute.xlu0 %1840  ;;  %v1882_v30 = vsel %vm1846_vm6, %v1843_v6, %v5039_v7 }
 0x311   :  { %v1880_v14 = vsel %vm1846_vm6, %v1839_v53, %v1841_v8  ;;  %1952 = vmatpush.bf16.msrb.mxu2 %v1867_v37  ;;  %v5763_v53 = vld [vmem:[#allocation21_spill] sm:$0xff]  ;;  %v735_v4 = vpop.f32.mrf.mxu0  ;;  %v748_v52 = vpop.f32.mrf.mxu1 }
 0x312   :  { %1963 = vmatpush.bf16.msrb.mxu3 %v1880_v14  ;;  %1926 = vmatpush.bf16.msrb.mxu0 %v1865_v21  ;;  %v5765_v14 = vld [vmem:[#allocation15_spill] sm:$0xff] }
 0x313   :  { %1939 = vmatpush.bf16.msrb.mxu1 %v1866_v42 }
 0x314   :  { %2046 = vrot.lane.b32.xlu2 %v5763_v53, %s2988_s25 }
 0x315   :  { %1953 = vmatpush.bf16.msrb.mxu2 %v4968_v12  ;;  %2314 = vrot.lane.b32.xlu1 %v5736_v56, %s2989_s28 }
 0x316   :  { %2312 = vrot.lane.b32.xlu0 %v5731_v0, %s2989_s28  ;;  %1927 = vmatpush.bf16.msrb.mxu0 %v4972_v61  ;;  %v5114_v39 = vpop.permute.xlu2 %2064  ;;  %v761_v0 = vpop.f32.mrf.mxu2 }
 0x317   :  { %1940 = vmatpush.bf16.msrb.mxu1 %v4975_v41  ;;  %v2011_v12 = vpop.permute.xlu1 %2010  ;;  %1964 = vmatpush.bf16.msrb.mxu3 %v1874_v16  ;;  %v1868_v41 = vsel %vm1846_vm6, %v5021_v10, %v5019_v27  ;;  %v1881_v10 = vsel %vm1846_vm6, %v1841_v8, %v1843_v6  ;;  %v1876_v6 = vsel %vm1846_vm6, %v5053_v46, %v5051_v17 }
 0x318   :  { %v2009_v43 = vpop.permute.xlu0 %2008  ;;  %v5118_v56 = vsel %vm2092_vm7, %v2011_v12, %v5049_v3 }
 0x319   :  { %1954 = vmatpush.bf16.msrb.mxu2 %v4936_v33  ;;  %v5122_v61 = vsel %vm2092_vm7, %v2009_v43, %v2011_v12  ;;  %v5764_v33 = vld [vmem:[#allocation20_spill] sm:$0xff]  ;;  %v960_v60 = vpop.f32.mrf.mxu1 }
 0x31a   :  { %1928 = vmatpush.bf16.msrb.mxu0 %v4903_v48  ;;  %v5139_v48 = vld [vmem:[%s5506_s1 + $0x18] sm:$0xf]  ;;  %v1017_v59 = vadd.f32 %v960_v60, %v5057_v13 }
 0x31b   :  { %1941 = vmatpush.bf16.msrb.mxu1 %v4933_v1  ;;  %1965 = vmatpush.bf16.msrb.mxu3 %v1868_v41  ;;  %v947_v1 = vpop.f32.mrf.mxu0  ;;  %v5769_v41 = vld [vmem:[#allocation8_spill] sm:$0xff] }
 0x31c   :  { %2298 = vrot.lane.b32.xlu2 %v5726_v55, %s2989_s28 }
 0x31d   :  { %1955 = vmatpush.bf16.msrb.mxu2 %v4872_v49  ;;  %2296 = vrot.lane.b32.xlu1 %v5744_v54, %s2989_s28  ;;  %v1016_v54 = vadd.f32 %v947_v1, %v5055_v57  ;;  %v5770_v1 = vld [vmem:[#allocation9_spill] sm:$0xff] }
 0x31e   :  { %2048 = vrot.lane.b32.xlu0 %v5764_v33, %s2988_s25  ;;  %1929 = vmatpush.bf16.msrb.mxu0 %v4832_v5  ;;  %v5144_v55 = vpop.permute.xlu2 %2084  ;;  %v986_v5 = vpop.f32.mrf.mxu3 }
 0x31f   :  { %1942 = vmatpush.bf16.msrb.mxu1 %v4826_v18  ;;  %v2017_v49 = vpop.permute.xlu1 %2016  ;;  %1966 = vmatpush.bf16.msrb.mxu3 %v4994_v50  ;;  %v973_v18 = vpop.f32.mrf.mxu2  ;;  %v5172_v57 = vadd.f32 %v986_v5, %v5086_v23 }
 0x320   :  { %v2015_v37 = vpop.permute.xlu0 %2014  ;;  %v5153_v8 = vsel %vm2092_vm7, %v2017_v49, %v5065_v20  ;;  %2876 = vmatmul.msk.bf16.vlgmr.msrb.gmra.mxu2 %vm433_vm1, %v5139_v48  ;;  %v5169_v50 = vadd.f32 %v973_v18, %v5084_v35  ;;  %v5766_v35 = vld [vmem:[#allocation16_spill] sm:$0xff] }
 0x321   :  { %v5159_v13 = vsel %vm2092_vm7, %v5049_v3, %v2015_v37  ;;  %v5162_v7 = vsel %vm2092_vm7, %v2015_v37, %v2017_v49  ;;  %2874 = vmatmul.msk.bf16.vlgmr.msrb.gmra.mxu0 %vm433_vm1, %v5139_v48  ;;  %v1875_v3 = vsel %vm1846_vm6, %v5007_v62, %v5053_v46  ;;  %v962_v32 = vpop.f32.mrf.mxu1  ;;  %v1870_v46 = vsel %vm1846_vm6, %v4965_v51, %v5031_v34 }
 0x322   :  { %1976 = vmatpush.bf16.msra.mxu0 %v1881_v10  ;;  %2875 = vmatmul.msk.bf16.vlgmr.msrb.gmra.mxu1 %vm433_vm1, %v5139_v48  ;;  %v5773_v32 = vld [vmem:[#allocation42_spill] sm:$0xff] }
 0x323   :  { %1989 = vmatpush.bf16.msra.mxu1 %v1882_v30  ;;  %1967 = vmatpush.bf16.msrb.mxu3 %v4929_v22  ;;  %v949_v23 = vpop.f32.mrf.mxu0  ;;  %v1869_v22 = vsel %vm1846_vm6, %v5019_v27, %v4965_v51 }
 0x324   :  { %2034 = vrot.lane.b32.xlu2 %v5765_v14, %s2988_s25 }
 0x325   :  { %2032 = vrot.lane.b32.xlu1 %v5766_v35, %s2988_s25 }
 0x326   :  { %1977 = vmatpush.bf16.msra.mxu0 %v1875_v3  ;;  %2300 = vrot.lane.b32.xlu0 %v5747_v40, %s2989_s28  ;;  %v5190_v62 = vpop.permute.xlu2 %2052  ;;  %v988_v21 = vpop.f32.mrf.mxu3 }
 0x327   :  { %1990 = vmatpush.bf16.msra.mxu1 %v1876_v6  ;;  %1968 = vmatpush.bf16.msrb.mxu3 %v4875_v31  ;;  %v5196_v17 = vpop.permute.xlu1 %2022  ;;  %v975_v40 = vpop.f32.mrf.mxu2 }
 0x328   :  { %v2021_v28 = vpop.permute.xlu0 %2020 }
 0x329   :  { %v5200_v42 = vsel %vm2092_vm7, %v5065_v20, %v2021_v28  ;;  %v1012_v51 = vpop.f32.mrf.mxu1 }
 0x32a   :  { %1978 = vmatpush.bf16.msra.mxu0 %v1869_v22  ;;  %2877 = vmatmul.msk.bf16.vlgmr.msrb.gmra.mxu3 %vm433_vm1, %v5139_v48  ;;  %v1021_v20 = vadd.f32 %v1012_v51, %v5100_v19 }
 0x32b   :  { %1991 = vmatpush.bf16.msra.mxu1 %v1870_v46  ;;  %v999_v31 = vpop.f32.mrf.mxu0 }
 0x32c   :  { %2282 = vrot.lane.b32.xlu2 %v5750_v47, %s2989_s28  ;;  %v1020_v34 = vadd.f32 %v999_v31, %v5098_v15 }
 0x32d   :  { %2332 = vrot.lane.b32.xlu1 %v5741_v9, %s2989_s28 }
 0x32e   :  { %1979 = vmatpush.bf16.msra.mxu0 %v4997_v24  ;;  %2330 = vrot.lane.b32.xlu0 %v5716_v63, %s2989_s28  ;;  %v5212_v27 = vpop.permute.xlu2 %2072  ;;  %v1206_v4 = vpop.f32.mrf.mxu3 }
 0x32f   :  { %1992 = vmatpush.bf16.msra.mxu1 %v4989_v45  ;;  %v2083_v45 = vpop.permute.xlu1 %2082  ;;  %v1193_v63 = vpop.f32.mrf.mxu2  ;;  %v5223_v15 = vadd.f32 %v1206_v4, %v1017_v59 }
 0x330   :  { %v2081_v24 = vpop.permute.xlu0 %2080  ;;  %v5221_v52 = vadd.f32 %v1193_v63, %v1016_v54 }
 0x331   :  { %v2123_v9 = vsel %vm2092_vm7, %v5082_v25, %v2081_v24  ;;  %v2124_v47 = vsel %vm2092_vm7, %v2081_v24, %v2083_v45  ;;  %v5768_v25 = vld [vmem:[#allocation19_spill] sm:$0xff]  ;;  %v1014_v16 = vpop.f32.mrf.mxu1 }
 0x332   :  { %1980 = vmatpush.bf16.msra.mxu0 %v4954_v36  ;;  %2170 = vmatpush.bf16.msra.mxu2 %v2123_v9  ;;  %v2125_v36 = vsel %vm2092_vm7, %v2083_v45, %v5144_v55  ;;  %v5775_v45 = vld [vmem:[#allocation4_spill] sm:$0xff]  ;;  %v5776_v24 = vld [vmem:[#allocation27_spill] sm:$0xff] }
 0x333   :  { %1993 = vmatpush.bf16.msra.mxu1 %v4957_v2  ;;  %2183 = vmatpush.bf16.msra.mxu3 %v2124_v47  ;;  %v5767_v2 = vld [vmem:[#allocation18_spill] sm:$0xff]  ;;  %v1001_v19 = vpop.f32.mrf.mxu0  ;;  %v5777_v9 = vld [vmem:[#allocation28_spill] sm:$0xff] }
 0x334   :  { %2316 = vrot.lane.b32.xlu2 %v5746_v58, %s2989_s28 }
 0x335   :  { %2286 = vrot.lane.b32.xlu1 %v5767_v2, %s2989_s28 }
 0x336   :  { %1981 = vmatpush.bf16.msra.mxu0 %v4868_v38  ;;  %2284 = vrot.lane.b32.xlu0 %v5768_v25, %s2989_s28  ;;  %v5237_v38 = vpop.permute.xlu2 %2040  ;;  %v1208_v11 = vpop.f32.mrf.mxu3 }
 0x337   :  { %1994 = vmatpush.bf16.msra.mxu1 %v4907_v29  ;;  %v2069_v29 = vpop.permute.xlu1 %2068  ;;  %v1195_v0 = vpop.f32.mrf.mxu2  ;;  %v5780_v11 = vld [vmem:[#allocation7_spill] sm:$0xff] }
 0x338   :  { %v2067_v12 = vpop.permute.xlu0 %2066  ;;  %v5778_v0 = vld [vmem:[#allocation37_spill] sm:$0xff] }
 0x339   :  { %2878 = vmatmul.msk.bf16.vlgmr.msra.gmra.mxu0 %vm433_vm1, %v5139_v48  ;;  %v2117_v58 = vsel %vm2092_vm7, %v5114_v39, %v2067_v12  ;;  %v2118_v43 = vsel %vm2092_vm7, %v2067_v12, %v2069_v29  ;;  %v1232_v37 = vpop.f32.mrf.mxu1 }
 0x33a   :  { %2879 = vmatmul.msk.bf16.vlgmr.msra.gmra.mxu1 %vm433_vm1, %v5139_v48  ;;  %2196 = vmatpush.bf16.msrb.mxu0 %v2125_v36  ;;  %v5771_v48 = vld [vmem:[#allocation32_spill] sm:$0xff]  ;;  %v1265_v5 = vadd.f32 %v1232_v37, %v5172_v57 }
 0x33b   :  { %2171 = vmatpush.bf16.msra.mxu2 %v2117_v58  ;;  %2184 = vmatpush.bf16.msra.mxu3 %v2118_v43  ;;  %v1219_v10 = vpop.f32.mrf.mxu0 }
 0x33c   :  { %2270 = vrot.lane.b32.xlu2 %v5769_v41, %s2989_s28  ;;  %v1264_v54 = vadd.f32 %v1219_v10, %v5169_v50  ;;  %v5772_v50 = vld [vmem:[#allocation41_spill] sm:$0xff] }
 0x33d   :  { %2268 = vrot.lane.b32.xlu1 %v5770_v1, %s2989_s28 }
 0x33e   :  { %2318 = vrot.lane.b32.xlu0 %v5771_v48, %s2989_s28  ;;  %v5250_v60 = vpop.permute.xlu2 %2024  ;;  %v1258_v6 = vpop.f32.mrf.mxu3 }
 0x33f   :  { %v2051_v49 = vpop.permute.xlu1 %2050  ;;  %v1245_v18 = vpop.f32.mrf.mxu2  ;;  %v5263_v23 = vadd.f32 %v1258_v6, %v1021_v20  ;;  %v2099_v41 = vsel %vm2092_vm7, %v5196_v17, %v5250_v60  ;;  %v5315_v17 = vld [vmem:[%s5506_s1 + $0x1c] sm:$0xf]  ;;  %v5783_v6 = vld [vmem:[#allocation36_spill] sm:$0xff] }
 0x340   :  { %v5252_v39 = vpop.permute.xlu0 %2086  ;;  %v2111_v30 = vsel %vm2092_vm7, %v2051_v49, %v5190_v62  ;;  %v5261_v3 = vadd.f32 %v1245_v18, %v1020_v34  ;;  %v5781_v18 = vld [vmem:[#allocation22_spill] sm:$0xff] }
 0x341   :  { %v2126_v59 = vsel %vm2092_vm7, %v5144_v55, %v5252_v39  ;;  %2172 = vmatpush.bf16.msra.mxu2 %v2111_v30  ;;  %v5774_v55 = vld [vmem:[#allocation13_spill] sm:$0xff]  ;;  %v1234_v51 = vpop.f32.mrf.mxu1 }
 0x342   :  { %2209 = vmatpush.bf16.msrb.mxu1 %v2126_v59 }
 0x343   :  { %v1221_v46 = vpop.f32.mrf.mxu0 }
 0x344   :  { %2336 = vrot.lane.b32.xlu2 %v5772_v50, %s2989_s28 }
 0x345   :  { %2334 = vrot.lane.b32.xlu1 %v5773_v32, %s2989_s28 }
 0x346   :  { %2272 = vrot.lane.b32.xlu0 %v5774_v55, %s2989_s28  ;;  %v5271_v22 = vpop.permute.xlu2 %2090  ;;  %v1260_v20 = vpop.f32.mrf.mxu3 }
 0x347   :  { %v2071_v28 = vpop.permute.xlu1 %2070  ;;  %v1247_v34 = vpop.f32.mrf.mxu2 }
 0x348   :  { %v2055_v40 = vpop.permute.xlu0 %2054  ;;  %v2119_v21 = vsel %vm2092_vm7, %v2069_v29, %v2071_v28  ;;  %v2120_v31 = vsel %vm2092_vm7, %v2071_v28, %v5212_v27 }
 0x349   :  { %v2112_v57 = vsel %vm2092_vm7, %v5190_v62, %v2055_v40  ;;  %2197 = vmatpush.bf16.msrb.mxu0 %v2119_v21  ;;  %2210 = vmatpush.bf16.msrb.mxu1 %v2120_v31  ;;  %v1452_v19 = vpop.f32.mrf.mxu1 }
 0x34a   :  { %2185 = vmatpush.bf16.msra.mxu3 %v2112_v57  ;;  %v1509_v29 = vadd.f32 %v1452_v19, %v5223_v15 }
 0x34b   :  { %v1439_v47 = vpop.f32.mrf.mxu0 }
 0x34c   :  { %2254 = vrot.lane.b32.xlu2 %v5775_v45, %s2989_s28  ;;  %v1508_v36 = vadd.f32 %v1439_v47, %v5221_v52  ;;  %v5779_v52 = vld [vmem:[#allocation3_spill] sm:$0xff]  ;;  %v5784_v45 = vld [vmem:[#allocation12_spill] sm:$0xff] }
 0x34d   :  { %2304 = vrot.lane.b32.xlu1 %v5776_v24, %s2989_s28  ;;  %v5785_v47 = vld [vmem:[#allocation11_spill] sm:$0xff] }
 0x34e   :  { %2302 = vrot.lane.b32.xlu0 %v5777_v9, %s2989_s28  ;;  %v5284_v62 = vpop.permute.xlu2 %2074  ;;  %v1478_v58 = vpop.f32.mrf.mxu3 }
 0x34f   :  { %v2039_v63 = vpop.permute.xlu1 %2038  ;;  %v1465_v16 = vpop.f32.mrf.mxu2  ;;  %v5293_v43 = vadd.f32 %v1478_v58, %v1265_v5  ;;  %v5782_v5 = vld [vmem:[#allocation17_spill] sm:$0xff] }
 0x350   :  { %v2037_v4 = vpop.permute.xlu0 %2036  ;;  %v2106_v25 = vsel %vm2092_vm7, %v2039_v63, %v5237_v38  ;;  %v5291_v12 = vadd.f32 %v1465_v16, %v1264_v54 }
 0x351   :  { %v2105_v2 = vsel %vm2092_vm7, %v2037_v4, %v2039_v63  ;;  %2186 = vmatpush.bf16.msra.mxu3 %v2106_v25  ;;  %v1454_v59 = vpop.f32.mrf.mxu1 }
 0x352   :  { %2173 = vmatpush.bf16.msra.mxu2 %v2105_v2  ;;  %v5789_v59 = vld [vmem:[#allocation5_spill] sm:$0xff] }
 0x353   :  { %v1441_v1 = vpop.f32.mrf.mxu0 }
 0x354   :  { %2320 = vrot.lane.b32.xlu2 %v5778_v0, %s2989_s28 }
 0x355   :  { %2258 = vrot.lane.b32.xlu1 %v5779_v52, %s2989_s28  ;;  %v5786_v52 = vld [vmem:[#allocation2_spill] sm:$0xff] }
 0x356   :  { %2256 = vrot.lane.b32.xlu0 %v5780_v11, %s2989_s28  ;;  %2174 = vmatpush.bf16.msra.mxu2 %v2099_v41  ;;  %v5304_v15 = vpop.permute.xlu2 %2030  ;;  %v1480_v37 = vpop.f32.mrf.mxu3 }
 0x357   :  { %v5306_v48 = vpop.permute.xlu1 %2058  ;;  %v1467_v30 = vpop.f32.mrf.mxu2 }
 0x358   :  { %v2057_v10 = vpop.permute.xlu0 %2056 }
 0x359   :  { %v2113_v49 = vsel %vm2092_vm7, %v2055_v40, %v2057_v10  ;;  %v2114_v54 = vsel %vm2092_vm7, %v2057_v10, %v5306_v48  ;;  %v1504_v57 = vpop.f32.mrf.mxu1 }
 0x35a   :  { %2198 = vmatpush.bf16.msrb.mxu0 %v2113_v49  ;;  %2211 = vmatpush.bf16.msrb.mxu1 %v2114_v54  ;;  %v1513_v31 = vadd.f32 %v1504_v57, %v5263_v23 }
 0x35b   :  { %2175 = vmatpush.bf16.msra.mxu2 %v5122_v61  ;;  %v1491_v61 = vpop.f32.mrf.mxu0 }
 0x35c   :  { %2290 = vrot.lane.b32.xlu2 %v5781_v18, %s2989_s28  ;;  %v1512_v46 = vadd.f32 %v1491_v61, %v5261_v3 }
 0x35d   :  { %2288 = vrot.lane.b32.xlu1 %v5782_v5, %s2989_s28 }
 0x35e   :  { %2881 = vmatmul.msk.bf16.vlgmr.msra.gmra.mxu2 %vm433_vm1, %v5315_v17  ;;  %2322 = vrot.lane.b32.xlu0 %v5783_v6, %s2989_s28  ;;  %v5325_v50 = vpop.permute.xlu2 %2328  ;;  %v1698_v34 = vpop.f32.mrf.mxu3 }
 0x35f   :  { %v2089_v32 = vpop.permute.xlu1 %2088  ;;  %v1685_v21 = vpop.f32.mrf.mxu2  ;;  %v5335_v20 = vadd.f32 %v1698_v34, %v1509_v29 }
 0x360   :  { %v2027_v55 = vpop.permute.xlu0 %2026  ;;  %v2127_v28 = vsel %vm2092_vm7, %v5252_v39, %v2089_v32  ;;  %v5333_v51 = vadd.f32 %v1685_v21, %v1508_v36  ;;  %v2128_v3 = vsel %vm2092_vm7, %v2089_v32, %v5271_v22 }
 0x361   :  { %v2100_v40 = vsel %vm2092_vm7, %v5250_v60, %v2027_v55  ;;  %2222 = vmatpush.bf16.msrb.mxu2 %v2127_v28  ;;  %v2121_v60 = vsel %vm2092_vm7, %v5212_v27, %v5284_v62  ;;  %v1506_v9 = vpop.f32.mrf.mxu1 }
 0x362   :  { %2187 = vmatpush.bf16.msra.mxu3 %v2100_v40 }
 0x363   :  { %v1493_v23 = vpop.f32.mrf.mxu0 }
 0x364   :  { %2274 = vrot.lane.b32.xlu2 %v5784_v45, %s2989_s28 }
 0x365   :  { %2308 = vrot.lane.b32.xlu1 %v5761_v26, %s2989_s28  ;;  %2223 = vmatpush.bf16.msrb.mxu2 %v2121_v60 }
 0x366   :  { %2188 = vmatpush.bf16.msra.mxu3 %v5118_v56  ;;  %2306 = vrot.lane.b32.xlu0 %v5762_v44, %s2989_s28  ;;  %v5349_v39 = vpop.permute.xlu2 %2310  ;;  %v1700_v44 = vpop.f32.mrf.mxu3 }
 0x367   :  { %v2045_v22 = vpop.permute.xlu1 %2044  ;;  %v1687_v27 = vpop.f32.mrf.mxu2 }
 0x368   :  { %v2043_v24 = vpop.permute.xlu0 %2042 }
 0x369   :  { %2882 = vmatmul.msk.bf16.vlgmr.msra.gmra.mxu3 %vm433_vm1, %v5315_v17  ;;  %v2107_v26 = vsel %vm2092_vm7, %v5237_v38, %v2043_v24  ;;  %v2108_v56 = vsel %vm2092_vm7, %v2043_v24, %v2045_v22  ;;  %v1724_v16 = vpop.f32.mrf.mxu1 }
 0x36a   :  { %2235 = vmatpush.bf16.msrb.mxu3 %v2128_v3  ;;  %2199 = vmatpush.bf16.msrb.mxu0 %v2107_v26 }
 0x36b   :  { %2212 = vmatpush.bf16.msrb.mxu1 %v2108_v56  ;;  %v1711_v4 = vpop.f32.mrf.mxu0 }
 0x36c   :  { %2294 = vrot.lane.b32.xlu2 %v5764_v33, %s2989_s28  ;;  %v5363_v2 = vadd.f32 %v1711_v4, %v5291_v12 }
 0x36d   :  { %2292 = vrot.lane.b32.xlu1 %v5763_v53, %s2989_s28  ;;  %v5371_v53 = vadd.f32 %v1724_v16, %v5293_v43 }
 0x36e   :  { %2276 = vrot.lane.b32.xlu0 %v5785_v47, %s2989_s28  ;;  %v2047_v63 = vpop.permute.xlu2 %2046  ;;  %v1750_v58 = vpop.f32.mrf.mxu3 }
 0x36f   :  { %v2029_v36 = vpop.permute.xlu1 %2028  ;;  %v1737_v29 = vpop.f32.mrf.mxu2  ;;  %v5375_v12 = vadd.f32 %v1750_v58, %v1513_v31  ;;  %v2109_v61 = vsel %vm2092_vm7, %v2045_v22, %v2047_v63 }
 0x370   :  { %v2077_v38 = vpop.permute.xlu0 %2076  ;;  %v2101_v25 = vsel %vm2092_vm7, %v2027_v55, %v2029_v36  ;;  %v2102_v19 = vsel %vm2092_vm7, %v2029_v36, %v5304_v15  ;;  %v5373_v0 = vadd.f32 %v1737_v29, %v1512_v46 }
 0x371   :  { %v2122_v33 = vsel %vm2092_vm7, %v5284_v62, %v2077_v38  ;;  %2200 = vmatpush.bf16.msrb.mxu0 %v2101_v25  ;;  %2213 = vmatpush.bf16.msrb.mxu1 %v2102_v19  ;;  %v5787_v62 = vld [vmem:[#allocation6_spill] sm:$0xff]  ;;  %v1726_v49 = vpop.f32.mrf.mxu1 }
 0x372   :  { %2236 = vmatpush.bf16.msrb.mxu3 %v2122_v33  ;;  %v2990_v49 = vmov 0  }
 0x373   :  { %v1713_v11 = vpop.f32.mrf.mxu0  ;;  %2981 = vset.pattern.permute.xlu0 %v2990_v49 }
 0x374   :  { %2278 = vrot.lane.b32.xlu2 %v5766_v35, %s2989_s28 }
 0x375   :  { %2262 = vrot.lane.b32.xlu1 %v5786_v52, %s2989_s28  ;;  %2201 = vmatpush.bf16.msrb.mxu0 %v5159_v13 }
 0x376   :  { %2260 = vrot.lane.b32.xlu0 %v5787_v62, %s2989_s28  ;;  %2214 = vmatpush.bf16.msrb.mxu1 %v5162_v7  ;;  %v2299_v43 = vpop.permute.xlu2 %2298  ;;  %v1752_v54 = vpop.f32.mrf.mxu3  ;;  %v5788_v7 = vld [vmem:[#allocation10_spill] sm:$0xff] }
 0x377   :  { %v2327_v41 = vpop.permute.xlu1 %2326  ;;  %v1739_v13 = vpop.f32.mrf.mxu2 }
 0x378   :  { %v2325_v1 = vpop.permute.xlu0 %2324  ;;  %v2370_v10 = vsel %vm2338_vm8, %v2327_v41, %v5325_v50  ;;  %2883 = vmatmul.msk.bf16.vlgmr.msrb.gmra.mxu0 %vm433_vm1, %v5315_v17 }
 0x379   :  { %v2369_v35 = vsel %vm2338_vm8, %v2325_v1, %v2327_v41  ;;  %2884 = vmatmul.msk.bf16.vlgmr.msrb.gmra.mxu1 %vm433_vm1, %v5315_v17 }
 0x37a   :  { %2416 = vmatpush.bf16.msra.mxu0 %v2369_v35  ;;  %2429 = vmatpush.bf16.msra.mxu1 %v2370_v10  ;;  %v2498_v10 = vld [vmem:[%s5507_s2] sm:$0xff] }
 0x37c   :  { %2266 = vrot.lane.b32.xlu2 %v5788_v7, %s2989_s28 }
 0x37d   :  { %2264 = vrot.lane.b32.xlu1 %v5789_v59, %s2989_s28 }
 0x37e   :  { %2280 = vrot.lane.b32.xlu0 %v5765_v14, %s2989_s28  ;;  %v2035_v30 = vpop.permute.xlu2 %2034 }
 0x37f   :  { %v2063_v37 = vpop.permute.xlu1 %2062 }
 0x380   :  { %v2061_v18 = vpop.permute.xlu0 %2060 }
 0x381   :  { %v2115_v5 = vsel %vm2092_vm7, %v5306_v48, %v2061_v18  ;;  %v2116_v6 = vsel %vm2092_vm7, %v2061_v18, %v2063_v37 }
 0x382   :  { %2224 = vmatpush.bf16.msrb.mxu2 %v2115_v5  ;;  %2237 = vmatpush.bf16.msrb.mxu3 %v2116_v6 }
 0x386   :  { %2225 = vmatpush.bf16.msrb.mxu2 %v2109_v61  ;;  %v2283_v28 = vpop.permute.xlu2 %2282  ;;  %2501 = vperm.xlu0 %2981, %v2498_v10  }
 0x387   :  { %v2315_v32 = vpop.permute.xlu1 %2314 }
 0x388   :  { %v2313_v55 = vpop.permute.xlu0 %2312 }
 0x389   :  { %v2363_v46 = vsel %vm2338_vm8, %v5349_v39, %v2313_v55  ;;  %v2364_v14 = vsel %vm2338_vm8, %v2313_v55, %v2315_v32 }
 0x38a   :  { %2417 = vmatpush.bf16.msra.mxu0 %v2363_v46  ;;  %2430 = vmatpush.bf16.msra.mxu1 %v2364_v14  ;;  %v5460_v46 = vld [vmem:[%s5506_s1 + $0x20] sm:$0xf] }
 0x38e   :  { %v2317_v31 = vpop.permute.xlu2 %2316 }
 0x38f   :  { %v2297_v40 = vpop.permute.xlu1 %2296 }
 0x390   :  { %v2049_v57 = vpop.permute.xlu0 %2048  ;;  %v2357_v21 = vsel %vm2338_vm8, %v2297_v40, %v2299_v43 }
 0x391   :  { %v2110_v48 = vsel %vm2092_vm7, %v2047_v63, %v2049_v57  ;;  %2418 = vmatpush.bf16.msra.mxu0 %v2357_v21 }
 0x392   :  { %2238 = vmatpush.bf16.msrb.mxu3 %v2110_v48 }
 0x396   :  { %v2271_v23 = vpop.permute.xlu2 %2270 }
 0x397   :  { %v2033_v34 = vpop.permute.xlu1 %2032 }
 0x398   :  { %v5407_v3 = vpop.permute.xlu0 %2300  ;;  %v2103_v45 = vsel %vm2092_vm7, %v5304_v15, %v2033_v34  ;;  %v2104_v60 = vsel %vm2092_vm7, %v2033_v34, %v2035_v30 }
 0x399   :  { %v2358_v39 = vsel %vm2338_vm8, %v2299_v43, %v5407_v3  ;;  %2226 = vmatpush.bf16.msrb.mxu2 %v2103_v45  ;;  %2239 = vmatpush.bf16.msrb.mxu3 %v2104_v60 }
 0x39a   :  { %2431 = vmatpush.bf16.msra.mxu1 %v2358_v39 }
 0x39d   :  { %2227 = vmatpush.bf16.msrb.mxu2 %v5153_v8  ;;  %2240 = vmatpush.bf16.msrb.mxu3 %v5200_v42 }
 0x39e   :  { %v1931_v22 = vpop.f32.mrf.mxu0  ;;  %v2337_v63 = vpop.permute.xlu2 %2336 }
 0x39f   :  { %v1944_v24 = vpop.f32.mrf.mxu1  ;;  %v5417_v26 = vadd.f32 %v1931_v22, %v5333_v51  ;;  %v2333_v56 = vpop.permute.xlu1 %2332 }
 0x3a0   :  { %v5420_v15 = vadd.f32 %v1944_v24, %v5335_v20  ;;  %v2331_v9 = vpop.permute.xlu0 %2330  ;;  %2885 = vmatmul.msk.bf16.vlgmr.msrb.gmra.mxu2 %vm433_vm1, %v5315_v17  ;;  %2886 = vmatmul.msk.bf16.vlgmr.msrb.gmra.mxu3 %vm433_vm1, %v5315_v17  ;;  %v2365_v20 = vsel %vm2338_vm8, %v2315_v32, %v2317_v31 }
 0x3a1   :  { %v2371_v8 = vsel %vm2338_vm8, %v5325_v50, %v2331_v9  ;;  %v2372_v42 = vsel %vm2338_vm8, %v2331_v9, %v2333_v56 }
 0x3a2   :  { %2442 = vmatpush.bf16.msra.mxu2 %v2371_v8  ;;  %2455 = vmatpush.bf16.msra.mxu3 %v2372_v42 }
 0x3a3   :  { %v1957_v51 = vpop.f32.mrf.mxu2 }
 0x3a4   :  { %v5430_v27 = vadd.f32 %v1957_v51, %v5363_v2 }
 0x3a6   :  { %2443 = vmatpush.bf16.msra.mxu2 %v2365_v20  ;;  %v1933_v44 = vpop.f32.mrf.mxu0  ;;  %v2255_v29 = vpop.permute.xlu2 %2254 }
 0x3a7   :  { %v1946_v47 = vpop.f32.mrf.mxu1  ;;  %v2287_v4 = vpop.permute.xlu1 %2286 }
 0x3a8   :  { %v2285_v36 = vpop.permute.xlu0 %2284 }
 0x3a9   :  { %v2351_v17 = vsel %vm2338_vm8, %v2283_v28, %v2285_v36  ;;  %v2352_v50 = vsel %vm2338_vm8, %v2285_v36, %v2287_v4 }
 0x3aa   :  { %2419 = vmatpush.bf16.msra.mxu0 %v2351_v17  ;;  %2432 = vmatpush.bf16.msra.mxu1 %v2352_v50 }
 0x3ab   :  { %v1959_v38 = vpop.f32.mrf.mxu2 }
 0x3ad   :  { %v1970_v25 = vpop.f32.mrf.mxu3 }
 0x3ae   :  { %v5436_v19 = vadd.f32 %v1970_v25, %v5371_v53  ;;  %v2321_v13 = vpop.permute.xlu2 %2320 }
 0x3af   :  { %v2269_v2 = vpop.permute.xlu1 %2268 }
 0x3b0   :  { %v2319_v33 = vpop.permute.xlu0 %2318  ;;  %v2345_v16 = vsel %vm2338_vm8, %v2269_v2, %v2271_v23 }
 0x3b1   :  { %v2366_v58 = vsel %vm2338_vm8, %v2317_v31, %v2319_v33  ;;  %2420 = vmatpush.bf16.msra.mxu0 %v2345_v16  ;;  %v2367_v14 = vsel %vm2338_vm8, %v2319_v33, %v2321_v13 }
 0x3b2   :  { %2456 = vmatpush.bf16.msra.mxu3 %v2366_v58 }
 0x3b5   :  { %v1972_v41 = vpop.f32.mrf.mxu3 }
 0x3b6   :  { %v1983_v52 = vpop.f32.mrf.mxu0  ;;  %v2291_v37 = vpop.permute.xlu2 %2290 }
 0x3b7   :  { %v5441_v62 = vadd.f32 %v1983_v52, %v5373_v0  ;;  %v1996_v43 = vpop.f32.mrf.mxu1  ;;  %v2335_v53 = vpop.permute.xlu1 %2334 }
 0x3b8   :  { %v5444_v11 = vadd.f32 %v1996_v43, %v5375_v12  ;;  %v2273_v1 = vpop.permute.xlu0 %2272  ;;  %v2373_v32 = vsel %vm2338_vm8, %v2333_v56, %v2335_v53  ;;  %v2374_v55 = vsel %vm2338_vm8, %v2335_v53, %v2337_v63 }
 0x3b9   :  { %v2346_v35 = vsel %vm2338_vm8, %v2271_v23, %v2273_v1 }
 0x3ba   :  { %2433 = vmatpush.bf16.msra.mxu1 %v2346_v35 }
 0x3be   :  { %v1985_v0 = vpop.f32.mrf.mxu0  ;;  %v2275_v28 = vpop.permute.xlu2 %2274 }
 0x3bf   :  { %v1998_v54 = vpop.f32.mrf.mxu1  ;;  %v2305_v7 = vpop.permute.xlu1 %2304  ;;  %v2347_v34 = vsel %vm2338_vm8, %v2273_v1, %v2275_v28 }
 0x3c0   :  { %v2303_v59 = vpop.permute.xlu0 %2302 }
 0x3c1   :  { %v2359_v12 = vsel %vm2338_vm8, %v5407_v3, %v2303_v59  ;;  %v2360_v30 = vsel %vm2338_vm8, %v2303_v59, %v2305_v7 }
 0x3c2   :  { %2444 = vmatpush.bf16.msra.mxu2 %v2359_v12  ;;  %2457 = vmatpush.bf16.msra.mxu3 %v2360_v30 }
 0x3c6   :  { %v2295_v3 = vpop.permute.xlu2 %2294 }
 0x3c7   :  { %v2259_v18 = vpop.permute.xlu1 %2258 }
 0x3c8   :  { %v2257_v5 = vpop.permute.xlu0 %2256 }
 0x3c9   :  { %v2339_v6 = vsel %vm2338_vm8, %v2255_v29, %v2257_v5  ;;  %v2340_v61 = vsel %vm2338_vm8, %v2257_v5, %v2259_v18 }
 0x3ca   :  { %2421 = vmatpush.bf16.msra.mxu0 %v2339_v6  ;;  %2434 = vmatpush.bf16.msra.mxu1 %v2340_v61 }
 0x3cd   :  { %2888 = vmatmul.msk.bf16.vlgmr.msra.gmra.mxu0 %vm433_vm1, %v5460_v46  ;;  %2889 = vmatmul.msk.bf16.vlgmr.msra.gmra.mxu1 %vm433_vm1, %v5460_v46 }
 0x3ce   :  { %2468 = vmatpush.bf16.msrb.mxu0 %v2373_v32  ;;  %2481 = vmatpush.bf16.msrb.mxu1 %v2374_v55  ;;  %v2279_v42 = vpop.permute.xlu2 %2278 }
 0x3cf   :  { %v2289_v40 = vpop.permute.xlu1 %2288 }
 0x3d0   :  { %v2323_v57 = vpop.permute.xlu0 %2322  ;;  %v2353_v48 = vsel %vm2338_vm8, %v2287_v4, %v2289_v40  ;;  %v2354_v21 = vsel %vm2338_vm8, %v2289_v40, %v2291_v37 }
 0x3d1   :  { %2445 = vmatpush.bf16.msra.mxu2 %v2353_v48  ;;  %v2368_v31 = vsel %vm2338_vm8, %v2321_v13, %v2323_v57  ;;  %2458 = vmatpush.bf16.msra.mxu3 %v2354_v21 }
 0x3d2   :  { %2469 = vmatpush.bf16.msrb.mxu0 %v2367_v14  ;;  %2482 = vmatpush.bf16.msrb.mxu1 %v2368_v31 }
 0x3d5   :  { %2446 = vmatpush.bf16.msra.mxu2 %v2347_v34 }
 0x3d6   :  { %v2267_v33 = vpop.permute.xlu2 %2266 }
 0x3d7   :  { %v2309_v45 = vpop.permute.xlu1 %2308 }
 0x3d8   :  { %v2307_v60 = vpop.permute.xlu0 %2306 }
 0x3d9   :  { %v2361_v39 = vsel %vm2338_vm8, %v2305_v7, %v2307_v60  ;;  %v2362_v23 = vsel %vm2338_vm8, %v2307_v60, %v2309_v45 }
 0x3da   :  { %2470 = vmatpush.bf16.msrb.mxu0 %v2361_v39  ;;  %2483 = vmatpush.bf16.msrb.mxu1 %v2362_v23 }
 0x3df   :  { %v2293_v22 = vpop.permute.xlu1 %2292 }
 0x3e0   :  { %v2277_v24 = vpop.permute.xlu0 %2276  ;;  %v2355_v9 = vsel %vm2338_vm8, %v2291_v37, %v2293_v22  ;;  %v2356_v8 = vsel %vm2338_vm8, %v2293_v22, %v2295_v3 }
 0x3e1   :  { %v2177_v56 = vpop.f32.mrf.mxu2  ;;  %v2348_v20 = vsel %vm2338_vm8, %v2275_v28, %v2277_v24  ;;  %2471 = vmatpush.bf16.msrb.mxu0 %v2355_v9  ;;  %2484 = vmatpush.bf16.msrb.mxu1 %v2356_v8  ;;  %v2349_v44 = vsel %vm2338_vm8, %v2277_v24, %v2279_v42 }
 0x3e2   :  { %v2246_v51 = vadd.f32 %v2177_v56, %v5417_v26  ;;  %2459 = vmatpush.bf16.msra.mxu3 %v2348_v20 }
 0x3e5   :  { %2472 = vmatpush.bf16.msrb.mxu0 %v2349_v44 }
 0x3e7   :  { %v2263_v47 = vpop.permute.xlu1 %2262 }
 0x3e8   :  { %v2261_v63 = vpop.permute.xlu0 %2260 }
 0x3e9   :  { %v2179_v4 = vpop.f32.mrf.mxu2  ;;  %v2341_v36 = vsel %vm2338_vm8, %v2259_v18, %v2261_v63  ;;  %v2342_v17 = vsel %vm2338_vm8, %v2261_v63, %v2263_v47 }
 0x3ea   :  { %2447 = vmatpush.bf16.msra.mxu2 %v2341_v36  ;;  %2460 = vmatpush.bf16.msra.mxu3 %v2342_v17 }
 0x3ec   :  { %v2190_v50 = vpop.f32.mrf.mxu3 }
 0x3ed   :  { %v2247_v26 = vadd.f32 %v2190_v50, %v5420_v15  ;;  %2890 = vmatmul.msk.bf16.vlgmr.msra.gmra.mxu2 %vm433_vm1, %v5460_v46  ;;  %2891 = vmatmul.msk.bf16.vlgmr.msra.gmra.mxu3 %vm433_vm1, %v5460_v46 }
 0x3ef   :  { %v2265_v38 = vpop.permute.xlu1 %2264 }
 0x3f0   :  { %v2281_v25 = vpop.permute.xlu0 %2280  ;;  %v2343_v2 = vsel %vm2338_vm8, %v2263_v47, %v2265_v38  ;;  %v2344_v29 = vsel %vm2338_vm8, %v2265_v38, %v2267_v33 }
 0x3f1   :  { %2473 = vmatpush.bf16.msrb.mxu0 %v2343_v2  ;;  %v2350_v16 = vsel %vm2338_vm8, %v2279_v42, %v2281_v25 }
 0x3f2   :  { %2485 = vmatpush.bf16.msrb.mxu1 %v2350_v16 }
 0x3f4   :  { %v2192_v58 = vpop.f32.mrf.mxu3  ;;  %2892 = vmatmul.msk.bf16.vlgmr.msrb.gmra.mxu0 %vm433_vm1, %v5460_v46 }
 0x3f5   :  { %v2203_v15 = vpop.f32.mrf.mxu0 }
 0x3f6   :  { %v2248_v52 = vadd.f32 %v2203_v15, %v5430_v27  ;;  %v2216_v43 = vpop.f32.mrf.mxu1  ;;  %2486 = vmatpush.bf16.msrb.mxu1 %v2344_v29 }
 0x3f7   :  { %v2249_v41 = vadd.f32 %v2216_v43, %v5436_v19 }
 0x3f8   :  { %v2502_v7 = vpop.permute.xlu0 %2501 }
 0x3f9   :  { %2893 = vmatmul.msk.bf16.vlgmr.msrb.gmra.mxu1 %vm433_vm1, %v5460_v46 }
 0x3fd   :  { %v2205_v53 = vpop.f32.mrf.mxu0 }
 0x3fe   :  { %v2218_v1 = vpop.f32.mrf.mxu1 }
 0x423   :  { %v2229_v10 = vpop.f32.mrf.mxu2  ;;  %v2242_v35 = vpop.f32.mrf.mxu3 }
 0x424   :  { %v2250_v49 = vadd.f32 %v2229_v10, %v5441_v62  ;;  %v2251_v13 = vadd.f32 %v2242_v35, %v5444_v11 }
 0x42b   :  { %v2231_v0 = vpop.f32.mrf.mxu2  ;;  %v2244_v54 = vpop.f32.mrf.mxu3 }
 0x44a   :  { %v2423_v59 = vpop.f32.mrf.mxu0  ;;  %v2436_v27 = vpop.f32.mrf.mxu1 }
 0x44b   :  { %v2492_v12 = vadd.f32 %v2423_v59, %v2246_v51  ;;  %v2493_v30 = vadd.f32 %v2436_v27, %v2247_v26 }
 0x44d   :  { %v2504_v37 = vadd.f32 %v2502_v7, %v2492_v12  ;;  %v2505_v19 = vadd.f32 %v2502_v7, %v2493_v30 }
 0x44f   :  { %v2510_v18 = vpack.c.bf16 %v2505_v19, %v2504_v37 }
 0x451   :  { %2513 = vst [vmem:[%s5508_s3] sm:$0xff] %v2510_v18 }
 0x452   :  { %v2425_v5 = vpop.f32.mrf.mxu0  ;;  %v2438_v6 = vpop.f32.mrf.mxu1 }
 0x470   :  { %v2449_v61 = vpop.f32.mrf.mxu2  ;;  %v2462_v62 = vpop.f32.mrf.mxu3 }
 0x471   :  { %v2494_v32 = vadd.f32 %v2449_v61, %v2248_v52  ;;  %v2495_v11 = vadd.f32 %v2462_v62, %v2249_v41  ;;  %v2475_v55 = vpop.f32.mrf.mxu0 }
 0x472   :  { %v2496_v40 = vadd.f32 %v2475_v55, %v2250_v49 }
 0x473   :  { %v2506_v46 = vadd.f32 %v2502_v7, %v2494_v32  ;;  %v2507_v14 = vadd.f32 %v2502_v7, %v2495_v11 }
 0x474   :  { %v2508_v34 = vadd.f32 %v2502_v7, %v2496_v40 }
 0x475   :  { %v2511_v28 = vpack.c.bf16 %v2507_v14, %v2506_v46 }
 0x476   :  { %v2488_v57 = vpop.f32.mrf.mxu1 }
 0x477   :  { %2514 = vst [vmem:[%s5508_s3 + $0x8] sm:$0xff] %v2511_v28  ;;  %v2497_v48 = vadd.f32 %v2488_v57, %v2251_v13 }
 0x478   :  { %v2451_v21 = vpop.f32.mrf.mxu2  ;;  %v2464_v31 = vpop.f32.mrf.mxu3 }
 0x479   :  { %v2509_v3 = vadd.f32 %v2502_v7, %v2497_v48  ;;  %v2477_v45 = vpop.f32.mrf.mxu0 }
 0x47b   :  { %v2512_v60 = vpack.c.bf16 %v2509_v3, %v2508_v34 }
 0x47d   :  { %2515 = vst [vmem:[%s5508_s3 + $0x10] sm:$0xff] %v2512_v60 }
 0x47e   :  { %v2490_v39 = vpop.f32.mrf.mxu1 }

</bundles_post_ra>
